<compile_context>
chip_gen: v7x
topology: tpu7x:2x2x1
jax: 0.10.0
libtpu: 0.0.40
codegen_flags: <defaults>
</compile_context>

<pallas_src>
import functools

import jax
import jax.numpy as jnp
import numpy as np
from jax import lax
from jax.experimental import pallas as pl
from jax.experimental.pallas import tpu as pltpu

THRESHOLD = 1.0  # snn.Leaky default


# ---------------------------------------------------------------------------
# Fused kernel: conv1+pool+LIF1 -> conv2+pool+LIF2 -> fc1+LIF3
# One grid step = Bt samples.
#
# Row layout of the conv1 im2col patches (built in the wrapper):
#   patches[(sh*2+sw), b*256 + ph*128 + pw*64 + hh*8 + ww, k]
#     -> conv1 output pixel (h1, w1) = (4*hh + 2*ph + sh, 4*ww + 2*pw + sw)
#     -> k = (di*5 + dj)*3 + ci  (padded 75 -> 128)
#   (sh,sw)   : position inside the 2x2 maxpool window      -> pool = max over the 4 groups
#   (ph,pw)   : parity of the pooled (14x14) spk1 grid       -> conv2's shifted reads become
#   (hh,ww)   : 7x7 parity plane, padded to 8x8                 contiguous slices
# ---------------------------------------------------------------------------
def _lif_kernel(p1_ref, w1_ref, b1_ref, w2_ref, b2_ref, wfc_ref, bfc_ref,
                spk_ref, mem_ref, *, bt):
    f32 = jnp.float32

    # ---- conv1 + 2x2 maxpool + LIF1 --------------------------------------
    # 4 matmuls, M = bt*256, K = 128 (75 real), N = 128 (12 real).
    w1 = w1_ref[...]                                              # (128,128) bf16
    cur1 = jnp.dot(p1_ref[0], w1, preferred_element_type=f32)     # (bt*256,128)
    for g in range(1, 4):
        cur1 = jnp.maximum(cur1, jnp.dot(p1_ref[g], w1, preferred_element_type=f32))
    cur1 = cur1 + b1_ref[...]                                     # maxpool then +bias == pool(conv+bias)
    spk1 = (cur1 > THRESHOLD).astype(jnp.bfloat16)                # rows ordered (b,ph,pw,hh,ww)

    # ---- conv2 (shift-after-matmul) + 2x2 maxpool + LIF2 ------------------
    # One full-plane matmul per tap; the tap shift becomes a contiguous slice of the
    # parity-split matmul output.  4 independent accumulators (one per output-pool parity).
    acc = [[jnp.zeros((bt, 5, 5, 128), f32) for _ in range(2)] for _ in range(2)]
    for di in range(5):
        for dj in range(5):
            y = jnp.dot(spk1, w2_ref[di * 5 + dj], preferred_element_type=f32)
            y = y.reshape(bt, 2, 2, 8, 8, 128)                    # (b, ph, pw, hh, ww, c) - 8-aligned
            for sh in range(2):
                qh, ph = divmod(sh + di, 2)                       # input row = 2*(hop+qh) + ph
                for sw in range(2):
                    qw, pw = divmod(sw + dj, 2)
                    acc[sh][sw] = acc[sh][sw] + y[:, ph, pw, qh:qh + 5, qw:qw + 5, :]
    cur2 = jnp.maximum(jnp.maximum(acc[0][0], acc[0][1]),
                       jnp.maximum(acc[1][0], acc[1][1])) + b2_ref[...]
    spk2 = (cur2 > THRESHOLD).astype(jnp.bfloat16)                # (bt, 5, 5, 128)

    # ---- fc1 + LIF3: single K=3200 contraction ----------------------------
    # Lane-aligned concat of the 25 spatial positions -> (bt, 3200) @ (3200, 128).
    lhs = jnp.concatenate([spk2[:, h, w, :] for h in range(5) for w in range(5)], axis=-1)
    cur3 = jnp.dot(lhs, wfc_ref[...], preferred_element_type=f32) + bfc_ref[...]   # (bt,128)

    mem_ref[...] = cur3.reshape(1, bt, 128)
    spk_ref[...] = (cur3 > THRESHOLD).astype(f32).reshape(1, bt, 128)


# ---------------------------------------------------------------------------
# Wrapper-side conv1 im2col (lane-dense K=128, pool/parity-ordered rows, bf16)
# ---------------------------------------------------------------------------
def _build_conv1_patches(x_nchw):
    B = x_nchw.shape[0]
    x = jnp.transpose(x_nchw, (0, 2, 3, 1))                       # NHWC (B,32,32,3)
    taps = [x[:, di:di + 28, dj:dj + 28, :] for di in range(5) for dj in range(5)]
    pat = jnp.concatenate(taps, axis=-1)                          # (B,28,28,75), k=(di,dj,ci)
    pat = jnp.pad(pat, ((0, 0), (0, 0), (0, 0), (0, 128 - 75)))   # K -> 128
    # h1 = 4*hh + 2*ph + sh,  w1 = 4*ww + 2*pw + sw
    pat = pat.reshape(B, 7, 2, 2, 7, 2, 2, 128)                   # (b, hh, ph, sh, ww, pw, sw, k)
    pat = jnp.transpose(pat, (3, 6, 0, 2, 5, 1, 4, 7))            # (sh, sw, b, ph, pw, hh, ww, k)
    pat = jnp.pad(pat, ((0, 0), (0, 0), (0, 0), (0, 0), (0, 0), (0, 1), (0, 1), (0, 0)))  # 7 -> 8
    return pat.reshape(4, B * 256, 128).astype(jnp.bfloat16)


def lif_forward(x_nchw, params):
    B = x_nchw.shape[0]
    # Batch block: amortize grid overhead / fill MXU M, but keep >= 2 grid steps when possible
    # so v7x's two TensorCores both get work.
    Bt = 8 if B >= 16 else max(1, B // 2)
    Bpad = ((B + Bt - 1) // Bt) * Bt
    if Bpad != B:
        x_nchw = jnp.pad(x_nchw, ((0, Bpad - B), (0, 0), (0, 0), (0, 0)))

    patches = _build_conv1_patches(x_nchw)                        # (4, Bpad*256, 128) bf16
    G = Bpad // Bt

    spk, mem = pl.pallas_call(
        functools.partial(_lif_kernel, bt=Bt),
        out_shape=(jax.ShapeDtypeStruct((G, Bt, 128), jnp.float32),
                   jax.ShapeDtypeStruct((G, Bt, 128), jnp.float32)),
        grid=(G,),
        in_specs=[
            pl.BlockSpec((4, Bt * 256, 128), lambda i: (0, i, 0)),   # conv1 patches
            pl.BlockSpec((128, 128), lambda i: (0, 0)),              # W1  (resident)
            pl.BlockSpec((1, 128), lambda i: (0, 0)),                # b1
            pl.BlockSpec((25, 128, 128), lambda i: (0, 0, 0)),       # W2
            pl.BlockSpec((1, 128), lambda i: (0, 0)),                # b2
            pl.BlockSpec((3200, 128), lambda i: (0, 0)),             # Wfc
            pl.BlockSpec((1, 128), lambda i: (0, 0)),                # bfc
        ],
        out_specs=(pl.BlockSpec((1, Bt, 128), lambda i: (i, 0, 0)),
                   pl.BlockSpec((1, Bt, 128), lambda i: (i, 0, 0))),
        compiler_params=pltpu.CompilerParams(dimension_semantics=("parallel",)),
    )(patches, params["w1"], params["b1"], params["w2"], params["b2"],
      params["wfc"], params["bfc"])

    spk = spk.reshape(Bpad, 128)[:B, :10]
    mem = mem.reshape(Bpad, 128)[:B, :10]
    return spk, mem


# ---------------------------------------------------------------------------
# Params: PyTorch-default-like init, packed into padded bf16 kernel layouts at init.
# ---------------------------------------------------------------------------
def init_params(key):
    ks = jax.random.split(key, 6)

    def uni(k, shape, fan_in):
        bound = 1.0 / np.sqrt(fan_in)
        return jax.random.uniform(k, shape, jnp.float32, -bound, bound)

    # torch layouts
    w1_t = uni(ks[0], (12, 3, 5, 5), 3 * 25)        # (Cout, Cin, kh, kw)
    b1_t = uni(ks[1], (12,), 3 * 25)
    w2_t = uni(ks[2], (64, 12, 5, 5), 12 * 25)
    b2_t = uni(ks[3], (64,), 12 * 25)
    wfc_t = uni(ks[4], (10, 64 * 5 * 5), 64 * 25)   # (N, 1600), K ordered (c, h, w)
    bfc_t = uni(ks[5], (10,), 64 * 25)

    # conv1: K = (di,dj,ci) padded 75->128, N = co padded 12->128
    w1 = np.zeros((128, 128), np.float32)
    w1[:75, :12] = np.transpose(np.asarray(w1_t), (2, 3, 1, 0)).reshape(75, 12)
    b1 = np.zeros((1, 128), np.float32); b1[0, :12] = np.asarray(b1_t)

    # conv2: [tap, ci(pad 128), co(pad 128)]
    w2 = np.zeros((25, 128, 128), np.float32)
    w2[:, :12, :64] = np.transpose(np.asarray(w2_t), (2, 3, 1, 0)).reshape(25, 12, 64)
    b2 = np.zeros((1, 128), np.float32); b2[0, :64] = np.asarray(b2_t)

    # fc: kernel LHS index = (h*5+w)*128 + c ; torch flatten index = c*25 + h*5 + w
    wfc = np.zeros((25, 128, 128), np.float32)
    wfc[:, :64, :10] = np.transpose(np.asarray(wfc_t).reshape(10, 64, 25), (2, 1, 0))
    bfc = np.zeros((1, 128), np.float32); bfc[0, :10] = np.asarray(bfc_t)

    return dict(
        w1=jnp.asarray(w1, jnp.bfloat16), b1=jnp.asarray(b1),
        w2=jnp.asarray(w2, jnp.bfloat16), b2=jnp.asarray(b2),
        wfc=jnp.asarray(wfc.reshape(3200, 128), jnp.bfloat16), bfc=jnp.asarray(bfc),
        w1_t=w1_t, b1_t=b1_t, w2_t=w2_t, b2_t=b2_t, wfc_t=wfc_t, bfc_t=bfc_t)


# ---------------------------------------------------------------------------
# Pure-JAX reference (torch layouts).  Inputs/weights rounded to bf16 exactly like
# the kernel's matmul operands so the comparison isolates real layout/logic bugs.
# ---------------------------------------------------------------------------
def lif_forward_ref(x_nchw, params):
    B = x_nchw.shape[0]
    r = lambda a: a.astype(jnp.bfloat16).astype(jnp.float32)

    def conv(x, w, b):
        y = lax.conv_general_dilated(x, w, (1, 1), "VALID",
                                     dimension_numbers=("NCHW", "OIHW", "NCHW"),
                                     precision=lax.Precision.HIGHEST)
        return y + b.reshape(1, -1, 1, 1)

    def pool2(y):
        Bc, C, H, W = y.shape
        return jnp.max(y.reshape(Bc, C, H // 2, 2, W // 2, 2), axis=(3, 5))

    c1 = pool2(conv(r(x_nchw), r(params["w1_t"]), params["b1_t"]))
    s1 = (c1 > THRESHOLD).astype(jnp.float32)
    c2 = pool2(conv(s1, r(params["w2_t"]), params["b2_t"]))
    s2 = (c2 > THRESHOLD).astype(jnp.float32)
    cur3 = jnp.dot(s2.reshape(B, -1), r(params["wfc_t"]).T,
                   precision=lax.Precision.HIGHEST) + params["bfc_t"]
    return (cur3 > THRESHOLD).astype(jnp.float32), cur3


if __name__ == "__main__":
    key = jax.random.PRNGKey(0)
    kp, kx = jax.random.split(key)
    params = init_params(kp)

    B = 2
    x = jax.random.normal(kx, (B, 3, 32, 32), jnp.float32) * 2.0   # CIFAR-like NCHW

    fwd = jax.jit(functools.partial(lif_forward, params=params))
    spk3, mem3 = fwd(x)
    spk3, mem3 = jax.block_until_ready((spk3, mem3))

    assert spk3.shape == (B, 10) and mem3.shape == (B, 10)
    assert spk3.dtype == jnp.float32 and mem3.dtype == jnp.float32
    assert bool(jnp.all(jnp.isfinite(mem3)))
    # LIF consistency: spike iff membrane above threshold.
    assert bool(jnp.all(spk3 == (mem3 > THRESHOLD).astype(jnp.float32)))

    # Cross-check against the pure-JAX reference (same bf16-rounded operands).
    spk_r, mem_r = jax.jit(functools.partial(lif_forward_ref, params=params))(x)
    err = float(jnp.max(jnp.abs(mem3 - mem_r)))
    assert err < 2e-2, f"mem3 mismatch vs pure-JAX reference: {err}"
    assert bool(jnp.all((spk3 == spk_r) | (jnp.abs(mem_r - THRESHOLD) < 2e-2)))

    print("KERNEL_OK")
</pallas_src>

<mosaic_0001>
module attributes {stable_mosaic.version = 11 : i64} {
  func.func @_lif_kernel(%arg0: i32, %arg1: memref<4x256x128xbf16, #tpu.memory_space<vmem>>, %arg2: memref<128x128xbf16, #tpu.memory_space<vmem>>, %arg3: memref<1x128xf32, #tpu.memory_space<vmem>>, %arg4: memref<25x128x128xbf16, #tpu.memory_space<vmem>>, %arg5: memref<1x128xf32, #tpu.memory_space<vmem>>, %arg6: memref<3200x128xbf16, #tpu.memory_space<vmem>>, %arg7: memref<1x128xf32, #tpu.memory_space<vmem>>, %arg8: memref<1x1x128xf32, #tpu.memory_space<vmem>>, %arg9: memref<1x1x128xf32, #tpu.memory_space<vmem>>) attributes {dimension_semantics = [#tpu.dimension_semantics<parallel>], iteration_bounds = array<i64: 2>, scalar_prefetch = 0 : i64, scratch_operands = 0 : i64, tpu.core_type = #tpu.core_type<tc>, window_params = [{transform_indices = @transform_0, window_bounds = array<i64: 4, 256, 128>}, {pipeline_mode = #tpu.pipeline_mode<synchronous>, transform_indices = @transform_1, window_bounds = array<i64: 128, 128>}, {pipeline_mode = #tpu.pipeline_mode<synchronous>, transform_indices = @transform_2, window_bounds = array<i64: 1, 128>}, {pipeline_mode = #tpu.pipeline_mode<synchronous>, transform_indices = @transform_3, window_bounds = array<i64: 25, 128, 128>}, {pipeline_mode = #tpu.pipeline_mode<synchronous>, transform_indices = @transform_4, window_bounds = array<i64: 1, 128>}, {pipeline_mode = #tpu.pipeline_mode<synchronous>, transform_indices = @transform_5, window_bounds = array<i64: 3200, 128>}, {pipeline_mode = #tpu.pipeline_mode<synchronous>, transform_indices = @transform_6, window_bounds = array<i64: 1, 128>}, {transform_indices = @transform_7, window_bounds = array<i64: 1, 1, 128>}, {transform_indices = @transform_8, window_bounds = array<i64: 1, 1, 128>}]} {
    %c0 = arith.constant 0 : index
    %c0_0 = arith.constant 0 : index
    %0 = vector.load %arg2[%c0, %c0_0] : memref<128x128xbf16, #tpu.memory_space<vmem>>, vector<128x128xbf16>
    %c0_1 = arith.constant 0 : index
    %c0_2 = arith.constant 0 : index
    %c0_3 = arith.constant 0 : index
    %1 = vector.load %arg1[%c0_1, %c0_2, %c0_3] : memref<4x256x128xbf16, #tpu.memory_space<vmem>>, vector<1x256x128xbf16>
    %2 = vector.shape_cast %1 : vector<1x256x128xbf16> to vector<256x128xbf16>
    %cst = arith.constant dense<0.000000e+00> : vector<256x128xf32>
    %3 = tpu.matmul %2, %0, %cst {dimension_numbers = #tpu.dot_dimension_numbers<[1], [0], [0], [1], [0, 0, 1, 1], [], []>} : vector<256x128xbf16>, vector<128x128xbf16>, vector<256x128xf32> -> vector<256x128xf32>
    %c1 = arith.constant 1 : index
    %c0_4 = arith.constant 0 : index
    %c0_5 = arith.constant 0 : index
    %4 = vector.load %arg1[%c1, %c0_4, %c0_5] : memref<4x256x128xbf16, #tpu.memory_space<vmem>>, vector<1x256x128xbf16>
    %5 = vector.shape_cast %4 : vector<1x256x128xbf16> to vector<256x128xbf16>
    %cst_6 = arith.constant dense<0.000000e+00> : vector<256x128xf32>
    %6 = tpu.matmul %5, %0, %cst_6 {dimension_numbers = #tpu.dot_dimension_numbers<[1], [0], [0], [1], [0, 0, 1, 1], [], []>} : vector<256x128xbf16>, vector<128x128xbf16>, vector<256x128xf32> -> vector<256x128xf32>
    %7 = arith.maximumf %3, %6 : vector<256x128xf32>
    %c2 = arith.constant 2 : index
    %c0_7 = arith.constant 0 : index
    %c0_8 = arith.constant 0 : index
    %8 = vector.load %arg1[%c2, %c0_7, %c0_8] : memref<4x256x128xbf16, #tpu.memory_space<vmem>>, vector<1x256x128xbf16>
    %9 = vector.shape_cast %8 : vector<1x256x128xbf16> to vector<256x128xbf16>
    %cst_9 = arith.constant dense<0.000000e+00> : vector<256x128xf32>
    %10 = tpu.matmul %9, %0, %cst_9 {dimension_numbers = #tpu.dot_dimension_numbers<[1], [0], [0], [1], [0, 0, 1, 1], [], []>} : vector<256x128xbf16>, vector<128x128xbf16>, vector<256x128xf32> -> vector<256x128xf32>
    %11 = arith.maximumf %7, %10 : vector<256x128xf32>
    %c3 = arith.constant 3 : index
    %c0_10 = arith.constant 0 : index
    %c0_11 = arith.constant 0 : index
    %12 = vector.load %arg1[%c3, %c0_10, %c0_11] : memref<4x256x128xbf16, #tpu.memory_space<vmem>>, vector<1x256x128xbf16>
    %13 = vector.shape_cast %12 : vector<1x256x128xbf16> to vector<256x128xbf16>
    %cst_12 = arith.constant dense<0.000000e+00> : vector<256x128xf32>
    %14 = tpu.matmul %13, %0, %cst_12 {dimension_numbers = #tpu.dot_dimension_numbers<[1], [0], [0], [1], [0, 0, 1, 1], [], []>} : vector<256x128xbf16>, vector<128x128xbf16>, vector<256x128xf32> -> vector<256x128xf32>
    %15 = arith.maximumf %11, %14 : vector<256x128xf32>
    %c0_13 = arith.constant 0 : index
    %c0_14 = arith.constant 0 : index
    %16 = vector.load %arg3[%c0_13, %c0_14] : memref<1x128xf32, #tpu.memory_space<vmem>>, vector<1x128xf32>
    %17 = vector.broadcast %16 : vector<1x128xf32> to vector<256x128xf32>
    %18 = arith.addf %15, %17 : vector<256x128xf32>
    %cst_15 = arith.constant 1.000000e+00 : f32
    %19 = vector.broadcast %cst_15 : f32 to vector<256x128xf32>
    %20 = arith.cmpf ogt, %18, %19 : vector<256x128xf32>
    %21 = arith.extui %20 : vector<256x128xi1> to vector<256x128xi32>
    %22 = arith.sitofp %21 : vector<256x128xi32> to vector<256x128xf32>
    %23 = arith.truncf %22 : vector<256x128xf32> to vector<256x128xbf16>
    %cst_16 = arith.constant 0.000000e+00 : f32
    %24 = vector.broadcast %cst_16 : f32 to vector<1x5x5x128xf32>
    %cst_17 = arith.constant 0.000000e+00 : f32
    %25 = vector.broadcast %cst_17 : f32 to vector<1x5x5x128xf32>
    %cst_18 = arith.constant 0.000000e+00 : f32
    %26 = vector.broadcast %cst_18 : f32 to vector<1x5x5x128xf32>
    %cst_19 = arith.constant 0.000000e+00 : f32
    %27 = vector.broadcast %cst_19 : f32 to vector<1x5x5x128xf32>
    %c0_20 = arith.constant 0 : index
    %c0_21 = arith.constant 0 : index
    %c0_22 = arith.constant 0 : index
    %28 = vector.load %arg4[%c0_20, %c0_21, %c0_22] : memref<25x128x128xbf16, #tpu.memory_space<vmem>>, vector<1x128x128xbf16>
    %29 = vector.shape_cast %28 : vector<1x128x128xbf16> to vector<128x128xbf16>
    %cst_23 = arith.constant dense<0.000000e+00> : vector<256x128xf32>
    %30 = tpu.matmul %23, %29, %cst_23 {dimension_numbers = #tpu.dot_dimension_numbers<[1], [0], [0], [1], [0, 0, 1, 1], [], []>} : vector<256x128xbf16>, vector<128x128xbf16>, vector<256x128xf32> -> vector<256x128xf32>
    %31 = vector.shape_cast %30 : vector<256x128xf32> to vector<1x2x2x8x8x128xf32>
    %32 = vector.extract_strided_slice %31 {offsets = [0, 0, 0, 0, 0, 0], sizes = [1, 1, 1, 5, 5, 128], strides = [1, 1, 1, 1, 1, 1]} : vector<1x2x2x8x8x128xf32> to vector<1x1x1x5x5x128xf32>
    %33 = vector.shape_cast %32 : vector<1x1x1x5x5x128xf32> to vector<1x5x5x128xf32>
    %34 = arith.addf %24, %33 : vector<1x5x5x128xf32>
    %35 = vector.extract_strided_slice %31 {offsets = [0, 0, 1, 0, 0, 0], sizes = [1, 1, 1, 5, 5, 128], strides = [1, 1, 1, 1, 1, 1]} : vector<1x2x2x8x8x128xf32> to vector<1x1x1x5x5x128xf32>
    %36 = vector.shape_cast %35 : vector<1x1x1x5x5x128xf32> to vector<1x5x5x128xf32>
    %37 = arith.addf %25, %36 : vector<1x5x5x128xf32>
    %38 = vector.extract_strided_slice %31 {offsets = [0, 1, 0, 0, 0, 0], sizes = [1, 1, 1, 5, 5, 128], strides = [1, 1, 1, 1, 1, 1]} : vector<1x2x2x8x8x128xf32> to vector<1x1x1x5x5x128xf32>
    %39 = vector.shape_cast %38 : vector<1x1x1x5x5x128xf32> to vector<1x5x5x128xf32>
    %40 = arith.addf %26, %39 : vector<1x5x5x128xf32>
    %41 = vector.extract_strided_slice %31 {offsets = [0, 1, 1, 0, 0, 0], sizes = [1, 1, 1, 5, 5, 128], strides = [1, 1, 1, 1, 1, 1]} : vector<1x2x2x8x8x128xf32> to vector<1x1x1x5x5x128xf32>
    %42 = vector.shape_cast %41 : vector<1x1x1x5x5x128xf32> to vector<1x5x5x128xf32>
    %43 = arith.addf %27, %42 : vector<1x5x5x128xf32>
    %c1_24 = arith.constant 1 : index
    %c0_25 = arith.constant 0 : index
    %c0_26 = arith.constant 0 : index
    %44 = vector.load %arg4[%c1_24, %c0_25, %c0_26] : memref<25x128x128xbf16, #tpu.memory_space<vmem>>, vector<1x128x128xbf16>
    %45 = vector.shape_cast %44 : vector<1x128x128xbf16> to vector<128x128xbf16>
    %cst_27 = arith.constant dense<0.000000e+00> : vector<256x128xf32>
    %46 = tpu.matmul %23, %45, %cst_27 {dimension_numbers = #tpu.dot_dimension_numbers<[1], [0], [0], [1], [0, 0, 1, 1], [], []>} : vector<256x128xbf16>, vector<128x128xbf16>, vector<256x128xf32> -> vector<256x128xf32>
    %47 = vector.shape_cast %46 : vector<256x128xf32> to vector<1x2x2x8x8x128xf32>
    %48 = vector.extract_strided_slice %47 {offsets = [0, 0, 1, 0, 0, 0], sizes = [1, 1, 1, 5, 5, 128], strides = [1, 1, 1, 1, 1, 1]} : vector<1x2x2x8x8x128xf32> to vector<1x1x1x5x5x128xf32>
    %49 = vector.shape_cast %48 : vector<1x1x1x5x5x128xf32> to vector<1x5x5x128xf32>
    %50 = arith.addf %34, %49 : vector<1x5x5x128xf32>
    %51 = vector.extract_strided_slice %47 {offsets = [0, 0, 0, 0, 1, 0], sizes = [1, 1, 1, 5, 5, 128], strides = [1, 1, 1, 1, 1, 1]} : vector<1x2x2x8x8x128xf32> to vector<1x1x1x5x5x128xf32>
    %52 = vector.shape_cast %51 : vector<1x1x1x5x5x128xf32> to vector<1x5x5x128xf32>
    %53 = arith.addf %37, %52 : vector<1x5x5x128xf32>
    %54 = vector.extract_strided_slice %47 {offsets = [0, 1, 1, 0, 0, 0], sizes = [1, 1, 1, 5, 5, 128], strides = [1, 1, 1, 1, 1, 1]} : vector<1x2x2x8x8x128xf32> to vector<1x1x1x5x5x128xf32>
    %55 = vector.shape_cast %54 : vector<1x1x1x5x5x128xf32> to vector<1x5x5x128xf32>
    %56 = arith.addf %40, %55 : vector<1x5x5x128xf32>
    %57 = vector.extract_strided_slice %47 {offsets = [0, 1, 0, 0, 1, 0], sizes = [1, 1, 1, 5, 5, 128], strides = [1, 1, 1, 1, 1, 1]} : vector<1x2x2x8x8x128xf32> to vector<1x1x1x5x5x128xf32>
    %58 = vector.shape_cast %57 : vector<1x1x1x5x5x128xf32> to vector<1x5x5x128xf32>
    %59 = arith.addf %43, %58 : vector<1x5x5x128xf32>
    %c2_28 = arith.constant 2 : index
    %c0_29 = arith.constant 0 : index
    %c0_30 = arith.constant 0 : index
    %60 = vector.load %arg4[%c2_28, %c0_29, %c0_30] : memref<25x128x128xbf16, #tpu.memory_space<vmem>>, vector<1x128x128xbf16>
    %61 = vector.shape_cast %60 : vector<1x128x128xbf16> to vector<128x128xbf16>
    %cst_31 = arith.constant dense<0.000000e+00> : vector<256x128xf32>
    %62 = tpu.matmul %23, %61, %cst_31 {dimension_numbers = #tpu.dot_dimension_numbers<[1], [0], [0], [1], [0, 0, 1, 1], [], []>} : vector<256x128xbf16>, vector<128x128xbf16>, vector<256x128xf32> -> vector<256x128xf32>
    %63 = vector.shape_cast %62 : vector<256x128xf32> to vector<1x2x2x8x8x128xf32>
    %64 = vector.extract_strided_slice %63 {offsets = [0, 0, 0, 0, 1, 0], sizes = [1, 1, 1, 5, 5, 128], strides = [1, 1, 1, 1, 1, 1]} : vector<1x2x2x8x8x128xf32> to vector<1x1x1x5x5x128xf32>
    %65 = vector.shape_cast %64 : vector<1x1x1x5x5x128xf32> to vector<1x5x5x128xf32>
    %66 = arith.addf %50, %65 : vector<1x5x5x128xf32>
    %67 = vector.extract_strided_slice %63 {offsets = [0, 0, 1, 0, 1, 0], sizes = [1, 1, 1, 5, 5, 128], strides = [1, 1, 1, 1, 1, 1]} : vector<1x2x2x8x8x128xf32> to vector<1x1x1x5x5x128xf32>
    %68 = vector.shape_cast %67 : vector<1x1x1x5x5x128xf32> to vector<1x5x5x128xf32>
    %69 = arith.addf %53, %68 : vector<1x5x5x128xf32>
    %70 = vector.extract_strided_slice %63 {offsets = [0, 1, 0, 0, 1, 0], sizes = [1, 1, 1, 5, 5, 128], strides = [1, 1, 1, 1, 1, 1]} : vector<1x2x2x8x8x128xf32> to vector<1x1x1x5x5x128xf32>
    %71 = vector.shape_cast %70 : vector<1x1x1x5x5x128xf32> to vector<1x5x5x128xf32>
    %72 = arith.addf %56, %71 : vector<1x5x5x128xf32>
    %73 = vector.extract_strided_slice %63 {offsets = [0, 1, 1, 0, 1, 0], sizes = [1, 1, 1, 5, 5, 128], strides = [1, 1, 1, 1, 1, 1]} : vector<1x2x2x8x8x128xf32> to vector<1x1x1x5x5x128xf32>
    %74 = vector.shape_cast %73 : vector<1x1x1x5x5x128xf32> to vector<1x5x5x128xf32>
    %75 = arith.addf %59, %74 : vector<1x5x5x128xf32>
    %c3_32 = arith.constant 3 : index
    %c0_33 = arith.constant 0 : index
    %c0_34 = arith.constant 0 : index
    %76 = vector.load %arg4[%c3_32, %c0_33, %c0_34] : memref<25x128x128xbf16, #tpu.memory_space<vmem>>, vector<1x128x128xbf16>
    %77 = vector.shape_cast %76 : vector<1x128x128xbf16> to vector<128x128xbf16>
    %cst_35 = arith.constant dense<0.000000e+00> : vector<256x128xf32>
    %78 = tpu.matmul %23, %77, %cst_35 {dimension_numbers = #tpu.dot_dimension_numbers<[1], [0], [0], [1], [0, 0, 1, 1], [], []>} : vector<256x128xbf16>, vector<128x128xbf16>, vector<256x128xf32> -> vector<256x128xf32>
    %79 = vector.shape_cast %78 : vector<256x128xf32> to vector<1x2x2x8x8x128xf32>
    %80 = vector.extract_strided_slice %79 {offsets = [0, 0, 1, 0, 1, 0], sizes = [1, 1, 1, 5, 5, 128], strides = [1, 1, 1, 1, 1, 1]} : vector<1x2x2x8x8x128xf32> to vector<1x1x1x5x5x128xf32>
    %81 = vector.shape_cast %80 : vector<1x1x1x5x5x128xf32> to vector<1x5x5x128xf32>
    %82 = arith.addf %66, %81 : vector<1x5x5x128xf32>
    %83 = vector.extract_strided_slice %79 {offsets = [0, 0, 0, 0, 2, 0], sizes = [1, 1, 1, 5, 5, 128], strides = [1, 1, 1, 1, 1, 1]} : vector<1x2x2x8x8x128xf32> to vector<1x1x1x5x5x128xf32>
    %84 = vector.shape_cast %83 : vector<1x1x1x5x5x128xf32> to vector<1x5x5x128xf32>
    %85 = arith.addf %69, %84 : vector<1x5x5x128xf32>
    %86 = vector.extract_strided_slice %79 {offsets = [0, 1, 1, 0, 1, 0], sizes = [1, 1, 1, 5, 5, 128], strides = [1, 1, 1, 1, 1, 1]} : vector<1x2x2x8x8x128xf32> to vector<1x1x1x5x5x128xf32>
    %87 = vector.shape_cast %86 : vector<1x1x1x5x5x128xf32> to vector<1x5x5x128xf32>
    %88 = arith.addf %72, %87 : vector<1x5x5x128xf32>
    %89 = vector.extract_strided_slice %79 {offsets = [0, 1, 0, 0, 2, 0], sizes = [1, 1, 1, 5, 5, 128], strides = [1, 1, 1, 1, 1, 1]} : vector<1x2x2x8x8x128xf32> to vector<1x1x1x5x5x128xf32>
    %90 = vector.shape_cast %89 : vector<1x1x1x5x5x128xf32> to vector<1x5x5x128xf32>
    %91 = arith.addf %75, %90 : vector<1x5x5x128xf32>
    %c4 = arith.constant 4 : index
    %c0_36 = arith.constant 0 : index
    %c0_37 = arith.constant 0 : index
    %92 = vector.load %arg4[%c4, %c0_36, %c0_37] : memref<25x128x128xbf16, #tpu.memory_space<vmem>>, vector<1x128x128xbf16>
    %93 = vector.shape_cast %92 : vector<1x128x128xbf16> to vector<128x128xbf16>
    %cst_38 = arith.constant dense<0.000000e+00> : vector<256x128xf32>
    %94 = tpu.matmul %23, %93, %cst_38 {dimension_numbers = #tpu.dot_dimension_numbers<[1], [0], [0], [1], [0, 0, 1, 1], [], []>} : vector<256x128xbf16>, vector<128x128xbf16>, vector<256x128xf32> -> vector<256x128xf32>
    %95 = vector.shape_cast %94 : vector<256x128xf32> to vector<1x2x2x8x8x128xf32>
    %96 = vector.extract_strided_slice %95 {offsets = [0, 0, 0, 0, 2, 0], sizes = [1, 1, 1, 5, 5, 128], strides = [1, 1, 1, 1, 1, 1]} : vector<1x2x2x8x8x128xf32> to vector<1x1x1x5x5x128xf32>
    %97 = vector.shape_cast %96 : vector<1x1x1x5x5x128xf32> to vector<1x5x5x128xf32>
    %98 = arith.addf %82, %97 : vector<1x5x5x128xf32>
    %99 = vector.extract_strided_slice %95 {offsets = [0, 0, 1, 0, 2, 0], sizes = [1, 1, 1, 5, 5, 128], strides = [1, 1, 1, 1, 1, 1]} : vector<1x2x2x8x8x128xf32> to vector<1x1x1x5x5x128xf32>
    %100 = vector.shape_cast %99 : vector<1x1x1x5x5x128xf32> to vector<1x5x5x128xf32>
    %101 = arith.addf %85, %100 : vector<1x5x5x128xf32>
    %102 = vector.extract_strided_slice %95 {offsets = [0, 1, 0, 0, 2, 0], sizes = [1, 1, 1, 5, 5, 128], strides = [1, 1, 1, 1, 1, 1]} : vector<1x2x2x8x8x128xf32> to vector<1x1x1x5x5x128xf32>
    %103 = vector.shape_cast %102 : vector<1x1x1x5x5x128xf32> to vector<1x5x5x128xf32>
    %104 = arith.addf %88, %103 : vector<1x5x5x128xf32>
    %105 = vector.extract_strided_slice %95 {offsets = [0, 1, 1, 0, 2, 0], sizes = [1, 1, 1, 5, 5, 128], strides = [1, 1, 1, 1, 1, 1]} : vector<1x2x2x8x8x128xf32> to vector<1x1x1x5x5x128xf32>
    %106 = vector.shape_cast %105 : vector<1x1x1x5x5x128xf32> to vector<1x5x5x128xf32>
    %107 = arith.addf %91, %106 : vector<1x5x5x128xf32>
    %c5 = arith.constant 5 : index
    %c0_39 = arith.constant 0 : index
    %c0_40 = arith.constant 0 : index
    %108 = vector.load %arg4[%c5, %c0_39, %c0_40] : memref<25x128x128xbf16, #tpu.memory_space<vmem>>, vector<1x128x128xbf16>
    %109 = vector.shape_cast %108 : vector<1x128x128xbf16> to vector<128x128xbf16>
    %cst_41 = arith.constant dense<0.000000e+00> : vector<256x128xf32>
    %110 = tpu.matmul %23, %109, %cst_41 {dimension_numbers = #tpu.dot_dimension_numbers<[1], [0], [0], [1], [0, 0, 1, 1], [], []>} : vector<256x128xbf16>, vector<128x128xbf16>, vector<256x128xf32> -> vector<256x128xf32>
    %111 = vector.shape_cast %110 : vector<256x128xf32> to vector<1x2x2x8x8x128xf32>
    %112 = vector.extract_strided_slice %111 {offsets = [0, 1, 0, 0, 0, 0], sizes = [1, 1, 1, 5, 5, 128], strides = [1, 1, 1, 1, 1, 1]} : vector<1x2x2x8x8x128xf32> to vector<1x1x1x5x5x128xf32>
    %113 = vector.shape_cast %112 : vector<1x1x1x5x5x128xf32> to vector<1x5x5x128xf32>
    %114 = arith.addf %98, %113 : vector<1x5x5x128xf32>
    %115 = vector.extract_strided_slice %111 {offsets = [0, 1, 1, 0, 0, 0], sizes = [1, 1, 1, 5, 5, 128], strides = [1, 1, 1, 1, 1, 1]} : vector<1x2x2x8x8x128xf32> to vector<1x1x1x5x5x128xf32>
    %116 = vector.shape_cast %115 : vector<1x1x1x5x5x128xf32> to vector<1x5x5x128xf32>
    %117 = arith.addf %101, %116 : vector<1x5x5x128xf32>
    %118 = vector.extract_strided_slice %111 {offsets = [0, 0, 0, 1, 0, 0], sizes = [1, 1, 1, 5, 5, 128], strides = [1, 1, 1, 1, 1, 1]} : vector<1x2x2x8x8x128xf32> to vector<1x1x1x5x5x128xf32>
    %119 = vector.shape_cast %118 : vector<1x1x1x5x5x128xf32> to vector<1x5x5x128xf32>
    %120 = arith.addf %104, %119 : vector<1x5x5x128xf32>
    %121 = vector.extract_strided_slice %111 {offsets = [0, 0, 1, 1, 0, 0], sizes = [1, 1, 1, 5, 5, 128], strides = [1, 1, 1, 1, 1, 1]} : vector<1x2x2x8x8x128xf32> to vector<1x1x1x5x5x128xf32>
    %122 = vector.shape_cast %121 : vector<1x1x1x5x5x128xf32> to vector<1x5x5x128xf32>
    %123 = arith.addf %107, %122 : vector<1x5x5x128xf32>
    %c6 = arith.constant 6 : index
    %c0_42 = arith.constant 0 : index
    %c0_43 = arith.constant 0 : index
    %124 = vector.load %arg4[%c6, %c0_42, %c0_43] : memref<25x128x128xbf16, #tpu.memory_space<vmem>>, vector<1x128x128xbf16>
    %125 = vector.shape_cast %124 : vector<1x128x128xbf16> to vector<128x128xbf16>
    %cst_44 = arith.constant dense<0.000000e+00> : vector<256x128xf32>
    %126 = tpu.matmul %23, %125, %cst_44 {dimension_numbers = #tpu.dot_dimension_numbers<[1], [0], [0], [1], [0, 0, 1, 1], [], []>} : vector<256x128xbf16>, vector<128x128xbf16>, vector<256x128xf32> -> vector<256x128xf32>
    %127 = vector.shape_cast %126 : vector<256x128xf32> to vector<1x2x2x8x8x128xf32>
    %128 = vector.extract_strided_slice %127 {offsets = [0, 1, 1, 0, 0, 0], sizes = [1, 1, 1, 5, 5, 128], strides = [1, 1, 1, 1, 1, 1]} : vector<1x2x2x8x8x128xf32> to vector<1x1x1x5x5x128xf32>
    %129 = vector.shape_cast %128 : vector<1x1x1x5x5x128xf32> to vector<1x5x5x128xf32>
    %130 = arith.addf %114, %129 : vector<1x5x5x128xf32>
    %131 = vector.extract_strided_slice %127 {offsets = [0, 1, 0, 0, 1, 0], sizes = [1, 1, 1, 5, 5, 128], strides = [1, 1, 1, 1, 1, 1]} : vector<1x2x2x8x8x128xf32> to vector<1x1x1x5x5x128xf32>
    %132 = vector.shape_cast %131 : vector<1x1x1x5x5x128xf32> to vector<1x5x5x128xf32>
    %133 = arith.addf %117, %132 : vector<1x5x5x128xf32>
    %134 = vector.extract_strided_slice %127 {offsets = [0, 0, 1, 1, 0, 0], sizes = [1, 1, 1, 5, 5, 128], strides = [1, 1, 1, 1, 1, 1]} : vector<1x2x2x8x8x128xf32> to vector<1x1x1x5x5x128xf32>
    %135 = vector.shape_cast %134 : vector<1x1x1x5x5x128xf32> to vector<1x5x5x128xf32>
    %136 = arith.addf %120, %135 : vector<1x5x5x128xf32>
    %137 = vector.extract_strided_slice %127 {offsets = [0, 0, 0, 1, 1, 0], sizes = [1, 1, 1, 5, 5, 128], strides = [1, 1, 1, 1, 1, 1]} : vector<1x2x2x8x8x128xf32> to vector<1x1x1x5x5x128xf32>
    %138 = vector.shape_cast %137 : vector<1x1x1x5x5x128xf32> to vector<1x5x5x128xf32>
    %139 = arith.addf %123, %138 : vector<1x5x5x128xf32>
    %c7 = arith.constant 7 : index
    %c0_45 = arith.constant 0 : index
    %c0_46 = arith.constant 0 : index
    %140 = vector.load %arg4[%c7, %c0_45, %c0_46] : memref<25x128x128xbf16, #tpu.memory_space<vmem>>, vector<1x128x128xbf16>
    %141 = vector.shape_cast %140 : vector<1x128x128xbf16> to vector<128x128xbf16>
    %cst_47 = arith.constant dense<0.000000e+00> : vector<256x128xf32>
    %142 = tpu.matmul %23, %141, %cst_47 {dimension_numbers = #tpu.dot_dimension_numbers<[1], [0], [0], [1], [0, 0, 1, 1], [], []>} : vector<256x128xbf16>, vector<128x128xbf16>, vector<256x128xf32> -> vector<256x128xf32>
    %143 = vector.shape_cast %142 : vector<256x128xf32> to vector<1x2x2x8x8x128xf32>
    %144 = vector.extract_strided_slice %143 {offsets = [0, 1, 0, 0, 1, 0], sizes = [1, 1, 1, 5, 5, 128], strides = [1, 1, 1, 1, 1, 1]} : vector<1x2x2x8x8x128xf32> to vector<1x1x1x5x5x128xf32>
    %145 = vector.shape_cast %144 : vector<1x1x1x5x5x128xf32> to vector<1x5x5x128xf32>
    %146 = arith.addf %130, %145 : vector<1x5x5x128xf32>
    %147 = vector.extract_strided_slice %143 {offsets = [0, 1, 1, 0, 1, 0], sizes = [1, 1, 1, 5, 5, 128], strides = [1, 1, 1, 1, 1, 1]} : vector<1x2x2x8x8x128xf32> to vector<1x1x1x5x5x128xf32>
    %148 = vector.shape_cast %147 : vector<1x1x1x5x5x128xf32> to vector<1x5x5x128xf32>
    %149 = arith.addf %133, %148 : vector<1x5x5x128xf32>
    %150 = vector.extract_strided_slice %143 {offsets = [0, 0, 0, 1, 1, 0], sizes = [1, 1, 1, 5, 5, 128], strides = [1, 1, 1, 1, 1, 1]} : vector<1x2x2x8x8x128xf32> to vector<1x1x1x5x5x128xf32>
    %151 = vector.shape_cast %150 : vector<1x1x1x5x5x128xf32> to vector<1x5x5x128xf32>
    %152 = arith.addf %136, %151 : vector<1x5x5x128xf32>
    %153 = vector.extract_strided_slice %143 {offsets = [0, 0, 1, 1, 1, 0], sizes = [1, 1, 1, 5, 5, 128], strides = [1, 1, 1, 1, 1, 1]} : vector<1x2x2x8x8x128xf32> to vector<1x1x1x5x5x128xf32>
    %154 = vector.shape_cast %153 : vector<1x1x1x5x5x128xf32> to vector<1x5x5x128xf32>
    %155 = arith.addf %139, %154 : vector<1x5x5x128xf32>
    %c8 = arith.constant 8 : index
    %c0_48 = arith.constant 0 : index
    %c0_49 = arith.constant 0 : index
    %156 = vector.load %arg4[%c8, %c0_48, %c0_49] : memref<25x128x128xbf16, #tpu.memory_space<vmem>>, vector<1x128x128xbf16>
    %157 = vector.shape_cast %156 : vector<1x128x128xbf16> to vector<128x128xbf16>
    %cst_50 = arith.constant dense<0.000000e+00> : vector<256x128xf32>
    %158 = tpu.matmul %23, %157, %cst_50 {dimension_numbers = #tpu.dot_dimension_numbers<[1], [0], [0], [1], [0, 0, 1, 1], [], []>} : vector<256x128xbf16>, vector<128x128xbf16>, vector<256x128xf32> -> vector<256x128xf32>
    %159 = vector.shape_cast %158 : vector<256x128xf32> to vector<1x2x2x8x8x128xf32>
    %160 = vector.extract_strided_slice %159 {offsets = [0, 1, 1, 0, 1, 0], sizes = [1, 1, 1, 5, 5, 128], strides = [1, 1, 1, 1, 1, 1]} : vector<1x2x2x8x8x128xf32> to vector<1x1x1x5x5x128xf32>
    %161 = vector.shape_cast %160 : vector<1x1x1x5x5x128xf32> to vector<1x5x5x128xf32>
    %162 = arith.addf %146, %161 : vector<1x5x5x128xf32>
    %163 = vector.extract_strided_slice %159 {offsets = [0, 1, 0, 0, 2, 0], sizes = [1, 1, 1, 5, 5, 128], strides = [1, 1, 1, 1, 1, 1]} : vector<1x2x2x8x8x128xf32> to vector<1x1x1x5x5x128xf32>
    %164 = vector.shape_cast %163 : vector<1x1x1x5x5x128xf32> to vector<1x5x5x128xf32>
    %165 = arith.addf %149, %164 : vector<1x5x5x128xf32>
    %166 = vector.extract_strided_slice %159 {offsets = [0, 0, 1, 1, 1, 0], sizes = [1, 1, 1, 5, 5, 128], strides = [1, 1, 1, 1, 1, 1]} : vector<1x2x2x8x8x128xf32> to vector<1x1x1x5x5x128xf32>
    %167 = vector.shape_cast %166 : vector<1x1x1x5x5x128xf32> to vector<1x5x5x128xf32>
    %168 = arith.addf %152, %167 : vector<1x5x5x128xf32>
    %169 = vector.extract_strided_slice %159 {offsets = [0, 0, 0, 1, 2, 0], sizes = [1, 1, 1, 5, 5, 128], strides = [1, 1, 1, 1, 1, 1]} : vector<1x2x2x8x8x128xf32> to vector<1x1x1x5x5x128xf32>
    %170 = vector.shape_cast %169 : vector<1x1x1x5x5x128xf32> to vector<1x5x5x128xf32>
    %171 = arith.addf %155, %170 : vector<1x5x5x128xf32>
    %c9 = arith.constant 9 : index
    %c0_51 = arith.constant 0 : index
    %c0_52 = arith.constant 0 : index
    %172 = vector.load %arg4[%c9, %c0_51, %c0_52] : memref<25x128x128xbf16, #tpu.memory_space<vmem>>, vector<1x128x128xbf16>
    %173 = vector.shape_cast %172 : vector<1x128x128xbf16> to vector<128x128xbf16>
    %cst_53 = arith.constant dense<0.000000e+00> : vector<256x128xf32>
    %174 = tpu.matmul %23, %173, %cst_53 {dimension_numbers = #tpu.dot_dimension_numbers<[1], [0], [0], [1], [0, 0, 1, 1], [], []>} : vector<256x128xbf16>, vector<128x128xbf16>, vector<256x128xf32> -> vector<256x128xf32>
    %175 = vector.shape_cast %174 : vector<256x128xf32> to vector<1x2x2x8x8x128xf32>
    %176 = vector.extract_strided_slice %175 {offsets = [0, 1, 0, 0, 2, 0], sizes = [1, 1, 1, 5, 5, 128], strides = [1, 1, 1, 1, 1, 1]} : vector<1x2x2x8x8x128xf32> to vector<1x1x1x5x5x128xf32>
    %177 = vector.shape_cast %176 : vector<1x1x1x5x5x128xf32> to vector<1x5x5x128xf32>
    %178 = arith.addf %162, %177 : vector<1x5x5x128xf32>
    %179 = vector.extract_strided_slice %175 {offsets = [0, 1, 1, 0, 2, 0], sizes = [1, 1, 1, 5, 5, 128], strides = [1, 1, 1, 1, 1, 1]} : vector<1x2x2x8x8x128xf32> to vector<1x1x1x5x5x128xf32>
    %180 = vector.shape_cast %179 : vector<1x1x1x5x5x128xf32> to vector<1x5x5x128xf32>
    %181 = arith.addf %165, %180 : vector<1x5x5x128xf32>
    %182 = vector.extract_strided_slice %175 {offsets = [0, 0, 0, 1, 2, 0], sizes = [1, 1, 1, 5, 5, 128], strides = [1, 1, 1, 1, 1, 1]} : vector<1x2x2x8x8x128xf32> to vector<1x1x1x5x5x128xf32>
    %183 = vector.shape_cast %182 : vector<1x1x1x5x5x128xf32> to vector<1x5x5x128xf32>
    %184 = arith.addf %168, %183 : vector<1x5x5x128xf32>
    %185 = vector.extract_strided_slice %175 {offsets = [0, 0, 1, 1, 2, 0], sizes = [1, 1, 1, 5, 5, 128], strides = [1, 1, 1, 1, 1, 1]} : vector<1x2x2x8x8x128xf32> to vector<1x1x1x5x5x128xf32>
    %186 = vector.shape_cast %185 : vector<1x1x1x5x5x128xf32> to vector<1x5x5x128xf32>
    %187 = arith.addf %171, %186 : vector<1x5x5x128xf32>
    %c10 = arith.constant 10 : index
    %c0_54 = arith.constant 0 : index
    %c0_55 = arith.constant 0 : index
    %188 = vector.load %arg4[%c10, %c0_54, %c0_55] : memref<25x128x128xbf16, #tpu.memory_space<vmem>>, vector<1x128x128xbf16>
    %189 = vector.shape_cast %188 : vector<1x128x128xbf16> to vector<128x128xbf16>
    %cst_56 = arith.constant dense<0.000000e+00> : vector<256x128xf32>
    %190 = tpu.matmul %23, %189, %cst_56 {dimension_numbers = #tpu.dot_dimension_numbers<[1], [0], [0], [1], [0, 0, 1, 1], [], []>} : vector<256x128xbf16>, vector<128x128xbf16>, vector<256x128xf32> -> vector<256x128xf32>
    %191 = vector.shape_cast %190 : vector<256x128xf32> to vector<1x2x2x8x8x128xf32>
    %192 = vector.extract_strided_slice %191 {offsets = [0, 0, 0, 1, 0, 0], sizes = [1, 1, 1, 5, 5, 128], strides = [1, 1, 1, 1, 1, 1]} : vector<1x2x2x8x8x128xf32> to vector<1x1x1x5x5x128xf32>
    %193 = vector.shape_cast %192 : vector<1x1x1x5x5x128xf32> to vector<1x5x5x128xf32>
    %194 = arith.addf %178, %193 : vector<1x5x5x128xf32>
    %195 = vector.extract_strided_slice %191 {offsets = [0, 0, 1, 1, 0, 0], sizes = [1, 1, 1, 5, 5, 128], strides = [1, 1, 1, 1, 1, 1]} : vector<1x2x2x8x8x128xf32> to vector<1x1x1x5x5x128xf32>
    %196 = vector.shape_cast %195 : vector<1x1x1x5x5x128xf32> to vector<1x5x5x128xf32>
    %197 = arith.addf %181, %196 : vector<1x5x5x128xf32>
    %198 = vector.extract_strided_slice %191 {offsets = [0, 1, 0, 1, 0, 0], sizes = [1, 1, 1, 5, 5, 128], strides = [1, 1, 1, 1, 1, 1]} : vector<1x2x2x8x8x128xf32> to vector<1x1x1x5x5x128xf32>
    %199 = vector.shape_cast %198 : vector<1x1x1x5x5x128xf32> to vector<1x5x5x128xf32>
    %200 = arith.addf %184, %199 : vector<1x5x5x128xf32>
    %201 = vector.extract_strided_slice %191 {offsets = [0, 1, 1, 1, 0, 0], sizes = [1, 1, 1, 5, 5, 128], strides = [1, 1, 1, 1, 1, 1]} : vector<1x2x2x8x8x128xf32> to vector<1x1x1x5x5x128xf32>
    %202 = vector.shape_cast %201 : vector<1x1x1x5x5x128xf32> to vector<1x5x5x128xf32>
    %203 = arith.addf %187, %202 : vector<1x5x5x128xf32>
    %c11 = arith.constant 11 : index
    %c0_57 = arith.constant 0 : index
    %c0_58 = arith.constant 0 : index
    %204 = vector.load %arg4[%c11, %c0_57, %c0_58] : memref<25x128x128xbf16, #tpu.memory_space<vmem>>, vector<1x128x128xbf16>
    %205 = vector.shape_cast %204 : vector<1x128x128xbf16> to vector<128x128xbf16>
    %cst_59 = arith.constant dense<0.000000e+00> : vector<256x128xf32>
    %206 = tpu.matmul %23, %205, %cst_59 {dimension_numbers = #tpu.dot_dimension_numbers<[1], [0], [0], [1], [0, 0, 1, 1], [], []>} : vector<256x128xbf16>, vector<128x128xbf16>, vector<256x128xf32> -> vector<256x128xf32>
    %207 = vector.shape_cast %206 : vector<256x128xf32> to vector<1x2x2x8x8x128xf32>
    %208 = vector.extract_strided_slice %207 {offsets = [0, 0, 1, 1, 0, 0], sizes = [1, 1, 1, 5, 5, 128], strides = [1, 1, 1, 1, 1, 1]} : vector<1x2x2x8x8x128xf32> to vector<1x1x1x5x5x128xf32>
    %209 = vector.shape_cast %208 : vector<1x1x1x5x5x128xf32> to vector<1x5x5x128xf32>
    %210 = arith.addf %194, %209 : vector<1x5x5x128xf32>
    %211 = vector.extract_strided_slice %207 {offsets = [0, 0, 0, 1, 1, 0], sizes = [1, 1, 1, 5, 5, 128], strides = [1, 1, 1, 1, 1, 1]} : vector<1x2x2x8x8x128xf32> to vector<1x1x1x5x5x128xf32>
    %212 = vector.shape_cast %211 : vector<1x1x1x5x5x128xf32> to vector<1x5x5x128xf32>
    %213 = arith.addf %197, %212 : vector<1x5x5x128xf32>
    %214 = vector.extract_strided_slice %207 {offsets = [0, 1, 1, 1, 0, 0], sizes = [1, 1, 1, 5, 5, 128], strides = [1, 1, 1, 1, 1, 1]} : vector<1x2x2x8x8x128xf32> to vector<1x1x1x5x5x128xf32>
    %215 = vector.shape_cast %214 : vector<1x1x1x5x5x128xf32> to vector<1x5x5x128xf32>
    %216 = arith.addf %200, %215 : vector<1x5x5x128xf32>
    %217 = vector.extract_strided_slice %207 {offsets = [0, 1, 0, 1, 1, 0], sizes = [1, 1, 1, 5, 5, 128], strides = [1, 1, 1, 1, 1, 1]} : vector<1x2x2x8x8x128xf32> to vector<1x1x1x5x5x128xf32>
    %218 = vector.shape_cast %217 : vector<1x1x1x5x5x128xf32> to vector<1x5x5x128xf32>
    %219 = arith.addf %203, %218 : vector<1x5x5x128xf32>
    %c12 = arith.constant 12 : index
    %c0_60 = arith.constant 0 : index
    %c0_61 = arith.constant 0 : index
    %220 = vector.load %arg4[%c12, %c0_60, %c0_61] : memref<25x128x128xbf16, #tpu.memory_space<vmem>>, vector<1x128x128xbf16>
    %221 = vector.shape_cast %220 : vector<1x128x128xbf16> to vector<128x128xbf16>
    %cst_62 = arith.constant dense<0.000000e+00> : vector<256x128xf32>
    %222 = tpu.matmul %23, %221, %cst_62 {dimension_numbers = #tpu.dot_dimension_numbers<[1], [0], [0], [1], [0, 0, 1, 1], [], []>} : vector<256x128xbf16>, vector<128x128xbf16>, vector<256x128xf32> -> vector<256x128xf32>
    %223 = vector.shape_cast %222 : vector<256x128xf32> to vector<1x2x2x8x8x128xf32>
    %224 = vector.extract_strided_slice %223 {offsets = [0, 0, 0, 1, 1, 0], sizes = [1, 1, 1, 5, 5, 128], strides = [1, 1, 1, 1, 1, 1]} : vector<1x2x2x8x8x128xf32> to vector<1x1x1x5x5x128xf32>
    %225 = vector.shape_cast %224 : vector<1x1x1x5x5x128xf32> to vector<1x5x5x128xf32>
    %226 = arith.addf %210, %225 : vector<1x5x5x128xf32>
    %227 = vector.extract_strided_slice %223 {offsets = [0, 0, 1, 1, 1, 0], sizes = [1, 1, 1, 5, 5, 128], strides = [1, 1, 1, 1, 1, 1]} : vector<1x2x2x8x8x128xf32> to vector<1x1x1x5x5x128xf32>
    %228 = vector.shape_cast %227 : vector<1x1x1x5x5x128xf32> to vector<1x5x5x128xf32>
    %229 = arith.addf %213, %228 : vector<1x5x5x128xf32>
    %230 = vector.extract_strided_slice %223 {offsets = [0, 1, 0, 1, 1, 0], sizes = [1, 1, 1, 5, 5, 128], strides = [1, 1, 1, 1, 1, 1]} : vector<1x2x2x8x8x128xf32> to vector<1x1x1x5x5x128xf32>
    %231 = vector.shape_cast %230 : vector<1x1x1x5x5x128xf32> to vector<1x5x5x128xf32>
    %232 = arith.addf %216, %231 : vector<1x5x5x128xf32>
    %233 = vector.extract_strided_slice %223 {offsets = [0, 1, 1, 1, 1, 0], sizes = [1, 1, 1, 5, 5, 128], strides = [1, 1, 1, 1, 1, 1]} : vector<1x2x2x8x8x128xf32> to vector<1x1x1x5x5x128xf32>
    %234 = vector.shape_cast %233 : vector<1x1x1x5x5x128xf32> to vector<1x5x5x128xf32>
    %235 = arith.addf %219, %234 : vector<1x5x5x128xf32>
    %c13 = arith.constant 13 : index
    %c0_63 = arith.constant 0 : index
    %c0_64 = arith.constant 0 : index
    %236 = vector.load %arg4[%c13, %c0_63, %c0_64] : memref<25x128x128xbf16, #tpu.memory_space<vmem>>, vector<1x128x128xbf16>
    %237 = vector.shape_cast %236 : vector<1x128x128xbf16> to vector<128x128xbf16>
    %cst_65 = arith.constant dense<0.000000e+00> : vector<256x128xf32>
    %238 = tpu.matmul %23, %237, %cst_65 {dimension_numbers = #tpu.dot_dimension_numbers<[1], [0], [0], [1], [0, 0, 1, 1], [], []>} : vector<256x128xbf16>, vector<128x128xbf16>, vector<256x128xf32> -> vector<256x128xf32>
    %239 = vector.shape_cast %238 : vector<256x128xf32> to vector<1x2x2x8x8x128xf32>
    %240 = vector.extract_strided_slice %239 {offsets = [0, 0, 1, 1, 1, 0], sizes = [1, 1, 1, 5, 5, 128], strides = [1, 1, 1, 1, 1, 1]} : vector<1x2x2x8x8x128xf32> to vector<1x1x1x5x5x128xf32>
    %241 = vector.shape_cast %240 : vector<1x1x1x5x5x128xf32> to vector<1x5x5x128xf32>
    %242 = arith.addf %226, %241 : vector<1x5x5x128xf32>
    %243 = vector.extract_strided_slice %239 {offsets = [0, 0, 0, 1, 2, 0], sizes = [1, 1, 1, 5, 5, 128], strides = [1, 1, 1, 1, 1, 1]} : vector<1x2x2x8x8x128xf32> to vector<1x1x1x5x5x128xf32>
    %244 = vector.shape_cast %243 : vector<1x1x1x5x5x128xf32> to vector<1x5x5x128xf32>
    %245 = arith.addf %229, %244 : vector<1x5x5x128xf32>
    %246 = vector.extract_strided_slice %239 {offsets = [0, 1, 1, 1, 1, 0], sizes = [1, 1, 1, 5, 5, 128], strides = [1, 1, 1, 1, 1, 1]} : vector<1x2x2x8x8x128xf32> to vector<1x1x1x5x5x128xf32>
    %247 = vector.shape_cast %246 : vector<1x1x1x5x5x128xf32> to vector<1x5x5x128xf32>
    %248 = arith.addf %232, %247 : vector<1x5x5x128xf32>
    %249 = vector.extract_strided_slice %239 {offsets = [0, 1, 0, 1, 2, 0], sizes = [1, 1, 1, 5, 5, 128], strides = [1, 1, 1, 1, 1, 1]} : vector<1x2x2x8x8x128xf32> to vector<1x1x1x5x5x128xf32>
    %250 = vector.shape_cast %249 : vector<1x1x1x5x5x128xf32> to vector<1x5x5x128xf32>
    %251 = arith.addf %235, %250 : vector<1x5x5x128xf32>
    %c14 = arith.constant 14 : index
    %c0_66 = arith.constant 0 : index
    %c0_67 = arith.constant 0 : index
    %252 = vector.load %arg4[%c14, %c0_66, %c0_67] : memref<25x128x128xbf16, #tpu.memory_space<vmem>>, vector<1x128x128xbf16>
    %253 = vector.shape_cast %252 : vector<1x128x128xbf16> to vector<128x128xbf16>
    %cst_68 = arith.constant dense<0.000000e+00> : vector<256x128xf32>
    %254 = tpu.matmul %23, %253, %cst_68 {dimension_numbers = #tpu.dot_dimension_numbers<[1], [0], [0], [1], [0, 0, 1, 1], [], []>} : vector<256x128xbf16>, vector<128x128xbf16>, vector<256x128xf32> -> vector<256x128xf32>
    %255 = vector.shape_cast %254 : vector<256x128xf32> to vector<1x2x2x8x8x128xf32>
    %256 = vector.extract_strided_slice %255 {offsets = [0, 0, 0, 1, 2, 0], sizes = [1, 1, 1, 5, 5, 128], strides = [1, 1, 1, 1, 1, 1]} : vector<1x2x2x8x8x128xf32> to vector<1x1x1x5x5x128xf32>
    %257 = vector.shape_cast %256 : vector<1x1x1x5x5x128xf32> to vector<1x5x5x128xf32>
    %258 = arith.addf %242, %257 : vector<1x5x5x128xf32>
    %259 = vector.extract_strided_slice %255 {offsets = [0, 0, 1, 1, 2, 0], sizes = [1, 1, 1, 5, 5, 128], strides = [1, 1, 1, 1, 1, 1]} : vector<1x2x2x8x8x128xf32> to vector<1x1x1x5x5x128xf32>
    %260 = vector.shape_cast %259 : vector<1x1x1x5x5x128xf32> to vector<1x5x5x128xf32>
    %261 = arith.addf %245, %260 : vector<1x5x5x128xf32>
    %262 = vector.extract_strided_slice %255 {offsets = [0, 1, 0, 1, 2, 0], sizes = [1, 1, 1, 5, 5, 128], strides = [1, 1, 1, 1, 1, 1]} : vector<1x2x2x8x8x128xf32> to vector<1x1x1x5x5x128xf32>
    %263 = vector.shape_cast %262 : vector<1x1x1x5x5x128xf32> to vector<1x5x5x128xf32>
    %264 = arith.addf %248, %263 : vector<1x5x5x128xf32>
    %265 = vector.extract_strided_slice %255 {offsets = [0, 1, 1, 1, 2, 0], sizes = [1, 1, 1, 5, 5, 128], strides = [1, 1, 1, 1, 1, 1]} : vector<1x2x2x8x8x128xf32> to vector<1x1x1x5x5x128xf32>
    %266 = vector.shape_cast %265 : vector<1x1x1x5x5x128xf32> to vector<1x5x5x128xf32>
    %267 = arith.addf %251, %266 : vector<1x5x5x128xf32>
    %c15 = arith.constant 15 : index
    %c0_69 = arith.constant 0 : index
    %c0_70 = arith.constant 0 : index
    %268 = vector.load %arg4[%c15, %c0_69, %c0_70] : memref<25x128x128xbf16, #tpu.memory_space<vmem>>, vector<1x128x128xbf16>
    %269 = vector.shape_cast %268 : vector<1x128x128xbf16> to vector<128x128xbf16>
    %cst_71 = arith.constant dense<0.000000e+00> : vector<256x128xf32>
    %270 = tpu.matmul %23, %269, %cst_71 {dimension_numbers = #tpu.dot_dimension_numbers<[1], [0], [0], [1], [0, 0, 1, 1], [], []>} : vector<256x128xbf16>, vector<128x128xbf16>, vector<256x128xf32> -> vector<256x128xf32>
    %271 = vector.shape_cast %270 : vector<256x128xf32> to vector<1x2x2x8x8x128xf32>
    %272 = vector.extract_strided_slice %271 {offsets = [0, 1, 0, 1, 0, 0], sizes = [1, 1, 1, 5, 5, 128], strides = [1, 1, 1, 1, 1, 1]} : vector<1x2x2x8x8x128xf32> to vector<1x1x1x5x5x128xf32>
    %273 = vector.shape_cast %272 : vector<1x1x1x5x5x128xf32> to vector<1x5x5x128xf32>
    %274 = arith.addf %258, %273 : vector<1x5x5x128xf32>
    %275 = vector.extract_strided_slice %271 {offsets = [0, 1, 1, 1, 0, 0], sizes = [1, 1, 1, 5, 5, 128], strides = [1, 1, 1, 1, 1, 1]} : vector<1x2x2x8x8x128xf32> to vector<1x1x1x5x5x128xf32>
    %276 = vector.shape_cast %275 : vector<1x1x1x5x5x128xf32> to vector<1x5x5x128xf32>
    %277 = arith.addf %261, %276 : vector<1x5x5x128xf32>
    %278 = vector.extract_strided_slice %271 {offsets = [0, 0, 0, 2, 0, 0], sizes = [1, 1, 1, 5, 5, 128], strides = [1, 1, 1, 1, 1, 1]} : vector<1x2x2x8x8x128xf32> to vector<1x1x1x5x5x128xf32>
    %279 = vector.shape_cast %278 : vector<1x1x1x5x5x128xf32> to vector<1x5x5x128xf32>
    %280 = arith.addf %264, %279 : vector<1x5x5x128xf32>
    %281 = vector.extract_strided_slice %271 {offsets = [0, 0, 1, 2, 0, 0], sizes = [1, 1, 1, 5, 5, 128], strides = [1, 1, 1, 1, 1, 1]} : vector<1x2x2x8x8x128xf32> to vector<1x1x1x5x5x128xf32>
    %282 = vector.shape_cast %281 : vector<1x1x1x5x5x128xf32> to vector<1x5x5x128xf32>
    %283 = arith.addf %267, %282 : vector<1x5x5x128xf32>
    %c16 = arith.constant 16 : index
    %c0_72 = arith.constant 0 : index
    %c0_73 = arith.constant 0 : index
    %284 = vector.load %arg4[%c16, %c0_72, %c0_73] : memref<25x128x128xbf16, #tpu.memory_space<vmem>>, vector<1x128x128xbf16>
    %285 = vector.shape_cast %284 : vector<1x128x128xbf16> to vector<128x128xbf16>
    %cst_74 = arith.constant dense<0.000000e+00> : vector<256x128xf32>
    %286 = tpu.matmul %23, %285, %cst_74 {dimension_numbers = #tpu.dot_dimension_numbers<[1], [0], [0], [1], [0, 0, 1, 1], [], []>} : vector<256x128xbf16>, vector<128x128xbf16>, vector<256x128xf32> -> vector<256x128xf32>
    %287 = vector.shape_cast %286 : vector<256x128xf32> to vector<1x2x2x8x8x128xf32>
    %288 = vector.extract_strided_slice %287 {offsets = [0, 1, 1, 1, 0, 0], sizes = [1, 1, 1, 5, 5, 128], strides = [1, 1, 1, 1, 1, 1]} : vector<1x2x2x8x8x128xf32> to vector<1x1x1x5x5x128xf32>
    %289 = vector.shape_cast %288 : vector<1x1x1x5x5x128xf32> to vector<1x5x5x128xf32>
    %290 = arith.addf %274, %289 : vector<1x5x5x128xf32>
    %291 = vector.extract_strided_slice %287 {offsets = [0, 1, 0, 1, 1, 0], sizes = [1, 1, 1, 5, 5, 128], strides = [1, 1, 1, 1, 1, 1]} : vector<1x2x2x8x8x128xf32> to vector<1x1x1x5x5x128xf32>
    %292 = vector.shape_cast %291 : vector<1x1x1x5x5x128xf32> to vector<1x5x5x128xf32>
    %293 = arith.addf %277, %292 : vector<1x5x5x128xf32>
    %294 = vector.extract_strided_slice %287 {offsets = [0, 0, 1, 2, 0, 0], sizes = [1, 1, 1, 5, 5, 128], strides = [1, 1, 1, 1, 1, 1]} : vector<1x2x2x8x8x128xf32> to vector<1x1x1x5x5x128xf32>
    %295 = vector.shape_cast %294 : vector<1x1x1x5x5x128xf32> to vector<1x5x5x128xf32>
    %296 = arith.addf %280, %295 : vector<1x5x5x128xf32>
    %297 = vector.extract_strided_slice %287 {offsets = [0, 0, 0, 2, 1, 0], sizes = [1, 1, 1, 5, 5, 128], strides = [1, 1, 1, 1, 1, 1]} : vector<1x2x2x8x8x128xf32> to vector<1x1x1x5x5x128xf32>
    %298 = vector.shape_cast %297 : vector<1x1x1x5x5x128xf32> to vector<1x5x5x128xf32>
    %299 = arith.addf %283, %298 : vector<1x5x5x128xf32>
    %c17 = arith.constant 17 : index
    %c0_75 = arith.constant 0 : index
    %c0_76 = arith.constant 0 : index
    %300 = vector.load %arg4[%c17, %c0_75, %c0_76] : memref<25x128x128xbf16, #tpu.memory_space<vmem>>, vector<1x128x128xbf16>
    %301 = vector.shape_cast %300 : vector<1x128x128xbf16> to vector<128x128xbf16>
    %cst_77 = arith.constant dense<0.000000e+00> : vector<256x128xf32>
    %302 = tpu.matmul %23, %301, %cst_77 {dimension_numbers = #tpu.dot_dimension_numbers<[1], [0], [0], [1], [0, 0, 1, 1], [], []>} : vector<256x128xbf16>, vector<128x128xbf16>, vector<256x128xf32> -> vector<256x128xf32>
    %303 = vector.shape_cast %302 : vector<256x128xf32> to vector<1x2x2x8x8x128xf32>
    %304 = vector.extract_strided_slice %303 {offsets = [0, 1, 0, 1, 1, 0], sizes = [1, 1, 1, 5, 5, 128], strides = [1, 1, 1, 1, 1, 1]} : vector<1x2x2x8x8x128xf32> to vector<1x1x1x5x5x128xf32>
    %305 = vector.shape_cast %304 : vector<1x1x1x5x5x128xf32> to vector<1x5x5x128xf32>
    %306 = arith.addf %290, %305 : vector<1x5x5x128xf32>
    %307 = vector.extract_strided_slice %303 {offsets = [0, 1, 1, 1, 1, 0], sizes = [1, 1, 1, 5, 5, 128], strides = [1, 1, 1, 1, 1, 1]} : vector<1x2x2x8x8x128xf32> to vector<1x1x1x5x5x128xf32>
    %308 = vector.shape_cast %307 : vector<1x1x1x5x5x128xf32> to vector<1x5x5x128xf32>
    %309 = arith.addf %293, %308 : vector<1x5x5x128xf32>
    %310 = vector.extract_strided_slice %303 {offsets = [0, 0, 0, 2, 1, 0], sizes = [1, 1, 1, 5, 5, 128], strides = [1, 1, 1, 1, 1, 1]} : vector<1x2x2x8x8x128xf32> to vector<1x1x1x5x5x128xf32>
    %311 = vector.shape_cast %310 : vector<1x1x1x5x5x128xf32> to vector<1x5x5x128xf32>
    %312 = arith.addf %296, %311 : vector<1x5x5x128xf32>
    %313 = vector.extract_strided_slice %303 {offsets = [0, 0, 1, 2, 1, 0], sizes = [1, 1, 1, 5, 5, 128], strides = [1, 1, 1, 1, 1, 1]} : vector<1x2x2x8x8x128xf32> to vector<1x1x1x5x5x128xf32>
    %314 = vector.shape_cast %313 : vector<1x1x1x5x5x128xf32> to vector<1x5x5x128xf32>
    %315 = arith.addf %299, %314 : vector<1x5x5x128xf32>
    %c18 = arith.constant 18 : index
    %c0_78 = arith.constant 0 : index
    %c0_79 = arith.constant 0 : index
    %316 = vector.load %arg4[%c18, %c0_78, %c0_79] : memref<25x128x128xbf16, #tpu.memory_space<vmem>>, vector<1x128x128xbf16>
    %317 = vector.shape_cast %316 : vector<1x128x128xbf16> to vector<128x128xbf16>
    %cst_80 = arith.constant dense<0.000000e+00> : vector<256x128xf32>
    %318 = tpu.matmul %23, %317, %cst_80 {dimension_numbers = #tpu.dot_dimension_numbers<[1], [0], [0], [1], [0, 0, 1, 1], [], []>} : vector<256x128xbf16>, vector<128x128xbf16>, vector<256x128xf32> -> vector<256x128xf32>
    %319 = vector.shape_cast %318 : vector<256x128xf32> to vector<1x2x2x8x8x128xf32>
    %320 = vector.extract_strided_slice %319 {offsets = [0, 1, 1, 1, 1, 0], sizes = [1, 1, 1, 5, 5, 128], strides = [1, 1, 1, 1, 1, 1]} : vector<1x2x2x8x8x128xf32> to vector<1x1x1x5x5x128xf32>
    %321 = vector.shape_cast %320 : vector<1x1x1x5x5x128xf32> to vector<1x5x5x128xf32>
    %322 = arith.addf %306, %321 : vector<1x5x5x128xf32>
    %323 = vector.extract_strided_slice %319 {offsets = [0, 1, 0, 1, 2, 0], sizes = [1, 1, 1, 5, 5, 128], strides = [1, 1, 1, 1, 1, 1]} : vector<1x2x2x8x8x128xf32> to vector<1x1x1x5x5x128xf32>
    %324 = vector.shape_cast %323 : vector<1x1x1x5x5x128xf32> to vector<1x5x5x128xf32>
    %325 = arith.addf %309, %324 : vector<1x5x5x128xf32>
    %326 = vector.extract_strided_slice %319 {offsets = [0, 0, 1, 2, 1, 0], sizes = [1, 1, 1, 5, 5, 128], strides = [1, 1, 1, 1, 1, 1]} : vector<1x2x2x8x8x128xf32> to vector<1x1x1x5x5x128xf32>
    %327 = vector.shape_cast %326 : vector<1x1x1x5x5x128xf32> to vector<1x5x5x128xf32>
    %328 = arith.addf %312, %327 : vector<1x5x5x128xf32>
    %329 = vector.extract_strided_slice %319 {offsets = [0, 0, 0, 2, 2, 0], sizes = [1, 1, 1, 5, 5, 128], strides = [1, 1, 1, 1, 1, 1]} : vector<1x2x2x8x8x128xf32> to vector<1x1x1x5x5x128xf32>
    %330 = vector.shape_cast %329 : vector<1x1x1x5x5x128xf32> to vector<1x5x5x128xf32>
    %331 = arith.addf %315, %330 : vector<1x5x5x128xf32>
    %c19 = arith.constant 19 : index
    %c0_81 = arith.constant 0 : index
    %c0_82 = arith.constant 0 : index
    %332 = vector.load %arg4[%c19, %c0_81, %c0_82] : memref<25x128x128xbf16, #tpu.memory_space<vmem>>, vector<1x128x128xbf16>
    %333 = vector.shape_cast %332 : vector<1x128x128xbf16> to vector<128x128xbf16>
    %cst_83 = arith.constant dense<0.000000e+00> : vector<256x128xf32>
    %334 = tpu.matmul %23, %333, %cst_83 {dimension_numbers = #tpu.dot_dimension_numbers<[1], [0], [0], [1], [0, 0, 1, 1], [], []>} : vector<256x128xbf16>, vector<128x128xbf16>, vector<256x128xf32> -> vector<256x128xf32>
    %335 = vector.shape_cast %334 : vector<256x128xf32> to vector<1x2x2x8x8x128xf32>
    %336 = vector.extract_strided_slice %335 {offsets = [0, 1, 0, 1, 2, 0], sizes = [1, 1, 1, 5, 5, 128], strides = [1, 1, 1, 1, 1, 1]} : vector<1x2x2x8x8x128xf32> to vector<1x1x1x5x5x128xf32>
    %337 = vector.shape_cast %336 : vector<1x1x1x5x5x128xf32> to vector<1x5x5x128xf32>
    %338 = arith.addf %322, %337 : vector<1x5x5x128xf32>
    %339 = vector.extract_strided_slice %335 {offsets = [0, 1, 1, 1, 2, 0], sizes = [1, 1, 1, 5, 5, 128], strides = [1, 1, 1, 1, 1, 1]} : vector<1x2x2x8x8x128xf32> to vector<1x1x1x5x5x128xf32>
    %340 = vector.shape_cast %339 : vector<1x1x1x5x5x128xf32> to vector<1x5x5x128xf32>
    %341 = arith.addf %325, %340 : vector<1x5x5x128xf32>
    %342 = vector.extract_strided_slice %335 {offsets = [0, 0, 0, 2, 2, 0], sizes = [1, 1, 1, 5, 5, 128], strides = [1, 1, 1, 1, 1, 1]} : vector<1x2x2x8x8x128xf32> to vector<1x1x1x5x5x128xf32>
    %343 = vector.shape_cast %342 : vector<1x1x1x5x5x128xf32> to vector<1x5x5x128xf32>
    %344 = arith.addf %328, %343 : vector<1x5x5x128xf32>
    %345 = vector.extract_strided_slice %335 {offsets = [0, 0, 1, 2, 2, 0], sizes = [1, 1, 1, 5, 5, 128], strides = [1, 1, 1, 1, 1, 1]} : vector<1x2x2x8x8x128xf32> to vector<1x1x1x5x5x128xf32>
    %346 = vector.shape_cast %345 : vector<1x1x1x5x5x128xf32> to vector<1x5x5x128xf32>
    %347 = arith.addf %331, %346 : vector<1x5x5x128xf32>
    %c20 = arith.constant 20 : index
    %c0_84 = arith.constant 0 : index
    %c0_85 = arith.constant 0 : index
    %348 = vector.load %arg4[%c20, %c0_84, %c0_85] : memref<25x128x128xbf16, #tpu.memory_space<vmem>>, vector<1x128x128xbf16>
    %349 = vector.shape_cast %348 : vector<1x128x128xbf16> to vector<128x128xbf16>
    %cst_86 = arith.constant dense<0.000000e+00> : vector<256x128xf32>
    %350 = tpu.matmul %23, %349, %cst_86 {dimension_numbers = #tpu.dot_dimension_numbers<[1], [0], [0], [1], [0, 0, 1, 1], [], []>} : vector<256x128xbf16>, vector<128x128xbf16>, vector<256x128xf32> -> vector<256x128xf32>
    %351 = vector.shape_cast %350 : vector<256x128xf32> to vector<1x2x2x8x8x128xf32>
    %352 = vector.extract_strided_slice %351 {offsets = [0, 0, 0, 2, 0, 0], sizes = [1, 1, 1, 5, 5, 128], strides = [1, 1, 1, 1, 1, 1]} : vector<1x2x2x8x8x128xf32> to vector<1x1x1x5x5x128xf32>
    %353 = vector.shape_cast %352 : vector<1x1x1x5x5x128xf32> to vector<1x5x5x128xf32>
    %354 = arith.addf %338, %353 : vector<1x5x5x128xf32>
    %355 = vector.extract_strided_slice %351 {offsets = [0, 0, 1, 2, 0, 0], sizes = [1, 1, 1, 5, 5, 128], strides = [1, 1, 1, 1, 1, 1]} : vector<1x2x2x8x8x128xf32> to vector<1x1x1x5x5x128xf32>
    %356 = vector.shape_cast %355 : vector<1x1x1x5x5x128xf32> to vector<1x5x5x128xf32>
    %357 = arith.addf %341, %356 : vector<1x5x5x128xf32>
    %358 = vector.extract_strided_slice %351 {offsets = [0, 1, 0, 2, 0, 0], sizes = [1, 1, 1, 5, 5, 128], strides = [1, 1, 1, 1, 1, 1]} : vector<1x2x2x8x8x128xf32> to vector<1x1x1x5x5x128xf32>
    %359 = vector.shape_cast %358 : vector<1x1x1x5x5x128xf32> to vector<1x5x5x128xf32>
    %360 = arith.addf %344, %359 : vector<1x5x5x128xf32>
    %361 = vector.extract_strided_slice %351 {offsets = [0, 1, 1, 2, 0, 0], sizes = [1, 1, 1, 5, 5, 128], strides = [1, 1, 1, 1, 1, 1]} : vector<1x2x2x8x8x128xf32> to vector<1x1x1x5x5x128xf32>
    %362 = vector.shape_cast %361 : vector<1x1x1x5x5x128xf32> to vector<1x5x5x128xf32>
    %363 = arith.addf %347, %362 : vector<1x5x5x128xf32>
    %c21 = arith.constant 21 : index
    %c0_87 = arith.constant 0 : index
    %c0_88 = arith.constant 0 : index
    %364 = vector.load %arg4[%c21, %c0_87, %c0_88] : memref<25x128x128xbf16, #tpu.memory_space<vmem>>, vector<1x128x128xbf16>
    %365 = vector.shape_cast %364 : vector<1x128x128xbf16> to vector<128x128xbf16>
    %cst_89 = arith.constant dense<0.000000e+00> : vector<256x128xf32>
    %366 = tpu.matmul %23, %365, %cst_89 {dimension_numbers = #tpu.dot_dimension_numbers<[1], [0], [0], [1], [0, 0, 1, 1], [], []>} : vector<256x128xbf16>, vector<128x128xbf16>, vector<256x128xf32> -> vector<256x128xf32>
    %367 = vector.shape_cast %366 : vector<256x128xf32> to vector<1x2x2x8x8x128xf32>
    %368 = vector.extract_strided_slice %367 {offsets = [0, 0, 1, 2, 0, 0], sizes = [1, 1, 1, 5, 5, 128], strides = [1, 1, 1, 1, 1, 1]} : vector<1x2x2x8x8x128xf32> to vector<1x1x1x5x5x128xf32>
    %369 = vector.shape_cast %368 : vector<1x1x1x5x5x128xf32> to vector<1x5x5x128xf32>
    %370 = arith.addf %354, %369 : vector<1x5x5x128xf32>
    %371 = vector.extract_strided_slice %367 {offsets = [0, 0, 0, 2, 1, 0], sizes = [1, 1, 1, 5, 5, 128], strides = [1, 1, 1, 1, 1, 1]} : vector<1x2x2x8x8x128xf32> to vector<1x1x1x5x5x128xf32>
    %372 = vector.shape_cast %371 : vector<1x1x1x5x5x128xf32> to vector<1x5x5x128xf32>
    %373 = arith.addf %357, %372 : vector<1x5x5x128xf32>
    %374 = vector.extract_strided_slice %367 {offsets = [0, 1, 1, 2, 0, 0], sizes = [1, 1, 1, 5, 5, 128], strides = [1, 1, 1, 1, 1, 1]} : vector<1x2x2x8x8x128xf32> to vector<1x1x1x5x5x128xf32>
    %375 = vector.shape_cast %374 : vector<1x1x1x5x5x128xf32> to vector<1x5x5x128xf32>
    %376 = arith.addf %360, %375 : vector<1x5x5x128xf32>
    %377 = vector.extract_strided_slice %367 {offsets = [0, 1, 0, 2, 1, 0], sizes = [1, 1, 1, 5, 5, 128], strides = [1, 1, 1, 1, 1, 1]} : vector<1x2x2x8x8x128xf32> to vector<1x1x1x5x5x128xf32>
    %378 = vector.shape_cast %377 : vector<1x1x1x5x5x128xf32> to vector<1x5x5x128xf32>
    %379 = arith.addf %363, %378 : vector<1x5x5x128xf32>
    %c22 = arith.constant 22 : index
    %c0_90 = arith.constant 0 : index
    %c0_91 = arith.constant 0 : index
    %380 = vector.load %arg4[%c22, %c0_90, %c0_91] : memref<25x128x128xbf16, #tpu.memory_space<vmem>>, vector<1x128x128xbf16>
    %381 = vector.shape_cast %380 : vector<1x128x128xbf16> to vector<128x128xbf16>
    %cst_92 = arith.constant dense<0.000000e+00> : vector<256x128xf32>
    %382 = tpu.matmul %23, %381, %cst_92 {dimension_numbers = #tpu.dot_dimension_numbers<[1], [0], [0], [1], [0, 0, 1, 1], [], []>} : vector<256x128xbf16>, vector<128x128xbf16>, vector<256x128xf32> -> vector<256x128xf32>
    %383 = vector.shape_cast %382 : vector<256x128xf32> to vector<1x2x2x8x8x128xf32>
    %384 = vector.extract_strided_slice %383 {offsets = [0, 0, 0, 2, 1, 0], sizes = [1, 1, 1, 5, 5, 128], strides = [1, 1, 1, 1, 1, 1]} : vector<1x2x2x8x8x128xf32> to vector<1x1x1x5x5x128xf32>
    %385 = vector.shape_cast %384 : vector<1x1x1x5x5x128xf32> to vector<1x5x5x128xf32>
    %386 = arith.addf %370, %385 : vector<1x5x5x128xf32>
    %387 = vector.extract_strided_slice %383 {offsets = [0, 0, 1, 2, 1, 0], sizes = [1, 1, 1, 5, 5, 128], strides = [1, 1, 1, 1, 1, 1]} : vector<1x2x2x8x8x128xf32> to vector<1x1x1x5x5x128xf32>
    %388 = vector.shape_cast %387 : vector<1x1x1x5x5x128xf32> to vector<1x5x5x128xf32>
    %389 = arith.addf %373, %388 : vector<1x5x5x128xf32>
    %390 = vector.extract_strided_slice %383 {offsets = [0, 1, 0, 2, 1, 0], sizes = [1, 1, 1, 5, 5, 128], strides = [1, 1, 1, 1, 1, 1]} : vector<1x2x2x8x8x128xf32> to vector<1x1x1x5x5x128xf32>
    %391 = vector.shape_cast %390 : vector<1x1x1x5x5x128xf32> to vector<1x5x5x128xf32>
    %392 = arith.addf %376, %391 : vector<1x5x5x128xf32>
    %393 = vector.extract_strided_slice %383 {offsets = [0, 1, 1, 2, 1, 0], sizes = [1, 1, 1, 5, 5, 128], strides = [1, 1, 1, 1, 1, 1]} : vector<1x2x2x8x8x128xf32> to vector<1x1x1x5x5x128xf32>
    %394 = vector.shape_cast %393 : vector<1x1x1x5x5x128xf32> to vector<1x5x5x128xf32>
    %395 = arith.addf %379, %394 : vector<1x5x5x128xf32>
    %c23 = arith.constant 23 : index
    %c0_93 = arith.constant 0 : index
    %c0_94 = arith.constant 0 : index
    %396 = vector.load %arg4[%c23, %c0_93, %c0_94] : memref<25x128x128xbf16, #tpu.memory_space<vmem>>, vector<1x128x128xbf16>
    %397 = vector.shape_cast %396 : vector<1x128x128xbf16> to vector<128x128xbf16>
    %cst_95 = arith.constant dense<0.000000e+00> : vector<256x128xf32>
    %398 = tpu.matmul %23, %397, %cst_95 {dimension_numbers = #tpu.dot_dimension_numbers<[1], [0], [0], [1], [0, 0, 1, 1], [], []>} : vector<256x128xbf16>, vector<128x128xbf16>, vector<256x128xf32> -> vector<256x128xf32>
    %399 = vector.shape_cast %398 : vector<256x128xf32> to vector<1x2x2x8x8x128xf32>
    %400 = vector.extract_strided_slice %399 {offsets = [0, 0, 1, 2, 1, 0], sizes = [1, 1, 1, 5, 5, 128], strides = [1, 1, 1, 1, 1, 1]} : vector<1x2x2x8x8x128xf32> to vector<1x1x1x5x5x128xf32>
    %401 = vector.shape_cast %400 : vector<1x1x1x5x5x128xf32> to vector<1x5x5x128xf32>
    %402 = arith.addf %386, %401 : vector<1x5x5x128xf32>
    %403 = vector.extract_strided_slice %399 {offsets = [0, 0, 0, 2, 2, 0], sizes = [1, 1, 1, 5, 5, 128], strides = [1, 1, 1, 1, 1, 1]} : vector<1x2x2x8x8x128xf32> to vector<1x1x1x5x5x128xf32>
    %404 = vector.shape_cast %403 : vector<1x1x1x5x5x128xf32> to vector<1x5x5x128xf32>
    %405 = arith.addf %389, %404 : vector<1x5x5x128xf32>
    %406 = vector.extract_strided_slice %399 {offsets = [0, 1, 1, 2, 1, 0], sizes = [1, 1, 1, 5, 5, 128], strides = [1, 1, 1, 1, 1, 1]} : vector<1x2x2x8x8x128xf32> to vector<1x1x1x5x5x128xf32>
    %407 = vector.shape_cast %406 : vector<1x1x1x5x5x128xf32> to vector<1x5x5x128xf32>
    %408 = arith.addf %392, %407 : vector<1x5x5x128xf32>
    %409 = vector.extract_strided_slice %399 {offsets = [0, 1, 0, 2, 2, 0], sizes = [1, 1, 1, 5, 5, 128], strides = [1, 1, 1, 1, 1, 1]} : vector<1x2x2x8x8x128xf32> to vector<1x1x1x5x5x128xf32>
    %410 = vector.shape_cast %409 : vector<1x1x1x5x5x128xf32> to vector<1x5x5x128xf32>
    %411 = arith.addf %395, %410 : vector<1x5x5x128xf32>
    %c24 = arith.constant 24 : index
    %c0_96 = arith.constant 0 : index
    %c0_97 = arith.constant 0 : index
    %412 = vector.load %arg4[%c24, %c0_96, %c0_97] : memref<25x128x128xbf16, #tpu.memory_space<vmem>>, vector<1x128x128xbf16>
    %413 = vector.shape_cast %412 : vector<1x128x128xbf16> to vector<128x128xbf16>
    %cst_98 = arith.constant dense<0.000000e+00> : vector<256x128xf32>
    %414 = tpu.matmul %23, %413, %cst_98 {dimension_numbers = #tpu.dot_dimension_numbers<[1], [0], [0], [1], [0, 0, 1, 1], [], []>} : vector<256x128xbf16>, vector<128x128xbf16>, vector<256x128xf32> -> vector<256x128xf32>
    %415 = vector.shape_cast %414 : vector<256x128xf32> to vector<1x2x2x8x8x128xf32>
    %416 = vector.extract_strided_slice %415 {offsets = [0, 0, 0, 2, 2, 0], sizes = [1, 1, 1, 5, 5, 128], strides = [1, 1, 1, 1, 1, 1]} : vector<1x2x2x8x8x128xf32> to vector<1x1x1x5x5x128xf32>
    %417 = vector.shape_cast %416 : vector<1x1x1x5x5x128xf32> to vector<1x5x5x128xf32>
    %418 = arith.addf %402, %417 : vector<1x5x5x128xf32>
    %419 = vector.extract_strided_slice %415 {offsets = [0, 0, 1, 2, 2, 0], sizes = [1, 1, 1, 5, 5, 128], strides = [1, 1, 1, 1, 1, 1]} : vector<1x2x2x8x8x128xf32> to vector<1x1x1x5x5x128xf32>
    %420 = vector.shape_cast %419 : vector<1x1x1x5x5x128xf32> to vector<1x5x5x128xf32>
    %421 = arith.addf %405, %420 : vector<1x5x5x128xf32>
    %422 = vector.extract_strided_slice %415 {offsets = [0, 1, 0, 2, 2, 0], sizes = [1, 1, 1, 5, 5, 128], strides = [1, 1, 1, 1, 1, 1]} : vector<1x2x2x8x8x128xf32> to vector<1x1x1x5x5x128xf32>
    %423 = vector.shape_cast %422 : vector<1x1x1x5x5x128xf32> to vector<1x5x5x128xf32>
    %424 = arith.addf %408, %423 : vector<1x5x5x128xf32>
    %425 = vector.extract_strided_slice %415 {offsets = [0, 1, 1, 2, 2, 0], sizes = [1, 1, 1, 5, 5, 128], strides = [1, 1, 1, 1, 1, 1]} : vector<1x2x2x8x8x128xf32> to vector<1x1x1x5x5x128xf32>
    %426 = vector.shape_cast %425 : vector<1x1x1x5x5x128xf32> to vector<1x5x5x128xf32>
    %427 = arith.addf %411, %426 : vector<1x5x5x128xf32>
    %428 = arith.maximumf %418, %421 : vector<1x5x5x128xf32>
    %429 = arith.maximumf %424, %427 : vector<1x5x5x128xf32>
    %430 = arith.maximumf %428, %429 : vector<1x5x5x128xf32>
    %c0_99 = arith.constant 0 : index
    %c0_100 = arith.constant 0 : index
    %431 = vector.load %arg5[%c0_99, %c0_100] : memref<1x128xf32, #tpu.memory_space<vmem>>, vector<1x128xf32>
    %432 = vector.shape_cast %431 : vector<1x128xf32> to vector<1x1x1x128xf32>
    %433 = vector.broadcast %432 : vector<1x1x1x128xf32> to vector<1x5x5x128xf32>
    %434 = arith.addf %430, %433 : vector<1x5x5x128xf32>
    %cst_101 = arith.constant 1.000000e+00 : f32
    %435 = vector.broadcast %cst_101 : f32 to vector<1x5x5x128xf32>
    %436 = arith.cmpf ogt, %434, %435 : vector<1x5x5x128xf32>
    %437 = arith.extui %436 : vector<1x5x5x128xi1> to vector<1x5x5x128xi32>
    %438 = arith.sitofp %437 : vector<1x5x5x128xi32> to vector<1x5x5x128xf32>
    %439 = arith.truncf %438 : vector<1x5x5x128xf32> to vector<1x5x5x128xbf16>
    %440 = vector.extract_strided_slice %439 {offsets = [0, 0, 0, 0], sizes = [1, 1, 1, 128], strides = [1, 1, 1, 1]} : vector<1x5x5x128xbf16> to vector<1x1x1x128xbf16>
    %441 = vector.shape_cast %440 : vector<1x1x1x128xbf16> to vector<1x128xbf16>
    %442 = vector.extract_strided_slice %439 {offsets = [0, 0, 1, 0], sizes = [1, 1, 1, 128], strides = [1, 1, 1, 1]} : vector<1x5x5x128xbf16> to vector<1x1x1x128xbf16>
    %443 = vector.shape_cast %442 : vector<1x1x1x128xbf16> to vector<1x128xbf16>
    %444 = vector.extract_strided_slice %439 {offsets = [0, 0, 2, 0], sizes = [1, 1, 1, 128], strides = [1, 1, 1, 1]} : vector<1x5x5x128xbf16> to vector<1x1x1x128xbf16>
    %445 = vector.shape_cast %444 : vector<1x1x1x128xbf16> to vector<1x128xbf16>
    %446 = vector.extract_strided_slice %439 {offsets = [0, 0, 3, 0], sizes = [1, 1, 1, 128], strides = [1, 1, 1, 1]} : vector<1x5x5x128xbf16> to vector<1x1x1x128xbf16>
    %447 = vector.shape_cast %446 : vector<1x1x1x128xbf16> to vector<1x128xbf16>
    %448 = vector.extract_strided_slice %439 {offsets = [0, 0, 4, 0], sizes = [1, 1, 1, 128], strides = [1, 1, 1, 1]} : vector<1x5x5x128xbf16> to vector<1x1x1x128xbf16>
    %449 = vector.shape_cast %448 : vector<1x1x1x128xbf16> to vector<1x128xbf16>
    %450 = vector.extract_strided_slice %439 {offsets = [0, 1, 0, 0], sizes = [1, 1, 1, 128], strides = [1, 1, 1, 1]} : vector<1x5x5x128xbf16> to vector<1x1x1x128xbf16>
    %451 = vector.shape_cast %450 : vector<1x1x1x128xbf16> to vector<1x128xbf16>
    %452 = vector.extract_strided_slice %439 {offsets = [0, 1, 1, 0], sizes = [1, 1, 1, 128], strides = [1, 1, 1, 1]} : vector<1x5x5x128xbf16> to vector<1x1x1x128xbf16>
    %453 = vector.shape_cast %452 : vector<1x1x1x128xbf16> to vector<1x128xbf16>
    %454 = vector.extract_strided_slice %439 {offsets = [0, 1, 2, 0], sizes = [1, 1, 1, 128], strides = [1, 1, 1, 1]} : vector<1x5x5x128xbf16> to vector<1x1x1x128xbf16>
    %455 = vector.shape_cast %454 : vector<1x1x1x128xbf16> to vector<1x128xbf16>
    %456 = vector.extract_strided_slice %439 {offsets = [0, 1, 3, 0], sizes = [1, 1, 1, 128], strides = [1, 1, 1, 1]} : vector<1x5x5x128xbf16> to vector<1x1x1x128xbf16>
    %457 = vector.shape_cast %456 : vector<1x1x1x128xbf16> to vector<1x128xbf16>
    %458 = vector.extract_strided_slice %439 {offsets = [0, 1, 4, 0], sizes = [1, 1, 1, 128], strides = [1, 1, 1, 1]} : vector<1x5x5x128xbf16> to vector<1x1x1x128xbf16>
    %459 = vector.shape_cast %458 : vector<1x1x1x128xbf16> to vector<1x128xbf16>
    %460 = vector.extract_strided_slice %439 {offsets = [0, 2, 0, 0], sizes = [1, 1, 1, 128], strides = [1, 1, 1, 1]} : vector<1x5x5x128xbf16> to vector<1x1x1x128xbf16>
    %461 = vector.shape_cast %460 : vector<1x1x1x128xbf16> to vector<1x128xbf16>
    %462 = vector.extract_strided_slice %439 {offsets = [0, 2, 1, 0], sizes = [1, 1, 1, 128], strides = [1, 1, 1, 1]} : vector<1x5x5x128xbf16> to vector<1x1x1x128xbf16>
    %463 = vector.shape_cast %462 : vector<1x1x1x128xbf16> to vector<1x128xbf16>
    %464 = vector.extract_strided_slice %439 {offsets = [0, 2, 2, 0], sizes = [1, 1, 1, 128], strides = [1, 1, 1, 1]} : vector<1x5x5x128xbf16> to vector<1x1x1x128xbf16>
    %465 = vector.shape_cast %464 : vector<1x1x1x128xbf16> to vector<1x128xbf16>
    %466 = vector.extract_strided_slice %439 {offsets = [0, 2, 3, 0], sizes = [1, 1, 1, 128], strides = [1, 1, 1, 1]} : vector<1x5x5x128xbf16> to vector<1x1x1x128xbf16>
    %467 = vector.shape_cast %466 : vector<1x1x1x128xbf16> to vector<1x128xbf16>
    %468 = vector.extract_strided_slice %439 {offsets = [0, 2, 4, 0], sizes = [1, 1, 1, 128], strides = [1, 1, 1, 1]} : vector<1x5x5x128xbf16> to vector<1x1x1x128xbf16>
    %469 = vector.shape_cast %468 : vector<1x1x1x128xbf16> to vector<1x128xbf16>
    %470 = vector.extract_strided_slice %439 {offsets = [0, 3, 0, 0], sizes = [1, 1, 1, 128], strides = [1, 1, 1, 1]} : vector<1x5x5x128xbf16> to vector<1x1x1x128xbf16>
    %471 = vector.shape_cast %470 : vector<1x1x1x128xbf16> to vector<1x128xbf16>
    %472 = vector.extract_strided_slice %439 {offsets = [0, 3, 1, 0], sizes = [1, 1, 1, 128], strides = [1, 1, 1, 1]} : vector<1x5x5x128xbf16> to vector<1x1x1x128xbf16>
    %473 = vector.shape_cast %472 : vector<1x1x1x128xbf16> to vector<1x128xbf16>
    %474 = vector.extract_strided_slice %439 {offsets = [0, 3, 2, 0], sizes = [1, 1, 1, 128], strides = [1, 1, 1, 1]} : vector<1x5x5x128xbf16> to vector<1x1x1x128xbf16>
    %475 = vector.shape_cast %474 : vector<1x1x1x128xbf16> to vector<1x128xbf16>
    %476 = vector.extract_strided_slice %439 {offsets = [0, 3, 3, 0], sizes = [1, 1, 1, 128], strides = [1, 1, 1, 1]} : vector<1x5x5x128xbf16> to vector<1x1x1x128xbf16>
    %477 = vector.shape_cast %476 : vector<1x1x1x128xbf16> to vector<1x128xbf16>
    %478 = vector.extract_strided_slice %439 {offsets = [0, 3, 4, 0], sizes = [1, 1, 1, 128], strides = [1, 1, 1, 1]} : vector<1x5x5x128xbf16> to vector<1x1x1x128xbf16>
    %479 = vector.shape_cast %478 : vector<1x1x1x128xbf16> to vector<1x128xbf16>
    %480 = vector.extract_strided_slice %439 {offsets = [0, 4, 0, 0], sizes = [1, 1, 1, 128], strides = [1, 1, 1, 1]} : vector<1x5x5x128xbf16> to vector<1x1x1x128xbf16>
    %481 = vector.shape_cast %480 : vector<1x1x1x128xbf16> to vector<1x128xbf16>
    %482 = vector.extract_strided_slice %439 {offsets = [0, 4, 1, 0], sizes = [1, 1, 1, 128], strides = [1, 1, 1, 1]} : vector<1x5x5x128xbf16> to vector<1x1x1x128xbf16>
    %483 = vector.shape_cast %482 : vector<1x1x1x128xbf16> to vector<1x128xbf16>
    %484 = vector.extract_strided_slice %439 {offsets = [0, 4, 2, 0], sizes = [1, 1, 1, 128], strides = [1, 1, 1, 1]} : vector<1x5x5x128xbf16> to vector<1x1x1x128xbf16>
    %485 = vector.shape_cast %484 : vector<1x1x1x128xbf16> to vector<1x128xbf16>
    %486 = vector.extract_strided_slice %439 {offsets = [0, 4, 3, 0], sizes = [1, 1, 1, 128], strides = [1, 1, 1, 1]} : vector<1x5x5x128xbf16> to vector<1x1x1x128xbf16>
    %487 = vector.shape_cast %486 : vector<1x1x1x128xbf16> to vector<1x128xbf16>
    %488 = vector.extract_strided_slice %439 {offsets = [0, 4, 4, 0], sizes = [1, 1, 1, 128], strides = [1, 1, 1, 1]} : vector<1x5x5x128xbf16> to vector<1x1x1x128xbf16>
    %489 = vector.shape_cast %488 : vector<1x1x1x128xbf16> to vector<1x128xbf16>
    %490 = tpu.concatenate %441, %443, %445, %447, %449, %451, %453, %455, %457, %459, %461, %463, %465, %467, %469, %471 in 1 : vector<1x128xbf16>, vector<1x128xbf16>, vector<1x128xbf16>, vector<1x128xbf16>, vector<1x128xbf16>, vector<1x128xbf16>, vector<1x128xbf16>, vector<1x128xbf16>, vector<1x128xbf16>, vector<1x128xbf16>, vector<1x128xbf16>, vector<1x128xbf16>, vector<1x128xbf16>, vector<1x128xbf16>, vector<1x128xbf16>, vector<1x128xbf16> -> vector<1x2048xbf16>
    %491 = tpu.concatenate %473, %475, %477, %479, %481, %483, %485, %487, %489 in 1 : vector<1x128xbf16>, vector<1x128xbf16>, vector<1x128xbf16>, vector<1x128xbf16>, vector<1x128xbf16>, vector<1x128xbf16>, vector<1x128xbf16>, vector<1x128xbf16>, vector<1x128xbf16> -> vector<1x1152xbf16>
    %492 = tpu.concatenate %490, %491 in 1 : vector<1x2048xbf16>, vector<1x1152xbf16> -> vector<1x3200xbf16>
    %c0_102 = arith.constant 0 : index
    %c0_103 = arith.constant 0 : index
    %493 = vector.load %arg6[%c0_102, %c0_103] : memref<3200x128xbf16, #tpu.memory_space<vmem>>, vector<3200x128xbf16>
    %cst_104 = arith.constant dense<0.000000e+00> : vector<1x128xf32>
    %494 = tpu.matmul %492, %493, %cst_104 {dimension_numbers = #tpu.dot_dimension_numbers<[1], [0], [0], [1], [0, 0, 1, 1], [], []>} : vector<1x3200xbf16>, vector<3200x128xbf16>, vector<1x128xf32> -> vector<1x128xf32>
    %c0_105 = arith.constant 0 : index
    %c0_106 = arith.constant 0 : index
    %495 = vector.load %arg7[%c0_105, %c0_106] : memref<1x128xf32, #tpu.memory_space<vmem>>, vector<1x128xf32>
    %496 = arith.addf %494, %495 : vector<1x128xf32>
    %497 = vector.shape_cast %496 : vector<1x128xf32> to vector<1x1x128xf32>
    %c0_107 = arith.constant 0 : index
    %c0_108 = arith.constant 0 : index
    %c0_109 = arith.constant 0 : index
    %498 = vector.load %arg9[%c0_107, %c0_108, %c0_109] : memref<1x1x128xf32, #tpu.memory_space<vmem>>, vector<1x1x128xf32>
    tpu.vector_store %arg9[%c0_107, %c0_108, %c0_109], %497 {strides = array<i32>} : memref<1x1x128xf32, #tpu.memory_space<vmem>>, vector<1x1x128xf32>,
    %cst_110 = arith.constant 1.000000e+00 : f32
    %499 = vector.broadcast %cst_110 : f32 to vector<1x128xf32>
    %500 = arith.cmpf ogt, %496, %499 : vector<1x128xf32>
    %501 = arith.extui %500 : vector<1x128xi1> to vector<1x128xi32>
    %502 = arith.sitofp %501 : vector<1x128xi32> to vector<1x128xf32>
    %503 = vector.shape_cast %502 : vector<1x128xf32> to vector<1x1x128xf32>
    %c0_111 = arith.constant 0 : index
    %c0_112 = arith.constant 0 : index
    %c0_113 = arith.constant 0 : index
    %504 = vector.load %arg8[%c0_111, %c0_112, %c0_113] : memref<1x1x128xf32, #tpu.memory_space<vmem>>, vector<1x1x128xf32>
    tpu.vector_store %arg8[%c0_111, %c0_112, %c0_113], %503 {strides = array<i32>} : memref<1x1x128xf32, #tpu.memory_space<vmem>>, vector<1x1x128xf32>,
    return
  }
  func.func @transform_0(%arg0: i32) -> (i32, i32, i32) {
    %c0_i32 = arith.constant 0 : i32
    %c0_i32_0 = arith.constant 0 : i32
    %c0_i32_1 = arith.constant 0 : i32
    return %c0_i32, %arg0, %c0_i32_0 : i32, i32, i32
  }
  func.func @transform_1(%arg0: i32) -> (i32, i32) {
    %c0_i32 = arith.constant 0 : i32
    %c0_i32_0 = arith.constant 0 : i32
    %c0_i32_1 = arith.constant 0 : i32
    return %c0_i32, %c0_i32_0 : i32, i32
  }
  func.func @transform_2(%arg0: i32) -> (i32, i32) {
    %c0_i32 = arith.constant 0 : i32
    %c0_i32_0 = arith.constant 0 : i32
    %c0_i32_1 = arith.constant 0 : i32
    return %c0_i32, %c0_i32_0 : i32, i32
  }
  func.func @transform_3(%arg0: i32) -> (i32, i32, i32) {
    %c0_i32 = arith.constant 0 : i32
    %c0_i32_0 = arith.constant 0 : i32
    %c0_i32_1 = arith.constant 0 : i32
    %c0_i32_2 = arith.constant 0 : i32
    return %c0_i32, %c0_i32_0, %c0_i32_1 : i32, i32, i32
  }
  func.func @transform_4(%arg0: i32) -> (i32, i32) {
    %c0_i32 = arith.constant 0 : i32
    %c0_i32_0 = arith.constant 0 : i32
    %c0_i32_1 = arith.constant 0 : i32
    return %c0_i32, %c0_i32_0 : i32, i32
  }
  func.func @transform_5(%arg0: i32) -> (i32, i32) {
    %c0_i32 = arith.constant 0 : i32
    %c0_i32_0 = arith.constant 0 : i32
    %c0_i32_1 = arith.constant 0 : i32
    return %c0_i32, %c0_i32_0 : i32, i32
  }
  func.func @transform_6(%arg0: i32) -> (i32, i32) {
    %c0_i32 = arith.constant 0 : i32
    %c0_i32_0 = arith.constant 0 : i32
    %c0_i32_1 = arith.constant 0 : i32
    return %c0_i32, %c0_i32_0 : i32, i32
  }
  func.func @transform_7(%arg0: i32) -> (i32, i32, i32) {
    %c0_i32 = arith.constant 0 : i32
    %c0_i32_0 = arith.constant 0 : i32
    %c0_i32_1 = arith.constant 0 : i32
    return %arg0, %c0_i32, %c0_i32_0 : i32, i32, i32
  }
  func.func @transform_8(%arg0: i32) -> (i32, i32, i32) {
    %c0_i32 = arith.constant 0 : i32
    %c0_i32_0 = arith.constant 0 : i32
    %c0_i32_1 = arith.constant 0 : i32
    return %arg0, %c0_i32, %c0_i32_0 : i32, i32, i32
  }
}

</mosaic_0001>

<bundles_post_ra>
// kernel: lif_forward.1
= control target key start
LH: loop header
LB: loop body
LE: loop exit
PB: predicated region body
PF: predicated region fallthrough
CT: control target
= control target key end

     0   :  { %14 = vsyncpa [#allocation4], 0  ;;  %s20880_s0 = inlined_call_operand.vmem [shape: bf16[4,512,128], index: 0, kind: input, shape index: {}]   ;;  %s20881_s1 = inlined_call_operand.vmem [shape: bf16[128,128], index: 1, kind: input, shape index: {}]   ;;  %s20882_s2 = inlined_call_operand.vmem [shape: f32[1,128], index: 2, kind: input, shape index: {}]   ;;  %s20883_s3 = inlined_call_operand.vmem [shape: bf16[25,128,128], index: 3, kind: input, shape index: {}]   ;;  %s20884_s4 = inlined_call_operand.vmem [shape: f32[1,128], index: 4, kind: input, shape index: {}]   ;;  %s20885_s5 = inlined_call_operand.vmem [shape: bf16[3200,128], index: 5, kind: input, shape index: {}]   ;;  %s20886_s6 = inlined_call_operand.vmem [shape: f32[1,128], index: 6, kind: input, shape index: {}]   ;;  %s20887_s7 = inlined_call_operand.hbm [shape: f32[2,1,128], index: 7, kind: output, shape index: {0}]   ;;  %s20888_s8 = inlined_call_operand.hbm [shape: f32[2,1,128], index: 8, kind: output, shape index: {1}]  }
   0x1   :  { %16 = vsyncpa [#allocation4 + $0x1], 0 }
   0x2   :  { %17 = vsyncpa [#allocation6], 0 }
   0x3   :  { %19 = vsyncpa [#allocation6 + $0x1], 0  ;;  %s16514_s27 = smov 0   ;;  %s16516_s28 = smov 0  }
   0x4   :  { %s16518_s29 = smov 0   ;;  %s16520_s30 = smov 0  }
   0x5 LB: > { %s11606_s9 = sadd.s32 4294967295, %s16462_s30   ;;  %s11607_s10 = sadd.s32 4294967294, %s16462_s30   ;;  %s16462_s30 = sphi %s16520_s30, %s21114_s30   ;;  %s16458_s29 = sphi %s16518_s29, %s21113_s29   ;;  %s16454_s28 = sphi %s16516_s28, %s21112_s28   ;;  %s16450_s27 = sphi %s16514_s27, %s21111_s27  }
   0x6   : > { %s16537_s11 = sadd.s32 1, %s16462_s30   ;;  %s32_s12 = sadd.s32 1, %s16458_s29 }
   0x7   : > { %s29_s13 = ssub.s32 %s16462_s30, %s16537_s11  ;;  %p39_p0 = scmp.ne.s32.totalorder %s16458_s29, %s16454_s28 }
   0x8   : > { %p30_p1 = scmp.eq.s32.totalorder %s29_s13, 0  ;;  %p40_p2 = scmp.eq.s32.totalorder %s16462_s30, 0 }
   0x9   : > { %p195_p3 = scmp.eq.s32.totalorder %s11606_s9, 1  ;;  %p200_p4 = scmp.ne.s32.totalorder %s16454_s28, %s16450_s27 }
   0xa   : > { %s16550_s14 = scalar_select %p30_p1, %s16458_s29, %s32_s12  }
   0xb   : > { %p41_p5 = por %p40_p2, %p39_p0  ;;  %p16552_p6 = por %p195_p3, %p39_p0 }
   0xc   : > { %p201_p7 = scmp.eq.s32.totalorder %s11607_s10, 1  ;;  %p11609_p9 = scmp.ge.s32.totalorder %s16462_s30, 2 }
   0xe   : > { %p16556_p8 = por %p201_p7, %p200_p4  ;;  %261 = sbr.rel (%p11609_p9) target bundleno = 57 (0x39), region = 40 }
  0x15   : > { %264 = sbr.rel (!%p41_p5) target bundleno = 57 (0x39), region = 44  ;;  %s266_s17 = sand.u32 (%p41_p5), 1, %s16458_s29  }
  0x16   : > { %s13419_s18 = sshll.u32 (%p41_p5), %s16462_s30, 7  ;;  %s11610_s19 = sshll.u32 (%p41_p5), %s266_s17, 9 }
  0x17   : > { %s16568_s22 = scalar_lea.vmem (%p41_p5), %s20880_s0, %s13419_s18  ;;  %s16573_s23 = scalar_lea.vmem (%p41_p5), [#allocation2], %s11610_s19 }
  0x18   : > { %v287_v0 = vld [vmem:[%s16568_s22] sm:$0xff] (%p41_p5)   ;;  %v291_v1 = vld [vmem:[%s16568_s22 + $0x8] sm:$0xff] (%p41_p5)   ;;  %v295_v2 = vld [vmem:[%s16568_s22 + $0x10] sm:$0xff] (%p41_p5)  }
  0x19   : > { %288 = vst [vmem:[%s16573_s23] sm:$0xff] (%p41_p5), %v287_v0   ;;  %292 = vst [vmem:[%s16573_s23 + $0x8] sm:$0xff] (%p41_p5), %v291_v1   ;;  %v299_v3 = vld [vmem:[%s16568_s22 + $0x18] sm:$0xff] (%p41_p5)   ;;  %v303_v4 = vld [vmem:[%s16568_s22 + $0x20] sm:$0xff] (%p41_p5)  }
  0x1a   : > { %296 = vst [vmem:[%s16573_s23 + $0x10] sm:$0xff] (%p41_p5), %v295_v2   ;;  %v307_v5 = vld [vmem:[%s16568_s22 + $0x28] sm:$0xff] (%p41_p5)   ;;  %300 = vst [vmem:[%s16573_s23 + $0x18] sm:$0xff] (%p41_p5), %v299_v3   ;;  %v311_v6 = vld [vmem:[%s16568_s22 + $0x30] sm:$0xff] (%p41_p5)  }
  0x1b   : > { %304 = vst [vmem:[%s16573_s23 + $0x20] sm:$0xff] (%p41_p5), %v303_v4   ;;  %308 = vst [vmem:[%s16573_s23 + $0x28] sm:$0xff] (%p41_p5), %v307_v5   ;;  %v315_v7 = vld [vmem:[%s16568_s22 + $0x38] sm:$0xff] (%p41_p5)   ;;  %v319_v8 = vld [vmem:[%s16568_s22 + $0x40] sm:$0xff] (%p41_p5)  }
  0x1c   : > { %312 = vst [vmem:[%s16573_s23 + $0x30] sm:$0xff] %v311_v6   ;;  %316 = vst [vmem:[%s16573_s23 + $0x38] sm:$0xff] %v315_v7   ;;  %v323_v9 = vld [vmem:[%s16568_s22 + $0x48] sm:$0xff]   ;;  %v327_v10 = vld [vmem:[%s16568_s22 + $0x50] sm:$0xff]  }
  0x1d   : > { %320 = vst [vmem:[%s16573_s23 + $0x40] sm:$0xff] %v319_v8   ;;  %v331_v11 = vld [vmem:[%s16568_s22 + $0x58] sm:$0xff]   ;;  %324 = vst [vmem:[%s16573_s23 + $0x48] sm:$0xff] %v323_v9   ;;  %v335_v12 = vld [vmem:[%s16568_s22 + $0x60] sm:$0xff]  }
  0x1e   : > { %328 = vst [vmem:[%s16573_s23 + $0x50] sm:$0xff] %v327_v10   ;;  %332 = vst [vmem:[%s16573_s23 + $0x58] sm:$0xff] %v331_v11   ;;  %v339_v13 = vld [vmem:[%s16568_s22 + $0x68] sm:$0xff]   ;;  %v343_v14 = vld [vmem:[%s16568_s22 + $0x70] sm:$0xff]  }
  0x1f   : > { %336 = vst [vmem:[%s16573_s23 + $0x60] sm:$0xff] %v335_v12   ;;  %340 = vst [vmem:[%s16573_s23 + $0x68] sm:$0xff] %v339_v13   ;;  %v347_v15 = vld [vmem:[%s16568_s22 + $0x78] sm:$0xff]   ;;  %v351_v16 = vld [vmem:[%s16568_s22 + $0x100] sm:$0xff]  }
  0x20   : > { %344 = vst [vmem:[%s16573_s23 + $0x70] sm:$0xff] %v343_v14   ;;  %v355_v17 = vld [vmem:[%s16568_s22 + $0x108] sm:$0xff]   ;;  %348 = vst [vmem:[%s16573_s23 + $0x78] sm:$0xff] %v347_v15   ;;  %v359_v18 = vld [vmem:[%s16568_s22 + $0x110] sm:$0xff]  }
  0x21   : > { %352 = vst [vmem:[%s16573_s23 + $0x80] sm:$0xff] %v351_v16   ;;  %356 = vst [vmem:[%s16573_s23 + $0x88] sm:$0xff] %v355_v17   ;;  %v363_v19 = vld [vmem:[%s16568_s22 + $0x118] sm:$0xff]   ;;  %v367_v20 = vld [vmem:[%s16568_s22 + $0x120] sm:$0xff]  }
  0x22   : > { %360 = vst [vmem:[%s16573_s23 + $0x90] sm:$0xff] %v359_v18   ;;  %364 = vst [vmem:[%s16573_s23 + $0x98] sm:$0xff] %v363_v19   ;;  %v371_v21 = vld [vmem:[%s16568_s22 + $0x128] sm:$0xff]   ;;  %v375_v22 = vld [vmem:[%s16568_s22 + $0x130] sm:$0xff]  }
  0x23   : > { %368 = vst [vmem:[%s16573_s23 + $0xa0] sm:$0xff] %v367_v20   ;;  %v379_v23 = vld [vmem:[%s16568_s22 + $0x138] sm:$0xff]   ;;  %372 = vst [vmem:[%s16573_s23 + $0xa8] sm:$0xff] %v371_v21   ;;  %v383_v24 = vld [vmem:[%s16568_s22 + $0x140] sm:$0xff]  }
  0x24   : > { %376 = vst [vmem:[%s16573_s23 + $0xb0] sm:$0xff] %v375_v22   ;;  %380 = vst [vmem:[%s16573_s23 + $0xb8] sm:$0xff] %v379_v23   ;;  %v387_v25 = vld [vmem:[%s16568_s22 + $0x148] sm:$0xff]   ;;  %v391_v26 = vld [vmem:[%s16568_s22 + $0x150] sm:$0xff]  }
  0x25   : > { %384 = vst [vmem:[%s16573_s23 + $0xc0] sm:$0xff] %v383_v24   ;;  %388 = vst [vmem:[%s16573_s23 + $0xc8] sm:$0xff] %v387_v25   ;;  %v395_v27 = vld [vmem:[%s16568_s22 + $0x158] sm:$0xff]   ;;  %v399_v28 = vld [vmem:[%s16568_s22 + $0x160] sm:$0xff]  }
  0x26   : > { %392 = vst [vmem:[%s16573_s23 + $0xd0] sm:$0xff] %v391_v26   ;;  %v403_v29 = vld [vmem:[%s16568_s22 + $0x168] sm:$0xff]   ;;  %396 = vst [vmem:[%s16573_s23 + $0xd8] sm:$0xff] %v395_v27   ;;  %v407_v30 = vld [vmem:[%s16568_s22 + $0x170] sm:$0xff]  }
  0x27   : > { %400 = vst [vmem:[%s16573_s23 + $0xe0] sm:$0xff] %v399_v28   ;;  %404 = vst [vmem:[%s16573_s23 + $0xe8] sm:$0xff] %v403_v29   ;;  %v411_v31 = vld [vmem:[%s16568_s22 + $0x178] sm:$0xff]   ;;  %v415_v32 = vld [vmem:[%s16568_s22 + $0x200] sm:$0xff]  }
  0x28   : > { %408 = vst [vmem:[%s16573_s23 + $0xf0] sm:$0xff] %v407_v30   ;;  %412 = vst [vmem:[%s16573_s23 + $0xf8] sm:$0xff] %v411_v31   ;;  %v419_v33 = vld [vmem:[%s16568_s22 + $0x208] sm:$0xff]   ;;  %v423_v34 = vld [vmem:[%s16568_s22 + $0x210] sm:$0xff]  }
  0x29   : > { %416 = vst [vmem:[%s16573_s23 + $0x100] sm:$0xff] %v415_v32   ;;  %v427_v35 = vld [vmem:[%s16568_s22 + $0x218] sm:$0xff]   ;;  %420 = vst [vmem:[%s16573_s23 + $0x108] sm:$0xff] %v419_v33   ;;  %v431_v36 = vld [vmem:[%s16568_s22 + $0x220] sm:$0xff]  }
  0x2a   : > { %424 = vst [vmem:[%s16573_s23 + $0x110] sm:$0xff] %v423_v34   ;;  %428 = vst [vmem:[%s16573_s23 + $0x118] sm:$0xff] %v427_v35   ;;  %v435_v37 = vld [vmem:[%s16568_s22 + $0x228] sm:$0xff]   ;;  %v439_v38 = vld [vmem:[%s16568_s22 + $0x230] sm:$0xff]  }
  0x2b   : > { %432 = vst [vmem:[%s16573_s23 + $0x120] sm:$0xff] %v431_v36   ;;  %436 = vst [vmem:[%s16573_s23 + $0x128] sm:$0xff] %v435_v37   ;;  %v443_v39 = vld [vmem:[%s16568_s22 + $0x238] sm:$0xff]   ;;  %v447_v40 = vld [vmem:[%s16568_s22 + $0x240] sm:$0xff]  }
  0x2c   : > { %440 = vst [vmem:[%s16573_s23 + $0x130] sm:$0xff] %v439_v38   ;;  %v451_v41 = vld [vmem:[%s16568_s22 + $0x248] sm:$0xff]   ;;  %444 = vst [vmem:[%s16573_s23 + $0x138] sm:$0xff] %v443_v39   ;;  %v455_v42 = vld [vmem:[%s16568_s22 + $0x250] sm:$0xff]  }
  0x2d   : > { %448 = vst [vmem:[%s16573_s23 + $0x140] sm:$0xff] %v447_v40   ;;  %452 = vst [vmem:[%s16573_s23 + $0x148] sm:$0xff] %v451_v41   ;;  %v459_v43 = vld [vmem:[%s16568_s22 + $0x258] sm:$0xff]   ;;  %v463_v44 = vld [vmem:[%s16568_s22 + $0x260] sm:$0xff]  }
  0x2e   : > { %456 = vst [vmem:[%s16573_s23 + $0x150] sm:$0xff] %v455_v42   ;;  %460 = vst [vmem:[%s16573_s23 + $0x158] sm:$0xff] %v459_v43   ;;  %v467_v45 = vld [vmem:[%s16568_s22 + $0x268] sm:$0xff]   ;;  %v471_v46 = vld [vmem:[%s16568_s22 + $0x270] sm:$0xff]  }
  0x2f   : > { %464 = vst [vmem:[%s16573_s23 + $0x160] sm:$0xff] %v463_v44   ;;  %v475_v47 = vld [vmem:[%s16568_s22 + $0x278] sm:$0xff]   ;;  %468 = vst [vmem:[%s16573_s23 + $0x168] sm:$0xff] %v467_v45   ;;  %v479_v48 = vld [vmem:[%s16568_s22 + $0x300] sm:$0xff]  }
  0x30   : > { %472 = vst [vmem:[%s16573_s23 + $0x170] sm:$0xff] %v471_v46   ;;  %476 = vst [vmem:[%s16573_s23 + $0x178] sm:$0xff] %v475_v47   ;;  %v483_v49 = vld [vmem:[%s16568_s22 + $0x308] sm:$0xff]   ;;  %v487_v50 = vld [vmem:[%s16568_s22 + $0x310] sm:$0xff]  }
  0x31   : > { %480 = vst [vmem:[%s16573_s23 + $0x180] sm:$0xff] %v479_v48   ;;  %484 = vst [vmem:[%s16573_s23 + $0x188] sm:$0xff] %v483_v49   ;;  %v491_v51 = vld [vmem:[%s16568_s22 + $0x318] sm:$0xff]   ;;  %v495_v52 = vld [vmem:[%s16568_s22 + $0x320] sm:$0xff]  }
  0x32   : > { %488 = vst [vmem:[%s16573_s23 + $0x190] sm:$0xff] %v487_v50   ;;  %v499_v53 = vld [vmem:[%s16568_s22 + $0x328] sm:$0xff]   ;;  %492 = vst [vmem:[%s16573_s23 + $0x198] sm:$0xff] %v491_v51   ;;  %v503_v54 = vld [vmem:[%s16568_s22 + $0x330] sm:$0xff]  }
  0x33   : > { %496 = vst [vmem:[%s16573_s23 + $0x1a0] sm:$0xff] %v495_v52   ;;  %500 = vst [vmem:[%s16573_s23 + $0x1a8] sm:$0xff] %v499_v53   ;;  %v507_v55 = vld [vmem:[%s16568_s22 + $0x338] sm:$0xff]   ;;  %v511_v56 = vld [vmem:[%s16568_s22 + $0x340] sm:$0xff]  }
  0x34   : > { %504 = vst [vmem:[%s16573_s23 + $0x1b0] sm:$0xff] %v503_v54   ;;  %508 = vst [vmem:[%s16573_s23 + $0x1b8] sm:$0xff] %v507_v55   ;;  %v515_v57 = vld [vmem:[%s16568_s22 + $0x348] sm:$0xff]   ;;  %v519_v58 = vld [vmem:[%s16568_s22 + $0x350] sm:$0xff]  }
  0x35   : > { %512 = vst [vmem:[%s16573_s23 + $0x1c0] sm:$0xff] %v511_v56   ;;  %v523_v59 = vld [vmem:[%s16568_s22 + $0x358] sm:$0xff]   ;;  %516 = vst [vmem:[%s16573_s23 + $0x1c8] sm:$0xff] %v515_v57   ;;  %v527_v60 = vld [vmem:[%s16568_s22 + $0x360] sm:$0xff]  }
  0x36   : > { %520 = vst [vmem:[%s16573_s23 + $0x1d0] sm:$0xff] %v519_v58   ;;  %524 = vst [vmem:[%s16573_s23 + $0x1d8] sm:$0xff] %v523_v59   ;;  %v531_v61 = vld [vmem:[%s16568_s22 + $0x368] sm:$0xff]   ;;  %v535_v62 = vld [vmem:[%s16568_s22 + $0x370] sm:$0xff]  }
  0x37   : > { %528 = vst [vmem:[%s16573_s23 + $0x1e0] sm:$0xff] %v527_v60   ;;  %532 = vst [vmem:[%s16573_s23 + $0x1e8] sm:$0xff] %v531_v61   ;;  %v539_v63 = vld [vmem:[%s16568_s22 + $0x378] sm:$0xff]  }
  0x38   : > { %536 = vst [vmem:[%s16573_s23 + $0x1f0] sm:$0xff] %v535_v62   ;;  %540 = vst [vmem:[%s16573_s23 + $0x1f8] sm:$0xff] %v539_v63  }
  0x39 PF: > { %p11613_p10 = scmp.ge.s32.totalorder %s16462_s30, 1  ;;  %p820_p11 = scmp.lt.s32.totalorder %s16462_s30, 3 }
  0x3b   : > { %p821_p12 = pnand %p11613_p10, %p820_p11 }
  0x3d   : > { %824 = sbr.rel (%p821_p12) target bundleno = 1883 (0x75b), region = 85 }
  0x44   : > { %v15896_v0 = vld [vmem:[%s20881_s1] sm:$0xff]   ;;  %s16706_s26 = sand.u32 1, %s16454_s28   ;;  %v15897_v1 = vld [vmem:[%s20881_s1 + $0x8] sm:$0xff]   ;;  %v16715_v2 = vld [vmem:[%s20881_s1 + $0x10] sm:$0xff]   ;;  %s13415_s20 = sshll.u32 %s11606_s9, 4 }
  0x45   : > { %14389 = vmatprep.subr.bf16.mxu0 %v15896_v0  ;;  %14437 = vmatprep.subr.bf16.mxu1 %v15896_v0  ;;  %s11614_s13 = sshll.u32 %s16706_s26, 9  ;;  %v16720_v3 = vld [vmem:[%s20881_s1 + $0x18] sm:$0xff]   ;;  %v16735_v6 = vld [vmem:[%s20881_s1 + $0x20] sm:$0xff]   ;;  %v16744_v7 = vld [vmem:[%s20881_s1 + $0x28] sm:$0xff]   ;;  %s862_s22 = scalar_lea.vmem [#allocation5], %s16706_s26 }
  0x46   : > { %14390 = vmatpush3.bf16.msra.mxu0 %v15896_v0  ;;  %14438 = vmatpush3.bf16.msra.mxu1 %v15896_v0  ;;  %s16724_s21 = scalar_lea.vmem [#allocation2], %s11614_s13  ;;  %v16753_v8 = vld [vmem:[%s20881_s1 + $0x30] sm:$0xff]   ;;  %v16762_v9 = vld [vmem:[%s20881_s1 + $0x38] sm:$0xff]   ;;  %v15968_v62 = vld [vmem:[%s20883_s3] sm:$0xff]   ;;  %s11518_s23 = sshll.u32 %s862_s22, 4  ;;  %s20806_s23 = int_to_ptr.vmem [resolvable:$true] %s11518_s23 }
  0x47   : > { %14391 = vmatprep.subr.bf16.mxu0 %v15897_v1  ;;  %14439 = vmatprep.subr.bf16.mxu1 %v15897_v1  ;;  %v15904_v4 = vld [vmem:[%s16724_s21] sm:$0xff]   ;;  %v15906_v10 = vld [vmem:[%s16724_s21 + $0x8] sm:$0xff]   ;;  %v15908_v12 = vld [vmem:[%s16724_s21 + $0x10] sm:$0xff]   ;;  %s20934_s24 = scalar_lea.vmem [#allocation3], %s16706_s26  ;;  %s20804_s13 = scalar_lea.hbm %s20888_s8, %s13415_s20 }
  0x48   : > { %v15905_v5 = vld [vmem:[%s16724_s21 + $0x80] sm:$0xff]   ;;  %14405 = vmatprep.mubr.bf16.mxu0 %v15904_v4  ;;  %v15907_v11 = vld [vmem:[%s16724_s21 + $0x88] sm:$0xff]   ;;  %v15909_v13 = vld [vmem:[%s16724_s21 + $0x90] sm:$0xff]   ;;  %s11505_s25 = sshll.u32 %s20934_s24, 4  ;;  %s20811_s18 = scalar_lea.hbm %s20887_s7, %s13415_s20  ;;  %s20813_s25 = int_to_ptr.vmem [resolvable:$true] %s11505_s25 }
  0x49   : > { %14453 = vmatprep.mubr.bf16.mxu1 %v15905_v5  ;;  %v15910_v14 = vld [vmem:[%s16724_s21 + $0x18] sm:$0xff]   ;;  %v15912_v16 = vld [vmem:[%s16724_s21 + $0x20] sm:$0xff]   ;;  %v15914_v18 = vld [vmem:[%s16724_s21 + $0x28] sm:$0xff]   ;;  %s16368_s19 = scalar_lea.vmem %s20806_s23, 16  ;;  %s16467_s10 = smov [#allocation5]  }
  0x4a   : > { %14392 = vmatpush3.bf16.msra.mxu0 %v15897_v1  ;;  %14440 = vmatpush3.bf16.msra.mxu1 %v15897_v1  ;;  %v15911_v15 = vld [vmem:[%s16724_s21 + $0x98] sm:$0xff]   ;;  %v15913_v17 = vld [vmem:[%s16724_s21 + $0xa0] sm:$0xff]   ;;  %v15915_v19 = vld [vmem:[%s16724_s21 + $0xa8] sm:$0xff]   ;;  %p16369_p13 = scmp.ne.s32.totalorder %s20806_s23, %s16368_s19  ;;  %s16372_s12 = sshll.u32 %s16467_s10, 4  ;;  %s16373_s12 = int_to_ptr.vmem [resolvable:$false] %s16372_s12 }
  0x4b   : > { %14393 = vmatprep.subr.bf16.mxu0 %v16715_v2  ;;  %14441 = vmatprep.subr.bf16.mxu1 %v16715_v2  ;;  %v15916_v20 = vld [vmem:[%s16724_s21 + $0x30] sm:$0xff]   ;;  %v15918_v22 = vld [vmem:[%s16724_s21 + $0x38] sm:$0xff]   ;;  %v15920_v24 = vld [vmem:[%s16724_s21 + $0x40] sm:$0xff]   ;;  %s16374_s24 = scalar_lea.vmem %s16373_s12, 32  ;;  %p16375_p2 = scmp.lt.s32.totalorder %s20806_s23, %s16373_s12 }
  0x4c   : > { %v15917_v21 = vld [vmem:[%s16724_s21 + $0xb0] sm:$0xff]   ;;  %v15919_v23 = vld [vmem:[%s16724_s21 + $0xb8] sm:$0xff]   ;;  %v15921_v25 = vld [vmem:[%s16724_s21 + $0xc0] sm:$0xff]   ;;  %p16370_p0 = pnand %p16369_p13, %p16552_p6  ;;  %p16376_p3 = scmp.lt.s32.totalorder %s16374_s24, %s16368_s19 }
  0x4d   : > { %v15922_v26 = vld [vmem:[%s16724_s21 + $0x48] sm:$0xff]   ;;  %v15924_v28 = vld [vmem:[%s16724_s21 + $0x50] sm:$0xff]   ;;  %v15926_v30 = vld [vmem:[%s16724_s21 + $0x58] sm:$0xff]  }
  0x4e   : > { %14394 = vmatpush3.bf16.msra.mxu0 %v16715_v2  ;;  %14442 = vmatpush3.bf16.msra.mxu1 %v16715_v2  ;;  %v15923_v27 = vld [vmem:[%s16724_s21 + $0xc8] sm:$0xff]   ;;  %v15925_v29 = vld [vmem:[%s16724_s21 + $0xd0] sm:$0xff]   ;;  %v15927_v31 = vld [vmem:[%s16724_s21 + $0xd8] sm:$0xff]   ;;  %p16371_p1 = pneg %p16370_p0  ;;  %p16377_p4 = por %p16376_p3, %p16375_p2 }
  0x4f   : > { %14395 = vmatprep.subr.bf16.mxu0 %v16720_v3  ;;  %14443 = vmatprep.subr.bf16.mxu1 %v16720_v3  ;;  %v15928_v32 = vld [vmem:[%s16724_s21 + $0x60] sm:$0xff]   ;;  %v15930_v34 = vld [vmem:[%s16724_s21 + $0x68] sm:$0xff]   ;;  %v15932_v36 = vld [vmem:[%s16724_s21 + $0x70] sm:$0xff]  }
  0x50   : > { %v15929_v33 = vld [vmem:[%s16724_s21 + $0xe0] sm:$0xff]   ;;  %v15931_v35 = vld [vmem:[%s16724_s21 + $0xe8] sm:$0xff]   ;;  %v15933_v37 = vld [vmem:[%s16724_s21 + $0xf0] sm:$0xff]   ;;  %p16378_p5 = pnand %p16377_p4, %p16371_p1 }
  0x51   : > { %v15934_v38 = vld [vmem:[%s16724_s21 + $0x78] sm:$0xff]   ;;  %v15936_v40 = vld [vmem:[%s16724_s21 + $0x100] sm:$0xff]   ;;  %v15938_v42 = vld [vmem:[%s16724_s21 + $0x108] sm:$0xff]  }
  0x52   : > { %14396 = vmatpush3.bf16.msra.mxu0 %v16720_v3  ;;  %14444 = vmatpush3.bf16.msra.mxu1 %v16720_v3  ;;  %v15935_v39 = vld [vmem:[%s16724_s21 + $0xf8] sm:$0xff]   ;;  %v15937_v41 = vld [vmem:[%s16724_s21 + $0x180] sm:$0xff]   ;;  %v15939_v43 = vld [vmem:[%s16724_s21 + $0x188] sm:$0xff]  }
  0x53   : > { %14397 = vmatprep.subr.bf16.mxu0 %v16735_v6  ;;  %14445 = vmatprep.subr.bf16.mxu1 %v16735_v6  ;;  %v15940_v44 = vld [vmem:[%s16724_s21 + $0x110] sm:$0xff]   ;;  %v15942_v46 = vld [vmem:[%s16724_s21 + $0x118] sm:$0xff]   ;;  %v15944_v48 = vld [vmem:[%s16724_s21 + $0x120] sm:$0xff]  }
  0x54   : > { %v15941_v45 = vld [vmem:[%s16724_s21 + $0x190] sm:$0xff]   ;;  %v15943_v47 = vld [vmem:[%s16724_s21 + $0x198] sm:$0xff]   ;;  %v15945_v49 = vld [vmem:[%s16724_s21 + $0x1a0] sm:$0xff]  }
  0x55   : > { %v15946_v50 = vld [vmem:[%s16724_s21 + $0x128] sm:$0xff]   ;;  %v15948_v52 = vld [vmem:[%s16724_s21 + $0x130] sm:$0xff]   ;;  %v15950_v54 = vld [vmem:[%s16724_s21 + $0x138] sm:$0xff]  }
  0x56   : > { %14398 = vmatpush3.bf16.msra.mxu0 %v16735_v6  ;;  %14446 = vmatpush3.bf16.msra.mxu1 %v16735_v6  ;;  %v15947_v51 = vld [vmem:[%s16724_s21 + $0x1a8] sm:$0xff]   ;;  %v15949_v53 = vld [vmem:[%s16724_s21 + $0x1b0] sm:$0xff]   ;;  %v15951_v55 = vld [vmem:[%s16724_s21 + $0x1b8] sm:$0xff]  }
  0x57   : > { %14399 = vmatprep.subr.bf16.mxu0 %v16744_v7  ;;  %14447 = vmatprep.subr.bf16.mxu1 %v16744_v7  ;;  %v15952_v56 = vld [vmem:[%s16724_s21 + $0x140] sm:$0xff]   ;;  %v15954_v58 = vld [vmem:[%s16724_s21 + $0x148] sm:$0xff]   ;;  %v15956_v60 = vld [vmem:[%s16724_s21 + $0x150] sm:$0xff]  }
  0x58   : > { %v15953_v57 = vld [vmem:[%s16724_s21 + $0x1c0] sm:$0xff]   ;;  %v15955_v59 = vld [vmem:[%s16724_s21 + $0x1c8] sm:$0xff]   ;;  %v15957_v61 = vld [vmem:[%s16724_s21 + $0x1d0] sm:$0xff]  }
  0x59   : > { %v15958_v63 = vld [vmem:[%s16724_s21 + $0x158] sm:$0xff]   ;;  %v15962_v4 = vld [vmem:[%s16724_s21 + $0x168] sm:$0xff]  }
  0x5a   : > { %14400 = vmatpush3.bf16.msra.mxu0 %v16744_v7  ;;  %14448 = vmatpush3.bf16.msra.mxu1 %v16744_v7  ;;  %v15963_v5 = vld [vmem:[%s16724_s21 + $0x1e8] sm:$0xff]  }
  0x5b   : > { %14401 = vmatprep.subr.bf16.mxu0 %v16753_v8  ;;  %14449 = vmatprep.subr.bf16.mxu1 %v16753_v8 }
  0x5e   : > { %14402 = vmatpush3.bf16.msra.mxu0 %v16753_v8  ;;  %14450 = vmatpush3.bf16.msra.mxu1 %v16753_v8 }
  0x5f   : > { %14403 = vmatprep.subr.bf16.mxu0 %v16762_v9  ;;  %14451 = vmatprep.subr.bf16.mxu1 %v16762_v9 }
  0x62   : > { %14404 = vmatpush3.bf16.msra.mxu0 %v16762_v9  ;;  %14452 = vmatpush3.bf16.msra.mxu1 %v16762_v9 }
  0x63   : > { %14485 = vmatprep.subr.bf16.mxu0 %v15896_v0  ;;  %14533 = vmatprep.subr.bf16.mxu1 %v15896_v0 }
  0x65   : > { %14406 = vmatmul.mubr.bf16.vlgmr.msra.gmra.mrb[0].mxu0 %v15906_v10  ;;  %14454 = vmatmul.mubr.bf16.vlgmr.msra.gmra.mrb[0].mxu1 %v15907_v11  ;;  %v15967_v10 = vld [vmem:[%s16724_s21 + $0x1f8] sm:$0xff]   ;;  %v15971_v11 = vld [vmem:[%s20883_s3 + $0x18] sm:$0xff]  }
  0x66   : > { %14486 = vmatpush3.bf16.msra.mxu0 %v15896_v0  ;;  %14534 = vmatpush3.bf16.msra.mxu1 %v15896_v0  ;;  %v15959_v0 = vld [vmem:[%s16724_s21 + $0x1d8] sm:$0xff]  }
  0x67   : > { %14409 = vmatprep.mubr.bf16.mxu0 %v15908_v12  ;;  %14457 = vmatprep.mubr.bf16.mxu1 %v15909_v13  ;;  %v15973_v12 = vld [vmem:[%s20883_s3 + $0x80] sm:$0xff]  }
  0x68   : > { %14487 = vmatprep.subr.bf16.mxu0 %v15897_v1  ;;  %14535 = vmatprep.subr.bf16.mxu1 %v15897_v1  ;;  %v15972_v13 = vld [vmem:[%s20883_s3 + $0x20] sm:$0xff]  }
  0x6a   : > { %14488 = vmatpush3.bf16.msra.mxu0 %v15897_v1  ;;  %14536 = vmatpush3.bf16.msra.mxu1 %v15897_v1  ;;  %v15960_v1 = vld [vmem:[%s16724_s21 + $0x160] sm:$0xff]  }
  0x6b   : > { %14489 = vmatprep.subr.bf16.mxu0 %v16715_v2  ;;  %14537 = vmatprep.subr.bf16.mxu1 %v16715_v2 }
  0x6d   : > { %14410 = vmatmul.mubr.bf16.gmra.mrb[4].mxu0 %v15910_v14  ;;  %14458 = vmatmul.mubr.bf16.gmra.mrb[4].mxu1 %v15911_v15  ;;  %v15974_v14 = vld [vmem:[%s20883_s3 + $0x88] sm:$0xff]   ;;  %v15976_v15 = vld [vmem:[%s20883_s3 + $0x90] sm:$0xff]  }
  0x6e   : > { %14413 = vmatprep.mubr.bf16.mxu0 %v15912_v16  ;;  %14461 = vmatprep.mubr.bf16.mxu1 %v15913_v17  ;;  %v15975_v16 = vld [vmem:[%s20883_s3 + $0x28] sm:$0xff]   ;;  %v15977_v17 = vld [vmem:[%s20883_s3 + $0x98] sm:$0xff]  }
  0x6f   : > { %14490 = vmatpush3.bf16.msra.mxu0 %v16715_v2  ;;  %14538 = vmatpush3.bf16.msra.mxu1 %v16715_v2  ;;  %v15961_v2 = vld [vmem:[%s16724_s21 + $0x1e0] sm:$0xff]  }
  0x70   : > { %14491 = vmatprep.subr.bf16.mxu0 %v16720_v3  ;;  %14539 = vmatprep.subr.bf16.mxu1 %v16720_v3 }
  0x73   : > { %14492 = vmatpush3.bf16.msra.mxu0 %v16720_v3  ;;  %14540 = vmatpush3.bf16.msra.mxu1 %v16720_v3  ;;  %v15969_v3 = vld [vmem:[%s20883_s3 + $0x8] sm:$0xff]  }
  0x74   : > { %14493 = vmatprep.subr.bf16.mxu0 %v16735_v6  ;;  %14541 = vmatprep.subr.bf16.mxu1 %v16735_v6 }
  0x75   : > { %14414 = vmatmul.mubr.bf16.gmra.mrb[8].mxu0 %v15914_v18  ;;  %14462 = vmatmul.mubr.bf16.gmra.mrb[8].mxu1 %v15915_v19  ;;  %v15979_v18 = vld [vmem:[%s20883_s3 + $0xa0] sm:$0xff]   ;;  %v15978_v19 = vld [vmem:[%s20883_s3 + $0x30] sm:$0xff]  }
  0x76   : > { %14417 = vmatprep.mubr.bf16.mxu0 %v15916_v20  ;;  %14465 = vmatprep.mubr.bf16.mxu1 %v15917_v21  ;;  %v15980_v20 = vld [vmem:[%s20883_s3 + $0xa8] sm:$0xff]   ;;  %v15982_v21 = vld [vmem:[%s20883_s3 + $0xb0] sm:$0xff]  }
  0x77   : > { %14494 = vmatpush3.bf16.msra.mxu0 %v16735_v6  ;;  %14542 = vmatpush3.bf16.msra.mxu1 %v16735_v6  ;;  %v15964_v6 = vld [vmem:[%s16724_s21 + $0x170] sm:$0xff]  }
  0x78   : > { %14495 = vmatprep.subr.bf16.mxu0 %v16744_v7  ;;  %14543 = vmatprep.subr.bf16.mxu1 %v16744_v7 }
  0x7b   : > { %14496 = vmatpush3.bf16.msra.mxu0 %v16744_v7  ;;  %14544 = vmatpush3.bf16.msra.mxu1 %v16744_v7  ;;  %v15965_v7 = vld [vmem:[%s16724_s21 + $0x1f0] sm:$0xff]  }
  0x7c   : > { %14497 = vmatprep.subr.bf16.mxu0 %v16753_v8  ;;  %14545 = vmatprep.subr.bf16.mxu1 %v16753_v8 }
  0x7d   : > { %14418 = vmatmul.mubr.bf16.gmra.mrb[12].mxu0 %v15918_v22  ;;  %14466 = vmatmul.mubr.bf16.gmra.mrb[12].mxu1 %v15919_v23  ;;  %v15981_v22 = vld [vmem:[%s20883_s3 + $0x38] sm:$0xff]  }
  0x7e   : > { %14421 = vmatprep.mubr.bf16.mxu0 %v15920_v24  ;;  %14469 = vmatprep.mubr.bf16.mxu1 %v15921_v25  ;;  %v15983_v23 = vld [vmem:[%s20883_s3 + $0xb8] sm:$0xff]   ;;  %v16907_v24 = vld [vmem:[%s20883_s3 + $0x40] sm:$0xff]  }
  0x7f   : > { %14498 = vmatpush3.bf16.msra.mxu0 %v16753_v8  ;;  %14546 = vmatpush3.bf16.msra.mxu1 %v16753_v8  ;;  %v15970_v8 = vld [vmem:[%s20883_s3 + $0x10] sm:$0xff]   ;;  %v16913_v25 = vld [vmem:[%s20883_s3 + $0xc0] sm:$0xff]  }
  0x80   : > { %14499 = vmatprep.subr.bf16.mxu0 %v16762_v9  ;;  %14547 = vmatprep.subr.bf16.mxu1 %v16762_v9 }
  0x83   : > { %14500 = vmatpush3.bf16.msra.mxu0 %v16762_v9  ;;  %14548 = vmatpush3.bf16.msra.mxu1 %v16762_v9  ;;  %v15966_v9 = vld [vmem:[%s16724_s21 + $0x178] sm:$0xff]   ;;  %s11493_s21 = scalar_lea.sflag [#allocation6], %s16706_s26 }
  0x84   : > { %14581 = vmatprep.subr.bf16.mxu0 %v15968_v62  ;;  %14677 = vmatprep.subr.bf16.mxu1 %v15973_v12 }
  0x85   : > { %14422 = vmatmul.mubr.bf16.gmra.mrb[16].mxu0 %v15922_v26  ;;  %14470 = vmatmul.mubr.bf16.gmra.mrb[16].mxu1 %v15923_v27 }
  0x86   : > { %14425 = vmatprep.mubr.bf16.mxu0 %v15924_v28  ;;  %14473 = vmatprep.mubr.bf16.mxu1 %v15925_v29 }
  0x8d   : > { %14426 = vmatmul.mubr.bf16.gmra.mrb[20].mxu0 %v15926_v30  ;;  %14474 = vmatmul.mubr.bf16.gmra.mrb[20].mxu1 %v15927_v31 }
  0x8e   : > { %14429 = vmatprep.mubr.bf16.mxu0 %v15928_v32  ;;  %14477 = vmatprep.mubr.bf16.mxu1 %v15929_v33 }
  0x95   : > { %14430 = vmatmul.mubr.bf16.gmra.mrb[24].mxu0 %v15930_v34  ;;  %14478 = vmatmul.mubr.bf16.gmra.mrb[24].mxu1 %v15931_v35 }
  0x96   : > { %14433 = vmatprep.mubr.bf16.mxu0 %v15932_v36  ;;  %14481 = vmatprep.mubr.bf16.mxu1 %v15933_v37 }
  0x9d   : > { %14434 = vmatmul.mubr.bf16.gmra.mrb[28].mxu0 %v15934_v38  ;;  %14482 = vmatmul.mubr.bf16.gmra.mrb[28].mxu1 %v15935_v39 }
  0x9e   : > { %14501 = vmatprep.mubr.bf16.mxu0 %v15936_v40  ;;  %14549 = vmatprep.mubr.bf16.mxu1 %v15937_v41 }
  0xa5   : > { %14502 = vmatmul.mubr.bf16.vlgmr.msra.gmra.mrb[32].mxu0 %v15938_v42  ;;  %14550 = vmatmul.mubr.bf16.vlgmr.msra.gmra.mrb[32].mxu1 %v15939_v43 }
  0xa6   : > { %14505 = vmatprep.mubr.bf16.mxu0 %v15940_v44  ;;  %14553 = vmatprep.mubr.bf16.mxu1 %v15941_v45 }
  0xa7   : > { %14582 = vmatpush3.bf16.msra.mxu0 %v15968_v62  ;;  %14678 = vmatpush3.bf16.msra.mxu1 %v15973_v12 }
  0xa8   : > { %14583 = vmatprep.subr.bf16.mxu0 %v15969_v3  ;;  %14679 = vmatprep.subr.bf16.mxu1 %v15974_v14 }
  0xab   : > { %14584 = vmatpush3.bf16.msra.mxu0 %v15969_v3  ;;  %14680 = vmatpush3.bf16.msra.mxu1 %v15974_v14 }
  0xac   : > { %14585 = vmatprep.subr.bf16.mxu0 %v15970_v8  ;;  %14681 = vmatprep.subr.bf16.mxu1 %v15976_v15 }
  0xad   : > { %14506 = vmatmul.mubr.bf16.gmra.mrb[36].mxu0 %v15942_v46  ;;  %14554 = vmatmul.mubr.bf16.gmra.mrb[36].mxu1 %v15943_v47 }
  0xae   : > { %14509 = vmatprep.mubr.bf16.mxu0 %v15944_v48  ;;  %14557 = vmatprep.mubr.bf16.mxu1 %v15945_v49 }
  0xaf   : > { %14586 = vmatpush3.bf16.msra.mxu0 %v15970_v8  ;;  %14682 = vmatpush3.bf16.msra.mxu1 %v15976_v15  ;;  %v17111_v15 = vld [vmem:[%s20882_s2] ss:$0 sm:$0xff] }
  0xb0   : > { %14587 = vmatprep.subr.bf16.mxu0 %v15971_v11  ;;  %14683 = vmatprep.subr.bf16.mxu1 %v15977_v17 }
  0xb3   : > { %14588 = vmatpush3.bf16.msra.mxu0 %v15971_v11  ;;  %14684 = vmatpush3.bf16.msra.mxu1 %v15977_v17 }
  0xb4   : > { %14589 = vmatprep.subr.bf16.mxu0 %v15972_v13  ;;  %14685 = vmatprep.subr.bf16.mxu1 %v15979_v18 }
  0xb5   : > { %14510 = vmatmul.mubr.bf16.gmra.mrb[40].mxu0 %v15946_v50  ;;  %14558 = vmatmul.mubr.bf16.gmra.mrb[40].mxu1 %v15947_v51 }
  0xb6   : > { %14513 = vmatprep.mubr.bf16.mxu0 %v15948_v52  ;;  %14561 = vmatprep.mubr.bf16.mxu1 %v15949_v53 }
  0xb7   : > { %14590 = vmatpush3.bf16.msra.mxu0 %v15972_v13  ;;  %14686 = vmatpush3.bf16.msra.mxu1 %v15979_v18 }
  0xb8   : > { %14591 = vmatprep.subr.bf16.mxu0 %v15975_v16  ;;  %14687 = vmatprep.subr.bf16.mxu1 %v15980_v20 }
  0xbb   : > { %14592 = vmatpush3.bf16.msra.mxu0 %v15975_v16  ;;  %14688 = vmatpush3.bf16.msra.mxu1 %v15980_v20 }
  0xbc   : > { %14593 = vmatprep.subr.bf16.mxu0 %v15978_v19  ;;  %14689 = vmatprep.subr.bf16.mxu1 %v15982_v21 }
  0xbd   : > { %14514 = vmatmul.mubr.bf16.gmra.mrb[44].mxu0 %v15950_v54  ;;  %14562 = vmatmul.mubr.bf16.gmra.mrb[44].mxu1 %v15951_v55 }
  0xbe   : > { %14517 = vmatprep.mubr.bf16.mxu0 %v15952_v56  ;;  %14565 = vmatprep.mubr.bf16.mxu1 %v15953_v57 }
  0xbf   : > { %14594 = vmatpush3.bf16.msra.mxu0 %v15978_v19  ;;  %14690 = vmatpush3.bf16.msra.mxu1 %v15982_v21 }
  0xc0   : > { %14595 = vmatprep.subr.bf16.mxu0 %v15981_v22  ;;  %14691 = vmatprep.subr.bf16.mxu1 %v15983_v23 }
  0xc3   : > { %14596 = vmatpush3.bf16.msra.mxu0 %v15981_v22  ;;  %14692 = vmatpush3.bf16.msra.mxu1 %v15983_v23 }
  0xc4   : > { %14629 = vmatprep.subr.bf16.mxu0 %v16907_v24  ;;  %14725 = vmatprep.subr.bf16.mxu1 %v16913_v25 }
  0xc5   : > { %14518 = vmatmul.mubr.bf16.gmra.mrb[48].mxu0 %v15954_v58  ;;  %14566 = vmatmul.mubr.bf16.gmra.mrb[48].mxu1 %v15955_v59 }
  0xc6   : > { %14521 = vmatprep.mubr.bf16.mxu0 %v15956_v60  ;;  %14569 = vmatprep.mubr.bf16.mxu1 %v15957_v61 }
  0xcd   : > { %14522 = vmatmul.mubr.bf16.gmra.mrb[52].mxu0 %v15958_v63  ;;  %14570 = vmatmul.mubr.bf16.gmra.mrb[52].mxu1 %v15959_v0 }
  0xce   : > { %14525 = vmatprep.mubr.bf16.mxu0 %v15960_v1  ;;  %14573 = vmatprep.mubr.bf16.mxu1 %v15961_v2 }
  0xd5   : > { %14526 = vmatmul.mubr.bf16.gmra.mrb[56].mxu0 %v15962_v4  ;;  %14574 = vmatmul.mubr.bf16.gmra.mrb[56].mxu1 %v15963_v5 }
  0xd6   : > { %14529 = vmatprep.mubr.bf16.mxu0 %v15964_v6  ;;  %14577 = vmatprep.mubr.bf16.mxu1 %v15965_v7 }
  0xdd   : > { %14530 = vmatmul.mubr.bf16.gmra.mrb[60].mxu0 %v15966_v9  ;;  %14578 = vmatmul.mubr.bf16.gmra.mrb[60].mxu1 %v15967_v10 }
 0x138   : > { %v16916_v26 = vpop.f32.mrb[0].mxu0  ;;  %v16918_v27 = vpop.f32.mrb[0].mxu1 }
 0x139   : > { %v16922_v29 = vpop.f32.mrb[1].mxu0  ;;  %v16924_v30 = vpop.f32.mrb[1].mxu1 }
 0x13a   : > { %v16928_v32 = vpop.f32.mrb[2].mxu0  ;;  %v16930_v33 = vpop.f32.mrb[2].mxu1 }
 0x13b   : > { %v16934_v35 = vpop.f32.mrb[3].mxu0  ;;  %v16936_v36 = vpop.f32.mrb[3].mxu1 }
 0x140   : > { %v16940_v38 = vpop.f32.mrb[4].mxu0  ;;  %v16942_v39 = vpop.f32.mrb[4].mxu1 }
 0x141   : > { %v16946_v41 = vpop.f32.mrb[5].mxu0  ;;  %v16948_v42 = vpop.f32.mrb[5].mxu1 }
 0x142   : > { %v16952_v44 = vpop.f32.mrb[6].mxu0  ;;  %v16954_v45 = vpop.f32.mrb[6].mxu1 }
 0x143   : > { %v16958_v47 = vpop.f32.mrb[7].mxu0  ;;  %v16960_v48 = vpop.f32.mrb[7].mxu1 }
 0x148   : > { %v16964_v50 = vpop.f32.mrb[8].mxu0  ;;  %v16966_v51 = vpop.f32.mrb[8].mxu1 }
 0x149   : > { %v16970_v53 = vpop.f32.mrb[9].mxu0  ;;  %v16972_v54 = vpop.f32.mrb[9].mxu1 }
 0x14a   : > { %v16976_v56 = vpop.f32.mrb[10].mxu0  ;;  %v16978_v57 = vpop.f32.mrb[10].mxu1 }
 0x14b   : > { %v16982_v59 = vpop.f32.mrb[11].mxu0  ;;  %v16984_v60 = vpop.f32.mrb[11].mxu1 }
 0x150   : > { %v16988_v62 = vpop.f32.mrb[12].mxu0  ;;  %v16990_v63 = vpop.f32.mrb[12].mxu1 }
 0x151   : > { %v16994_v1 = vpop.f32.mrb[13].mxu0  ;;  %v16996_v2 = vpop.f32.mrb[13].mxu1 }
 0x152   : > { %v17000_v4 = vpop.f32.mrb[14].mxu0  ;;  %v17002_v5 = vpop.f32.mrb[14].mxu1 }
 0x153   : > { %v17006_v7 = vpop.f32.mrb[15].mxu0  ;;  %v17008_v8 = vpop.f32.mrb[15].mxu1 }
 0x158   : > { %v17012_v10 = vpop.f32.mrb[16].mxu0  ;;  %v17014_v11 = vpop.f32.mrb[16].mxu1 }
 0x159   : > { %v17018_v13 = vpop.f32.mrb[17].mxu0  ;;  %v17020_v14 = vpop.f32.mrb[17].mxu1 }
 0x15a   : > { %v17024_v16 = vpop.f32.mrb[18].mxu0  ;;  %v17026_v17 = vpop.f32.mrb[18].mxu1 }
 0x15b   : > { %v17030_v19 = vpop.f32.mrb[19].mxu0  ;;  %v17032_v20 = vpop.f32.mrb[19].mxu1 }
 0x160   : > { %v17036_v22 = vpop.f32.mrb[20].mxu0  ;;  %v17038_v23 = vpop.f32.mrb[20].mxu1 }
 0x161   : > { %v17042_v12 = vpop.f32.mrb[21].mxu0  ;;  %v17044_v9 = vpop.f32.mrb[21].mxu1 }
 0x162   : > { %v17048_v6 = vpop.f32.mrb[22].mxu0  ;;  %v17050_v3 = vpop.f32.mrb[22].mxu1 }
 0x163   : > { %20937 = vst [vmem:[#allocation9_spill] sm:$0xff] %v17050_v3  ;;  %v17054_v0 = vpop.f32.mrb[23].mxu0  ;;  %v17056_v61 = vpop.f32.mrb[23].mxu1 }
 0x164   : > { %20938 = vst [vmem:[#allocation10_spill] sm:$0xff] %v17054_v0  ;;  %20939 = vst [vmem:[#allocation11_spill] sm:$0xff] %v17056_v61 }
 0x168   : > { %v17060_v58 = vpop.f32.mrb[24].mxu0  ;;  %v17062_v55 = vpop.f32.mrb[24].mxu1 }
 0x169   : > { %20940 = vst [vmem:[#allocation12_spill] sm:$0xff] %v17060_v58  ;;  %20941 = vst [vmem:[#allocation13_spill] sm:$0xff] %v17062_v55  ;;  %v17066_v52 = vpop.f32.mrb[25].mxu0  ;;  %v17068_v49 = vpop.f32.mrb[25].mxu1 }
 0x16a   : > { %20942 = vst [vmem:[#allocation14_spill] sm:$0xff] %v17066_v52  ;;  %20943 = vst [vmem:[#allocation15_spill] sm:$0xff] %v17068_v49  ;;  %v17072_v46 = vpop.f32.mrb[26].mxu0  ;;  %v17074_v43 = vpop.f32.mrb[26].mxu1 }
 0x16b   : > { %20944 = vst [vmem:[#allocation16_spill] sm:$0xff] %v17072_v46  ;;  %20945 = vst [vmem:[#allocation17_spill] sm:$0xff] %v17074_v43  ;;  %v17078_v40 = vpop.f32.mrb[27].mxu0  ;;  %v17080_v37 = vpop.f32.mrb[27].mxu1 }
 0x16c   : > { %20946 = vst [vmem:[#allocation18_spill] sm:$0xff] %v17078_v40  ;;  %20947 = vst [vmem:[#allocation19_spill] sm:$0xff] %v17080_v37 }
 0x170   : > { %v17084_v34 = vpop.f32.mrb[28].mxu0  ;;  %v17086_v31 = vpop.f32.mrb[28].mxu1 }
 0x171   : > { %20948 = vst [vmem:[#allocation20_spill] sm:$0xff] %v17084_v34  ;;  %20949 = vst [vmem:[#allocation21_spill] sm:$0xff] %v17086_v31  ;;  %v17090_v28 = vpop.f32.mrb[29].mxu0  ;;  %v17092_v49 = vpop.f32.mrb[29].mxu1 }
 0x172   : > { %20950 = vst [vmem:[#allocation22_spill] sm:$0xff] %v17090_v28  ;;  %20951 = vst [vmem:[#allocation23_spill] sm:$0xff] %v17092_v49  ;;  %v17096_v43 = vpop.f32.mrb[30].mxu0  ;;  %v17098_v46 = vpop.f32.mrb[30].mxu1  ;;  %v20956_v49 = vmax.f32 %v16916_v26, %v16918_v27  ;;  %v20959_v26 = vmax.f32 %v16934_v35, %v16936_v36 }
 0x173   : > { %20952 = vst [vmem:[#allocation24_spill] sm:$0xff] %v17096_v43  ;;  %20953 = vst [vmem:[#allocation25_spill] sm:$0xff] %v17098_v46  ;;  %v17102_v37 = vpop.f32.mrb[31].mxu0  ;;  %v17104_v40 = vpop.f32.mrb[31].mxu1  ;;  %v20957_v46 = vmax.f32 %v16922_v29, %v16924_v30 }
 0x174   : > { %20954 = vst [vmem:[#allocation26_spill] sm:$0xff] %v17102_v37  ;;  %20955 = vst [vmem:[#allocation27_spill] sm:$0xff] %v17104_v40  ;;  %v20958_v40 = vmax.f32 %v16928_v32, %v16930_v33  ;;  %v20960_v33 = vmax.f32 %v16940_v38, %v16942_v39  ;;  %v20963_v38 = vmax.f32 %v16946_v41, %v16948_v42  ;;  %v20916_v41 = vmov 1.0|1.0  }
 0x178   : > { %v14503_v31 = vpop.f32.mrb[32].mxu0  ;;  %v14551_v34 = vpop.f32.mrb[32].mxu1 }
 0x179   : > { %v1832_v28 = vmax.f32 %v20956_v49, %v14503_v31  ;;  %v1703_v52 = vpop.f32.mrb[33].mxu0  ;;  %v2025_v18 = vpop.f32.mrb[33].mxu1 }
 0x17a   : > { %v1830_v43 = vmax.f32 %v20957_v46, %v1703_v52  ;;  %v14504_v55 = vpop.f32.mrb[34].mxu0  ;;  %v14552_v58 = vpop.f32.mrb[34].mxu1 }
 0x17b   : > { %v2154_v21 = vmax.f32 %v1832_v28, %v14551_v34  ;;  %v1833_v37 = vmax.f32 %v20958_v40, %v14504_v55  ;;  %v1706_v61 = vpop.f32.mrb[35].mxu0  ;;  %v2028_v0 = vpop.f32.mrb[35].mxu1 }
 0x17c   : > { %v2152_v3 = vmax.f32 %v1830_v43, %v2025_v18  ;;  %v1831_v27 = vmax.f32 %v20959_v26, %v1706_v61  ;;  %v15990_v43 = vld [vmem:[%s20883_s3 + $0xc8] sm:$0xff]   ;;  %v20964_v61 = vmov 0 }
 0x17d   : > { %v2193_v31 = vadd.f32 %v17111_v15, %v2154_v21  ;;  %v2155_v49 = vmax.f32 %v1833_v37, %v14552_v58  ;;  %v15985_v37 = vld [vmem:[%s20883_s3 + $0x48] sm:$0xff]  }
 0x17e   : > { %v2191_v29 = vadd.f32 %v17111_v15, %v2152_v3  ;;  %v2153_v30 = vmax.f32 %v1831_v27, %v2028_v0  ;;  %v20967_v3 = vmax.f32 %v16952_v44, %v16954_v45  ;;  %v15986_v45 = vld [vmem:[%s20883_s3 + $0x50] sm:$0xff]  }
 0x17f   : > { %v2194_v46 = vadd.f32 %v17111_v15, %v2155_v49  ;;  %vm2225_vm0 = vcmp.gt.f32.partialorder %v2193_v31, 1.0  ;;  %v20968_v31 = vmax.f32 %v16958_v47, %v16960_v48 }
 0x180   : > { %v2192_v28 = vadd.f32 %v17111_v15, %v2153_v30  ;;  %v14507_v34 = vpop.f32.mrb[36].mxu0  ;;  %v14555_v32 = vpop.f32.mrb[36].mxu1  ;;  %vm2223_vm2 = vcmp.gt.f32.partialorder %v2191_v29, 1.0  ;;  %v15992_v30 = vld [vmem:[%s20883_s3 + $0xd0] sm:$0xff]  }
 0x181   : > { %vm2226_vm1 = vcmp.gt.f32.partialorder %v2194_v46, 1.0  ;;  %v1836_v40 = vmax.f32 %v20960_v33, %v14507_v34  ;;  %v1719_v35 = vpop.f32.mrb[37].mxu0  ;;  %v2041_v36 = vpop.f32.mrb[37].mxu1 }
 0x182   : > { %vm17138_vm3 = vmpackc.low %vm2226_vm1, %vm2225_vm0  ;;  %vm2224_vm4 = vcmp.gt.f32.partialorder %v2192_v28, 1.0  ;;  %v1834_v39 = vmax.f32 %v20963_v38, %v1719_v35  ;;  %v14508_v55 = vpop.f32.mrb[38].mxu0  ;;  %v14556_v58 = vpop.f32.mrb[38].mxu1  ;;  %v15993_v35 = vld [vmem:[%s20883_s3 + $0xd8] sm:$0xff]  }
 0x183   : > { %vm17145_vm5 = vmpackc.low %vm2224_vm4, %vm2223_vm2  ;;  %v2158_v0 = vmax.f32 %v1836_v40, %v14555_v32  ;;  %v1837_v18 = vmax.f32 %v20967_v3, %v14508_v55  ;;  %v1722_v21 = vpop.f32.mrb[39].mxu0  ;;  %v2044_v26 = vpop.f32.mrb[39].mxu1  ;;  %v20969_v32 = vmax.f32 %v16964_v50, %v16966_v51  ;;  %v15987_v40 = vld [vmem:[%s20883_s3 + $0x58] sm:$0xff]   ;;  %v20973_v50 = vmax.f32 %v16970_v53, %v16972_v54 }
 0x184   : > { %v20965_v61 = vsel %vm17145_vm5, 4294967295, %v20964_v61  ;;  %v2156_v27 = vmax.f32 %v1834_v39, %v2041_v36  ;;  %v1835_v49 = vmax.f32 %v20968_v31, %v1722_v21  ;;  %14597 = vmatprep.mubr.msk.bf16.mxu0 %vm17145_vm5, %v20916_v41  ;;  %14693 = vmatprep.mubr.msk.bf16.mxu1 %vm17145_vm5, %v20916_v41  ;;  %v20970_v36 = vmov 0 }
 0x185   : > { %20966 = vst [vmem:[#allocation28_spill] sm:$0xff] %v20965_v61  ;;  %v2197_v42 = vadd.f32 %v17111_v15, %v2158_v0  ;;  %v2159_v44 = vmax.f32 %v1837_v18, %v14556_v58  ;;  %14598 = vmatmul.mubr.msk.bf16.vlgmr.msra.gmra.mrb[64].mxu0 %vm17138_vm3, %v20916_v41  ;;  %14694 = vmatmul.mubr.msk.bf16.vlgmr.msra.gmra.mrb[64].mxu1 %vm17138_vm3, %v20916_v41  ;;  %v20974_v55 = vmov 0  ;;  %v16102_v61 = vld [vmem:[%s20883_s3 + $0x448] sm:$0xff]  }
 0x186   : > { %v2195_v47 = vadd.f32 %v17111_v15, %v2156_v27  ;;  %v2157_v48 = vmax.f32 %v1835_v49, %v2044_v26  ;;  %14630 = vmatpush3.bf16.msra.mxu0 %v16907_v24  ;;  %14726 = vmatpush3.bf16.msra.mxu1 %v16913_v25  ;;  %v20977_v0 = vmax.f32 %v16976_v56, %v16978_v57  ;;  %v15995_v27 = vld [vmem:[%s20883_s3 + $0xe0] sm:$0xff]  }
 0x187   : > { %v2198_v29 = vadd.f32 %v17111_v15, %v2159_v44  ;;  %14631 = vmatprep.subr.bf16.mxu0 %v15985_v37  ;;  %14727 = vmatprep.subr.bf16.mxu1 %v15990_v43  ;;  %vm2229_vm6 = vcmp.gt.f32.partialorder %v2197_v42, 1.0  ;;  %v20978_v53 = vmax.f32 %v16982_v59, %v16984_v60  ;;  %v15988_v59 = vld [vmem:[%s20883_s3 + $0x60] sm:$0xff]   ;;  %v20979_v44 = vmax.f32 %v16988_v62, %v16990_v63 }
 0x188   : > { %v2196_v46 = vadd.f32 %v17111_v15, %v2157_v48  ;;  %v14511_v28 = vpop.f32.mrb[40].mxu0  ;;  %v14559_v34 = vpop.f32.mrb[40].mxu1  ;;  %vm2227_vm8 = vcmp.gt.f32.partialorder %v2195_v47, 1.0  ;;  %v20983_v62 = vmax.f32 %v16994_v1, %v16996_v2  ;;  %v20988_v1 = vmax.f32 %v17006_v7, %v17008_v8  ;;  %v15994_v7 = vld [vmem:[%s20883_s3 + $0x70] sm:$0xff]  }
 0x189   : > { %vm2230_vm7 = vcmp.gt.f32.partialorder %v2198_v29, 1.0  ;;  %v1840_v24 = vmax.f32 %v20969_v32, %v14511_v28  ;;  %v1735_v33 = vpop.f32.mrb[41].mxu0  ;;  %v2057_v25 = vpop.f32.mrb[41].mxu1  ;;  %v15991_v29 = vld [vmem:[%s20883_s3 + $0x68] sm:$0xff]   ;;  %v20984_v32 = vmov 0 }
 0x18a   : > { %vm17188_vm9 = vmpackc.low %vm2230_vm7, %vm2229_vm6  ;;  %vm2228_vm10 = vcmp.gt.f32.partialorder %v2196_v46, 1.0  ;;  %v1838_v51 = vmax.f32 %v20973_v50, %v1735_v33  ;;  %v14512_v38 = vpop.f32.mrb[42].mxu0  ;;  %v14560_v39 = vpop.f32.mrb[42].mxu1  ;;  %14632 = vmatpush3.bf16.msra.mxu0 %v15985_v37  ;;  %14728 = vmatpush3.bf16.msra.mxu1 %v15990_v43  ;;  %v20980_v46 = vmov 0  ;;  %v20987_v33 = vmax.f32 %v17000_v4, %v17002_v5 }
 0x18b   : > { %v20971_v36 = vsel %vm17188_vm9, 4294967295, %v20970_v36  ;;  %vm17195_vm11 = vmpackc.low %vm2228_vm10, %vm2227_vm8  ;;  %v2162_v58 = vmax.f32 %v1840_v24, %v14559_v34  ;;  %v1841_v3 = vmax.f32 %v20977_v0, %v14512_v38  ;;  %v1738_v18 = vpop.f32.mrb[43].mxu0  ;;  %v2060_v21 = vpop.f32.mrb[43].mxu1  ;;  %14633 = vmatprep.subr.bf16.mxu0 %v15986_v45  ;;  %14729 = vmatprep.subr.bf16.mxu1 %v15992_v30 }
 0x18c   : > { %20972 = vst [vmem:[#allocation29_spill] sm:$0xff] %v20971_v36  ;;  %v20975_v55 = vsel %vm17195_vm11, 4294967295, %v20974_v55  ;;  %v2160_v26 = vmax.f32 %v1838_v51, %v2057_v25  ;;  %v1839_v54 = vmax.f32 %v20978_v53, %v1738_v18  ;;  %14601 = vmatprep.mubr.msk.bf16.mxu0 %vm17195_vm11, %v20916_v41  ;;  %14697 = vmatprep.mubr.msk.bf16.mxu1 %vm17195_vm11, %v20916_v41  ;;  %v16108_v36 = vld [vmem:[%s20883_s3 + $0x468] sm:$0xff]  }
 0x18d   : > { %20976 = vst [vmem:[#allocation30_spill] sm:$0xff] %v20975_v55  ;;  %v2201_v56 = vadd.f32 %v17111_v15, %v2162_v58  ;;  %v2163_v57 = vmax.f32 %v1841_v3, %v14560_v39  ;;  %14602 = vmatmul.mubr.msk.bf16.gmra.mrb[68].mxu0 %vm17188_vm9, %v20916_v41  ;;  %14698 = vmatmul.mubr.msk.bf16.gmra.mrb[68].mxu1 %vm17188_vm9, %v20916_v41  ;;  %v15998_v39 = vld [vmem:[%s20883_s3 + $0xf0] sm:$0xff]  }
 0x18e   : > { %v2199_v60 = vadd.f32 %v17111_v15, %v2160_v26  ;;  %v2161_v37 = vmax.f32 %v1839_v54, %v2060_v21  ;;  %14634 = vmatpush3.bf16.msra.mxu0 %v15986_v45  ;;  %14730 = vmatpush3.bf16.msra.mxu1 %v15992_v30  ;;  %v15996_v30 = vld [vmem:[%s20883_s3 + $0xe8] sm:$0xff]   ;;  %v20989_v18 = vmax.f32 %v17012_v10, %v17014_v11  ;;  %v15997_v54 = vld [vmem:[%s20883_s3 + $0x78] sm:$0xff]  }
 0x18f   : > { %v2202_v43 = vadd.f32 %v17111_v15, %v2163_v57  ;;  %14635 = vmatprep.subr.bf16.mxu0 %v15987_v40  ;;  %14731 = vmatprep.subr.bf16.mxu1 %v15993_v35  ;;  %vm2233_vm12 = vcmp.gt.f32.partialorder %v2201_v56, 1.0  ;;  %v15999_v56 = vld [vmem:[%s20883_s3 + $0xf8] sm:$0xff]   ;;  %v20992_v10 = vmax.f32 %v17018_v13, %v17020_v14  ;;  %v20997_v13 = vmax.f32 %v17030_v19, %v17032_v20  ;;  %v17317_v19 = vld [vmem:[%s20883_s3 + $0x100] sm:$0xff]  }
 0x190   : > { %v2200_v31 = vadd.f32 %v17111_v15, %v2161_v37  ;;  %v14515_v49 = vpop.f32.mrb[44].mxu0  ;;  %v14563_v42 = vpop.f32.mrb[44].mxu1  ;;  %vm2231_vm14 = vcmp.gt.f32.partialorder %v2199_v60, 1.0  ;;  %v20993_v37 = vmov 0 }
 0x191   : > { %vm2234_vm13 = vcmp.gt.f32.partialorder %v2202_v43, 1.0  ;;  %v1844_v47 = vmax.f32 %v20979_v44, %v14515_v49  ;;  %v1751_v45 = vpop.f32.mrb[45].mxu0  ;;  %v2073_v48 = vpop.f32.mrb[45].mxu1 }
 0x192   : > { %vm17236_vm15 = vmpackc.low %vm2234_vm13, %vm2233_vm12  ;;  %vm2232_vm0 = vcmp.gt.f32.partialorder %v2200_v31, 1.0  ;;  %v1842_v63 = vmax.f32 %v20983_v62, %v1751_v45  ;;  %v14516_v28 = vpop.f32.mrb[46].mxu0  ;;  %v14564_v34 = vpop.f32.mrb[46].mxu1  ;;  %14636 = vmatpush3.bf16.msra.mxu0 %v15987_v40  ;;  %14732 = vmatpush3.bf16.msra.mxu1 %v15993_v35 }
 0x193   : > { %v20981_v46 = vsel %vm17236_vm15, 4294967295, %v20980_v46  ;;  %vm17243_vm1 = vmpackc.low %vm2232_vm0, %vm2231_vm14  ;;  %v2166_v24 = vmax.f32 %v1844_v47, %v14563_v42  ;;  %v1845_v25 = vmax.f32 %v20987_v33, %v14516_v28  ;;  %v1754_v50 = vpop.f32.mrb[47].mxu0  ;;  %v2076_v51 = vpop.f32.mrb[47].mxu1  ;;  %14637 = vmatprep.subr.bf16.mxu0 %v15988_v59  ;;  %14733 = vmatprep.subr.bf16.mxu1 %v15995_v27  ;;  %v20999_v33 = vmov 0 }
 0x194   : > { %20982 = vst [vmem:[#allocation31_spill] sm:$0xff] %v20981_v46  ;;  %v20985_v32 = vsel %vm17243_vm1, 4294967295, %v20984_v32  ;;  %v2164_v38 = vmax.f32 %v1842_v63, %v2073_v48  ;;  %v1843_v2 = vmax.f32 %v20988_v1, %v1754_v50  ;;  %14605 = vmatprep.mubr.msk.bf16.mxu0 %vm17243_vm1, %v20916_v41  ;;  %14701 = vmatprep.mubr.msk.bf16.mxu1 %vm17243_vm1, %v20916_v41  ;;  %v17324_v48 = vld [vmem:[%s20883_s3 + $0x1c0] sm:$0xff]  }
 0x195   : > { %20986 = vst [vmem:[#allocation32_spill] sm:$0xff] %v20985_v32  ;;  %v2205_v4 = vadd.f32 %v17111_v15, %v2166_v24  ;;  %v2167_v5 = vmax.f32 %v1845_v25, %v14564_v34  ;;  %14606 = vmatmul.mubr.msk.bf16.gmra.mrb[72].mxu0 %vm17236_vm15, %v20916_v41  ;;  %14702 = vmatmul.mubr.msk.bf16.gmra.mrb[72].mxu1 %vm17236_vm15, %v20916_v41  ;;  %v16103_v32 = vld [vmem:[%s20883_s3 + $0x428] sm:$0xff]  }
 0x196   : > { %v2203_v8 = vadd.f32 %v17111_v15, %v2164_v38  ;;  %v2165_v40 = vmax.f32 %v1843_v2, %v2076_v51  ;;  %14638 = vmatpush3.bf16.msra.mxu0 %v15988_v59  ;;  %14734 = vmatpush3.bf16.msra.mxu1 %v15995_v27  ;;  %v20996_v27 = vmax.f32 %v17024_v16, %v17026_v17 }
 0x197   : > { %v2206_v35 = vadd.f32 %v17111_v15, %v2167_v5  ;;  %14639 = vmatprep.subr.bf16.mxu0 %v15991_v29  ;;  %14735 = vmatprep.subr.bf16.mxu1 %v15996_v30  ;;  %vm2237_vm2 = vcmp.gt.f32.partialorder %v2205_v4, 1.0  ;;  %v20998_v63 = vmax.f32 %v17036_v22, %v17038_v23  ;;  %v21001_v25 = vmax.f32 %v17042_v12, %v17044_v9  ;;  %v21004_v23 = vld [vmem:[#allocation9_spill] sm:$0xff]  ;;  %v21006_v12 = vld [vmem:[#allocation10_spill] sm:$0xff] }
 0x198   : > { %v2204_v58 = vadd.f32 %v17111_v15, %v2165_v40  ;;  %v14519_v0 = vpop.f32.mrb[48].mxu0  ;;  %v14567_v3 = vpop.f32.mrb[48].mxu1  ;;  %vm2235_vm6 = vcmp.gt.f32.partialorder %v2203_v8, 1.0  ;;  %v21005_v2 = vmax.f32 %v17048_v6, %v21004_v23  ;;  %v21007_v8 = vld [vmem:[#allocation11_spill] sm:$0xff] }
 0x199   : > { %vm2238_vm4 = vcmp.gt.f32.partialorder %v2206_v35, 1.0  ;;  %v1848_v21 = vmax.f32 %v20989_v18, %v14519_v0  ;;  %v1767_v26 = vpop.f32.mrb[49].mxu0  ;;  %v2089_v53 = vpop.f32.mrb[49].mxu1  ;;  %v21008_v40 = vmax.f32 %v21006_v12, %v21007_v8 }
 0x19a   : > { %vm17284_vm7 = vmpackc.low %vm2238_vm4, %vm2237_vm2  ;;  %vm2236_vm8 = vcmp.gt.f32.partialorder %v2204_v58, 1.0  ;;  %v1846_v11 = vmax.f32 %v20992_v10, %v1767_v26  ;;  %v14520_v59 = vpop.f32.mrb[50].mxu0  ;;  %v14568_v60 = vpop.f32.mrb[50].mxu1  ;;  %14640 = vmatpush3.bf16.msra.mxu0 %v15991_v29  ;;  %14736 = vmatpush3.bf16.msra.mxu1 %v15996_v30 }
 0x19b   : > { %vm17291_vm10 = vmpackc.low %vm2236_vm8, %vm2235_vm6  ;;  %v2170_v43 = vmax.f32 %v1848_v21, %v14567_v3  ;;  %v1849_v31 = vmax.f32 %v20996_v27, %v14520_v59  ;;  %v1770_v49 = vpop.f32.mrb[51].mxu0  ;;  %v2092_v42 = vpop.f32.mrb[51].mxu1  ;;  %14641 = vmatprep.subr.bf16.mxu0 %v15994_v7  ;;  %14737 = vmatprep.subr.bf16.mxu1 %v15998_v39  ;;  %v21015_v27 = vld [vmem:[#allocation15_spill] sm:$0xff] }
 0x19c   : > { %v20994_v37 = vsel %vm17291_vm10, 4294967295, %v20993_v37  ;;  %v2168_v44 = vmax.f32 %v1846_v11, %v2089_v53  ;;  %v1847_v14 = vmax.f32 %v20997_v13, %v1770_v49  ;;  %14609 = vmatprep.mubr.msk.bf16.mxu0 %vm17291_vm10, %v20916_v41  ;;  %14705 = vmatprep.mubr.msk.bf16.mxu1 %vm17291_vm10, %v20916_v41  ;;  %v21009_v53 = vld [vmem:[#allocation12_spill] sm:$0xff]  ;;  %v21017_v13 = vmov 0 }
 0x19d   : > { %20995 = vst [vmem:[#allocation33_spill] sm:$0xff] %v20994_v37  ;;  %v2209_v16 = vadd.f32 %v17111_v15, %v2170_v43  ;;  %v2171_v17 = vmax.f32 %v1849_v31, %v14568_v60  ;;  %14610 = vmatmul.mubr.msk.bf16.gmra.mrb[76].mxu0 %vm17284_vm7, %v20916_v41  ;;  %14706 = vmatmul.mubr.msk.bf16.gmra.mrb[76].mxu1 %vm17284_vm7, %v20916_v41  ;;  %v21012_v60 = vmov 0  ;;  %v21014_v43 = vld [vmem:[#allocation14_spill] sm:$0xff] }
 0x19e   : > { %v2207_v20 = vadd.f32 %v17111_v15, %v2168_v44  ;;  %v2169_v47 = vmax.f32 %v1847_v14, %v2092_v42  ;;  %14642 = vmatpush3.bf16.msra.mxu0 %v15994_v7  ;;  %14738 = vmatpush3.bf16.msra.mxu1 %v15998_v39  ;;  %v21016_v31 = vmax.f32 %v21014_v43, %v21015_v27  ;;  %v21038_v43 = vld [vmem:[#allocation26_spill] sm:$0xff]  ;;  %v21039_v27 = vld [vmem:[#allocation27_spill] sm:$0xff] }
 0x19f   : > { %v2210_v45 = vadd.f32 %v17111_v15, %v2171_v17  ;;  %14643 = vmatprep.subr.bf16.mxu0 %v15997_v54  ;;  %14739 = vmatprep.subr.bf16.mxu1 %v15999_v56  ;;  %vm2241_vm12 = vcmp.gt.f32.partialorder %v2209_v16, 1.0  ;;  %v21019_v16 = vld [vmem:[#allocation16_spill] sm:$0xff]  ;;  %v21020_v17 = vld [vmem:[#allocation17_spill] sm:$0xff] }
 0x1a0   : > { %v2208_v29 = vadd.f32 %v17111_v15, %v2169_v47  ;;  %v14523_v30 = vpop.f32.mrb[52].mxu0  ;;  %v14571_v62 = vpop.f32.mrb[52].mxu1  ;;  %vm2239_vm14 = vcmp.gt.f32.partialorder %v2207_v20, 1.0  ;;  %v21021_v20 = vmax.f32 %v21019_v16, %v21020_v17 }
 0x1a1   : > { %vm2242_vm13 = vcmp.gt.f32.partialorder %v2210_v45, 1.0  ;;  %v1852_v28 = vmax.f32 %v20998_v63, %v14523_v30  ;;  %v1783_v34 = vpop.f32.mrb[53].mxu0  ;;  %v2105_v24 = vpop.f32.mrb[53].mxu1  ;;  %v21023_v63 = vld [vmem:[#allocation19_spill] sm:$0xff] }
 0x1a2   : > { %vm17330_vm0 = vmpackc.low %vm2242_vm13, %vm2241_vm12  ;;  %vm2240_vm2 = vcmp.gt.f32.partialorder %v2208_v29, 1.0  ;;  %v1850_v50 = vmax.f32 %v21001_v25, %v1783_v34  ;;  %v14524_v51 = vpop.f32.mrb[54].mxu0  ;;  %v14572_v38 = vpop.f32.mrb[54].mxu1  ;;  %14644 = vmatpush3.bf16.msra.mxu0 %v15997_v54  ;;  %14740 = vmatpush3.bf16.msra.mxu1 %v15999_v56  ;;  %v21010_v54 = vld [vmem:[#allocation13_spill] sm:$0xff] }
 0x1a3   : > { %v21000_v33 = vsel %vm17330_vm0, 4294967295, %v20999_v33  ;;  %vm17337_vm4 = vmpackc.low %vm2240_vm2, %vm2239_vm14  ;;  %v2174_v22 = vmax.f32 %v1852_v28, %v14571_v62  ;;  %v1853_v4 = vmax.f32 %v21005_v2, %v14524_v51  ;;  %v1786_v5 = vpop.f32.mrb[55].mxu0  ;;  %v2108_v7 = vpop.f32.mrb[55].mxu1  ;;  %14773 = vmatprep.subr.bf16.mxu0 %v17317_v19  ;;  %14917 = vmatprep.subr.bf16.mxu1 %v17324_v48  ;;  %v21011_v56 = vmax.f32 %v21009_v53, %v21010_v54  ;;  %v21022_v62 = vld [vmem:[#allocation18_spill] sm:$0xff]  ;;  %v21036_v53 = vld [vmem:[#allocation25_spill] sm:$0xff] }
 0x1a4   : > { %v2172_v9 = vmax.f32 %v1850_v50, %v2105_v24  ;;  %v1851_v35 = vmax.f32 %v21008_v40, %v1786_v5  ;;  %14613 = vmatprep.mubr.msk.bf16.mxu0 %vm17337_vm4, %v20916_v41  ;;  %14709 = vmatprep.mubr.msk.bf16.mxu1 %vm17337_vm4, %v20916_v41  ;;  %v21024_v28 = vmax.f32 %v21022_v62, %v21023_v63  ;;  %v21026_v5 = vld [vmem:[#allocation21_spill] sm:$0xff] }
 0x1a5   : > { %v2213_v6 = vadd.f32 %v17111_v15, %v2174_v22  ;;  %v2175_v39 = vmax.f32 %v1853_v4, %v14572_v38  ;;  %14614 = vmatmul.mubr.msk.bf16.gmra.mrb[80].mxu0 %vm17330_vm0, %v20916_v41  ;;  %14710 = vmatmul.mubr.msk.bf16.gmra.mrb[80].mxu1 %vm17330_vm0, %v20916_v41  ;;  %v21025_v4 = vld [vmem:[#allocation20_spill] sm:$0xff]  ;;  %v16003_v63 = vld [vmem:[%s20883_s3 + $0x118] sm:$0xff]  }
 0x1a6   : > { %v2211_v58 = vadd.f32 %v17111_v15, %v2172_v9  ;;  %v2173_v0 = vmax.f32 %v1851_v35, %v2108_v7  ;;  %v21027_v7 = vmax.f32 %v21025_v4, %v21026_v5  ;;  %v21030_v35 = vld [vmem:[#allocation22_spill] sm:$0xff]  ;;  %v16008_v62 = vld [vmem:[%s20883_s3 + $0x1d0] sm:$0xff]   ;;  %v16022_v4 = vld [vmem:[%s20883_s3 + $0x208] sm:$0xff]  }
 0x1a7   : > { %v2214_v3 = vadd.f32 %v17111_v15, %v2175_v39  ;;  %vm2245_vm6 = vcmp.gt.f32.partialorder %v2213_v6, 1.0  ;;  %v21031_v6 = vld [vmem:[#allocation23_spill] sm:$0xff]  ;;  %v16018_v5 = vld [vmem:[%s20883_s3 + $0x150] sm:$0xff]  }
 0x1a8   : > { %v2212_v18 = vadd.f32 %v17111_v15, %v2173_v0  ;;  %v14527_v21 = vpop.f32.mrb[56].mxu0  ;;  %v14575_v26 = vpop.f32.mrb[56].mxu1  ;;  %vm2243_vm12 = vcmp.gt.f32.partialorder %v2211_v58, 1.0  ;;  %v21032_v39 = vmax.f32 %v21030_v35, %v21031_v6  ;;  %v16027_v35 = vld [vmem:[%s20883_s3 + $0x220] sm:$0xff]   ;;  %v16023_v6 = vld [vmem:[%s20883_s3 + $0x168] sm:$0xff]  }
 0x1a9   : > { %vm2246_vm8 = vcmp.gt.f32.partialorder %v2214_v3, 1.0  ;;  %v1856_v10 = vmax.f32 %v21011_v56, %v14527_v21  ;;  %v1799_v11 = vpop.f32.mrb[57].mxu0  ;;  %v2121_v59 = vpop.f32.mrb[57].mxu1 }
 0x1aa   : > { %vm17368_vm13 = vmpackc.low %vm2246_vm8, %vm2245_vm6  ;;  %vm2244_vm14 = vcmp.gt.f32.partialorder %v2212_v18, 1.0  ;;  %v1854_v49 = vmax.f32 %v21016_v31, %v1799_v11  ;;  %v14528_v42 = vpop.f32.mrb[58].mxu0  ;;  %v14576_v44 = vpop.f32.mrb[58].mxu1  ;;  %v21033_v18 = vmov 0  ;;  %v21040_v31 = vmax.f32 %v21038_v43, %v21039_v27  ;;  %v16041_v43 = vld [vmem:[%s20883_s3 + $0x258] sm:$0xff]   ;;  %v16036_v27 = vld [vmem:[%s20883_s3 + $0x1a0] sm:$0xff]  }
 0x1ab   : > { %v21013_v60 = vsel %vm17368_vm13, 4294967295, %v21012_v60  ;;  %vm17375_vm2 = vmpackc.low %vm2244_vm14, %vm2243_vm12  ;;  %v2178_v14 = vmax.f32 %v1856_v10, %v14575_v26  ;;  %v1857_v47 = vmax.f32 %v21021_v20, %v14528_v42  ;;  %v1802_v45 = vpop.f32.mrb[59].mxu0  ;;  %v2124_v29 = vpop.f32.mrb[59].mxu1  ;;  %v21035_v26 = vld [vmem:[#allocation24_spill] sm:$0xff] }
 0x1ac   : > { %v21018_v13 = vsel %vm17375_vm2, 4294967295, %v21017_v13  ;;  %v2176_v30 = vmax.f32 %v1854_v49, %v2121_v59  ;;  %v1855_v34 = vmax.f32 %v21024_v28, %v1802_v45  ;;  %14617 = vmatprep.mubr.msk.bf16.mxu0 %vm17375_vm2, %v20916_v41  ;;  %14713 = vmatprep.mubr.msk.bf16.mxu1 %vm17375_vm2, %v20916_v41  ;;  %v21037_v54 = vmax.f32 %v21035_v26, %v21036_v53  ;;  %v16009_v28 = vld [vmem:[%s20883_s3 + $0x1d8] sm:$0xff]   ;;  %v16032_v26 = vld [vmem:[%s20883_s3 + $0x180] sm:$0xff]  }
 0x1ad   : > { %v2217_v24 = vadd.f32 %v17111_v15, %v2178_v14  ;;  %v2179_v25 = vmax.f32 %v1857_v47, %v14576_v44  ;;  %14618 = vmatmul.mubr.msk.bf16.gmra.mrb[84].mxu0 %vm17368_vm13, %v20916_v41  ;;  %14714 = vmatmul.mubr.msk.bf16.gmra.mrb[84].mxu1 %vm17368_vm13, %v20916_v41  ;;  %v21041_v47 = vmov 0  ;;  %v16037_v53 = vld [vmem:[%s20883_s3 + $0x240] sm:$0xff]  }
 0x1ae   : > { %v2215_v50 = vadd.f32 %v17111_v15, %v2176_v30  ;;  %v2177_v51 = vmax.f32 %v1855_v34, %v2124_v29  ;;  %v16006_v29 = vld [vmem:[%s20883_s3 + $0x1c8] sm:$0xff]   ;;  %v16002_v30 = vld [vmem:[%s20883_s3 + $0x110] sm:$0xff]  }
 0x1af   : > { %v2218_v38 = vadd.f32 %v17111_v15, %v2179_v25  ;;  %vm2249_vm6 = vcmp.gt.f32.partialorder %v2217_v24, 1.0  ;;  %v16007_v34 = vld [vmem:[%s20883_s3 + $0x128] sm:$0xff]   ;;  %v16010_v25 = vld [vmem:[%s20883_s3 + $0x130] sm:$0xff]  }
 0x1b0   : > { %v2216_v22 = vadd.f32 %v17111_v15, %v2177_v51  ;;  %v14531_v23 = vpop.f32.mrb[60].mxu0  ;;  %v14579_v2 = vpop.f32.mrb[60].mxu1  ;;  %vm2247_vm12 = vcmp.gt.f32.partialorder %v2215_v50, 1.0  ;;  %v16012_v24 = vld [vmem:[%s20883_s3 + $0x1e8] sm:$0xff]   ;;  %v16014_v50 = vld [vmem:[%s20883_s3 + $0x1f0] sm:$0xff]   ;;  %v16013_v51 = vld [vmem:[%s20883_s3 + $0x138] sm:$0xff]  }
 0x1b1   : > { %vm2250_vm8 = vcmp.gt.f32.partialorder %v2218_v38, 1.0  ;;  %v1860_v9 = vmax.f32 %v21027_v7, %v14531_v23  ;;  %v1815_v12 = vpop.f32.mrb[61].mxu0  ;;  %v2137_v8 = vpop.f32.mrb[61].mxu1  ;;  %v16015_v38 = vld [vmem:[%s20883_s3 + $0x1f8] sm:$0xff]   ;;  %v16021_v23 = vld [vmem:[%s20883_s3 + $0x200] sm:$0xff]   ;;  %v16024_v7 = vld [vmem:[%s20883_s3 + $0x210] sm:$0xff]  }
 0x1b2   : > { %vm17404_vm14 = vmpackc.low %vm2250_vm8, %vm2249_vm6  ;;  %vm2248_vm13 = vcmp.gt.f32.partialorder %v2216_v22, 1.0  ;;  %v1858_v58 = vmax.f32 %v21032_v39, %v1815_v12  ;;  %v14532_v0 = vpop.f32.mrb[62].mxu0  ;;  %v14580_v3 = vpop.f32.mrb[62].mxu1  ;;  %v16016_v22 = vld [vmem:[%s20883_s3 + $0x140] sm:$0xff]   ;;  %v16025_v12 = vld [vmem:[%s20883_s3 + $0x218] sm:$0xff]  }
 0x1b3   : > { %vm17411_vm2 = vmpackc.low %vm2248_vm13, %vm2247_vm12  ;;  %v2182_v21 = vmax.f32 %v1860_v9, %v14579_v2  ;;  %v1861_v56 = vmax.f32 %v21037_v54, %v14532_v0  ;;  %v1818_v10 = vpop.f32.mrb[63].mxu0  ;;  %v2140_v11 = vpop.f32.mrb[63].mxu1  ;;  %v16017_v2 = vld [vmem:[%s20883_s3 + $0x148] sm:$0xff]   ;;  %v16019_v9 = vld [vmem:[%s20883_s3 + $0x158] sm:$0xff]  }
 0x1b4   : > { %v21034_v18 = vsel %vm17411_vm2, 4294967295, %v21033_v18  ;;  %v2180_v59 = vmax.f32 %v1858_v58, %v2137_v8  ;;  %v1859_v49 = vmax.f32 %v21040_v31, %v1818_v10  ;;  %14621 = vmatprep.mubr.msk.bf16.mxu0 %vm17411_vm2, %v20916_v41  ;;  %14717 = vmatprep.mubr.msk.bf16.mxu1 %vm17411_vm2, %v20916_v41  ;;  %v16020_v8 = vld [vmem:[%s20883_s3 + $0x160] sm:$0xff]   ;;  %v16028_v39 = vld [vmem:[%s20883_s3 + $0x228] sm:$0xff]   ;;  %v16026_v58 = vld [vmem:[%s20883_s3 + $0x170] sm:$0xff]  }
 0x1b5   : > { %v2221_v42 = vadd.f32 %v17111_v15, %v2182_v21  ;;  %v2183_v44 = vmax.f32 %v1861_v56, %v14580_v3  ;;  %14622 = vmatmul.mubr.msk.bf16.gmra.mrb[88].mxu0 %vm17404_vm14, %v20916_v41  ;;  %14718 = vmatmul.mubr.msk.bf16.gmra.mrb[88].mxu1 %vm17404_vm14, %v20916_v41  ;;  %v16030_v0 = vld [vmem:[%s20883_s3 + $0x230] sm:$0xff]   ;;  %v16029_v3 = vld [vmem:[%s20883_s3 + $0x178] sm:$0xff]   ;;  %v16033_v54 = vld [vmem:[%s20883_s3 + $0x188] sm:$0xff]  }
 0x1b6   : > { %v2219_v14 = vadd.f32 %v17111_v15, %v2180_v59  ;;  %v2181_v16 = vmax.f32 %v1859_v49, %v2140_v11  ;;  %v16031_v21 = vld [vmem:[%s20883_s3 + $0x238] sm:$0xff]   ;;  %v16038_v56 = vld [vmem:[%s20883_s3 + $0x248] sm:$0xff]   ;;  %v16034_v10 = vld [vmem:[%s20883_s3 + $0x190] sm:$0xff]  }
 0x1b7   : > { %v2222_v17 = vadd.f32 %v17111_v15, %v2183_v44  ;;  %vm2253_vm13 = vcmp.gt.f32.partialorder %v2221_v42, 1.0  ;;  %v16040_v11 = vld [vmem:[%s20883_s3 + $0x250] sm:$0xff]   ;;  %v16035_v59 = vld [vmem:[%s20883_s3 + $0x198] sm:$0xff]   ;;  %v16043_v31 = vld [vmem:[%s20883_s3 + $0x260] sm:$0xff]  }
 0x1b8   : > { %v2220_v20 = vadd.f32 %v17111_v15, %v2181_v16  ;;  %vm2251_vm8 = vcmp.gt.f32.partialorder %v2219_v14, 1.0  ;;  %v16001_v15 = vld [vmem:[%s20883_s3 + $0x108] sm:$0xff]   ;;  %v16042_v14 = vld [vmem:[%s20883_s3 + $0x1b0] sm:$0xff]  }
 0x1b9   : > { %vm2254_vm6 = vcmp.gt.f32.partialorder %v2222_v17, 1.0  ;;  %v16039_v49 = vld [vmem:[%s20883_s3 + $0x1a8] sm:$0xff]  }
 0x1ba   : > { %vm17437_vm12 = vmpackc.low %vm2254_vm6, %vm2253_vm13  ;;  %vm2252_vm2 = vcmp.gt.f32.partialorder %v2220_v20, 1.0  ;;  %vm21047_vm13 = vnez %v21018_v13  ;;  %vm21048_vm6 = vnez %v21013_v60  ;;  %v16044_v42 = vld [vmem:[%s20883_s3 + $0x268] sm:$0xff]  }
 0x1bb   : > { %v21042_v47 = vsel %vm17437_vm12, 4294967295, %v21041_v47  ;;  %vm17441_vm0 = vmpackc.low %vm2252_vm2, %vm2251_vm8  ;;  %vm21046_vm2 = vnez %v21000_v33  ;;  %vm21049_vm8 = vnez %v21034_v18 }
 0x1bc   : > { %21043 = vst [vmem:[#allocation9_spill] sm:$0xff] %v21042_v47  ;;  %14625 = vmatprep.mubr.msk.bf16.mxu0 %vm17441_vm0, %v20916_v41  ;;  %14721 = vmatprep.mubr.msk.bf16.mxu1 %vm17441_vm0, %v20916_v41 }
 0x1bd   : > { %14626 = vmatmul.mubr.msk.bf16.gmra.mrb[92].mxu0 %vm17437_vm12, %v20916_v41  ;;  %14722 = vmatmul.mubr.msk.bf16.gmra.mrb[92].mxu1 %vm17437_vm12, %v20916_v41 }
 0x1be   : > { %14645 = vmatprep.mubr.msk.bf16.mxu0 %vm17145_vm5, %v20916_v41  ;;  %14741 = vmatprep.mubr.msk.bf16.mxu1 %vm17145_vm5, %v20916_v41 }
 0x1c5   : > { %14646 = vmatmul.mubr.msk.bf16.vlgmr.msra.gmra.mrb[96].mxu0 %vm17138_vm3, %v20916_v41  ;;  %14742 = vmatmul.mubr.msk.bf16.vlgmr.msra.gmra.mrb[96].mxu1 %vm17138_vm3, %v20916_v41 }
 0x1c6   : > { %14649 = vmatprep.mubr.msk.bf16.mxu0 %vm17195_vm11, %v20916_v41  ;;  %14745 = vmatprep.mubr.msk.bf16.mxu1 %vm17195_vm11, %v20916_v41 }
 0x1c7   : > { %14774 = vmatpush3.bf16.msra.mxu0 %v17317_v19  ;;  %14918 = vmatpush3.bf16.msra.mxu1 %v17324_v48  ;;  %v16004_v19 = vld [vmem:[%s20883_s3 + $0x120] sm:$0xff]  }
 0x1c8   : > { %14775 = vmatprep.subr.bf16.mxu0 %v16001_v15  ;;  %14919 = vmatprep.subr.bf16.mxu1 %v16006_v29  ;;  %v16011_v48 = vld [vmem:[%s20883_s3 + $0x1e0] sm:$0xff]  }
 0x1cb   : > { %14776 = vmatpush3.bf16.msra.mxu0 %v16001_v15  ;;  %14920 = vmatpush3.bf16.msra.mxu1 %v16006_v29  ;;  %v16046_v15 = vld [vmem:[%s20883_s3 + $0x270] sm:$0xff]   ;;  %v16045_v29 = vld [vmem:[%s20883_s3 + $0x1b8] sm:$0xff]  }
 0x1cc   : > { %14777 = vmatprep.subr.bf16.mxu0 %v16002_v30  ;;  %14921 = vmatprep.subr.bf16.mxu1 %v16008_v62 }
 0x1cd   : > { %14650 = vmatmul.mubr.msk.bf16.gmra.mrb[100].mxu0 %vm17188_vm9, %v20916_v41  ;;  %14746 = vmatmul.mubr.msk.bf16.gmra.mrb[100].mxu1 %vm17188_vm9, %v20916_v41 }
 0x1ce   : > { %14653 = vmatprep.mubr.msk.bf16.mxu0 %vm17243_vm1, %v20916_v41  ;;  %14749 = vmatprep.mubr.msk.bf16.mxu1 %vm17243_vm1, %v20916_v41 }
 0x1cf   : > { %14778 = vmatpush3.bf16.msra.mxu0 %v16002_v30  ;;  %14922 = vmatpush3.bf16.msra.mxu1 %v16008_v62  ;;  %v16047_v30 = vld [vmem:[%s20883_s3 + $0x278] sm:$0xff]  }
 0x1d0   : > { %14779 = vmatprep.subr.bf16.mxu0 %v16003_v63  ;;  %14923 = vmatprep.subr.bf16.mxu1 %v16009_v28 }
 0x1d3   : > { %14780 = vmatpush3.bf16.msra.mxu0 %v16003_v63  ;;  %14924 = vmatpush3.bf16.msra.mxu1 %v16009_v28  ;;  %v16048_v28 = vld [vmem:[%s20883_s3 + $0x280] sm:$0xff]  }
 0x1d4   : > { %14781 = vmatprep.subr.bf16.mxu0 %v16004_v19  ;;  %14925 = vmatprep.subr.bf16.mxu1 %v16011_v48 }
 0x1d5   : > { %14654 = vmatmul.mubr.msk.bf16.gmra.mrb[64].mxu0 %vm17236_vm15, %v20916_v41  ;;  %14750 = vmatmul.mubr.msk.bf16.gmra.mrb[104].mxu1 %vm17236_vm15, %v20916_v41 }
 0x1d6   : > { %14657 = vmatprep.mubr.msk.bf16.mxu0 %vm17291_vm10, %v20916_v41  ;;  %14753 = vmatprep.mubr.msk.bf16.mxu1 %vm17291_vm10, %v20916_v41 }
 0x1d7   : > { %14782 = vmatpush3.bf16.msra.mxu0 %v16004_v19  ;;  %14926 = vmatpush3.bf16.msra.mxu1 %v16011_v48 }
 0x1d8   : > { %14783 = vmatprep.subr.bf16.mxu0 %v16007_v34  ;;  %14927 = vmatprep.subr.bf16.mxu1 %v16012_v24 }
 0x1db   : > { %14784 = vmatpush3.bf16.msra.mxu0 %v16007_v34  ;;  %14928 = vmatpush3.bf16.msra.mxu1 %v16012_v24 }
 0x1dc   : > { %14785 = vmatprep.subr.bf16.mxu0 %v16010_v25  ;;  %14929 = vmatprep.subr.bf16.mxu1 %v16014_v50 }
 0x1dd   : > { %14658 = vmatmul.mubr.msk.bf16.gmra.mrb[104].mxu0 %vm17284_vm7, %v20916_v41  ;;  %14754 = vmatmul.mubr.msk.bf16.gmra.mrb[108].mxu1 %vm17284_vm7, %v20916_v41 }
 0x1de   : > { %14661 = vmatprep.mubr.msk.bf16.mxu0 %vm17337_vm4, %v20916_v41  ;;  %14757 = vmatprep.mubr.msk.bf16.mxu1 %vm17337_vm4, %v20916_v41 }
 0x1df   : > { %14786 = vmatpush3.bf16.msra.mxu0 %v16010_v25  ;;  %14930 = vmatpush3.bf16.msra.mxu1 %v16014_v50 }
 0x1e0   : > { %14787 = vmatprep.subr.bf16.mxu0 %v16013_v51  ;;  %14931 = vmatprep.subr.bf16.mxu1 %v16015_v38 }
 0x1e3   : > { %14788 = vmatpush3.bf16.msra.mxu0 %v16013_v51  ;;  %14932 = vmatpush3.bf16.msra.mxu1 %v16015_v38  ;;  %v16053_v51 = vld [vmem:[%s20883_s3 + $0x2c0] sm:$0xff]  }
 0x1e4   : > { %14821 = vmatprep.subr.bf16.mxu0 %v16016_v22  ;;  %14965 = vmatprep.subr.bf16.mxu1 %v16021_v23 }
 0x1e5   : > { %14662 = vmatmul.mubr.msk.bf16.gmra.mrb[108].mxu0 %vm21046_vm2, %v20916_v41  ;;  %14758 = vmatmul.mubr.msk.bf16.gmra.mrb[112].mxu1 %vm21046_vm2, %v20916_v41 }
 0x1e6   : > { %14665 = vmatprep.mubr.msk.bf16.mxu0 %vm21047_vm13, %v20916_v41  ;;  %14761 = vmatprep.mubr.msk.bf16.mxu1 %vm21047_vm13, %v20916_v41 }
 0x1ed   : > { %14666 = vmatmul.mubr.msk.bf16.gmra.mrb[112].mxu0 %vm21048_vm6, %v20916_v41  ;;  %14762 = vmatmul.mubr.msk.bf16.gmra.mrb[116].mxu1 %vm21048_vm6, %v20916_v41 }
 0x1ee   : > { %14669 = vmatprep.mubr.msk.bf16.mxu0 %vm21049_vm8, %v20916_v41  ;;  %14765 = vmatprep.mubr.msk.bf16.mxu1 %vm21049_vm8, %v20916_v41 }
 0x1f5   : > { %14670 = vmatmul.mubr.msk.bf16.gmra.mrb[80].mxu0 %vm17404_vm14, %v20916_v41  ;;  %14766 = vmatmul.mubr.msk.bf16.gmra.mrb[120].mxu1 %vm17404_vm14, %v20916_v41 }
 0x1f6   : > { %14673 = vmatprep.mubr.msk.bf16.mxu0 %vm17441_vm0, %v20916_v41  ;;  %14769 = vmatprep.mubr.msk.bf16.mxu1 %vm17441_vm0, %v20916_v41 }
 0x1fd   : > { %14674 = vmatmul.mubr.msk.bf16.gmra.mrb[116].mxu0 %vm17437_vm12, %v20916_v41  ;;  %14770 = vmatmul.mubr.msk.bf16.gmra.mrb[124].mxu1 %vm17437_vm12, %v20916_v41 }
 0x1fe   : > { %14789 = vmatprep.mubr.msk.bf16.mxu0 %vm17145_vm5, %v20916_v41  ;;  %14933 = vmatprep.mubr.msk.bf16.mxu1 %vm17145_vm5, %v20916_v41 }
 0x205   : > { %14790 = vmatmul.mubr.msk.bf16.vlgmr.msra.gmra.mrb[120].mxu0 %vm17138_vm3, %v20916_v41  ;;  %14934 = vmatmul.mubr.msk.bf16.vlgmr.msra.gmra.mrb[128].mxu1 %vm17138_vm3, %v20916_v41 }
 0x206   : > { %14793 = vmatprep.mubr.msk.bf16.mxu0 %vm17195_vm11, %v20916_v41  ;;  %14822 = vmatpush3.bf16.msra.mxu0 %v16016_v22 }
 0x207   : > { %14937 = vmatprep.mubr.msk.bf16.mxu1 %vm17195_vm11, %v20916_v41  ;;  %14823 = vmatprep.subr.bf16.mxu0 %v16017_v2 }
 0x208   : > { %14966 = vmatpush3.bf16.msra.mxu1 %v16021_v23 }
 0x209   : > { %14967 = vmatprep.subr.bf16.mxu1 %v16022_v4 }
 0x20a   : > { %14824 = vmatpush3.bf16.msra.mxu0 %v16017_v2 }
 0x20b   : > { %14825 = vmatprep.subr.bf16.mxu0 %v16018_v5 }
 0x20c   : > { %14968 = vmatpush3.bf16.msra.mxu1 %v16022_v4 }
 0x20d   : > { %14794 = vmatmul.mubr.msk.bf16.gmra.mrb[124].mxu0 %vm17188_vm9, %v20916_v41  ;;  %14938 = vmatmul.mubr.msk.bf16.gmra.mrb[132].mxu1 %vm17188_vm9, %v20916_v41 }
 0x20e   : > { %14797 = vmatprep.mubr.msk.bf16.mxu0 %vm17243_vm1, %v20916_v41  ;;  %14941 = vmatprep.mubr.msk.bf16.mxu1 %vm17243_vm1, %v20916_v41 }
 0x20f   : > { %14826 = vmatpush3.bf16.msra.mxu0 %v16018_v5  ;;  %14969 = vmatprep.subr.bf16.mxu1 %v16024_v7 }
 0x210   : > { %14827 = vmatprep.subr.bf16.mxu0 %v16019_v9  ;;  %14970 = vmatpush3.bf16.msra.mxu1 %v16024_v7 }
 0x211   : > { %14971 = vmatprep.subr.bf16.mxu1 %v16025_v12 }
 0x213   : > { %14828 = vmatpush3.bf16.msra.mxu0 %v16019_v9 }
 0x214   : > { %14829 = vmatprep.subr.bf16.mxu0 %v16020_v8  ;;  %14972 = vmatpush3.bf16.msra.mxu1 %v16025_v12 }
 0x215   : > { %14798 = vmatmul.mubr.msk.bf16.gmra.mrb[128].mxu0 %vm17236_vm15, %v20916_v41  ;;  %14942 = vmatmul.mubr.msk.bf16.gmra.mrb[136].mxu1 %vm17236_vm15, %v20916_v41 }
 0x216   : > { %14801 = vmatprep.mubr.msk.bf16.mxu0 %vm17291_vm10, %v20916_v41  ;;  %14945 = vmatprep.mubr.msk.bf16.mxu1 %vm17291_vm10, %v20916_v41 }
 0x217   : > { %14830 = vmatpush3.bf16.msra.mxu0 %v16020_v8  ;;  %14973 = vmatprep.subr.bf16.mxu1 %v16027_v35 }
 0x218   : > { %14831 = vmatprep.subr.bf16.mxu0 %v16023_v6  ;;  %14974 = vmatpush3.bf16.msra.mxu1 %v16027_v35 }
 0x219   : > { %14975 = vmatprep.subr.bf16.mxu1 %v16028_v39 }
 0x21b   : > { %14832 = vmatpush3.bf16.msra.mxu0 %v16023_v6 }
 0x21c   : > { %14833 = vmatprep.subr.bf16.mxu0 %v16026_v58  ;;  %14976 = vmatpush3.bf16.msra.mxu1 %v16028_v39 }
 0x21d   : > { %14802 = vmatmul.mubr.msk.bf16.gmra.mrb[132].mxu0 %vm17284_vm7, %v20916_v41  ;;  %14946 = vmatmul.mubr.msk.bf16.gmra.mrb[140].mxu1 %vm17284_vm7, %v20916_v41 }
 0x21e   : > { %14805 = vmatprep.mubr.msk.bf16.mxu0 %vm17337_vm4, %v20916_v41  ;;  %14949 = vmatprep.mubr.msk.bf16.mxu1 %vm17337_vm4, %v20916_v41 }
 0x21f   : > { %14834 = vmatpush3.bf16.msra.mxu0 %v16026_v58  ;;  %14977 = vmatprep.subr.bf16.mxu1 %v16030_v0 }
 0x220   : > { %14835 = vmatprep.subr.bf16.mxu0 %v16029_v3  ;;  %14978 = vmatpush3.bf16.msra.mxu1 %v16030_v0 }
 0x221   : > { %14979 = vmatprep.subr.bf16.mxu1 %v16031_v21 }
 0x223   : > { %14836 = vmatpush3.bf16.msra.mxu0 %v16029_v3 }
 0x224   : > { %14980 = vmatpush3.bf16.msra.mxu1 %v16031_v21  ;;  %14869 = vmatprep.subr.bf16.mxu0 %v16032_v26 }
 0x225   : > { %14806 = vmatmul.mubr.msk.bf16.gmra.mrb[136].mxu0 %vm21046_vm2, %v20916_v41  ;;  %14950 = vmatmul.mubr.msk.bf16.gmra.mrb[144].mxu1 %vm21046_vm2, %v20916_v41 }
 0x226   : > { %14809 = vmatprep.mubr.msk.bf16.mxu0 %vm21047_vm13, %v20916_v41  ;;  %14953 = vmatprep.mubr.msk.bf16.mxu1 %vm21047_vm13, %v20916_v41 }
 0x227   : > { %15013 = vmatprep.subr.bf16.mxu1 %v16037_v53 }
 0x22d   : > { %14810 = vmatmul.mubr.msk.bf16.gmra.mrb[140].mxu0 %vm21048_vm6, %v20916_v41  ;;  %14954 = vmatmul.mubr.msk.bf16.gmra.mrb[148].mxu1 %vm21048_vm6, %v20916_v41 }
 0x22e   : > { %14813 = vmatprep.mubr.msk.bf16.mxu0 %vm21049_vm8, %v20916_v41  ;;  %14957 = vmatprep.mubr.msk.bf16.mxu1 %vm21049_vm8, %v20916_v41 }
 0x235   : > { %14814 = vmatmul.mubr.msk.bf16.gmra.mrb[144].mxu0 %vm17404_vm14, %v20916_v41  ;;  %14958 = vmatmul.mubr.msk.bf16.gmra.mrb[152].mxu1 %vm17404_vm14, %v20916_v41 }
 0x236   : > { %14817 = vmatprep.mubr.msk.bf16.mxu0 %vm17441_vm0, %v20916_v41  ;;  %14961 = vmatprep.mubr.msk.bf16.mxu1 %vm17441_vm0, %v20916_v41 }
 0x23d   : > { %14818 = vmatmul.mubr.msk.bf16.gmra.mrb[148].mxu0 %vm17437_vm12, %v20916_v41  ;;  %14962 = vmatmul.mubr.msk.bf16.gmra.mrb[156].mxu1 %vm17437_vm12, %v20916_v41 }
 0x23e   : > { %14837 = vmatprep.mubr.msk.bf16.mxu0 %vm17145_vm5, %v20916_v41  ;;  %14981 = vmatprep.mubr.msk.bf16.mxu1 %vm17145_vm5, %v20916_v41 }
 0x245   : > { %14838 = vmatmul.mubr.msk.bf16.vlgmr.msra.gmra.mrb[152].mxu0 %vm17138_vm3, %v20916_v41  ;;  %14982 = vmatmul.mubr.msk.bf16.vlgmr.msra.gmra.mrb[160].mxu1 %vm17138_vm3, %v20916_v41 }
 0x246   : > { %14841 = vmatprep.mubr.msk.bf16.mxu0 %vm17195_vm11, %v20916_v41  ;;  %14870 = vmatpush3.bf16.msra.mxu0 %v16032_v26 }
 0x247   : > { %14985 = vmatprep.mubr.msk.bf16.mxu1 %vm17195_vm11, %v20916_v41  ;;  %14871 = vmatprep.subr.bf16.mxu0 %v16033_v54 }
 0x248   : > { %15014 = vmatpush3.bf16.msra.mxu1 %v16037_v53 }
 0x249   : > { %15015 = vmatprep.subr.bf16.mxu1 %v16038_v56 }
 0x24a   : > { %14872 = vmatpush3.bf16.msra.mxu0 %v16033_v54 }
 0x24b   : > { %14873 = vmatprep.subr.bf16.mxu0 %v16034_v10 }
 0x24c   : > { %15016 = vmatpush3.bf16.msra.mxu1 %v16038_v56 }
 0x24d   : > { %14842 = vmatmul.mubr.msk.bf16.gmra.mrb[156].mxu0 %vm17188_vm9, %v20916_v41  ;;  %14986 = vmatmul.mubr.msk.bf16.gmra.mrb[164].mxu1 %vm17188_vm9, %v20916_v41 }
 0x24e   : > { %14845 = vmatprep.mubr.msk.bf16.mxu0 %vm17243_vm1, %v20916_v41  ;;  %14989 = vmatprep.mubr.msk.bf16.mxu1 %vm17243_vm1, %v20916_v41 }
 0x24f   : > { %14874 = vmatpush3.bf16.msra.mxu0 %v16034_v10  ;;  %15017 = vmatprep.subr.bf16.mxu1 %v16040_v11 }
 0x250   : > { %14875 = vmatprep.subr.bf16.mxu0 %v16035_v59  ;;  %15018 = vmatpush3.bf16.msra.mxu1 %v16040_v11 }
 0x251   : > { %15019 = vmatprep.subr.bf16.mxu1 %v16041_v43 }
 0x253   : > { %14876 = vmatpush3.bf16.msra.mxu0 %v16035_v59 }
 0x254   : > { %14877 = vmatprep.subr.bf16.mxu0 %v16036_v27  ;;  %15020 = vmatpush3.bf16.msra.mxu1 %v16041_v43  ;;  %v16049_v43 = vld [vmem:[%s20883_s3 + $0x288] sm:$0xff]  }
 0x255   : > { %14846 = vmatmul.mubr.msk.bf16.gmra.mrb[160].mxu0 %vm17236_vm15, %v20916_v41  ;;  %14990 = vmatmul.mubr.msk.bf16.gmra.mrb[168].mxu1 %vm17236_vm15, %v20916_v41 }
 0x256   : > { %14849 = vmatprep.mubr.msk.bf16.mxu0 %vm17291_vm10, %v20916_v41  ;;  %14993 = vmatprep.mubr.msk.bf16.mxu1 %vm17291_vm10, %v20916_v41 }
 0x257   : > { %14878 = vmatpush3.bf16.msra.mxu0 %v16036_v27  ;;  %15021 = vmatprep.subr.bf16.mxu1 %v16043_v31  ;;  %v16054_v27 = vld [vmem:[%s20883_s3 + $0x2c8] sm:$0xff]  }
 0x258   : > { %v17819_v44 = vpop.f32.mrb[64].mxu1  ;;  %14879 = vmatprep.subr.bf16.mxu0 %v16039_v49  ;;  %15022 = vmatpush3.bf16.msra.mxu1 %v16043_v31 }
 0x259   : > { %v17824_v16 = vpop.f32.mrb[65].mxu1  ;;  %15023 = vmatprep.subr.bf16.mxu1 %v16044_v42 }
 0x25a   : > { %v17826_v17 = vpop.f32.mrb[66].mxu1 }
 0x25b   : > { %v17828_v20 = vpop.f32.mrb[67].mxu1  ;;  %14880 = vmatpush3.bf16.msra.mxu0 %v16039_v49 }
 0x25c   : > { %14881 = vmatprep.subr.bf16.mxu0 %v16042_v14  ;;  %15024 = vmatpush3.bf16.msra.mxu1 %v16044_v42  ;;  %v16050_v42 = vld [vmem:[%s20883_s3 + $0x290] sm:$0xff]  }
 0x25d   : > { %14850 = vmatmul.mubr.msk.bf16.gmra.mrb[164].mxu0 %vm17284_vm7, %v20916_v41  ;;  %14994 = vmatmul.mubr.msk.bf16.gmra.mrb[172].mxu1 %vm17284_vm7, %v20916_v41 }
 0x25e   : > { %14853 = vmatprep.mubr.msk.bf16.mxu0 %vm17337_vm4, %v20916_v41  ;;  %14997 = vmatprep.mubr.msk.bf16.mxu1 %vm17337_vm4, %v20916_v41 }
 0x25f   : > { %14882 = vmatpush3.bf16.msra.mxu0 %v16042_v14  ;;  %15025 = vmatprep.subr.bf16.mxu1 %v16046_v15  ;;  %v16056_v14 = vld [vmem:[%s20883_s3 + $0x2d0] sm:$0xff]  }
 0x260   : > { %v14603_v62 = vpop.f32.mrb[68].mxu0  ;;  %v14699_v63 = vpop.f32.mrb[68].mxu1  ;;  %14883 = vmatprep.subr.bf16.mxu0 %v16045_v29  ;;  %15026 = vmatpush3.bf16.msra.mxu1 %v16046_v15 }
 0x261   : > { %v17854_v19 = vpop.f32.mrb[69].mxu0  ;;  %v17856_v48 = vpop.f32.mrb[69].mxu1  ;;  %15027 = vmatprep.subr.bf16.mxu1 %v16047_v30 }
 0x262   : > { %v14604_v34 = vpop.f32.mrb[70].mxu0  ;;  %v14700_v24 = vpop.f32.mrb[70].mxu1 }
 0x263   : > { %v2452_v25 = vpop.f32.mrb[71].mxu0  ;;  %v2950_v50 = vpop.f32.mrb[71].mxu1  ;;  %14884 = vmatpush3.bf16.msra.mxu0 %v16045_v29  ;;  %v16051_v34 = vld [vmem:[%s20883_s3 + $0x298] sm:$0xff]  }
 0x264   : > { %15028 = vmatpush3.bf16.msra.mxu1 %v16047_v30  ;;  %15061 = vmatprep.subr.bf16.mxu0 %v16048_v28  ;;  %v16057_v24 = vld [vmem:[%s20883_s3 + $0x2d8] sm:$0xff]  }
 0x265   : > { %14854 = vmatmul.mubr.msk.bf16.gmra.mrb[64].mxu0 %vm21046_vm2, %v20916_v41  ;;  %14998 = vmatmul.mubr.msk.bf16.gmra.mrb[176].mxu1 %vm21046_vm2, %v20916_v41 }
 0x266   : > { %14857 = vmatprep.mubr.msk.bf16.mxu0 %vm21047_vm13, %v20916_v41  ;;  %15001 = vmatprep.mubr.msk.bf16.mxu1 %vm21047_vm13, %v20916_v41 }
 0x267   : > { %15109 = vmatprep.subr.bf16.mxu1 %v16053_v51 }
 0x268   : > { %v17873_v38 = vpop.f32.mrb[72].mxu1 }
 0x269   : > { %v17875_v22 = vpop.f32.mrb[73].mxu1 }
 0x26a   : > { %v17877_v23 = vpop.f32.mrb[74].mxu1 }
 0x26b   : > { %v17879_v2 = vpop.f32.mrb[75].mxu1 }
 0x26c   : > { %v3072_v37 = vrot.slane %v17879_v2, 1 }
 0x26d   : > { %14858 = vmatmul.mubr.msk.bf16.gmra.mrb[168].mxu0 %vm21048_vm6, %v20916_v41  ;;  %15002 = vmatmul.mubr.msk.bf16.gmra.mrb[180].mxu1 %vm21048_vm6, %v20916_v41 }
 0x26e   : > { %14861 = vmatprep.mubr.msk.bf16.mxu0 %vm21049_vm8, %v20916_v41  ;;  %15005 = vmatprep.mubr.msk.bf16.mxu1 %vm21049_vm8, %v20916_v41 }
 0x270   : > { %v14611_v4 = vpop.f32.mrb[76].mxu0  ;;  %v14707_v5 = vpop.f32.mrb[76].mxu1 }
 0x271   : > { %v17893_v7 = vpop.f32.mrb[77].mxu0  ;;  %v17895_v9 = vpop.f32.mrb[77].mxu1  ;;  %v16059_v4 = vld [vmem:[%s20883_s3 + $0x2e0] sm:$0xff]  }
 0x272   : > { %v14612_v12 = vpop.f32.mrb[78].mxu0  ;;  %v14708_v8 = vpop.f32.mrb[78].mxu1 }
 0x273   : > { %v2481_v35 = vpop.f32.mrb[79].mxu0  ;;  %v2979_v6 = vpop.f32.mrb[79].mxu1 }
 0x275   : > { %14862 = vmatmul.mubr.msk.bf16.gmra.mrb[72].mxu0 %vm17404_vm14, %v20916_v41  ;;  %15006 = vmatmul.mubr.msk.bf16.gmra.mrb[184].mxu1 %vm17404_vm14, %v20916_v41 }
 0x276   : > { %14865 = vmatprep.mubr.msk.bf16.mxu0 %vm17441_vm0, %v20916_v41  ;;  %15009 = vmatprep.mubr.msk.bf16.mxu1 %vm17441_vm0, %v20916_v41 }
 0x278   : > { %v17909_v39 = vpop.f32.mrb[80].mxu1 }
 0x279   : > { %v17911_v58 = vpop.f32.mrb[81].mxu1 }
 0x27a   : > { %v17913_v0 = vpop.f32.mrb[82].mxu1 }
 0x27b   : > { %v17915_v3 = vpop.f32.mrb[83].mxu1 }
 0x27d   : > { %14866 = vmatmul.mubr.msk.bf16.gmra.mrb[172].mxu0 %vm17437_vm12, %v20916_v41  ;;  %15010 = vmatmul.mubr.msk.bf16.gmra.mrb[188].mxu1 %vm17437_vm12, %v20916_v41 }
 0x27e   : > { %14885 = vmatprep.mubr.msk.bf16.mxu0 %vm17145_vm5, %v20916_v41  ;;  %15029 = vmatprep.mubr.msk.bf16.mxu1 %vm17145_vm5, %v20916_v41 }
 0x280   : > { %v14619_v21 = vpop.f32.mrb[84].mxu0  ;;  %v14715_v26 = vpop.f32.mrb[84].mxu1 }
 0x281   : > { %v17929_v53 = vpop.f32.mrb[85].mxu0  ;;  %v17931_v54 = vpop.f32.mrb[85].mxu1  ;;  %v16055_v26 = vld [vmem:[%s20883_s3 + $0x2a8] sm:$0xff]  }
 0x282   : > { %v14620_v56 = vpop.f32.mrb[86].mxu0  ;;  %v14716_v10 = vpop.f32.mrb[86].mxu1 }
 0x283   : > { %v2510_v11 = vpop.f32.mrb[87].mxu0  ;;  %v3008_v59 = vpop.f32.mrb[87].mxu1  ;;  %v16060_v56 = vld [vmem:[%s20883_s3 + $0x2e8] sm:$0xff]  }
 0x284   : > { %v16058_v59 = vld [vmem:[%s20883_s3 + $0x2b0] sm:$0xff]  }
 0x285   : > { %14886 = vmatmul.mubr.msk.bf16.vlgmr.msra.gmra.mrb[176].mxu0 %vm17138_vm3, %v20916_v41  ;;  %15030 = vmatmul.mubr.msk.bf16.vlgmr.msra.gmra.mrb[192].mxu1 %vm17138_vm3, %v20916_v41 }
 0x286   : > { %14889 = vmatprep.mubr.msk.bf16.mxu0 %vm17195_vm11, %v20916_v41  ;;  %15033 = vmatprep.mubr.msk.bf16.mxu1 %vm17195_vm11, %v20916_v41 }
 0x287   : > { %15062 = vmatpush3.bf16.msra.mxu0 %v16048_v28  ;;  %15110 = vmatpush3.bf16.msra.mxu1 %v16053_v51  ;;  %v16052_v51 = vld [vmem:[%s20883_s3 + $0x2a0] sm:$0xff]  }
 0x288   : > { %v17951_v31 = vpop.f32.mrb[88].mxu0  ;;  %v17953_v49 = vpop.f32.mrb[88].mxu1  ;;  %15063 = vmatprep.subr.bf16.mxu0 %v16049_v43  ;;  %15111 = vmatprep.subr.bf16.mxu1 %v16054_v27 }
 0x289   : > { %v17961_v15 = vpop.f32.mrb[89].mxu0  ;;  %v17963_v29 = vpop.f32.mrb[89].mxu1 }
 0x28a   : > { %v17965_v30 = vpop.f32.mrb[90].mxu0  ;;  %v17967_v62 = vpop.f32.mrb[90].mxu1 }
 0x28b   : > { %v17969_v63 = vpop.f32.mrb[91].mxu0  ;;  %v17971_v28 = vpop.f32.mrb[91].mxu1  ;;  %15064 = vmatpush3.bf16.msra.mxu0 %v16049_v43  ;;  %15112 = vmatpush3.bf16.msra.mxu1 %v16054_v27  ;;  %v16062_v43 = vld [vmem:[%s20883_s3 + $0x2f0] sm:$0xff]   ;;  %v3073_v27 = vrot.slane %v17873_v38, 1 }
 0x28c   : > { %15065 = vmatprep.subr.bf16.mxu0 %v16050_v42  ;;  %15113 = vmatprep.subr.bf16.mxu1 %v16056_v14 }
 0x28d   : > { %14890 = vmatmul.mubr.msk.bf16.gmra.mrb[180].mxu0 %vm17188_vm9, %v20916_v41  ;;  %15034 = vmatmul.mubr.msk.bf16.gmra.mrb[196].mxu1 %vm17188_vm9, %v20916_v41 }
 0x28e   : > { %14893 = vmatprep.mubr.msk.bf16.mxu0 %vm17243_vm1, %v20916_v41  ;;  %15037 = vmatprep.mubr.msk.bf16.mxu1 %vm17243_vm1, %v20916_v41 }
 0x28f   : > { %15066 = vmatpush3.bf16.msra.mxu0 %v16050_v42  ;;  %15114 = vmatpush3.bf16.msra.mxu1 %v16056_v14 }
 0x290   : > { %v14627_v25 = vpop.f32.mrb[92].mxu0  ;;  %v14723_v50 = vpop.f32.mrb[92].mxu1  ;;  %15067 = vmatprep.subr.bf16.mxu0 %v16051_v34  ;;  %15115 = vmatprep.subr.bf16.mxu1 %v16057_v24 }
 0x291   : > { %v17997_v5 = vpop.f32.mrb[93].mxu0  ;;  %v17999_v12 = vpop.f32.mrb[93].mxu1 }
 0x292   : > { %v14628_v8 = vpop.f32.mrb[94].mxu0  ;;  %v14724_v35 = vpop.f32.mrb[94].mxu1 }
 0x293   : > { %v2539_v6 = vpop.f32.mrb[95].mxu0  ;;  %v3037_v21 = vpop.f32.mrb[95].mxu1  ;;  %15068 = vmatpush3.bf16.msra.mxu0 %v16051_v34  ;;  %15116 = vmatpush3.bf16.msra.mxu1 %v16057_v24  ;;  %v3071_v24 = vrot.slane %v17875_v22, 1  ;;  %v16061_v22 = vld [vmem:[%s20883_s3 + $0x2b8] sm:$0xff]  }
 0x294   : > { %15069 = vmatprep.subr.bf16.mxu0 %v16052_v51  ;;  %15117 = vmatprep.subr.bf16.mxu1 %v16059_v4 }
 0x295   : > { %14894 = vmatmul.mubr.msk.bf16.gmra.mrb[184].mxu0 %vm17236_vm15, %v20916_v41  ;;  %15038 = vmatmul.mubr.msk.bf16.gmra.mrb[200].mxu1 %vm17236_vm15, %v20916_v41 }
 0x296   : > { %14897 = vmatprep.mubr.msk.bf16.mxu0 %vm17291_vm10, %v20916_v41  ;;  %15041 = vmatprep.mubr.msk.bf16.mxu1 %vm17291_vm10, %v20916_v41 }
 0x297   : > { %15070 = vmatpush3.bf16.msra.mxu0 %v16052_v51  ;;  %15118 = vmatpush3.bf16.msra.mxu1 %v16059_v4  ;;  %v3074_v4 = vrot.slane %v17877_v23, 1  ;;  %v16063_v23 = vld [vmem:[%s20883_s3 + $0x2f8] sm:$0xff]  }
 0x298   : > { %v14647_v10 = vpop.f32.mrb[96].mxu0  ;;  %v14743_v11 = vpop.f32.mrb[96].mxu1  ;;  %15071 = vmatprep.subr.bf16.mxu0 %v16055_v26  ;;  %15119 = vmatprep.subr.bf16.mxu1 %v16060_v56 }
 0x299   : > { %v2794_v42 = vrot.slane %v14647_v10, 1  ;;  %v2667_v14 = vpop.f32.mrb[97].mxu0  ;;  %v3225_v34 = vpop.f32.mrb[97].mxu1  ;;  %v3367_v35 = vrot.slane %v14743_v11, 2 }
 0x29a   : > { %v2792_v25 = vrot.slane %v2667_v14, 1  ;;  %v14648_v50 = vpop.f32.mrb[98].mxu0  ;;  %v14744_v51 = vpop.f32.mrb[98].mxu1  ;;  %v3365_v10 = vrot.slane %v3225_v34, 2 }
 0x29b   : > { %v15813_v8 = vadd.f32 %v3073_v27, %v2794_v42  ;;  %v2795_v6 = vrot.slane %v14648_v50, 1  ;;  %v2670_v21 = vpop.f32.mrb[99].mxu0  ;;  %v3228_v41 = vpop.f32.mrb[99].mxu1  ;;  %15072 = vmatpush3.bf16.msra.mxu0 %v16055_v26  ;;  %15120 = vmatpush3.bf16.msra.mxu1 %v16060_v56  ;;  %v3368_v26 = vrot.slane %v14744_v51, 2  ;;  %v21050_v56 = vmov 1.0|1.0  }
 0x29c   : > { %v15817_v38 = vadd.f32 %v3071_v24, %v2792_v25  ;;  %v2793_v46 = vrot.slane %v2670_v21, 1  ;;  %15073 = vmatprep.subr.bf16.mxu0 %v16058_v59  ;;  %15121 = vmatprep.subr.bf16.mxu1 %v16062_v43  ;;  %v3366_v14 = vrot.slane %v3228_v41, 2  ;;  %v18058_v41 = vld [vmem:[%s20883_s3 + $0x300] sm:$0xff]  }
 0x29d   : > { %v18035_v11 = vadd.f32 %v15813_v8, %v3367_v35  ;;  %v15821_v27 = vadd.f32 %v3074_v4, %v2795_v6  ;;  %14898 = vmatmul.mubr.msk.bf16.gmra.mrb[188].mxu0 %vm17284_vm7, %v21050_v56  ;;  %15042 = vmatmul.mubr.msk.bf16.gmra.mrb[204].mxu1 %vm17284_vm7, %v21050_v56  ;;  %v3075_v6 = vrot.slane %v17895_v9, 1 }
 0x29e   : > { %v18043_v2 = vadd.f32 %v15817_v38, %v3365_v10  ;;  %v15825_v42 = vadd.f32 %v3072_v37, %v2793_v46  ;;  %14901 = vmatprep.mubr.msk.bf16.mxu0 %vm17337_vm4, %v21050_v56  ;;  %15045 = vmatprep.mubr.msk.bf16.mxu1 %vm17337_vm4, %v21050_v56  ;;  %v18063_v46 = vld [vmem:[%s20883_s3 + $0x340] sm:$0xff]  }
 0x29f   : > { %v18051_v34 = vadd.f32 %v15821_v27, %v3368_v26  ;;  %15074 = vmatpush3.bf16.msra.mxu0 %v16058_v59  ;;  %15122 = vmatpush3.bf16.msra.mxu1 %v16062_v43  ;;  %v3051_v26 = vrot.slane %v17824_v16, 1 }
 0x2a0   : > { %v18053_v24 = vadd.f32 %v15825_v42, %v3366_v14  ;;  %v14651_v25 = vpop.f32.mrb[100].mxu0  ;;  %v14747_v50 = vpop.f32.mrb[100].mxu1  ;;  %15075 = vmatprep.subr.bf16.mxu0 %v16061_v22  ;;  %15123 = vmatprep.subr.bf16.mxu1 %v16063_v23 }
 0x2a1   : > { %v2683_v37 = vpop.f32.mrb[101].mxu0  ;;  %v3241_v51 = vpop.f32.mrb[101].mxu1  ;;  %v3054_v25 = vrot.slane %v17826_v17, 1 }
 0x2a2   : > { %v2796_v59 = vrot.slane %v2683_v37, 1  ;;  %v14652_v43 = vpop.f32.mrb[102].mxu0  ;;  %v14748_v4 = vpop.f32.mrb[102].mxu1  ;;  %v3369_v10 = vrot.slane %v3241_v51, 2 }
 0x2a3   : > { %v2686_v8 = vpop.f32.mrb[103].mxu0  ;;  %v3244_v35 = vpop.f32.mrb[103].mxu1  ;;  %15076 = vmatpush3.bf16.msra.mxu0 %v16061_v22  ;;  %15124 = vmatpush3.bf16.msra.mxu1 %v16063_v23  ;;  %v3053_v22 = vrot.slane %v17819_v44, 1 }
 0x2a4   : > { %v2806_v21 = vadd.f32 %v2796_v59, %v17893_v7  ;;  %15157 = vmatprep.subr.bf16.mxu0 %v18058_v41  ;;  %15205 = vmatprep.subr.bf16.mxu1 %v18063_v46  ;;  %v3052_v59 = vrot.slane %v17828_v20, 1 }
 0x2a5   : > { %14902 = vmatmul.mubr.msk.bf16.gmra.mrb[192].mxu0 %vm21046_vm2, %v21050_v56  ;;  %15046 = vmatmul.mubr.msk.bf16.gmra.mrb[208].mxu1 %vm21046_vm2, %v21050_v56 }
 0x2a6   : > { %v3085_v38 = vadd.f32 %v3075_v6, %v2806_v21  ;;  %14905 = vmatprep.mubr.msk.bf16.mxu0 %vm21047_vm13, %v21050_v56  ;;  %15049 = vmatprep.mubr.msk.bf16.mxu1 %vm21047_vm13, %v21050_v56  ;;  %v3055_v6 = vrot.slane %v17856_v48, 1 }
 0x2a8   : > { %v18081_v7 = vadd.f32 %v3369_v10, %v3085_v38  ;;  %v14751_v9 = vpop.f32.mrb[104].mxu1 }
 0x2a9   : > { %v3347_v23 = vrot.slane %v14751_v9, 1  ;;  %v3254_v27 = vpop.f32.mrb[105].mxu1 }
 0x2aa   : > { %v3345_v42 = vrot.slane %v3254_v27, 1  ;;  %v14752_v14 = vpop.f32.mrb[106].mxu1 }
 0x2ab   : > { %v18086_v50 = vadd.f32 %v3347_v23, %v3053_v22  ;;  %v3348_v37 = vrot.slane %v14752_v14, 1  ;;  %v3257_v51 = vpop.f32.mrb[107].mxu1 }
 0x2ac   : > { %v18089_v43 = vadd.f32 %v3345_v42, %v3051_v26  ;;  %v3346_v4 = vrot.slane %v3257_v51, 1 }
 0x2ad   : > { %v18091_v8 = vadd.f32 %v3348_v37, %v3054_v25  ;;  %14906 = vmatmul.mubr.msk.bf16.gmra.mrb[196].mxu0 %vm21048_vm6, %v21050_v56  ;;  %15050 = vmatmul.mubr.msk.bf16.gmra.mrb[212].mxu1 %vm21048_vm6, %v21050_v56 }
 0x2ae   : > { %v18099_v44 = vadd.f32 %v3346_v4, %v3052_v59  ;;  %14909 = vmatprep.mubr.msk.bf16.mxu0 %vm21049_vm8, %v21050_v56  ;;  %15053 = vmatprep.mubr.msk.bf16.mxu1 %vm21049_vm8, %v21050_v56  ;;  %v3113_v4 = vrot.slane %v17953_v49, 1 }
 0x2b0   : > { %v14659_v16 = vpop.f32.mrb[104].mxu0  ;;  %v14755_v17 = vpop.f32.mrb[108].mxu1 }
 0x2b1   : > { %v2712_v20 = vpop.f32.mrb[105].mxu0  ;;  %v3270_v35 = vpop.f32.mrb[109].mxu1 }
 0x2b2   : > { %v2786_v21 = vadd.f32 %v2712_v20, %v17854_v19  ;;  %v14660_v38 = vpop.f32.mrb[106].mxu0  ;;  %v14756_v10 = vpop.f32.mrb[110].mxu1  ;;  %v3349_v27 = vrot.slane %v3270_v35, 1 }
 0x2b3   : > { %v2715_v9 = vpop.f32.mrb[107].mxu0  ;;  %v3273_v22 = vpop.f32.mrb[111].mxu1  ;;  %v3114_v10 = vrot.slane %v17967_v62, 1 }
 0x2b4   : > { %v3065_v23 = vadd.f32 %v3055_v6, %v2786_v21  ;;  %v3111_v6 = vrot.slane %v17963_v29, 1 }
 0x2b5   : > { %14910 = vmatmul.mubr.msk.bf16.gmra.mrb[64].mxu0 %vm17404_vm14, %v21050_v56  ;;  %15054 = vmatmul.mubr.msk.bf16.gmra.mrb[216].mxu1 %vm17404_vm14, %v21050_v56 }
 0x2b6   : > { %v18115_v26 = vadd.f32 %v3349_v27, %v3065_v23  ;;  %14913 = vmatprep.mubr.msk.bf16.mxu0 %vm17441_vm0, %v21050_v56  ;;  %15057 = vmatprep.mubr.msk.bf16.mxu1 %vm17441_vm0, %v21050_v56 }
 0x2b8   : > { %v14663_v19 = vpop.f32.mrb[108].mxu0  ;;  %v14759_v48 = vpop.f32.mrb[112].mxu1 }
 0x2b9   : > { %v2819_v42 = vrot.slane %v14663_v19, 1  ;;  %v2725_v14 = vpop.f32.mrb[109].mxu0  ;;  %v3283_v25 = vpop.f32.mrb[113].mxu1  ;;  %v3407_v22 = vrot.slane %v14759_v48, 2 }
 0x2ba   : > { %v2817_v37 = vrot.slane %v2725_v14, 1  ;;  %v14664_v51 = vpop.f32.mrb[110].mxu0  ;;  %v14760_v59 = vpop.f32.mrb[114].mxu1  ;;  %v3405_v29 = vrot.slane %v3283_v25, 2 }
 0x2bb   : > { %v2829_v16 = vadd.f32 %v17951_v31, %v2819_v42  ;;  %v2820_v17 = vrot.slane %v14664_v51, 1  ;;  %v2728_v20 = vpop.f32.mrb[111].mxu0  ;;  %v3286_v35 = vpop.f32.mrb[115].mxu1  ;;  %v3112_v31 = vrot.slane %v17971_v28, 1  ;;  %v3408_v27 = vrot.slane %v14760_v59, 2 }
 0x2bc   : > { %v2827_v21 = vadd.f32 %v2817_v37, %v17961_v15  ;;  %v2818_v38 = vrot.slane %v2728_v20, 1  ;;  %v3406_v28 = vrot.slane %v3286_v35, 2  ;;  %v16065_v35 = vld [vmem:[%s20883_s3 + $0x308] sm:$0xff]  }
 0x2bd   : > { %v3123_v9 = vadd.f32 %v3113_v4, %v2829_v16  ;;  %v2830_v23 = vadd.f32 %v17965_v30, %v2820_v17  ;;  %14914 = vmatmul.mubr.msk.bf16.gmra.mrb[200].mxu0 %vm17437_vm12, %v21050_v56  ;;  %15058 = vmatmul.mubr.msk.bf16.gmra.mrb[220].mxu1 %vm17437_vm12, %v21050_v56 }
 0x2be   : > { %v3121_v49 = vadd.f32 %v3111_v6, %v2827_v21  ;;  %v2828_v15 = vadd.f32 %v2818_v38, %v17969_v63  ;;  %15077 = vmatprep.mubr.msk.bf16.mxu0 %vm17145_vm5, %v21050_v56  ;;  %15125 = vmatprep.mubr.msk.bf16.mxu1 %vm17145_vm5, %v21050_v56  ;;  %v3115_v21 = vrot.slane %v17999_v12, 1  ;;  %v16070_v38 = vld [vmem:[%s20883_s3 + $0x348] sm:$0xff]  }
 0x2bf   : > { %v18143_v30 = vadd.f32 %v3407_v22, %v3123_v9  ;;  %v3124_v62 = vadd.f32 %v3114_v10, %v2830_v23  ;;  %v3091_v9 = vrot.slane %v17911_v58, 1 }
 0x2c0   : > { %v18145_v19 = vadd.f32 %v3405_v29, %v3121_v49  ;;  %v3122_v48 = vadd.f32 %v3112_v31, %v2828_v15  ;;  %v14667_v42 = vpop.f32.mrb[112].mxu0  ;;  %v14763_v14 = vpop.f32.mrb[116].mxu1  ;;  %v16066_v49 = vld [vmem:[%s20883_s3 + $0x310] sm:$0xff]  }
 0x2c1   : > { %v18147_v25 = vadd.f32 %v3408_v27, %v3124_v62  ;;  %v2741_v63 = vpop.f32.mrb[113].mxu0  ;;  %v3299_v37 = vpop.f32.mrb[117].mxu1  ;;  %v3092_v62 = vrot.slane %v17915_v3, 1  ;;  %v16067_v3 = vld [vmem:[%s20883_s3 + $0x318] sm:$0xff]  }
 0x2c2   : > { %v18149_v51 = vadd.f32 %v3406_v28, %v3122_v48  ;;  %v2821_v4 = vrot.slane %v2741_v63, 1  ;;  %v14668_v16 = vpop.f32.mrb[114].mxu0  ;;  %v14764_v17 = vpop.f32.mrb[118].mxu1  ;;  %v3409_v12 = vrot.slane %v3299_v37, 2 }
 0x2c3   : > { %v2744_v20 = vpop.f32.mrb[115].mxu0  ;;  %v3302_v6 = vpop.f32.mrb[119].mxu1 }
 0x2c4   : > { %v2831_v59 = vadd.f32 %v2821_v4, %v17997_v5  ;;  %v3093_v5 = vrot.slane %v17909_v39, 1  ;;  %v16072_v39 = vld [vmem:[%s20883_s3 + $0x350] sm:$0xff]   ;;  %v16073_v6 = vld [vmem:[%s20883_s3 + $0x358] sm:$0xff]  }
 0x2c5   : > { %15078 = vmatmul.mubr.msk.bf16.vlgmr.msra.gmra.mrb[204].mxu0 %vm17138_vm3, %v21050_v56  ;;  %15126 = vmatmul.mubr.msk.bf16.vlgmr.msra.gmra.mrb[224].mxu1 %vm17138_vm3, %v21050_v56 }
 0x2c6   : > { %v3125_v10 = vadd.f32 %v3115_v21, %v2831_v59  ;;  %15081 = vmatprep.mubr.msk.bf16.mxu0 %vm17195_vm11, %v21050_v56  ;;  %15129 = vmatprep.mubr.msk.bf16.mxu1 %vm17195_vm11, %v21050_v56 }
 0x2c7   : > { %15158 = vmatpush3.bf16.msra.mxu0 %v18058_v41  ;;  %15206 = vmatpush3.bf16.msra.mxu1 %v18063_v46  ;;  %v3094_v41 = vrot.slane %v17913_v0, 1 }
 0x2c8   : > { %v18175_v22 = vadd.f32 %v3409_v12, %v3125_v10  ;;  %v14671_v23 = vpop.f32.mrb[80].mxu0  ;;  %v14767_v31 = vpop.f32.mrb[120].mxu1  ;;  %15159 = vmatprep.subr.bf16.mxu0 %v16065_v35  ;;  %15207 = vmatprep.subr.bf16.mxu1 %v16070_v38  ;;  %v16068_v10 = vld [vmem:[%s20883_s3 + $0x320] sm:$0xff]  }
 0x2c9   : > { %v3103_v29 = vadd.f32 %v14671_v23, %v3093_v5  ;;  %v3387_v46 = vrot.slane %v14767_v31, 1  ;;  %v2754_v15 = vpop.f32.mrb[81].mxu0  ;;  %v3312_v58 = vpop.f32.mrb[121].mxu1  ;;  %v16075_v12 = vld [vmem:[%s20883_s3 + $0x360] sm:$0xff]   ;;  %v3095_v23 = vrot.slane %v17931_v54, 1  ;;  %v16076_v54 = vld [vmem:[%s20883_s3 + $0x368] sm:$0xff]  }
 0x2ca   : > { %v3101_v27 = vadd.f32 %v3091_v9, %v2754_v15  ;;  %v3385_v48 = vrot.slane %v3312_v58, 1  ;;  %v14672_v28 = vpop.f32.mrb[82].mxu0  ;;  %v14768_v42 = vpop.f32.mrb[122].mxu1  ;;  %v16071_v58 = vld [vmem:[%s20883_s3 + $0x328] sm:$0xff]  }
 0x2cb   : > { %v18185_v14 = vadd.f32 %v3387_v46, %v3103_v29  ;;  %v3104_v63 = vadd.f32 %v14672_v28, %v3094_v41  ;;  %v3388_v37 = vrot.slane %v14768_v42, 1  ;;  %v2757_v4 = vpop.f32.mrb[83].mxu0  ;;  %v3315_v16 = vpop.f32.mrb[123].mxu1  ;;  %15160 = vmatpush3.bf16.msra.mxu0 %v16065_v35  ;;  %15208 = vmatpush3.bf16.msra.mxu1 %v16070_v38  ;;  %v16074_v42 = vld [vmem:[%s20883_s3 + $0x330] sm:$0xff]  }
 0x2cc   : > { %v18187_v17 = vadd.f32 %v3385_v48, %v3101_v27  ;;  %v3102_v0 = vadd.f32 %v3092_v62, %v2757_v4  ;;  %v3386_v20 = vrot.slane %v3315_v16, 1  ;;  %15161 = vmatprep.subr.bf16.mxu0 %v16066_v49  ;;  %15209 = vmatprep.subr.bf16.mxu1 %v16072_v39 }
 0x2cd   : > { %v18195_v21 = vadd.f32 %v3388_v37, %v3104_v63  ;;  %15082 = vmatmul.mubr.msk.bf16.gmra.mrb[208].mxu0 %vm17188_vm9, %v21050_v56  ;;  %15130 = vmatmul.mubr.msk.bf16.gmra.mrb[228].mxu1 %vm17188_vm9, %v21050_v56  ;;  %v16078_v63 = vld [vmem:[%s20883_s3 + $0x370] sm:$0xff]  }
 0x2ce   : > { %v18203_v59 = vadd.f32 %v3386_v20, %v3102_v0  ;;  %15085 = vmatprep.mubr.msk.bf16.mxu0 %vm17243_vm1, %v21050_v56  ;;  %15133 = vmatprep.mubr.msk.bf16.mxu1 %vm17243_vm1, %v21050_v56 }
 0x2cf   : > { %15162 = vmatpush3.bf16.msra.mxu0 %v16066_v49  ;;  %15210 = vmatpush3.bf16.msra.mxu1 %v16072_v39 }
 0x2d0   : > { %v14675_v35 = vpop.f32.mrb[116].mxu0  ;;  %v14771_v38 = vpop.f32.mrb[124].mxu1  ;;  %15163 = vmatprep.subr.bf16.mxu0 %v16067_v3  ;;  %15211 = vmatprep.subr.bf16.mxu1 %v16073_v6 }
 0x2d1   : > { %v2770_v5 = vpop.f32.mrb[117].mxu0  ;;  %v3328_v9 = vpop.f32.mrb[125].mxu1 }
 0x2d2   : > { %v2811_v31 = vadd.f32 %v2770_v5, %v17929_v53  ;;  %v14676_v49 = vpop.f32.mrb[118].mxu0  ;;  %v14772_v39 = vpop.f32.mrb[126].mxu1  ;;  %v3389_v15 = vrot.slane %v3328_v9, 1  ;;  %v16077_v5 = vld [vmem:[%s20883_s3 + $0x338] sm:$0xff]  }
 0x2d3   : > { %v2773_v41 = vpop.f32.mrb[119].mxu0  ;;  %v3331_v29 = vpop.f32.mrb[127].mxu1  ;;  %15164 = vmatpush3.bf16.msra.mxu0 %v16067_v3  ;;  %15212 = vmatpush3.bf16.msra.mxu1 %v16073_v6  ;;  %v16079_v9 = vld [vmem:[%s20883_s3 + $0x378] sm:$0xff]   ;;  %v18289_v39 = vld [vmem:[%s20883_s3 + $0x3c0] sm:$0xff]  }
 0x2d4   : > { %v3105_v46 = vadd.f32 %v3095_v23, %v2811_v31  ;;  %15165 = vmatprep.subr.bf16.mxu0 %v16068_v10  ;;  %15213 = vmatprep.subr.bf16.mxu1 %v16075_v12 }
 0x2d5   : > { %15086 = vmatmul.mubr.msk.bf16.gmra.mrb[212].mxu0 %vm17236_vm15, %v21050_v56  ;;  %15134 = vmatmul.mubr.msk.bf16.gmra.mrb[232].mxu1 %vm17236_vm15, %v21050_v56 }
 0x2d6   : > { %v18231_v62 = vadd.f32 %v3389_v15, %v3105_v46  ;;  %15089 = vmatprep.mubr.msk.bf16.mxu0 %vm17291_vm10, %v21050_v56  ;;  %15137 = vmatprep.mubr.msk.bf16.mxu1 %vm17291_vm10, %v21050_v56 }
 0x2d7   : > { %15166 = vmatpush3.bf16.msra.mxu0 %v16068_v10  ;;  %15214 = vmatpush3.bf16.msra.mxu1 %v16075_v12 }
 0x2d8   : > { %v14791_v48 = vpop.f32.mrb[120].mxu0  ;;  %v18239_v28 = vpop.f32.mrb[128].mxu1  ;;  %15167 = vmatprep.subr.bf16.mxu0 %v16071_v58  ;;  %15215 = vmatprep.subr.bf16.mxu1 %v16076_v54 }
 0x2d9   : > { %v3641_v37 = vrot.slane %v14791_v48, 2  ;;  %v3519_v4 = vpop.f32.mrb[121].mxu0  ;;  %v4311_v16 = vpop.f32.mrb[129].mxu1 }
 0x2da   : > { %v3639_v0 = vrot.slane %v3519_v4, 2  ;;  %v14792_v20 = vpop.f32.mrb[122].mxu0  ;;  %v18247_v3 = vpop.f32.mrb[130].mxu1 }
 0x2db   : > { %v3642_v6 = vrot.slane %v14792_v20, 2  ;;  %v3522_v35 = vpop.f32.mrb[123].mxu0  ;;  %v18249_v38 = vpop.f32.mrb[131].mxu1  ;;  %15168 = vmatpush3.bf16.msra.mxu0 %v16071_v58  ;;  %15216 = vmatpush3.bf16.msra.mxu1 %v16076_v54  ;;  %v18252_v10 = vadd.f32 %v18086_v50, %v3641_v37 }
 0x2dc   : > { %v3640_v12 = vrot.slane %v3522_v35, 2  ;;  %15169 = vmatprep.subr.bf16.mxu0 %v16074_v42  ;;  %15217 = vmatprep.subr.bf16.mxu1 %v16078_v63  ;;  %v18261_v23 = vadd.f32 %v18089_v43, %v3639_v0 }
 0x2dd   : > { %21053 = vst [vmem:[#allocation10_spill] sm:$0xff] %v18252_v10  ;;  %15090 = vmatmul.mubr.msk.bf16.gmra.mrb[216].mxu0 %vm17284_vm7, %v21050_v56  ;;  %15138 = vmatmul.mubr.msk.bf16.gmra.mrb[236].mxu1 %vm17284_vm7, %v21050_v56  ;;  %v18270_v50 = vadd.f32 %v18091_v8, %v3642_v6  ;;  %v18284_v8 = vld [vmem:[%s20883_s3 + $0x380] sm:$0xff]  }
 0x2de   : > { %21054 = vst [vmem:[#allocation11_spill] sm:$0xff] %v18261_v23  ;;  %15093 = vmatprep.mubr.msk.bf16.mxu0 %vm17337_vm4, %v21050_v56  ;;  %15141 = vmatprep.mubr.msk.bf16.mxu1 %vm17337_vm4, %v21050_v56  ;;  %v18279_v43 = vadd.f32 %v18099_v44, %v3640_v12 }
 0x2df   : > { %21055 = vst [vmem:[#allocation12_spill] sm:$0xff] %v18270_v50  ;;  %15170 = vmatpush3.bf16.msra.mxu0 %v16074_v42  ;;  %15218 = vmatpush3.bf16.msra.mxu1 %v16078_v63 }
 0x2e0   : > { %21056 = vst [vmem:[#allocation13_spill] sm:$0xff] %v18279_v43  ;;  %v14795_v31 = vpop.f32.mrb[124].mxu0  ;;  %v14939_v49 = vpop.f32.mrb[132].mxu1  ;;  %15171 = vmatprep.subr.bf16.mxu0 %v16077_v5  ;;  %15219 = vmatprep.subr.bf16.mxu1 %v16079_v9  ;;  %v16081_v43 = vld [vmem:[%s20883_s3 + $0x388] sm:$0xff]  }
 0x2e1   : > { %v3535_v41 = vpop.f32.mrb[125].mxu0  ;;  %v18291_v29 = vpop.f32.mrb[133].mxu1 }
 0x2e2   : > { %v3643_v44 = vrot.slane %v3535_v41, 2  ;;  %v14796_v46 = vpop.f32.mrb[126].mxu0  ;;  %v14940_v15 = vpop.f32.mrb[134].mxu1 }
 0x2e3   : > { %v3538_v58 = vpop.f32.mrb[127].mxu0  ;;  %v18293_v54 = vpop.f32.mrb[135].mxu1  ;;  %15172 = vmatpush3.bf16.msra.mxu0 %v16077_v5  ;;  %15220 = vmatpush3.bf16.msra.mxu1 %v16079_v9 }
 0x2e4   : > { %15253 = vmatprep.subr.bf16.mxu0 %v18284_v8  ;;  %15301 = vmatprep.subr.bf16.mxu1 %v18289_v39  ;;  %v18298_v48 = vadd.f32 %v3643_v44, %v18115_v26 }
 0x2e5   : > { %15094 = vmatmul.mubr.msk.bf16.gmra.mrb[220].mxu0 %vm21046_vm2, %v21050_v56  ;;  %15142 = vmatmul.mubr.msk.bf16.gmra.mrb[240].mxu1 %vm21046_vm2, %v21050_v56 }
 0x2e6   : > { %15097 = vmatprep.mubr.msk.bf16.mxu0 %vm21047_vm13, %v21050_v56  ;;  %15145 = vmatprep.mubr.msk.bf16.mxu1 %vm21047_vm13, %v21050_v56 }
 0x2e8   : > { %v14799_v42 = vpop.f32.mrb[128].mxu0  ;;  %v18312_v63 = vpop.f32.mrb[136].mxu1 }
 0x2e9   : > { %v3661_v26 = vrot.slane %v14799_v42, 2  ;;  %v3548_v37 = vpop.f32.mrb[129].mxu0  ;;  %v4340_v4 = vpop.f32.mrb[137].mxu1 }
 0x2ea   : > { %v3659_v16 = vrot.slane %v3548_v37, 2  ;;  %v14800_v0 = vpop.f32.mrb[130].mxu0  ;;  %v18314_v20 = vpop.f32.mrb[138].mxu1 }
 0x2eb   : > { %v3662_v6 = vrot.slane %v14800_v0, 2  ;;  %v3551_v35 = vpop.f32.mrb[131].mxu0  ;;  %v18316_v12 = vpop.f32.mrb[139].mxu1  ;;  %v18319_v5 = vadd.f32 %v18035_v11, %v3661_v26 }
 0x2ec   : > { %v3660_v9 = vrot.slane %v3551_v35, 2  ;;  %v18322_v31 = vadd.f32 %v18043_v2, %v3659_v16 }
 0x2ed   : > { %15098 = vmatmul.mubr.msk.bf16.gmra.mrb[224].mxu0 %vm21048_vm6, %v21050_v56  ;;  %15146 = vmatmul.mubr.msk.bf16.gmra.mrb[244].mxu1 %vm21048_vm6, %v21050_v56  ;;  %v18331_v49 = vadd.f32 %v18051_v34, %v3662_v6 }
 0x2ee   : > { %15101 = vmatprep.mubr.msk.bf16.mxu0 %vm21049_vm8, %v21050_v56  ;;  %15149 = vmatprep.mubr.msk.bf16.mxu1 %vm21049_vm8, %v21050_v56  ;;  %v18340_v11 = vadd.f32 %v18053_v24, %v3660_v9 }
 0x2f0   : > { %v14803_v2 = vpop.f32.mrb[132].mxu0  ;;  %v14947_v41 = vpop.f32.mrb[140].mxu1 }
 0x2f1   : > { %v3564_v44 = vpop.f32.mrb[133].mxu0  ;;  %v18342_v46 = vpop.f32.mrb[141].mxu1 }
 0x2f2   : > { %v3663_v15 = vrot.slane %v3564_v44, 2  ;;  %v14804_v58 = vpop.f32.mrb[134].mxu0  ;;  %v14948_v34 = vpop.f32.mrb[142].mxu1 }
 0x2f3   : > { %v3567_v42 = vpop.f32.mrb[135].mxu0  ;;  %v18344_v26 = vpop.f32.mrb[143].mxu1 }
 0x2f4   : > { %v18347_v37 = vadd.f32 %v3663_v15, %v18081_v7 }
 0x2f5   : > { %15102 = vmatmul.mubr.msk.bf16.gmra.mrb[228].mxu0 %vm17404_vm14, %v21050_v56  ;;  %15150 = vmatmul.mubr.msk.bf16.gmra.mrb[248].mxu1 %vm17404_vm14, %v21050_v56 }
 0x2f6   : > { %15105 = vmatprep.mubr.msk.bf16.mxu0 %vm17441_vm0, %v21050_v56  ;;  %15153 = vmatprep.mubr.msk.bf16.mxu1 %vm17441_vm0, %v21050_v56 }
 0x2f8   : > { %v14807_v24 = vpop.f32.mrb[136].mxu0  ;;  %v18361_v4 = vpop.f32.mrb[144].mxu1 }
 0x2f9   : > { %21057 = vst [vmem:[#allocation14_spill] sm:$0xff] %v18361_v4  ;;  %v3681_v7 = vrot.slane %v14807_v24, 2  ;;  %v3577_v16 = vpop.f32.mrb[137].mxu0  ;;  %v18363_v0 = vpop.f32.mrb[145].mxu1 }
 0x2fa   : > { %21058 = vst [vmem:[#allocation15_spill] sm:$0xff] %v18363_v0  ;;  %v3679_v6 = vrot.slane %v3577_v16, 2  ;;  %v14808_v35 = vpop.f32.mrb[138].mxu0  ;;  %v18365_v9 = vpop.f32.mrb[146].mxu1 }
 0x2fb   : > { %21059 = vst [vmem:[#allocation16_spill] sm:$0xff] %v18365_v9  ;;  %v3682_v2 = vrot.slane %v14808_v35, 2  ;;  %v3580_v41 = vpop.f32.mrb[139].mxu0  ;;  %v18367_v44 = vpop.f32.mrb[147].mxu1  ;;  %v18370_v15 = vadd.f32 %v3681_v7, %v18185_v14 }
 0x2fc   : > { %21060 = vst [vmem:[#allocation17_spill] sm:$0xff] %v18367_v44  ;;  %v3680_v58 = vrot.slane %v3580_v41, 2  ;;  %v18373_v34 = vadd.f32 %v3679_v6, %v18187_v17  ;;  %v16092_v44 = vld [vmem:[%s20883_s3 + $0x3e8] sm:$0xff]  }
 0x2fd   : > { %15106 = vmatmul.mubr.msk.bf16.gmra.mrb[232].mxu0 %vm17437_vm12, %v21050_v56  ;;  %15154 = vmatmul.mubr.msk.bf16.gmra.mrb[252].mxu1 %vm17437_vm12, %v21050_v56  ;;  %v18382_v42 = vadd.f32 %v3682_v2, %v18195_v21 }
 0x2fe   : > { %15173 = vmatprep.mubr.msk.bf16.mxu0 %vm17145_vm5, %v21050_v56  ;;  %15221 = vmatprep.mubr.msk.bf16.mxu1 %vm17145_vm5, %v21050_v56  ;;  %v18391_v14 = vadd.f32 %v3680_v58, %v18203_v59  ;;  %v16086_v59 = vld [vmem:[%s20883_s3 + $0x3c8] sm:$0xff]  }
 0x300   : > { %v14811_v17 = vpop.f32.mrb[140].mxu0  ;;  %v14955_v24 = vpop.f32.mrb[148].mxu1 }
 0x301   : > { %v3593_v7 = vpop.f32.mrb[141].mxu0  ;;  %v18393_v16 = vpop.f32.mrb[149].mxu1  ;;  %v16082_v17 = vld [vmem:[%s20883_s3 + $0x390] sm:$0xff]  }
 0x302   : > { %21061 = vst [vmem:[#allocation18_spill] sm:$0xff] %v18393_v16  ;;  %v3683_v6 = vrot.slane %v3593_v7, 2  ;;  %v14812_v35 = vpop.f32.mrb[142].mxu0  ;;  %v14956_v21 = vpop.f32.mrb[150].mxu1  ;;  %v16088_v24 = vld [vmem:[%s20883_s3 + $0x3d0] sm:$0xff]  }
 0x303   : > { %v3596_v2 = vpop.f32.mrb[143].mxu0  ;;  %v4388_v41 = vpop.f32.mrb[151].mxu1 }
 0x304   : > { %v18399_v50 = vadd.f32 %v3683_v6, %v18231_v62 }
 0x305   : > { %15174 = vmatmul.mubr.msk.bf16.vlgmr.msra.gmra.mrb[236].mxu0 %vm17138_vm3, %v21050_v56  ;;  %15222 = vmatmul.mubr.msk.bf16.vlgmr.msra.gmra.mrb[0].mxu1 %vm17138_vm3, %v21050_v56 }
 0x306   : > { %15177 = vmatprep.mubr.msk.bf16.mxu0 %vm17195_vm11, %v21050_v56  ;;  %15225 = vmatprep.mubr.msk.bf16.mxu1 %vm17195_vm11, %v21050_v56 }
 0x307   : > { %15254 = vmatpush3.bf16.msra.mxu0 %v18284_v8  ;;  %15302 = vmatpush3.bf16.msra.mxu1 %v18289_v39 }
 0x308   : > { %v14815_v62 = vpop.f32.mrb[144].mxu0  ;;  %v18418_v58 = vpop.f32.mrb[152].mxu1  ;;  %15255 = vmatprep.subr.bf16.mxu0 %v16081_v43  ;;  %15303 = vmatprep.subr.bf16.mxu1 %v16086_v59 }
 0x309   : > { %21062 = vst [vmem:[#allocation19_spill] sm:$0xff] %v18418_v58  ;;  %v3701_v7 = vrot.slane %v14815_v62, 2  ;;  %v3606_v6 = vpop.f32.mrb[145].mxu0  ;;  %v18426_v35 = vpop.f32.mrb[153].mxu1  ;;  %v16083_v62 = vld [vmem:[%s20883_s3 + $0x398] sm:$0xff]   ;;  %v16097_v58 = vld [vmem:[%s20883_s3 + $0x408] sm:$0xff]  }
 0x30a   : > { %21063 = vst [vmem:[#allocation20_spill] sm:$0xff] %v18426_v35  ;;  %v3699_v8 = vrot.slane %v3606_v6, 2  ;;  %v14816_v21 = vpop.f32.mrb[146].mxu0  ;;  %v18428_v39 = vpop.f32.mrb[154].mxu1 }
 0x30b   : > { %21064 = vst [vmem:[#allocation21_spill] sm:$0xff] %v18428_v39  ;;  %v3702_v2 = vrot.slane %v14816_v21, 2  ;;  %v3609_v41 = vpop.f32.mrb[147].mxu0  ;;  %v18430_v16 = vpop.f32.mrb[155].mxu1  ;;  %15256 = vmatpush3.bf16.msra.mxu0 %v16081_v43  ;;  %v18433_v23 = vadd.f32 %v3701_v7, %v18143_v30  ;;  %15304 = vmatpush3.bf16.msra.mxu1 %v16086_v59  ;;  %v16089_v21 = vld [vmem:[%s20883_s3 + $0x3d8] sm:$0xff]   ;;  %v16091_v7 = vld [vmem:[%s20883_s3 + $0x3e0] sm:$0xff]  }
 0x30c   : > { %21065 = vst [vmem:[#allocation22_spill] sm:$0xff] %v18430_v16  ;;  %v3700_v10 = vrot.slane %v3609_v41, 2  ;;  %15257 = vmatprep.subr.bf16.mxu0 %v16082_v17  ;;  %v18439_v6 = vadd.f32 %v3699_v8, %v18145_v19  ;;  %15305 = vmatprep.subr.bf16.mxu1 %v16088_v24 }
 0x30d   : > { %15178 = vmatmul.mubr.msk.bf16.gmra.mrb[240].mxu0 %vm17188_vm9, %v21050_v56  ;;  %15226 = vmatmul.mubr.msk.bf16.gmra.mrb[4].mxu1 %vm17188_vm9, %v21050_v56  ;;  %v18451_v30 = vadd.f32 %v3702_v2, %v18147_v25  ;;  %v16084_v25 = vld [vmem:[%s20883_s3 + $0x3a0] sm:$0xff]  }
 0x30e   : > { %15181 = vmatprep.mubr.msk.bf16.mxu0 %vm17243_vm1, %v21050_v56  ;;  %15229 = vmatprep.mubr.msk.bf16.mxu1 %vm17243_vm1, %v21050_v56  ;;  %v18460_v19 = vadd.f32 %v3700_v10, %v18149_v51 }
 0x30f   : > { %15258 = vmatpush3.bf16.msra.mxu0 %v16082_v17  ;;  %15306 = vmatpush3.bf16.msra.mxu1 %v16088_v24 }
 0x310   : > { %v14819_v43 = vpop.f32.mrb[148].mxu0  ;;  %v14963_v59 = vpop.f32.mrb[156].mxu1  ;;  %15259 = vmatprep.subr.bf16.mxu0 %v16083_v62  ;;  %15307 = vmatprep.subr.bf16.mxu1 %v16089_v21 }
 0x311   : > { %v3622_v8 = vpop.f32.mrb[149].mxu0  ;;  %v18468_v2 = vpop.f32.mrb[157].mxu1  ;;  %v16087_v43 = vld [vmem:[%s20883_s3 + $0x3a8] sm:$0xff]  }
 0x312   : > { %21066 = vst [vmem:[#allocation23_spill] sm:$0xff] %v18468_v2  ;;  %v3703_v41 = vrot.slane %v3622_v8, 2  ;;  %v14820_v51 = vpop.f32.mrb[150].mxu0  ;;  %v14964_v10 = vpop.f32.mrb[158].mxu1  ;;  %v16094_v8 = vld [vmem:[%s20883_s3 + $0x3f0] sm:$0xff]  }
 0x313   : > { %v3625_v17 = vpop.f32.mrb[151].mxu0  ;;  %v4417_v24 = vpop.f32.mrb[159].mxu1  ;;  %15260 = vmatpush3.bf16.msra.mxu0 %v16083_v62  ;;  %15308 = vmatpush3.bf16.msra.mxu1 %v16089_v21  ;;  %v16090_v21 = vld [vmem:[%s20883_s3 + $0x3b0] sm:$0xff]  }
 0x314   : > { %15261 = vmatprep.subr.bf16.mxu0 %v16084_v25  ;;  %v18474_v59 = vadd.f32 %v3703_v41, %v18175_v22  ;;  %15309 = vmatprep.subr.bf16.mxu1 %v16091_v7 }
 0x315   : > { %15182 = vmatmul.mubr.msk.bf16.gmra.mrb[244].mxu0 %vm17236_vm15, %v21050_v56  ;;  %15230 = vmatmul.mubr.msk.bf16.gmra.mrb[8].mxu1 %vm17236_vm15, %v21050_v56 }
 0x316   : > { %15185 = vmatprep.mubr.msk.bf16.mxu0 %vm17291_vm10, %v21050_v56  ;;  %15233 = vmatprep.mubr.msk.bf16.mxu1 %vm17291_vm10, %v21050_v56 }
 0x317   : > { %15262 = vmatpush3.bf16.msra.mxu0 %v16084_v25  ;;  %15310 = vmatpush3.bf16.msra.mxu1 %v16091_v7 }
 0x318   : > { %v14839_v22 = vpop.f32.mrb[152].mxu0  ;;  %v18491_v62 = vpop.f32.mrb[160].mxu1  ;;  %15263 = vmatprep.subr.bf16.mxu0 %v16087_v43  ;;  %15311 = vmatprep.subr.bf16.mxu1 %v16092_v44 }
 0x319   : > { %v18500_v41 = vadd.f32 %v14839_v22, %v18391_v14  ;;  %v3813_v51 = vpop.f32.mrb[153].mxu0  ;;  %v4605_v10 = vpop.f32.mrb[161].mxu1  ;;  %v16093_v14 = vld [vmem:[%s20883_s3 + $0x3b8] sm:$0xff]  }
 0x31a   : > { %v14840_v25 = vpop.f32.mrb[154].mxu0  ;;  %v18502_v7 = vpop.f32.mrb[162].mxu1  ;;  %v16095_v22 = vld [vmem:[%s20883_s3 + $0x3f8] sm:$0xff]  }
 0x31b   : > { %v18505_v17 = vadd.f32 %v14840_v25, %v18370_v15  ;;  %v3815_v24 = vpop.f32.mrb[155].mxu0  ;;  %v18507_v9 = vpop.f32.mrb[163].mxu1  ;;  %15264 = vmatpush3.bf16.msra.mxu0 %v16087_v43  ;;  %15312 = vmatpush3.bf16.msra.mxu1 %v16092_v44  ;;  %v18538_v43 = vld [vmem:[%s20883_s3 + $0x440] sm:$0xff]  }
 0x31c   : > { %v18510_v0 = vadd.f32 %v3815_v24, %v18373_v34  ;;  %15265 = vmatprep.subr.bf16.mxu0 %v16090_v21  ;;  %15313 = vmatprep.subr.bf16.mxu1 %v16094_v8  ;;  %v18533_v34 = vld [vmem:[%s20883_s3 + $0x400] sm:$0xff]  }
 0x31d   : > { %15186 = vmatmul.mubr.msk.bf16.gmra.mrb[248].mxu0 %vm17284_vm7, %v21050_v56  ;;  %15234 = vmatmul.mubr.msk.bf16.gmra.mrb[12].mxu1 %vm17284_vm7, %v21050_v56 }
 0x31e   : > { %15189 = vmatprep.mubr.msk.bf16.mxu0 %vm17337_vm4, %v21050_v56  ;;  %15237 = vmatprep.mubr.msk.bf16.mxu1 %vm17337_vm4, %v21050_v56 }
 0x31f   : > { %15266 = vmatpush3.bf16.msra.mxu0 %v16090_v21  ;;  %15314 = vmatpush3.bf16.msra.mxu1 %v16094_v8 }
 0x320   : > { %v14843_v44 = vpop.f32.mrb[156].mxu0  ;;  %v14987_v15 = vpop.f32.mrb[164].mxu1  ;;  %15267 = vmatprep.subr.bf16.mxu0 %v16093_v14  ;;  %15315 = vmatprep.subr.bf16.mxu1 %v16095_v22 }
 0x321   : > { %v3828_v51 = vpop.f32.mrb[157].mxu0  ;;  %v18540_v10 = vpop.f32.mrb[165].mxu1 }
 0x322   : > { %v18543_v21 = vadd.f32 %v3828_v51, %v18382_v42  ;;  %v14844_v8 = vpop.f32.mrb[158].mxu0  ;;  %v14988_v25 = vpop.f32.mrb[166].mxu1 }
 0x323   : > { %v3831_v24 = vpop.f32.mrb[159].mxu0  ;;  %v18545_v44 = vpop.f32.mrb[167].mxu1  ;;  %15268 = vmatpush3.bf16.msra.mxu0 %v16093_v14  ;;  %15316 = vmatpush3.bf16.msra.mxu1 %v16095_v22 }
 0x324   : > { %v18548_v15 = vadd.f32 %v3831_v24, %v18399_v50  ;;  %15349 = vmatprep.subr.bf16.mxu0 %v18533_v34  ;;  %15397 = vmatprep.subr.bf16.mxu1 %v18538_v43 }
 0x325   : > { %15190 = vmatmul.mubr.msk.bf16.gmra.mrb[252].mxu0 %vm21046_vm2, %v21050_v56  ;;  %15238 = vmatmul.mubr.msk.bf16.gmra.mrb[16].mxu1 %vm21046_vm2, %v21050_v56 }
 0x326   : > { %15193 = vmatprep.mubr.msk.bf16.mxu0 %vm21047_vm13, %v21050_v56  ;;  %15241 = vmatprep.mubr.msk.bf16.mxu1 %vm21047_vm13, %v21050_v56 }
 0x328   : > { %v14847_v50 = vpop.f32.mrb[160].mxu0  ;;  %v18564_v42 = vpop.f32.mrb[168].mxu1 }
 0x329   : > { %v18567_v14 = vadd.f32 %v14847_v50, %v18460_v19  ;;  %v3842_v22 = vpop.f32.mrb[161].mxu0  ;;  %v4634_v51 = vpop.f32.mrb[169].mxu1 }
 0x32a   : > { %v14848_v8 = vpop.f32.mrb[162].mxu0  ;;  %v18569_v25 = vpop.f32.mrb[170].mxu1 }
 0x32b   : > { %v18572_v24 = vadd.f32 %v14848_v8, %v18433_v23  ;;  %v3844_v4 = vpop.f32.mrb[163].mxu0  ;;  %v18574_v2 = vpop.f32.mrb[171].mxu1 }
 0x32c   : > { %v18577_v16 = vadd.f32 %v3844_v4, %v18439_v6 }
 0x32d   : > { %15194 = vmatmul.mubr.msk.bf16.gmra.mrb[0].mxu0 %vm21048_vm6, %v21050_v56  ;;  %15242 = vmatmul.mubr.msk.bf16.gmra.mrb[20].mxu1 %vm21048_vm6, %v21050_v56 }
 0x32e   : > { %15197 = vmatprep.mubr.msk.bf16.mxu0 %vm21049_vm8, %v21050_v56  ;;  %15245 = vmatprep.mubr.msk.bf16.mxu1 %vm21049_vm8, %v21050_v56 }
 0x330   : > { %v14851_v23 = vpop.f32.mrb[164].mxu0  ;;  %v14995_v19 = vpop.f32.mrb[172].mxu1 }
 0x331   : > { %v3857_v4 = vpop.f32.mrb[165].mxu0  ;;  %v18591_v6 = vpop.f32.mrb[173].mxu1 }
 0x332   : > { %v18594_v50 = vadd.f32 %v3857_v4, %v18451_v30  ;;  %v14852_v22 = vpop.f32.mrb[166].mxu0  ;;  %v14996_v51 = vpop.f32.mrb[174].mxu1 }
 0x333   : > { %v3860_v8 = vpop.f32.mrb[167].mxu0  ;;  %v18596_v39 = vpop.f32.mrb[175].mxu1 }
 0x334   : > { %v18599_v35 = vadd.f32 %v3860_v8, %v18474_v59 }
 0x335   : > { %15198 = vmatmul.mubr.msk.bf16.gmra.mrb[4].mxu0 %vm17404_vm14, %v21050_v56  ;;  %15246 = vmatmul.mubr.msk.bf16.gmra.mrb[24].mxu1 %vm17404_vm14, %v21050_v56 }
 0x336   : > { %15201 = vmatprep.mubr.msk.bf16.mxu0 %vm17441_vm0, %v21050_v56  ;;  %15249 = vmatprep.mubr.msk.bf16.mxu1 %vm17441_vm0, %v21050_v56 }
 0x338   : > { %v18613_v30 = vpop.f32.mrb[176].mxu1 }
 0x339   : > { %21067 = vst [vmem:[#allocation24_spill] sm:$0xff] %v18613_v30  ;;  %v18615_v59 = vpop.f32.mrb[177].mxu1 }
 0x33a   : > { %21068 = vst [vmem:[#allocation25_spill] sm:$0xff] %v18615_v59  ;;  %v18617_v23 = vpop.f32.mrb[178].mxu1 }
 0x33b   : > { %21069 = vst [vmem:[#allocation26_spill] sm:$0xff] %v18617_v23  ;;  %v18619_v19 = vpop.f32.mrb[179].mxu1 }
 0x33c   : > { %21070 = vst [vmem:[#allocation27_spill] sm:$0xff] %v18619_v19 }
 0x33d   : > { %15202 = vmatmul.mubr.msk.bf16.gmra.mrb[8].mxu0 %vm17437_vm12, %v21050_v56  ;;  %15250 = vmatmul.mubr.msk.bf16.gmra.mrb[28].mxu1 %vm17437_vm12, %v21050_v56 }
 0x33e   : > { %15269 = vmatprep.mubr.msk.bf16.mxu0 %vm17145_vm5, %v21050_v56  ;;  %15317 = vmatprep.mubr.msk.bf16.mxu1 %vm17145_vm5, %v21050_v56 }
 0x340   : > { %v14859_v4 = vpop.f32.mrb[168].mxu0  ;;  %v15003_v22 = vpop.f32.mrb[180].mxu1 }
 0x341   : > { %v3887_v51 = vpop.f32.mrb[169].mxu0  ;;  %v18633_v8 = vpop.f32.mrb[181].mxu1 }
 0x342   : > { %v18636_v19 = vadd.f32 %v3887_v51, %v18298_v48  ;;  %v14860_v23 = vpop.f32.mrb[170].mxu0  ;;  %v15004_v59 = vpop.f32.mrb[182].mxu1 }
 0x343   : > { %v3890_v47 = vpop.f32.mrb[171].mxu0  ;;  %v4682_v30 = vpop.f32.mrb[183].mxu1  ;;  %v16104_v59 = vld [vmem:[%s20883_s3 + $0x450] sm:$0xff]  }
 0x344   : > { %21071 = vst [vmem:[#allocation34_spill] sm:$0xff] %v18636_v19  ;;  %v16098_v30 = vld [vmem:[%s20883_s3 + $0x410] sm:$0xff]  }
 0x345   : > { %15270 = vmatmul.mubr.msk.bf16.vlgmr.msra.gmra.mrb[12].mxu0 %vm17138_vm3, %v21050_v56  ;;  %15318 = vmatmul.mubr.msk.bf16.vlgmr.msra.gmra.mrb[32].mxu1 %vm17138_vm3, %v21050_v56 }
 0x346   : > { %15273 = vmatprep.mubr.msk.bf16.mxu0 %vm17195_vm11, %v21050_v56  ;;  %15321 = vmatprep.mubr.msk.bf16.mxu1 %vm17195_vm11, %v21050_v56 }
 0x347   : > { %15350 = vmatpush3.bf16.msra.mxu0 %v18533_v34  ;;  %15398 = vmatpush3.bf16.msra.mxu1 %v18538_v43 }
 0x348   : > { %v14863_v47 = vpop.f32.mrb[72].mxu0  ;;  %v18658_v48 = vpop.f32.mrb[184].mxu1  ;;  %15351 = vmatprep.subr.bf16.mxu0 %v16097_v58  ;;  %15399 = vmatprep.subr.bf16.mxu1 %v16102_v61 }
 0x349   : > { %21072 = vst [vmem:[#allocation35_spill] sm:$0xff] %v18658_v48  ;;  %v18667_v23 = vadd.f32 %v18319_v5, %v14863_v47  ;;  %v3900_v4 = vpop.f32.mrb[73].mxu0  ;;  %v18669_v34 = vpop.f32.mrb[185].mxu1  ;;  %v16105_v47 = vld [vmem:[%s20883_s3 + $0x458] sm:$0xff]  }
 0x34a   : > { %v18672_v43 = vadd.f32 %v18322_v31, %v3900_v4  ;;  %v14864_v22 = vpop.f32.mrb[74].mxu0  ;;  %v18674_v51 = vpop.f32.mrb[186].mxu1  ;;  %v16099_v31 = vld [vmem:[%s20883_s3 + $0x418] sm:$0xff]  }
 0x34b   : > { %21073 = vst [vmem:[#allocation36_spill] sm:$0xff] %v18674_v51  ;;  %v18677_v19 = vadd.f32 %v18331_v49, %v14864_v22  ;;  %v3903_v48 = vpop.f32.mrb[75].mxu0  ;;  %v18679_v55 = vpop.f32.mrb[187].mxu1  ;;  %15352 = vmatpush3.bf16.msra.mxu0 %v16097_v58  ;;  %15400 = vmatpush3.bf16.msra.mxu1 %v16102_v61  ;;  %v16107_v58 = vld [vmem:[%s20883_s3 + $0x460] sm:$0xff]  }
 0x34c   : > { %21074 = vst [vmem:[#allocation37_spill] sm:$0xff] %v18679_v55  ;;  %v18682_v5 = vadd.f32 %v18340_v11, %v3903_v48  ;;  %15353 = vmatprep.subr.bf16.mxu0 %v16098_v30  ;;  %15401 = vmatprep.subr.bf16.mxu1 %v16104_v59  ;;  %v16100_v11 = vld [vmem:[%s20883_s3 + $0x420] sm:$0xff]  }
 0x34d   : > { %15274 = vmatmul.mubr.msk.bf16.gmra.mrb[16].mxu0 %vm17188_vm9, %v21050_v56  ;;  %15322 = vmatmul.mubr.msk.bf16.gmra.mrb[36].mxu1 %vm17188_vm9, %v21050_v56 }
 0x34e   : > { %15277 = vmatprep.mubr.msk.bf16.mxu0 %vm17243_vm1, %v21050_v56  ;;  %15325 = vmatprep.mubr.msk.bf16.mxu1 %vm17243_vm1, %v21050_v56 }
 0x34f   : > { %15354 = vmatpush3.bf16.msra.mxu0 %v16098_v30  ;;  %15402 = vmatpush3.bf16.msra.mxu1 %v16104_v59 }
 0x350   : > { %v14867_v61 = vpop.f32.mrb[172].mxu0  ;;  %v15011_v49 = vpop.f32.mrb[188].mxu1  ;;  %15355 = vmatprep.subr.bf16.mxu0 %v16099_v31  ;;  %15403 = vmatprep.subr.bf16.mxu1 %v16105_v47 }
 0x351   : > { %v3916_v48 = vpop.f32.mrb[173].mxu0  ;;  %v18708_v4 = vpop.f32.mrb[189].mxu1 }
 0x352   : > { %21075 = vst [vmem:[#allocation38_spill] sm:$0xff] %v18708_v4  ;;  %v18711_v22 = vadd.f32 %v3916_v48, %v18347_v37  ;;  %v14868_v30 = vpop.f32.mrb[174].mxu0  ;;  %v15012_v59 = vpop.f32.mrb[190].mxu1  ;;  %v16110_v48 = vld [vmem:[%s20883_s3 + $0x470] sm:$0xff]  }
 0x353   : > { %v3919_v61 = vpop.f32.mrb[175].mxu0  ;;  %v4711_v49 = vpop.f32.mrb[191].mxu1  ;;  %15356 = vmatpush3.bf16.msra.mxu0 %v16099_v31  ;;  %15404 = vmatpush3.bf16.msra.mxu1 %v16105_v47  ;;  %v16106_v47 = vld [vmem:[%s20883_s3 + $0x430] sm:$0xff]  }
 0x354   : > { %15357 = vmatprep.subr.bf16.mxu0 %v16100_v11  ;;  %15405 = vmatprep.subr.bf16.mxu1 %v16107_v58 }
 0x355   : > { %15278 = vmatmul.mubr.msk.bf16.gmra.mrb[20].mxu0 %vm17236_vm15, %v21050_v56  ;;  %15326 = vmatmul.mubr.msk.bf16.gmra.mrb[40].mxu1 %vm17236_vm15, %v21050_v56 }
 0x356   : > { %15281 = vmatprep.mubr.msk.bf16.mxu0 %vm17291_vm10, %v21050_v56  ;;  %15329 = vmatprep.mubr.msk.bf16.mxu1 %vm17291_vm10, %v21050_v56 }
 0x357   : > { %15358 = vmatpush3.bf16.msra.mxu0 %v16100_v11  ;;  %15406 = vmatpush3.bf16.msra.mxu1 %v16107_v58  ;;  %v4492_v11 = vrot.slane %v18312_v63, 1  ;;  %v4493_v63 = vrot.slane %v18314_v20, 1 }
 0x358   : > { %v14887_v37 = vpop.f32.mrb[176].mxu0  ;;  %v18731_v31 = vpop.f32.mrb[192].mxu1  ;;  %15359 = vmatprep.subr.bf16.mxu0 %v16103_v32  ;;  %15407 = vmatprep.subr.bf16.mxu1 %v16108_v36 }
 0x359   : > { %v4198_v30 = vrot.slane %v14887_v37, 1  ;;  %v4047_v59 = vpop.f32.mrb[177].mxu0  ;;  %v4899_v61 = vpop.f32.mrb[193].mxu1  ;;  %v16109_v37 = vld [vmem:[%s20883_s3 + $0x438] sm:$0xff]  }
 0x35a   : > { %v14888_v49 = vpop.f32.mrb[178].mxu0  ;;  %v18739_v27 = vpop.f32.mrb[194].mxu1  ;;  %v16111_v59 = vld [vmem:[%s20883_s3 + $0x478] sm:$0xff]  }
 0x35b   : > { %v4208_v58 = vadd.f32 %v4198_v30, %v18567_v14  ;;  %v4199_v53 = vrot.slane %v14888_v49, 1  ;;  %v4049_v4 = vpop.f32.mrb[179].mxu0  ;;  %v18743_v55 = vpop.f32.mrb[195].mxu1  ;;  %15360 = vmatpush3.bf16.msra.mxu0 %v16103_v32  ;;  %15408 = vmatpush3.bf16.msra.mxu1 %v16108_v36  ;;  %v4786_v14 = vrot.slane %v18491_v62, 2  ;;  %v4491_v32 = vrot.slane %v18316_v12, 1 }
 0x35c   : > { %v4197_v51 = vrot.slane %v4049_v4, 1  ;;  %15361 = vmatprep.subr.bf16.mxu0 %v16106_v47  ;;  %15409 = vmatprep.subr.bf16.mxu1 %v16110_v48 }
 0x35d   : > { %v4209_v30 = vadd.f32 %v4199_v53, %v18572_v24  ;;  %15282 = vmatmul.mubr.msk.bf16.gmra.mrb[24].mxu0 %vm17284_vm7, %v21050_v56  ;;  %15330 = vmatmul.mubr.msk.bf16.gmra.mrb[44].mxu1 %vm17284_vm7, %v21050_v56  ;;  %v4502_v36 = vadd.f32 %v4492_v11, %v4208_v58  ;;  %v4787_v53 = vrot.slane %v18502_v7, 2  ;;  %v4785_v24 = vrot.slane %v18507_v9, 2 }
 0x35e   : > { %v4207_v4 = vadd.f32 %v4197_v51, %v18577_v16  ;;  %15285 = vmatprep.mubr.msk.bf16.mxu0 %vm17337_vm4, %v21050_v56  ;;  %15333 = vmatprep.mubr.msk.bf16.mxu1 %vm17337_vm4, %v21050_v56  ;;  %v18773_v16 = vld [vmem:[%s20883_s3 + $0x480] sm:$0xff]  }
 0x35f   : > { %15362 = vmatpush3.bf16.msra.mxu0 %v16106_v47  ;;  %15410 = vmatpush3.bf16.msra.mxu1 %v16110_v48  ;;  %v4796_v20 = vadd.f32 %v4786_v14, %v4502_v36  ;;  %v4503_v62 = vadd.f32 %v4493_v63, %v4209_v30  ;;  %v18778_v51 = vld [vmem:[%s20883_s3 + $0x4c0] sm:$0xff]   ;;  %v4494_v36 = vrot.slane %v18342_v46, 1 }
 0x360   : > { %v14891_v61 = vpop.f32.mrb[180].mxu0  ;;  %v15035_v12 = vpop.f32.mrb[196].mxu1  ;;  %15363 = vmatprep.subr.bf16.mxu0 %v16109_v37  ;;  %15411 = vmatprep.subr.bf16.mxu1 %v16111_v59  ;;  %v4501_v7 = vadd.f32 %v4491_v32, %v4207_v4  ;;  %v4789_v32 = vrot.slane %v18545_v44, 2 }
 0x361   : > { %v4062_v47 = vpop.f32.mrb[181].mxu0  ;;  %v18780_v48 = vpop.f32.mrb[197].mxu1  ;;  %v4797_v49 = vadd.f32 %v4787_v53, %v4503_v62 }
 0x362   : > { %v4200_v9 = vrot.slane %v4062_v47, 1  ;;  %v14892_v11 = vpop.f32.mrb[182].mxu0  ;;  %v15036_v58 = vpop.f32.mrb[198].mxu1  ;;  %v4795_v63 = vadd.f32 %v4785_v24, %v4501_v7 }
 0x363   : > { %v4065_v14 = vpop.f32.mrb[183].mxu0  ;;  %v18782_v30 = vpop.f32.mrb[199].mxu1  ;;  %15364 = vmatpush3.bf16.msra.mxu0 %v16109_v37  ;;  %15412 = vmatpush3.bf16.msra.mxu1 %v16111_v59  ;;  %v4495_v37 = vrot.slane %v18344_v26, 1  ;;  %v4788_v59 = vrot.slane %v18540_v10, 2  ;;  %v4472_v26 = vrot.slane %v18239_v28, 1  ;;  %v4766_v11 = vrot.slane %v18564_v42, 1 }
 0x364   : > { %v4210_v61 = vadd.f32 %v4200_v9, %v18594_v50  ;;  %v4201_v12 = vrot.slane %v4065_v14, 1  ;;  %15445 = vmatprep.subr.bf16.mxu0 %v18773_v16  ;;  %15493 = vmatprep.subr.bf16.mxu1 %v18778_v51  ;;  %v4473_v9 = vrot.slane %v18247_v3, 1  ;;  %v4471_v28 = vrot.slane %v18249_v38, 1 }
 0x365   : > { %15286 = vmatmul.mubr.msk.bf16.gmra.mrb[28].mxu0 %vm21046_vm2, %v21050_v56  ;;  %15334 = vmatmul.mubr.msk.bf16.gmra.mrb[48].mxu1 %vm21046_vm2, %v21050_v56  ;;  %v5060_v42 = vrot.slane %v18731_v31, 2  ;;  %v4765_v38 = vrot.slane %v18574_v2, 1  ;;  %v5061_v31 = vrot.slane %v18739_v27, 2 }
 0x366   : > { %v4211_v46 = vadd.f32 %v4201_v12, %v18599_v35  ;;  %15289 = vmatprep.mubr.msk.bf16.mxu0 %vm21047_vm13, %v21050_v56  ;;  %15337 = vmatprep.mubr.msk.bf16.mxu1 %vm21047_vm13, %v21050_v56  ;;  %v4504_v50 = vadd.f32 %v4494_v36, %v4210_v61 }
 0x368   : > { %v14895_v4 = vpop.f32.mrb[184].mxu0  ;;  %v15039_v53 = vpop.f32.mrb[200].mxu1  ;;  %v4798_v62 = vadd.f32 %v4788_v59, %v4504_v50  ;;  %v4505_v24 = vadd.f32 %v4495_v37, %v4211_v46 }
 0x369   : > { %v4188_v10 = vadd.f32 %v14895_v4, %v18500_v41  ;;  %v5080_v35 = vrot.slane %v15039_v53, 2  ;;  %v4076_v7 = vpop.f32.mrb[185].mxu0  ;;  %v4928_v47 = vpop.f32.mrb[201].mxu1  ;;  %v4767_v41 = vrot.slane %v18569_v25, 1 }
 0x36a   : > { %v14896_v58 = vpop.f32.mrb[186].mxu0  ;;  %v15040_v14 = vpop.f32.mrb[202].mxu1  ;;  %v4799_v36 = vadd.f32 %v4789_v32, %v4505_v24  ;;  %v4474_v47 = vrot.slane %v18291_v29, 1  ;;  %v4769_v29 = vrot.slane %v18596_v39, 1 }
 0x36b   : > { %v4482_v61 = vadd.f32 %v4472_v26, %v4188_v10  ;;  %v4189_v44 = vadd.f32 %v14896_v58, %v18505_v17  ;;  %v5081_v12 = vrot.slane %v15040_v14, 2  ;;  %v4078_v59 = vpop.f32.mrb[187].mxu0  ;;  %v4930_v37 = vpop.f32.mrb[203].mxu1  ;;  %v18809_v46 = vadd.f32 %v5080_v35, %v4796_v20 }
 0x36c   : > { %v4187_v50 = vadd.f32 %v4078_v59, %v18510_v0  ;;  %v5079_v3 = vrot.slane %v4930_v37, 2  ;;  %v4475_v14 = vrot.slane %v18293_v54, 1  ;;  %v5062_v54 = vrot.slane %v18780_v48, 2 }
 0x36d   : > { %v4483_v4 = vadd.f32 %v4473_v9, %v4189_v44  ;;  %15290 = vmatmul.mubr.msk.bf16.gmra.mrb[32].mxu0 %vm21048_vm6, %v21050_v56  ;;  %15338 = vmatmul.mubr.msk.bf16.gmra.mrb[52].mxu1 %vm21048_vm6, %v21050_v56  ;;  %v4776_v17 = vadd.f32 %v4766_v11, %v4482_v61  ;;  %v18821_v20 = vadd.f32 %v5081_v12, %v4797_v49  ;;  %v5059_v49 = vrot.slane %v18743_v55, 2 }
 0x36e   : > { %v4481_v25 = vadd.f32 %v4471_v28, %v4187_v50  ;;  %15293 = vmatprep.mubr.msk.bf16.mxu0 %vm21049_vm8, %v21050_v56  ;;  %15341 = vmatprep.mubr.msk.bf16.mxu1 %vm21049_vm8, %v21050_v56  ;;  %v18830_v0 = vadd.f32 %v5079_v3, %v4795_v63  ;;  %v4768_v55 = vrot.slane %v18591_v6, 1  ;;  %v5063_v6 = vrot.slane %v18782_v30, 2 }
 0x36f   : > { %v18833_v32 = vadd.f32 %v5060_v42, %v4776_v17  ;;  %v4777_v53 = vadd.f32 %v4767_v41, %v4483_v4 }
 0x370   : > { %v14899_v24 = vpop.f32.mrb[188].mxu0  ;;  %v15043_v2 = vpop.f32.mrb[204].mxu1  ;;  %v4775_v26 = vadd.f32 %v4765_v38, %v4481_v25 }
 0x371   : > { %v4091_v10 = vpop.f32.mrb[189].mxu0  ;;  %v4943_v35 = vpop.f32.mrb[205].mxu1  ;;  %v18836_v7 = vadd.f32 %v5061_v31, %v4777_v53 }
 0x372   : > { %v4190_v9 = vadd.f32 %v4091_v10, %v18543_v21  ;;  %v5082_v63 = vrot.slane %v4943_v35, 2  ;;  %v14900_v11 = vpop.f32.mrb[190].mxu0  ;;  %v15044_v58 = vpop.f32.mrb[206].mxu1  ;;  %v18840_v27 = vadd.f32 %v5059_v49, %v4775_v26  ;;  %v21079_v26 = vld [vmem:[#allocation20_spill] sm:$0xff] }
 0x373   : > { %v4094_v61 = vpop.f32.mrb[191].mxu0  ;;  %v4946_v44 = vpop.f32.mrb[207].mxu1  ;;  %v4451_v10 = vrot.slane %v21079_v26, 1  ;;  %v21081_v11 = vld [vmem:[#allocation24_spill] sm:$0xff] }
 0x374   : > { %v4484_v12 = vadd.f32 %v4474_v47, %v4190_v9  ;;  %v4191_v59 = vadd.f32 %v4094_v61, %v18548_v15  ;;  %v5083_v37 = vrot.slane %v4946_v44, 2  ;;  %v18845_v28 = vadd.f32 %v5082_v63, %v4798_v62  ;;  %v21080_v9 = vld [vmem:[#allocation21_spill] sm:$0xff] }
 0x375   : > { %15294 = vmatmul.mubr.msk.bf16.gmra.mrb[36].mxu0 %vm17404_vm14, %v21050_v56  ;;  %15342 = vmatmul.mubr.msk.bf16.gmra.mrb[56].mxu1 %vm17404_vm14, %v21050_v56  ;;  %v4454_v63 = vrot.slane %v21080_v9, 1  ;;  %v4747_v58 = vrot.slane %v21081_v11, 2  ;;  %v16118_v11 = vld [vmem:[%s20883_s3 + $0x4c8] sm:$0xff]  }
 0x376   : > { %21076 = vst [vmem:[#allocation39_spill] sm:$0xff] %v18845_v28  ;;  %v4485_v21 = vadd.f32 %v4475_v14, %v4191_v59  ;;  %15297 = vmatprep.mubr.msk.bf16.mxu0 %vm17441_vm0, %v21050_v56  ;;  %15345 = vmatprep.mubr.msk.bf16.mxu1 %vm17441_vm0, %v21050_v56  ;;  %v4778_v39 = vadd.f32 %v4768_v55, %v4484_v12  ;;  %v21084_v12 = vld [vmem:[#allocation25_spill] sm:$0xff] }
 0x377   : > { %v18861_v15 = vadd.f32 %v5083_v37, %v4799_v36  ;;  %v21078_v36 = vld [vmem:[#allocation19_spill] sm:$0xff] }
 0x378   : > { %v14903_v62 = vpop.f32.mrb[192].mxu0  ;;  %v18864_v41 = vpop.f32.mrb[208].mxu1  ;;  %v18866_v50 = vadd.f32 %v5062_v54, %v4778_v39  ;;  %v4779_v48 = vadd.f32 %v4769_v29, %v4485_v21  ;;  %v4453_v53 = vrot.slane %v21078_v36, 1 }
 0x379   : > { %21077 = vst [vmem:[#allocation40_spill] sm:$0xff] %v18861_v15  ;;  %v4174_v3 = vrot.slane %v14903_v62, 1  ;;  %v4105_v42 = vpop.f32.mrb[193].mxu0  ;;  %v18868_v4 = vpop.f32.mrb[209].mxu1 }
 0x37a   : > { %v4172_v17 = vrot.slane %v4105_v42, 1  ;;  %v14904_v38 = vpop.f32.mrb[194].mxu0  ;;  %v18870_v25 = vpop.f32.mrb[210].mxu1  ;;  %v18872_v31 = vadd.f32 %v5063_v6, %v4779_v48  ;;  %v21087_v6 = vld [vmem:[#allocation27_spill] sm:$0xff] }
 0x37b   : > { %v4184_v30 = vadd.f32 %v18667_v23, %v4174_v3  ;;  %v4175_v49 = vrot.slane %v14904_v38, 1  ;;  %v4108_v24 = vpop.f32.mrb[195].mxu0  ;;  %v18876_v2 = vpop.f32.mrb[211].mxu1  ;;  %v21083_v23 = vld [vmem:[#allocation22_spill] sm:$0xff]  ;;  %v4746_v62 = vrot.slane %v21087_v6, 2  ;;  %v16114_v6 = vld [vmem:[%s20883_s3 + $0x490] sm:$0xff]  }
 0x37c   : > { %v4182_v35 = vadd.f32 %v18672_v43, %v4172_v17  ;;  %v4173_v47 = vrot.slane %v4108_v24, 1  ;;  %v4452_v44 = vrot.slane %v21083_v23, 1  ;;  %v4745_v43 = vrot.slane %v21084_v12, 2 }
 0x37d   : > { %v4463_v14 = vadd.f32 %v4453_v53, %v4184_v30  ;;  %v4185_v55 = vadd.f32 %v18677_v19, %v4175_v49  ;;  %15298 = vmatmul.mubr.msk.bf16.gmra.mrb[40].mxu0 %vm17437_vm12, %v21050_v56  ;;  %15346 = vmatmul.mubr.msk.bf16.gmra.mrb[60].mxu1 %vm17437_vm12, %v21050_v56  ;;  %v21086_v19 = vld [vmem:[#allocation26_spill] sm:$0xff] }
 0x37e   : > { %v4461_v59 = vadd.f32 %v4451_v10, %v4182_v35  ;;  %v4183_v37 = vadd.f32 %v18682_v5, %v4173_v47  ;;  %15365 = vmatprep.mubr.msk.bf16.mxu0 %vm17145_vm5, %v21050_v56  ;;  %15413 = vmatprep.mubr.msk.bf16.mxu1 %vm17145_vm5, %v21050_v56  ;;  %v4748_v54 = vrot.slane %v21086_v19, 2  ;;  %v21088_v35 = vld [vmem:[#allocation23_spill] sm:$0xff] }
 0x37f   : > { %v4464_v21 = vadd.f32 %v4454_v63, %v4185_v55  ;;  %v4757_v39 = vadd.f32 %v4747_v58, %v4463_v14  ;;  %v4455_v47 = vrot.slane %v21088_v35, 1  ;;  %v16113_v63 = vld [vmem:[%s20883_s3 + $0x488] sm:$0xff]   ;;  %v4749_v58 = vrot.slane %v18633_v8, 2  ;;  %v21090_v55 = vld [vmem:[#allocation14_spill] sm:$0xff]  ;;  %v21093_v8 = vld [vmem:[#allocation17_spill] sm:$0xff] }
 0x380   : > { %v4462_v48 = vadd.f32 %v4452_v44, %v4183_v37  ;;  %v14907_v3 = vpop.f32.mrb[196].mxu0  ;;  %v15051_v42 = vpop.f32.mrb[212].mxu1  ;;  %v4755_v17 = vadd.f32 %v4745_v43, %v4461_v59  ;;  %v4433_v23 = vrot.slane %v21090_v55, 1  ;;  %v21091_v44 = vld [vmem:[#allocation15_spill] sm:$0xff]  ;;  %v21092_v43 = vld [vmem:[#allocation16_spill] sm:$0xff]  ;;  %v4432_v37 = vrot.slane %v21093_v8, 1 }
 0x381   : > { %v4121_v38 = vpop.f32.mrb[197].mxu0  ;;  %v18900_v5 = vpop.f32.mrb[213].mxu1  ;;  %v18902_v36 = vadd.f32 %v4748_v54, %v4464_v21  ;;  %v4431_v12 = vrot.slane %v21091_v44, 1  ;;  %v4434_v59 = vrot.slane %v21092_v43, 1  ;;  %v21095_v3 = vld [vmem:[#allocation10_spill] sm:$0xff]  ;;  %v21099_v43 = vld [vmem:[#allocation12_spill] sm:$0xff] }
 0x382   : > { %v4176_v53 = vrot.slane %v4121_v38, 1  ;;  %v14908_v30 = vpop.f32.mrb[198].mxu0  ;;  %v15052_v49 = vpop.f32.mrb[214].mxu1  ;;  %v18904_v24 = vadd.f32 %v4746_v62, %v4462_v48  ;;  %v21094_v62 = vld [vmem:[#allocation35_spill] sm:$0xff]  ;;  %v4725_v48 = vrot.slane %v18669_v34, 1 }
 0x383   : > { %v4124_v26 = vpop.f32.mrb[199].mxu0  ;;  %v4976_v10 = vpop.f32.mrb[215].mxu1  ;;  %v21096_v49 = vld [vmem:[#allocation36_spill] sm:$0xff] }
 0x384   : > { %v4186_v9 = vadd.f32 %v4176_v53, %v18711_v22  ;;  %v4728_v26 = vrot.slane %v21096_v49, 1  ;;  %v21097_v10 = vld [vmem:[#allocation37_spill] sm:$0xff] }
 0x385   : > { %15366 = vmatmul.mubr.msk.bf16.vlgmr.msra.gmra.mrb[44].mxu0 %vm17138_vm3, %v21050_v56  ;;  %15414 = vmatmul.mubr.msk.bf16.vlgmr.msra.gmra.mrb[64].mxu1 %vm17138_vm3, %v21050_v56  ;;  %v4726_v35 = vrot.slane %v21097_v10, 1 }
 0x386   : > { %15369 = vmatprep.mubr.msk.bf16.mxu0 %vm17195_vm11, %v21050_v56  ;;  %15417 = vmatprep.mubr.msk.bf16.mxu1 %vm17195_vm11, %v21050_v56  ;;  %v4465_v14 = vadd.f32 %v4455_v47, %v4186_v9  ;;  %v21098_v47 = vld [vmem:[#allocation11_spill] sm:$0xff] }
 0x387   : > { %15446 = vmatpush3.bf16.msra.mxu0 %v18773_v16  ;;  %15494 = vmatpush3.bf16.msra.mxu1 %v18778_v51  ;;  %v16120_v16 = vld [vmem:[%s20883_s3 + $0x4d0] sm:$0xff]   ;;  %v4727_v51 = vrot.slane %v21094_v62, 1 }
 0x388   : > { %v14911_v19 = vpop.f32.mrb[64].mxu0  ;;  %v15055_v54 = vpop.f32.mrb[216].mxu1  ;;  %15447 = vmatprep.subr.bf16.mxu0 %v16113_v63  ;;  %v18933_v21 = vadd.f32 %v4749_v58, %v4465_v14  ;;  %15495 = vmatprep.subr.bf16.mxu1 %v16118_v11 }
 0x389   : > { %v15803_v42 = vadd.f32 %v21095_v3, %v14911_v19  ;;  %v5041_v38 = vrot.slane %v15055_v54, 2  ;;  %v4134_v53 = vpop.f32.mrb[65].mxu0  ;;  %v4986_v30 = vpop.f32.mrb[217].mxu1  ;;  %v21100_v3 = vld [vmem:[#allocation13_spill] sm:$0xff] }
 0x38a   : > { %v15806_v9 = vadd.f32 %v21098_v47, %v4134_v53  ;;  %v5039_v58 = vrot.slane %v4986_v30, 2  ;;  %v14912_v14 = vpop.f32.mrb[66].mxu0  ;;  %v15056_v55 = vpop.f32.mrb[218].mxu1  ;;  %v16115_v53 = vld [vmem:[%s20883_s3 + $0x498] sm:$0xff]  }
 0x38b   : > { %v4443_v44 = vadd.f32 %v15803_v42, %v4433_v23  ;;  %v15809_v8 = vadd.f32 %v21099_v43, %v14912_v14  ;;  %v5042_v62 = vrot.slane %v15056_v55, 2  ;;  %v4137_v15 = vpop.f32.mrb[67].mxu0  ;;  %v4989_v34 = vpop.f32.mrb[219].mxu1  ;;  %15448 = vmatpush3.bf16.msra.mxu0 %v16113_v63  ;;  %v18948_v19 = vadd.f32 %v5041_v38, %v4757_v39  ;;  %15496 = vmatpush3.bf16.msra.mxu1 %v16118_v11  ;;  %v16121_v23 = vld [vmem:[%s20883_s3 + $0x4d8] sm:$0xff]  }
 0x38c   : > { %v4441_v54 = vadd.f32 %v15806_v9, %v4431_v12  ;;  %v15812_v49 = vadd.f32 %v21100_v3, %v4137_v15  ;;  %v5040_v28 = vrot.slane %v4989_v34, 2  ;;  %15449 = vmatprep.subr.bf16.mxu0 %v16114_v6  ;;  %v18954_v30 = vadd.f32 %v5039_v58, %v4755_v17  ;;  %15497 = vmatprep.subr.bf16.mxu1 %v16120_v16  ;;  %v16116_v9 = vld [vmem:[%s20883_s3 + $0x4a0] sm:$0xff]  }
 0x38d   : > { %v5021_v39 = vrot.slane %v18864_v41, 2  ;;  %v4444_v63 = vadd.f32 %v15809_v8, %v4434_v59  ;;  %15370 = vmatmul.mubr.msk.bf16.gmra.mrb[48].mxu0 %vm17188_vm9, %v21050_v56  ;;  %15418 = vmatmul.mubr.msk.bf16.gmra.mrb[68].mxu1 %vm17188_vm9, %v21050_v56  ;;  %v4737_v15 = vadd.f32 %v4727_v51, %v4443_v44  ;;  %v18967_v17 = vadd.f32 %v5042_v62, %v18902_v36  ;;  %v21105_v34 = vld [vmem:[#allocation38_spill] sm:$0xff] }
 0x38e   : > { %v5019_v12 = vrot.slane %v18868_v4, 2  ;;  %v4442_v42 = vadd.f32 %v15812_v49, %v4432_v37  ;;  %15373 = vmatprep.mubr.msk.bf16.mxu0 %vm17243_vm1, %v21050_v56  ;;  %15421 = vmatprep.mubr.msk.bf16.mxu1 %vm17243_vm1, %v21050_v56  ;;  %v18977_v41 = vadd.f32 %v5040_v28, %v18904_v24  ;;  %v4735_v59 = vadd.f32 %v4725_v48, %v4441_v54  ;;  %v16123_v28 = vld [vmem:[%s20883_s3 + $0x4e0] sm:$0xff]  }
 0x38f   : > { %v5022_v51 = vrot.slane %v18870_v25, 2  ;;  %15450 = vmatpush3.bf16.msra.mxu0 %v16114_v6  ;;  %v5031_v36 = vadd.f32 %v5021_v39, %v4737_v15  ;;  %15498 = vmatpush3.bf16.msra.mxu1 %v16120_v16  ;;  %v4738_v10 = vadd.f32 %v4728_v26, %v4444_v63  ;;  %v5020_v4 = vrot.slane %v18876_v2, 2  ;;  %v21103_v16 = vld [vmem:[#allocation18_spill] sm:$0xff]  ;;  %v16119_v39 = vld [vmem:[%s20883_s3 + $0x4a8] sm:$0xff]  }
 0x390   : > { %v14915_v37 = vpop.f32.mrb[200].mxu0  ;;  %v15059_v47 = vpop.f32.mrb[220].mxu1  ;;  %15451 = vmatprep.subr.bf16.mxu0 %v16115_v53  ;;  %v4736_v58 = vadd.f32 %v4726_v35, %v4442_v42  ;;  %v5029_v14 = vadd.f32 %v5019_v12, %v4735_v59  ;;  %15499 = vmatprep.subr.bf16.mxu1 %v16121_v23  ;;  %v4435_v2 = vrot.slane %v21103_v16, 1  ;;  %v21104_v48 = vld [vmem:[#allocation34_spill] sm:$0xff]  ;;  %v4729_v54 = vrot.slane %v21105_v34, 1  ;;  %v16124_v63 = vld [vmem:[%s20883_s3 + $0x4e8] sm:$0xff]  }
 0x391   : > { %v4150_v25 = vpop.f32.mrb[201].mxu0  ;;  %v5002_v24 = vpop.f32.mrb[221].mxu1  ;;  %v18987_v6 = vadd.f32 %v5022_v51, %v4738_v10  ;;  %v16126_v51 = vld [vmem:[%s20883_s3 + $0x4f0] sm:$0xff]   ;;  %v16125_v16 = vld [vmem:[%s20883_s3 + $0x4b8] sm:$0xff]  }
 0x392   : > { %v4166_v26 = vadd.f32 %v4150_v25, %v21104_v48  ;;  %v5043_v55 = vrot.slane %v5002_v24, 2  ;;  %v14916_v44 = vpop.f32.mrb[202].mxu0  ;;  %v15060_v43 = vpop.f32.mrb[222].mxu1  ;;  %v5030_v8 = vadd.f32 %v5020_v4, %v4736_v58  ;;  %v19043_v48 = vld [vmem:[%s20883_s3 + $0x500] sm:$0xff]  }
 0x393   : > { %v4153_v62 = vpop.f32.mrb[203].mxu0  ;;  %v5005_v35 = vpop.f32.mrb[223].mxu1  ;;  %15452 = vmatpush3.bf16.msra.mxu0 %v16115_v53  ;;  %15500 = vmatpush3.bf16.msra.mxu1 %v16121_v23 }
 0x394   : > { %v4445_v3 = vadd.f32 %v4435_v2, %v4166_v26  ;;  %v18993_v49 = vadd.f32 %v5043_v55, %v18933_v21  ;;  %15453 = vmatprep.subr.bf16.mxu0 %v16116_v9  ;;  %15501 = vmatprep.subr.bf16.mxu1 %v16123_v28  ;;  %v5023_v21 = vrot.slane %v18900_v5, 2  ;;  %v16122_v5 = vld [vmem:[%s20883_s3 + $0x4b0] sm:$0xff]   ;;  %v16127_v2 = vld [vmem:[%s20883_s3 + $0x4f8] sm:$0xff]   ;;  %v19048_v26 = vld [vmem:[%s20883_s3 + $0x540] sm:$0xff]  }
 0x395   : > { %15374 = vmatmul.mubr.msk.bf16.gmra.mrb[52].mxu0 %vm17236_vm15, %v21050_v56  ;;  %15422 = vmatmul.mubr.msk.bf16.gmra.mrb[72].mxu1 %vm17236_vm15, %v21050_v56 }
 0x396   : > { %15377 = vmatprep.mubr.msk.bf16.mxu0 %vm17291_vm10, %v21050_v56  ;;  %15425 = vmatprep.mubr.msk.bf16.mxu1 %vm17291_vm10, %v21050_v56  ;;  %v4739_v23 = vadd.f32 %v4729_v54, %v4445_v3 }
 0x397   : > { %15454 = vmatpush3.bf16.msra.mxu0 %v16116_v9  ;;  %15502 = vmatpush3.bf16.msra.mxu1 %v16123_v28 }
 0x398   : > { %v15079_v12 = vpop.f32.mrb[204].mxu0  ;;  %v19014_v42 = vpop.f32.mrb[224].mxu1  ;;  %15455 = vmatprep.subr.bf16.mxu0 %v16119_v39  ;;  %v5033_v59 = vadd.f32 %v5023_v21, %v4739_v23  ;;  %15503 = vmatprep.subr.bf16.mxu1 %v16124_v63 }
 0x399   : > { %v5193_v10 = vpop.f32.mrb[205].mxu0  ;;  %v5427_v4 = vpop.f32.mrb[225].mxu1  ;;  %v5309_v37 = vadd.f32 %v15079_v12, %v5030_v8 }
 0x39a   : > { %v15080_v47 = vpop.f32.mrb[206].mxu0  ;;  %v15128_v9 = vpop.f32.mrb[226].mxu1 }
 0x39b   : > { %v5195_v58 = vpop.f32.mrb[207].mxu0  ;;  %v5429_v28 = vpop.f32.mrb[227].mxu1  ;;  %v5310_v25 = vadd.f32 %v15080_v47, %v5031_v36  ;;  %15456 = vmatpush3.bf16.msra.mxu0 %v16119_v39  ;;  %15504 = vmatpush3.bf16.msra.mxu1 %v16124_v63  ;;  %v5553_v39 = vrot.slane %v19014_v42, 1 }
 0x39c   : > { %v5308_v24 = vadd.f32 %v5195_v58, %v5029_v14  ;;  %15457 = vmatprep.subr.bf16.mxu0 %v16122_v5  ;;  %15505 = vmatprep.subr.bf16.mxu1 %v16126_v51 }
 0x39d   : > { %15378 = vmatmul.mubr.msk.bf16.gmra.mrb[56].mxu0 %vm17284_vm7, %v21050_v56  ;;  %15426 = vmatmul.mubr.msk.bf16.gmra.mrb[76].mxu1 %vm17284_vm7, %v21050_v56 }
 0x39e   : > { %15381 = vmatprep.mubr.msk.bf16.mxu0 %vm17337_vm4, %v21050_v56  ;;  %15429 = vmatprep.mubr.msk.bf16.mxu1 %vm17337_vm4, %v21050_v56 }
 0x39f   : > { %15458 = vmatpush3.bf16.msra.mxu0 %v16122_v5  ;;  %15506 = vmatpush3.bf16.msra.mxu1 %v16126_v51  ;;  %v5554_v51 = vrot.slane %v15128_v9, 1 }
 0x3a0   : > { %v15083_v36 = vpop.f32.mrb[208].mxu0  ;;  %v15131_v14 = vpop.f32.mrb[228].mxu1  ;;  %15459 = vmatprep.subr.bf16.mxu0 %v16125_v16  ;;  %15507 = vmatprep.subr.bf16.mxu1 %v16127_v2 }
 0x3a1   : > { %v5208_v55 = vpop.f32.mrb[209].mxu0  ;;  %v5442_v44 = vpop.f32.mrb[229].mxu1 }
 0x3a2   : > { %v15084_v43 = vpop.f32.mrb[210].mxu0  ;;  %v15132_v8 = vpop.f32.mrb[230].mxu1  ;;  %v5311_v62 = vadd.f32 %v5208_v55, %v18987_v6 }
 0x3a3   : > { %v5211_v35 = vpop.f32.mrb[211].mxu0  ;;  %v5445_v34 = vpop.f32.mrb[231].mxu1  ;;  %15460 = vmatpush3.bf16.msra.mxu0 %v16125_v16  ;;  %15508 = vmatpush3.bf16.msra.mxu1 %v16127_v2  ;;  %v5552_v2 = vrot.slane %v5429_v28, 1 }
 0x3a4   : > { %v5312_v54 = vadd.f32 %v5211_v35, %v5033_v59  ;;  %15541 = vmatprep.subr.bf16.mxu0 %v19043_v48  ;;  %15589 = vmatprep.subr.bf16.mxu1 %v19048_v26 }
 0x3a5   : > { %15382 = vmatmul.mubr.msk.bf16.gmra.mrb[60].mxu0 %vm21046_vm2, %v21050_v56  ;;  %15430 = vmatmul.mubr.msk.bf16.gmra.mrb[80].mxu1 %vm21046_vm2, %v21050_v56 }
 0x3a6   : > { %15385 = vmatprep.mubr.msk.bf16.mxu0 %vm21047_vm13, %v21050_v56  ;;  %15433 = vmatprep.mubr.msk.bf16.mxu1 %vm21047_vm13, %v21050_v56 }
 0x3a8   : > { %v15087_v6 = vpop.f32.mrb[212].mxu0  ;;  %v15135_v3 = vpop.f32.mrb[232].mxu1 }
 0x3a9   : > { %v5314_v63 = vadd.f32 %v15087_v6, %v18977_v41  ;;  %v19067_v21 = vadd.f32 %v15135_v3, %v5309_v37  ;;  %v5222_v23 = vpop.f32.mrb[213].mxu0  ;;  %v5456_v12 = vpop.f32.mrb[233].mxu1  ;;  %v5556_v6 = vrot.slane %v5445_v34, 1 }
 0x3aa   : > { %v15088_v59 = vpop.f32.mrb[214].mxu0  ;;  %v15136_v5 = vpop.f32.mrb[234].mxu1 }
 0x3ab   : > { %v5315_v10 = vadd.f32 %v15088_v59, %v18948_v19  ;;  %v19070_v4 = vadd.f32 %v15136_v5, %v5310_v25  ;;  %v5224_v47 = vpop.f32.mrb[215].mxu0  ;;  %v5458_v58 = vpop.f32.mrb[235].mxu1  ;;  %v19072_v16 = vadd.f32 %v5553_v39, %v5314_v63  ;;  %v5555_v25 = vrot.slane %v5442_v44, 1 }
 0x3ac   : > { %v5313_v42 = vadd.f32 %v5224_v47, %v18954_v30  ;;  %v19075_v36 = vadd.f32 %v5458_v58, %v5308_v24 }
 0x3ad   : > { %15386 = vmatmul.mubr.msk.bf16.gmra.mrb[68].mxu0 %vm21048_vm6, %v21050_v56  ;;  %15434 = vmatmul.mubr.msk.bf16.gmra.mrb[84].mxu1 %vm21048_vm6, %v21050_v56  ;;  %v19083_v19 = vadd.f32 %v5554_v51, %v5315_v10 }
 0x3ae   : > { %15389 = vmatprep.mubr.msk.bf16.mxu0 %vm21049_vm8, %v21050_v56  ;;  %15437 = vmatprep.mubr.msk.bf16.mxu1 %vm21049_vm8, %v21050_v56  ;;  %v19091_v30 = vadd.f32 %v5552_v2, %v5313_v42 }
 0x3b0   : > { %v15091_v41 = vpop.f32.mrb[216].mxu0  ;;  %v15139_v37 = vpop.f32.mrb[236].mxu1 }
 0x3b1   : > { %v5237_v9 = vpop.f32.mrb[217].mxu0  ;;  %v5471_v28 = vpop.f32.mrb[237].mxu1 }
 0x3b2   : > { %v5316_v24 = vadd.f32 %v5237_v9, %v18967_v17  ;;  %v19094_v14 = vadd.f32 %v5471_v28, %v5311_v62  ;;  %v15092_v55 = vpop.f32.mrb[218].mxu0  ;;  %v15140_v43 = vpop.f32.mrb[238].mxu1  ;;  %v16129_v9 = vld [vmem:[%s20883_s3 + $0x508] sm:$0xff]  }
 0x3b3   : > { %v5240_v8 = vpop.f32.mrb[219].mxu0  ;;  %v5474_v35 = vpop.f32.mrb[239].mxu1  ;;  %v16136_v55 = vld [vmem:[%s20883_s3 + $0x550] sm:$0xff]  }
 0x3b4   : > { %v5317_v3 = vadd.f32 %v5240_v8, %v18993_v49  ;;  %v19097_v39 = vadd.f32 %v5474_v35, %v5312_v54  ;;  %v19099_v63 = vadd.f32 %v5555_v25, %v5316_v24  ;;  %v16134_v25 = vld [vmem:[%s20883_s3 + $0x548] sm:$0xff]   ;;  %v16130_v24 = vld [vmem:[%s20883_s3 + $0x510] sm:$0xff]  }
 0x3b5   : > { %15390 = vmatmul.mubr.msk.bf16.gmra.mrb[76].mxu0 %vm17404_vm14, %v21050_v56  ;;  %15438 = vmatmul.mubr.msk.bf16.gmra.mrb[88].mxu1 %vm17404_vm14, %v21050_v56 }
 0x3b6   : > { %15393 = vmatprep.mubr.msk.bf16.mxu0 %vm17441_vm0, %v21050_v56  ;;  %15441 = vmatprep.mubr.msk.bf16.mxu1 %vm17441_vm0, %v21050_v56  ;;  %v19113_v17 = vadd.f32 %v5556_v6, %v5317_v3 }
 0x3b8   : > { %v15095_v49 = vpop.f32.mrb[220].mxu0  ;;  %v15143_v44 = vpop.f32.mrb[240].mxu1 }
 0x3b9   : > { %v5251_v62 = vpop.f32.mrb[221].mxu0  ;;  %v5485_v34 = vpop.f32.mrb[241].mxu1  ;;  %v5319_v54 = vadd.f32 %v15095_v49, %v18833_v32  ;;  %v5578_v43 = vrot.slane %v15143_v44, 1 }
 0x3ba   : > { %v15096_v23 = vpop.f32.mrb[222].mxu0  ;;  %v15144_v12 = vpop.f32.mrb[242].mxu1 }
 0x3bb   : > { %v5253_v59 = vpop.f32.mrb[223].mxu0  ;;  %v5487_v5 = vpop.f32.mrb[243].mxu1  ;;  %v5320_v51 = vadd.f32 %v15096_v23, %v18836_v7  ;;  %v5579_v49 = vrot.slane %v15144_v12, 1  ;;  %v16131_v12 = vld [vmem:[%s20883_s3 + $0x518] sm:$0xff]  }
 0x3bc   : > { %v5318_v10 = vadd.f32 %v5253_v59, %v18840_v27  ;;  %v5577_v44 = vrot.slane %v5487_v5, 1 }
 0x3bd   : > { %15394 = vmatmul.mubr.msk.bf16.gmra.mrb[84].mxu0 %vm17437_vm12, %v21050_v56  ;;  %15442 = vmatmul.mubr.msk.bf16.gmra.mrb[92].mxu1 %vm17437_vm12, %v21050_v56 }
 0x3be   : > { %15461 = vmatprep.mubr.msk.bf16.mxu0 %vm17145_vm5, %v21050_v56  ;;  %15509 = vmatprep.mubr.msk.bf16.mxu1 %vm17145_vm5, %v21050_v56 }
 0x3c0   : > { %v15099_v32 = vpop.f32.mrb[224].mxu0  ;;  %v15147_v7 = vpop.f32.mrb[244].mxu1 }
 0x3c1   : > { %v5266_v47 = vpop.f32.mrb[225].mxu0  ;;  %v19130_v27 = vpop.f32.mrb[245].mxu1  ;;  %v16132_v7 = vld [vmem:[%s20883_s3 + $0x520] sm:$0xff]  }
 0x3c2   : > { %v15100_v58 = vpop.f32.mrb[226].mxu0  ;;  %v15148_v2 = vpop.f32.mrb[246].mxu1  ;;  %v5321_v42 = vadd.f32 %v5266_v47, %v18866_v50  ;;  %v16139_v47 = vld [vmem:[%s20883_s3 + $0x560] sm:$0xff]  }
 0x3c3   : > { %v5269_v41 = vpop.f32.mrb[227].mxu0  ;;  %v19133_v37 = vpop.f32.mrb[247].mxu1 }
 0x3c4   : > { %v19139_v28 = vadd.f32 %v5269_v41, %v18872_v31  ;;  %v5580_v41 = vrot.slane %v19130_v27, 1  ;;  %v16135_v27 = vld [vmem:[%s20883_s3 + $0x528] sm:$0xff]  }
 0x3c5   : > { %15462 = vmatmul.mubr.msk.bf16.vlgmr.msra.gmra.mrb[88].mxu0 %vm17138_vm3, %v21050_v56  ;;  %15510 = vmatmul.mubr.msk.bf16.vlgmr.msra.gmra.mrb[96].mxu1 %vm17138_vm3, %v21050_v56 }
 0x3c6   : > { %15465 = vmatprep.mubr.msk.bf16.mxu0 %vm17195_vm11, %v21050_v56  ;;  %15513 = vmatprep.mubr.msk.bf16.mxu1 %vm17195_vm11, %v21050_v56 }
 0x3c7   : > { %15542 = vmatpush3.bf16.msra.mxu0 %v19043_v48  ;;  %15590 = vmatpush3.bf16.msra.mxu1 %v19048_v26 }
 0x3c8   : > { %v15103_v50 = vpop.f32.mrb[228].mxu0  ;;  %v15151_v31 = vpop.f32.mrb[248].mxu1  ;;  %15543 = vmatprep.subr.bf16.mxu0 %v16129_v9  ;;  %15591 = vmatprep.subr.bf16.mxu1 %v16134_v25 }
 0x3c9   : > { %v5324_v8 = vadd.f32 %v15103_v50, %v18809_v46  ;;  %v19165_v35 = vadd.f32 %v15151_v31, %v5319_v54  ;;  %v5280_v48 = vpop.f32.mrb[229].mxu0  ;;  %v5514_v6 = vpop.f32.mrb[249].mxu1 }
 0x3ca   : > { %v15104_v26 = vpop.f32.mrb[230].mxu0  ;;  %v15152_v3 = vpop.f32.mrb[250].mxu1  ;;  %v21109_v6 = vld [vmem:[#allocation40_spill] sm:$0xff] }
 0x3cb   : > { %v19167_v62 = vadd.f32 %v5578_v43, %v5324_v8  ;;  %v5325_v34 = vadd.f32 %v15104_v26, %v18821_v20  ;;  %v19170_v23 = vadd.f32 %v15152_v3, %v5320_v51  ;;  %v5282_v59 = vpop.f32.mrb[231].mxu0  ;;  %v5516_v32 = vpop.f32.mrb[251].mxu1  ;;  %15544 = vmatpush3.bf16.msra.mxu0 %v16129_v9  ;;  %15592 = vmatpush3.bf16.msra.mxu1 %v16134_v25  ;;  %v16137_v20 = vld [vmem:[%s20883_s3 + $0x558] sm:$0xff]   ;;  %v21108_v9 = vld [vmem:[#allocation39_spill] sm:$0xff]  ;;  %v5581_v8 = vrot.slane %v19133_v37, 1 }
 0x3cc   : > { %v5323_v46 = vadd.f32 %v5282_v59, %v18830_v0  ;;  %v19173_v54 = vadd.f32 %v5516_v32, %v5318_v10  ;;  %15545 = vmatprep.subr.bf16.mxu0 %v16130_v24  ;;  %15593 = vmatprep.subr.bf16.mxu1 %v16136_v55  ;;  %v16142_v59 = vld [vmem:[%s20883_s3 + $0x570] sm:$0xff]  }
 0x3cd   : > { %v19181_v51 = vadd.f32 %v5579_v49, %v5325_v34  ;;  %15466 = vmatmul.mubr.msk.bf16.gmra.mrb[92].mxu0 %vm17188_vm9, %v21050_v56  ;;  %15514 = vmatmul.mubr.msk.bf16.gmra.mrb[100].mxu1 %vm17188_vm9, %v21050_v56  ;;  %v16138_v34 = vld [vmem:[%s20883_s3 + $0x530] sm:$0xff]  }
 0x3ce   : > { %v19189_v0 = vadd.f32 %v5577_v44, %v5323_v46  ;;  %15469 = vmatprep.mubr.msk.bf16.mxu0 %vm17243_vm1, %v21050_v56  ;;  %15517 = vmatprep.mubr.msk.bf16.mxu1 %vm17243_vm1, %v21050_v56 }
 0x3cf   : > { %15546 = vmatpush3.bf16.msra.mxu0 %v16130_v24  ;;  %15594 = vmatpush3.bf16.msra.mxu1 %v16136_v55 }
 0x3d0   : > { %v15107_v5 = vpop.f32.mrb[232].mxu0  ;;  %v15155_v10 = vpop.f32.mrb[252].mxu1  ;;  %15547 = vmatprep.subr.bf16.mxu0 %v16131_v12  ;;  %15595 = vmatprep.subr.bf16.mxu1 %v16137_v20 }
 0x3d1   : > { %v5295_v58 = vpop.f32.mrb[233].mxu0  ;;  %v5529_v2 = vpop.f32.mrb[253].mxu1 }
 0x3d2   : > { %v5326_v25 = vadd.f32 %v5295_v58, %v21108_v9  ;;  %v19205_v50 = vadd.f32 %v5529_v2, %v5321_v42  ;;  %v15108_v31 = vpop.f32.mrb[234].mxu0  ;;  %v15156_v24 = vpop.f32.mrb[254].mxu1  ;;  %v16140_v42 = vld [vmem:[%s20883_s3 + $0x568] sm:$0xff]   ;;  %v16141_v2 = vld [vmem:[%s20883_s3 + $0x538] sm:$0xff]  }
 0x3d3   : > { %v5298_v55 = vpop.f32.mrb[235].mxu0  ;;  %v5532_v43 = vpop.f32.mrb[255].mxu1  ;;  %15548 = vmatpush3.bf16.msra.mxu0 %v16131_v12  ;;  %15596 = vmatpush3.bf16.msra.mxu1 %v16137_v20  ;;  %v19270_v31 = vld [vmem:[%s20883_s3 + $0x580] sm:$0xff]  }
 0x3d4   : > { %v19208_v48 = vadd.f32 %v5580_v41, %v5326_v25  ;;  %v5327_v26 = vadd.f32 %v5298_v55, %v21109_v6  ;;  %v19212_v3 = vadd.f32 %v5532_v43, %v19139_v28  ;;  %15549 = vmatprep.subr.bf16.mxu0 %v16132_v7  ;;  %15597 = vmatprep.subr.bf16.mxu1 %v16139_v47  ;;  %v16143_v41 = vld [vmem:[%s20883_s3 + $0x578] sm:$0xff]  }
 0x3d5   : > { %15470 = vmatmul.mubr.msk.bf16.gmra.mrb[96].mxu0 %vm17236_vm15, %v21050_v56  ;;  %15518 = vmatmul.mubr.msk.bf16.gmra.mrb[104].mxu1 %vm17236_vm15, %v21050_v56 }
 0x3d6   : > { %v19226_v37 = vadd.f32 %v5581_v8, %v5327_v26  ;;  %15473 = vmatprep.mubr.msk.bf16.mxu0 %vm17291_vm10, %v21050_v56  ;;  %15521 = vmatprep.mubr.msk.bf16.mxu1 %vm17291_vm10, %v21050_v56 }
 0x3d7   : > { %15550 = vmatpush3.bf16.msra.mxu0 %v16132_v7  ;;  %15598 = vmatpush3.bf16.msra.mxu1 %v16139_v47 }
 0x3d8   : > { %v15175_v28 = vpop.f32.mrb[236].mxu0  ;;  %v19234_v49 = vpop.f32.mrb[0].mxu1  ;;  %15551 = vmatprep.subr.bf16.mxu0 %v16135_v27  ;;  %15599 = vmatprep.subr.bf16.mxu1 %v16140_v42 }
 0x3d9   : > { %v5812_v32 = vrot.slane %v15175_v28, 1  ;;  %v5691_v44 = vpop.f32.mrb[237].mxu0  ;;  %v5985_v46 = vpop.f32.mrb[1].mxu1 }
 0x3da   : > { %v15176_v12 = vpop.f32.mrb[238].mxu0  ;;  %v19242_v20 = vpop.f32.mrb[2].mxu1 }
 0x3db   : > { %v5822_v5 = vadd.f32 %v5812_v32, %v19067_v21  ;;  %v5813_v10 = vrot.slane %v15176_v12, 1  ;;  %v5693_v7 = vpop.f32.mrb[239].mxu0  ;;  %v19245_v47 = vpop.f32.mrb[3].mxu1  ;;  %15552 = vmatpush3.bf16.msra.mxu0 %v16135_v27  ;;  %15600 = vmatpush3.bf16.msra.mxu1 %v16140_v42 }
 0x3dc   : > { %v5811_v58 = vrot.slane %v5693_v7, 1  ;;  %15553 = vmatprep.subr.bf16.mxu0 %v16138_v34  ;;  %15601 = vmatprep.subr.bf16.mxu1 %v16142_v59 }
 0x3dd   : > { %v5823_v9 = vadd.f32 %v5813_v10, %v19070_v4  ;;  %15474 = vmatmul.mubr.msk.bf16.gmra.mrb[100].mxu0 %vm17284_vm7, %v21050_v56  ;;  %15522 = vmatmul.mubr.msk.bf16.gmra.mrb[108].mxu1 %vm17284_vm7, %v21050_v56  ;;  %v6126_v10 = vrot.slane %v19234_v49, 2  ;;  %v6125_v49 = vrot.slane %v19245_v47, 2 }
 0x3de   : > { %v5821_v21 = vadd.f32 %v5811_v58, %v19075_v36  ;;  %15477 = vmatprep.mubr.msk.bf16.mxu0 %vm17337_vm4, %v21050_v56  ;;  %15525 = vmatprep.mubr.msk.bf16.mxu1 %vm17337_vm4, %v21050_v56  ;;  %v19275_v36 = vld [vmem:[%s20883_s3 + $0x5c0] sm:$0xff]  }
 0x3df   : > { %15554 = vmatpush3.bf16.msra.mxu0 %v16138_v34  ;;  %15602 = vmatpush3.bf16.msra.mxu1 %v16142_v59 }
 0x3e0   : > { %v15179_v4 = vpop.f32.mrb[240].mxu0  ;;  %v15227_v25 = vpop.f32.mrb[4].mxu1  ;;  %15555 = vmatprep.subr.bf16.mxu0 %v16141_v2  ;;  %15603 = vmatprep.subr.bf16.mxu1 %v16143_v41 }
 0x3e1   : > { %v5706_v24 = vpop.f32.mrb[241].mxu0  ;;  %v19277_v55 = vpop.f32.mrb[5].mxu1 }
 0x3e2   : > { %v5814_v43 = vrot.slane %v5706_v24, 1  ;;  %v15180_v8 = vpop.f32.mrb[242].mxu0  ;;  %v15228_v6 = vpop.f32.mrb[6].mxu1 }
 0x3e3   : > { %v5709_v26 = vpop.f32.mrb[243].mxu0  ;;  %v19279_v27 = vpop.f32.mrb[7].mxu1  ;;  %15556 = vmatpush3.bf16.msra.mxu0 %v16141_v2  ;;  %15604 = vmatpush3.bf16.msra.mxu1 %v16143_v41  ;;  %v6127_v6 = vrot.slane %v19242_v20, 2 }
 0x3e4   : > { %v5824_v42 = vadd.f32 %v5814_v43, %v19094_v14  ;;  %v5815_v28 = vrot.slane %v5709_v26, 1  ;;  %15637 = vmatprep.subr.bf16.mxu0 %v19270_v31  ;;  %15685 = vmatprep.subr.bf16.mxu1 %v19275_v36 }
 0x3e5   : > { %15478 = vmatmul.mubr.msk.bf16.gmra.mrb[104].mxu0 %vm21046_vm2, %v21050_v56  ;;  %15526 = vmatmul.mubr.msk.bf16.gmra.mrb[112].mxu1 %vm21046_vm2, %v21050_v56 }
 0x3e6   : > { %v5825_v34 = vadd.f32 %v5815_v28, %v19097_v39  ;;  %15481 = vmatprep.mubr.msk.bf16.mxu0 %vm21047_vm13, %v21050_v56  ;;  %15529 = vmatprep.mubr.msk.bf16.mxu1 %vm21047_vm13, %v21050_v56 }
 0x3e8   : > { %v15183_v14 = vpop.f32.mrb[244].mxu0  ;;  %v15231_v59 = vpop.f32.mrb[8].mxu1 }
 0x3e9   : > { %v5832_v32 = vrot.slane %v15183_v14, 1  ;;  %v6106_v44 = vrot.slane %v15231_v59, 1  ;;  %v5720_v46 = vpop.f32.mrb[245].mxu0  ;;  %v6014_v12 = vpop.f32.mrb[9].mxu1 }
 0x3ea   : > { %v15184_v7 = vpop.f32.mrb[246].mxu0  ;;  %v15232_v58 = vpop.f32.mrb[10].mxu1  ;;  %v6128_v12 = vrot.slane %v19277_v55, 2 }
 0x3eb   : > { %v5842_v39 = vadd.f32 %v5832_v32, %v19072_v16  ;;  %v19299_v2 = vadd.f32 %v6106_v44, %v5822_v5  ;;  %v5833_v41 = vrot.slane %v15184_v7, 1  ;;  %v6107_v4 = vrot.slane %v15232_v58, 1  ;;  %v5722_v25 = vpop.f32.mrb[247].mxu0  ;;  %v6016_v24 = vpop.f32.mrb[11].mxu1 }
 0x3ec   : > { %v5831_v43 = vrot.slane %v5722_v25, 1  ;;  %v6105_v8 = vrot.slane %v6016_v24, 1  ;;  %v6129_v25 = vrot.slane %v19279_v27, 2 }
 0x3ed   : > { %v5843_v26 = vadd.f32 %v5833_v41, %v19083_v19  ;;  %v19303_v28 = vadd.f32 %v6107_v4, %v5823_v9  ;;  %15482 = vmatmul.mubr.msk.bf16.gmra.mrb[108].mxu0 %vm21048_vm6, %v21050_v56  ;;  %15530 = vmatmul.mubr.msk.bf16.gmra.mrb[116].mxu1 %vm21048_vm6, %v21050_v56  ;;  %v19311_v16 = vadd.f32 %v6126_v10, %v5842_v39 }
 0x3ee   : > { %v5841_v5 = vadd.f32 %v5831_v43, %v19091_v30  ;;  %v19315_v14 = vadd.f32 %v6105_v8, %v5821_v21  ;;  %15485 = vmatprep.mubr.msk.bf16.mxu0 %vm21049_vm8, %v21050_v56  ;;  %15533 = vmatprep.mubr.msk.bf16.mxu1 %vm21049_vm8, %v21050_v56 }
 0x3ef   : > { %v19323_v19 = vadd.f32 %v6127_v6, %v5843_v26 }
 0x3f0   : > { %v15187_v20 = vpop.f32.mrb[248].mxu0  ;;  %v15235_v9 = vpop.f32.mrb[12].mxu1  ;;  %v19325_v59 = vadd.f32 %v6125_v49, %v5841_v5 }
 0x3f1   : > { %v5735_v32 = vpop.f32.mrb[249].mxu0  ;;  %v6029_v47 = vpop.f32.mrb[13].mxu1 }
 0x3f2   : > { %v5834_v44 = vrot.slane %v5735_v32, 1  ;;  %v6108_v30 = vrot.slane %v6029_v47, 1  ;;  %v15188_v21 = vpop.f32.mrb[250].mxu0  ;;  %v15236_v46 = vpop.f32.mrb[14].mxu1 }
 0x3f3   : > { %v5738_v10 = vpop.f32.mrb[251].mxu0  ;;  %v6032_v7 = vpop.f32.mrb[15].mxu1 }
 0x3f4   : > { %v5844_v58 = vadd.f32 %v5834_v44, %v19099_v63  ;;  %v19329_v39 = vadd.f32 %v6108_v30, %v5824_v42  ;;  %v5835_v41 = vrot.slane %v5738_v10, 1  ;;  %v6109_v4 = vrot.slane %v6032_v7, 1 }
 0x3f5   : > { %15486 = vmatmul.mubr.msk.bf16.gmra.mrb[112].mxu0 %vm17404_vm14, %v21050_v56  ;;  %15534 = vmatmul.mubr.msk.bf16.gmra.mrb[120].mxu1 %vm17404_vm14, %v21050_v56 }
 0x3f6   : > { %v5845_v55 = vadd.f32 %v5835_v41, %v19113_v17  ;;  %v19339_v24 = vadd.f32 %v6109_v4, %v5825_v34  ;;  %15489 = vmatprep.mubr.msk.bf16.mxu0 %vm17441_vm0, %v21050_v56  ;;  %15537 = vmatprep.mubr.msk.bf16.mxu1 %vm17441_vm0, %v21050_v56  ;;  %v19347_v63 = vadd.f32 %v6128_v12, %v5844_v58  ;;  %v16145_v4 = vld [vmem:[%s20883_s3 + $0x588] sm:$0xff]  }
 0x3f8   : > { %v15191_v42 = vpop.f32.mrb[252].mxu0  ;;  %v19349_v43 = vpop.f32.mrb[16].mxu1  ;;  %v19351_v8 = vadd.f32 %v6129_v25, %v5845_v55  ;;  %v16150_v25 = vld [vmem:[%s20883_s3 + $0x5c8] sm:$0xff]  }
 0x3f9   : > { %v5852_v27 = vrot.slane %v15191_v42, 1  ;;  %v5749_v6 = vpop.f32.mrb[253].mxu0  ;;  %v6043_v17 = vpop.f32.mrb[17].mxu1 }
 0x3fa   : > { %v15192_v34 = vpop.f32.mrb[254].mxu0  ;;  %v19353_v26 = vpop.f32.mrb[18].mxu1 }
 0x3fb   : > { %v5862_v49 = vadd.f32 %v5852_v27, %v19165_v35  ;;  %v5853_v5 = vrot.slane %v15192_v34, 1  ;;  %v5751_v20 = vpop.f32.mrb[255].mxu0  ;;  %v19356_v9 = vpop.f32.mrb[19].mxu1  ;;  %v16152_v27 = vld [vmem:[%s20883_s3 + $0x5d0] sm:$0xff]  }
 0x3fc   : > { %v5851_v32 = vrot.slane %v5751_v20, 1 }
 0x3fd   : > { %v5863_v47 = vadd.f32 %v5853_v5, %v19170_v23  ;;  %15490 = vmatmul.mubr.msk.bf16.gmra.mrb[80].mxu0 %vm17437_vm12, %v21050_v56  ;;  %15538 = vmatmul.mubr.msk.bf16.gmra.mrb[124].mxu1 %vm17437_vm12, %v21050_v56 }
 0x3fe   : > { %v5861_v44 = vadd.f32 %v5851_v32, %v19173_v54  ;;  %15557 = vmatprep.mubr.msk.bf16.mxu0 %vm17145_vm5, %v21050_v56  ;;  %15605 = vmatprep.mubr.msk.bf16.mxu1 %vm17145_vm5, %v21050_v56 }
 0x400   : > { %v15195_v35 = vpop.f32.mrb[0].mxu0  ;;  %v15243_v23 = vpop.f32.mrb[20].mxu1 }
 0x401   : > { %v5764_v30 = vpop.f32.mrb[1].mxu0  ;;  %v19372_v21 = vpop.f32.mrb[21].mxu1 }
 0x402   : > { %v5854_v46 = vrot.slane %v5764_v30, 1  ;;  %v15196_v12 = vpop.f32.mrb[2].mxu0  ;;  %v15244_v10 = vpop.f32.mrb[22].mxu1 }
 0x403   : > { %v5767_v7 = vpop.f32.mrb[3].mxu0  ;;  %v19374_v58 = vpop.f32.mrb[23].mxu1 }
 0x404   : > { %v19377_v54 = vadd.f32 %v5854_v46, %v19205_v50  ;;  %v5855_v41 = vrot.slane %v5767_v7, 1 }
 0x405   : > { %15558 = vmatmul.mubr.msk.bf16.vlgmr.msra.gmra.mrb[116].mxu0 %vm17138_vm3, %v21050_v56  ;;  %15606 = vmatmul.mubr.msk.bf16.vlgmr.msra.gmra.mrb[128].mxu1 %vm17138_vm3, %v21050_v56 }
 0x406   : > { %v19392_v50 = vadd.f32 %v5855_v41, %v19212_v3  ;;  %15561 = vmatprep.mubr.msk.bf16.mxu0 %vm17195_vm11, %v21050_v56  ;;  %15609 = vmatprep.mubr.msk.bf16.mxu1 %vm17195_vm11, %v21050_v56  ;;  %v16146_v3 = vld [vmem:[%s20883_s3 + $0x590] sm:$0xff]   ;;  %v16147_v41 = vld [vmem:[%s20883_s3 + $0x598] sm:$0xff]  }
 0x407   : > { %15638 = vmatpush3.bf16.msra.mxu0 %v19270_v31  ;;  %15686 = vmatpush3.bf16.msra.mxu1 %v19275_v36  ;;  %v6166_v31 = vrot.slane %v19349_v43, 2  ;;  %v6167_v43 = vrot.slane %v19353_v26, 2 }
 0x408   : > { %v15199_v55 = vpop.f32.mrb[4].mxu0  ;;  %v15247_v42 = vpop.f32.mrb[24].mxu1  ;;  %15639 = vmatprep.subr.bf16.mxu0 %v16145_v4  ;;  %15687 = vmatprep.subr.bf16.mxu1 %v16150_v25 }
 0x409   : > { %v5872_v6 = vrot.slane %v15199_v55, 1  ;;  %v6146_v17 = vrot.slane %v15247_v42, 1  ;;  %v5778_v34 = vpop.f32.mrb[5].mxu0  ;;  %v6072_v5 = vpop.f32.mrb[25].mxu1 }
 0x40a   : > { %v15200_v20 = vpop.f32.mrb[6].mxu0  ;;  %v15248_v36 = vpop.f32.mrb[26].mxu1 }
 0x40b   : > { %v5882_v32 = vadd.f32 %v5872_v6, %v19167_v62  ;;  %v19410_v35 = vadd.f32 %v6146_v17, %v5862_v49  ;;  %v5873_v23 = vrot.slane %v15200_v20, 1  ;;  %v6147_v30 = vrot.slane %v15248_v36, 1  ;;  %v5780_v46 = vpop.f32.mrb[7].mxu0  ;;  %v6074_v12 = vpop.f32.mrb[27].mxu1  ;;  %15640 = vmatpush3.bf16.msra.mxu0 %v16145_v4  ;;  %15688 = vmatpush3.bf16.msra.mxu1 %v16150_v25  ;;  %v16153_v62 = vld [vmem:[%s20883_s3 + $0x5d8] sm:$0xff]  }
 0x40c   : > { %v5871_v10 = vrot.slane %v5780_v46, 1  ;;  %v6145_v7 = vrot.slane %v6074_v12, 1  ;;  %15641 = vmatprep.subr.bf16.mxu0 %v16146_v3  ;;  %15689 = vmatprep.subr.bf16.mxu1 %v16152_v27  ;;  %v6165_v25 = vrot.slane %v19356_v9, 2  ;;  %v16155_v9 = vld [vmem:[%s20883_s3 + $0x5e0] sm:$0xff]   ;;  %v6168_v20 = vrot.slane %v19372_v21, 2  ;;  %v16156_v21 = vld [vmem:[%s20883_s3 + $0x5e8] sm:$0xff]  }
 0x40d   : > { %v5883_v49 = vadd.f32 %v5873_v23, %v19181_v51  ;;  %v19420_v55 = vadd.f32 %v6147_v30, %v5863_v47  ;;  %15562 = vmatmul.mubr.msk.bf16.gmra.mrb[120].mxu0 %vm17188_vm9, %v21050_v56  ;;  %15610 = vmatmul.mubr.msk.bf16.gmra.mrb[132].mxu1 %vm17188_vm9, %v21050_v56  ;;  %v19428_v4 = vadd.f32 %v6166_v31, %v5882_v32 }
 0x40e   : > { %v5881_v42 = vadd.f32 %v5871_v10, %v19189_v0  ;;  %v19432_v6 = vadd.f32 %v6145_v7, %v5861_v44  ;;  %15565 = vmatprep.mubr.msk.bf16.mxu0 %vm17243_vm1, %v21050_v56  ;;  %15613 = vmatprep.mubr.msk.bf16.mxu1 %vm17243_vm1, %v21050_v56  ;;  %v16148_v0 = vld [vmem:[%s20883_s3 + $0x5a0] sm:$0xff]   ;;  %v16151_v10 = vld [vmem:[%s20883_s3 + $0x5a8] sm:$0xff]  }
 0x40f   : > { %15642 = vmatpush3.bf16.msra.mxu0 %v16146_v3  ;;  %15690 = vmatpush3.bf16.msra.mxu1 %v16152_v27  ;;  %v19440_v51 = vadd.f32 %v6167_v43, %v5883_v49 }
 0x410   : > { %v15203_v26 = vpop.f32.mrb[8].mxu0  ;;  %v15251_v47 = vpop.f32.mrb[28].mxu1  ;;  %15643 = vmatprep.subr.bf16.mxu0 %v16147_v41  ;;  %15691 = vmatprep.subr.bf16.mxu1 %v16153_v62  ;;  %v19448_v44 = vadd.f32 %v6165_v25, %v5881_v42 }
 0x411   : > { %v5793_v17 = vpop.f32.mrb[9].mxu0  ;;  %v6087_v34 = vpop.f32.mrb[29].mxu1 }
 0x412   : > { %v5874_v3 = vrot.slane %v5793_v17, 1  ;;  %v6148_v27 = vrot.slane %v6087_v34, 1  ;;  %v15204_v5 = vpop.f32.mrb[10].mxu0  ;;  %v15252_v31 = vpop.f32.mrb[30].mxu1 }
 0x413   : > { %v5796_v36 = vpop.f32.mrb[11].mxu0  ;;  %v6090_v32 = vpop.f32.mrb[31].mxu1  ;;  %15644 = vmatpush3.bf16.msra.mxu0 %v16147_v41  ;;  %15692 = vmatpush3.bf16.msra.mxu1 %v16153_v62  ;;  %v16159_v5 = vld [vmem:[%s20883_s3 + $0x5f8] sm:$0xff]  }
 0x414   : > { %v5884_v23 = vadd.f32 %v5874_v3, %v19208_v48  ;;  %v19453_v30 = vadd.f32 %v6148_v27, %v19377_v54  ;;  %v5875_v46 = vrot.slane %v5796_v36, 1  ;;  %v6149_v12 = vrot.slane %v6090_v32, 1  ;;  %15645 = vmatprep.subr.bf16.mxu0 %v16148_v0  ;;  %15693 = vmatprep.subr.bf16.mxu1 %v16155_v9  ;;  %v16157_v27 = vld [vmem:[%s20883_s3 + $0x5b8] sm:$0xff]  }
 0x415   : > { %15566 = vmatmul.mubr.msk.bf16.gmra.mrb[124].mxu0 %vm17236_vm15, %v21050_v56  ;;  %15614 = vmatmul.mubr.msk.bf16.gmra.mrb[136].mxu1 %vm17236_vm15, %v21050_v56  ;;  %v6169_v48 = vrot.slane %v19374_v58, 2  ;;  %v16158_v58 = vld [vmem:[%s20883_s3 + $0x5f0] sm:$0xff]  }
 0x416   : > { %v5885_v54 = vadd.f32 %v5875_v46, %v19226_v37  ;;  %v19470_v7 = vadd.f32 %v6149_v12, %v19392_v50  ;;  %15569 = vmatprep.mubr.msk.bf16.mxu0 %vm17291_vm10, %v21050_v56  ;;  %15617 = vmatprep.mubr.msk.bf16.mxu1 %vm17291_vm10, %v21050_v56  ;;  %v19478_v41 = vadd.f32 %v6168_v20, %v5884_v23  ;;  %v16154_v37 = vld [vmem:[%s20883_s3 + $0x5b0] sm:$0xff]  }
 0x417   : > { %15646 = vmatpush3.bf16.msra.mxu0 %v16148_v0  ;;  %15694 = vmatpush3.bf16.msra.mxu1 %v16155_v9 }
 0x418   : > { %v15271_v62 = vpop.f32.mrb[12].mxu0  ;;  %v19480_v43 = vpop.f32.mrb[32].mxu1  ;;  %15647 = vmatprep.subr.bf16.mxu0 %v16151_v10  ;;  %15695 = vmatprep.subr.bf16.mxu1 %v16156_v21  ;;  %v19488_v50 = vadd.f32 %v6169_v48, %v5885_v54 }
 0x419   : > { %v6400_v49 = vrot.slane %v15271_v62, 2  ;;  %v6279_v25 = vpop.f32.mrb[13].mxu0  ;;  %v6573_v42 = vpop.f32.mrb[33].mxu1 }
 0x41a   : > { %v15272_v26 = vpop.f32.mrb[14].mxu0  ;;  %v19490_v47 = vpop.f32.mrb[34].mxu1 }
 0x41b   : > { %v6401_v0 = vrot.slane %v15272_v26, 2  ;;  %v6281_v9 = vpop.f32.mrb[15].mxu0  ;;  %v6575_v17 = vpop.f32.mrb[35].mxu1  ;;  %15648 = vmatpush3.bf16.msra.mxu0 %v16151_v10  ;;  %v19493_v34 = vadd.f32 %v6400_v49, %v19299_v2  ;;  %15696 = vmatpush3.bf16.msra.mxu1 %v16156_v21 }
 0x41c   : > { %v6399_v3 = vrot.slane %v6281_v9, 2  ;;  %15649 = vmatprep.subr.bf16.mxu0 %v16154_v37  ;;  %15697 = vmatprep.subr.bf16.mxu1 %v16158_v58 }
 0x41d   : > { %15570 = vmatmul.mubr.msk.bf16.gmra.mrb[128].mxu0 %vm17284_vm7, %v21050_v56  ;;  %15618 = vmatmul.mubr.msk.bf16.gmra.mrb[140].mxu1 %vm17284_vm7, %v21050_v56  ;;  %v19508_v2 = vadd.f32 %v6401_v0, %v19303_v28  ;;  %v19524_v28 = vld [vmem:[%s20883_s3 + $0x600] sm:$0xff]  }
 0x41e   : > { %15573 = vmatprep.mubr.msk.bf16.mxu0 %vm17337_vm4, %v21050_v56  ;;  %15621 = vmatprep.mubr.msk.bf16.mxu1 %vm17337_vm4, %v21050_v56  ;;  %v19517_v31 = vadd.f32 %v6399_v3, %v19315_v14 }
 0x41f   : > { %15650 = vmatpush3.bf16.msra.mxu0 %v16154_v37  ;;  %15698 = vmatpush3.bf16.msra.mxu1 %v16158_v58 }
 0x420   : > { %v15275_v20 = vpop.f32.mrb[16].mxu0  ;;  %v19519_v36 = vpop.f32.mrb[36].mxu1  ;;  %15651 = vmatprep.subr.bf16.mxu0 %v16157_v27  ;;  %15699 = vmatprep.subr.bf16.mxu1 %v16159_v5 }
 0x421   : > { %v6294_v32 = vpop.f32.mrb[17].mxu0  ;;  %v19526_v23 = vpop.f32.mrb[37].mxu1 }
 0x422   : > { %v6402_v46 = vrot.slane %v6294_v32, 2  ;;  %v15276_v12 = vpop.f32.mrb[18].mxu0  ;;  %v15324_v10 = vpop.f32.mrb[38].mxu1 }
 0x423   : > { %v6297_v14 = vpop.f32.mrb[19].mxu0  ;;  %v19528_v21 = vpop.f32.mrb[39].mxu1  ;;  %15652 = vmatpush3.bf16.msra.mxu0 %v16157_v27  ;;  %15700 = vmatpush3.bf16.msra.mxu1 %v16159_v5 }
 0x424   : > { %v6403_v48 = vrot.slane %v6297_v14, 2  ;;  %v19531_v54 = vadd.f32 %v6402_v46, %v19329_v39  ;;  %15733 = vmatprep.subr.bf16.mxu0 %v19524_v28 }
 0x425   : > { %15574 = vmatmul.mubr.msk.bf16.gmra.mrb[132].mxu0 %vm21046_vm2, %v21050_v56  ;;  %15622 = vmatmul.mubr.msk.bf16.gmra.mrb[144].mxu1 %vm21046_vm2, %v21050_v56 }
 0x426   : > { %15577 = vmatprep.mubr.msk.bf16.mxu0 %vm21047_vm13, %v21050_v56  ;;  %15625 = vmatprep.mubr.msk.bf16.mxu1 %vm21047_vm13, %v21050_v56  ;;  %v19547_v39 = vadd.f32 %v6403_v48, %v19339_v24 }
 0x428   : > { %v15279_v62 = vpop.f32.mrb[20].mxu0  ;;  %v19549_v37 = vpop.f32.mrb[40].mxu1 }
 0x429   : > { %v6420_v58 = vrot.slane %v15279_v62, 2  ;;  %v6308_v49 = vpop.f32.mrb[21].mxu0  ;;  %v6602_v25 = vpop.f32.mrb[41].mxu1 }
 0x42a   : > { %v15280_v42 = vpop.f32.mrb[22].mxu0  ;;  %v19551_v26 = vpop.f32.mrb[42].mxu1 }
 0x42b   : > { %v6421_v0 = vrot.slane %v15280_v42, 2  ;;  %v6310_v9 = vpop.f32.mrb[23].mxu0  ;;  %v6604_v17 = vpop.f32.mrb[43].mxu1  ;;  %v19554_v3 = vadd.f32 %v6420_v58, %v19311_v16 }
 0x42c   : > { %v6419_v27 = vrot.slane %v6310_v9, 2 }
 0x42d   : > { %15578 = vmatmul.mubr.msk.bf16.gmra.mrb[136].mxu0 %vm21048_vm6, %v21050_v56  ;;  %15626 = vmatmul.mubr.msk.bf16.gmra.mrb[148].mxu1 %vm21048_vm6, %v21050_v56  ;;  %v19563_v24 = vadd.f32 %v6421_v0, %v19323_v19 }
 0x42e   : > { %15581 = vmatprep.mubr.msk.bf16.mxu0 %vm21049_vm8, %v21050_v56  ;;  %15629 = vmatprep.mubr.msk.bf16.mxu1 %vm21049_vm8, %v21050_v56  ;;  %v19572_v16 = vadd.f32 %v6419_v27, %v19325_v59 }
 0x430   : > { %v15283_v5 = vpop.f32.mrb[24].mxu0  ;;  %v19574_v20 = vpop.f32.mrb[44].mxu1 }
 0x431   : > { %v6323_v32 = vpop.f32.mrb[25].mxu0  ;;  %v19576_v46 = vpop.f32.mrb[45].mxu1 }
 0x432   : > { %v6422_v12 = vrot.slane %v6323_v32, 2  ;;  %v15284_v19 = vpop.f32.mrb[26].mxu0  ;;  %v15332_v10 = vpop.f32.mrb[46].mxu1 }
 0x433   : > { %v6326_v14 = vpop.f32.mrb[27].mxu0  ;;  %v19578_v48 = vpop.f32.mrb[47].mxu1 }
 0x434   : > { %v6423_v62 = vrot.slane %v6326_v14, 2  ;;  %v19581_v58 = vadd.f32 %v6422_v12, %v19347_v63 }
 0x435   : > { %15582 = vmatmul.mubr.msk.bf16.gmra.mrb[140].mxu0 %vm17404_vm14, %v21050_v56  ;;  %15630 = vmatmul.mubr.msk.bf16.gmra.mrb[152].mxu1 %vm17404_vm14, %v21050_v56 }
 0x436   : > { %15585 = vmatprep.mubr.msk.bf16.mxu0 %vm17441_vm0, %v21050_v56  ;;  %15633 = vmatprep.mubr.msk.bf16.mxu1 %vm17441_vm0, %v21050_v56  ;;  %v19596_v59 = vadd.f32 %v6423_v62, %v19351_v8 }
 0x438   : > { %v15287_v63 = vpop.f32.mrb[28].mxu0  ;;  %v15335_v49 = vpop.f32.mrb[48].mxu1 }
 0x439   : > { %v6440_v25 = vrot.slane %v15287_v63, 2  ;;  %v19599_v42 = vadd.f32 %v15335_v49, %v19493_v34  ;;  %v6337_v0 = vpop.f32.mrb[29].mxu0  ;;  %v6631_v9 = vpop.f32.mrb[49].mxu1 }
 0x43a   : > { %v15288_v17 = vpop.f32.mrb[30].mxu0  ;;  %v15336_v27 = vpop.f32.mrb[50].mxu1 }
 0x43b   : > { %v6450_v5 = vadd.f32 %v6440_v25, %v19410_v35  ;;  %v6441_v32 = vrot.slane %v15288_v17, 2  ;;  %v19603_v12 = vadd.f32 %v15336_v27, %v19508_v2  ;;  %v6339_v19 = vpop.f32.mrb[31].mxu0  ;;  %v6633_v10 = vpop.f32.mrb[51].mxu1 }
 0x43c   : > { %v6439_v8 = vrot.slane %v6339_v19, 2  ;;  %v19606_v14 = vadd.f32 %v6633_v10, %v19517_v31 }
 0x43d   : > { %v6451_v62 = vadd.f32 %v6441_v32, %v19420_v55  ;;  %15586 = vmatmul.mubr.msk.bf16.gmra.mrb[144].mxu0 %vm17437_vm12, %v21050_v56  ;;  %15634 = vmatmul.mubr.msk.bf16.gmra.mrb[156].mxu1 %vm17437_vm12, %v21050_v56  ;;  %v19616_v35 = vadd.f32 %v19490_v47, %v6450_v5 }
 0x43e   : > { %v6449_v34 = vadd.f32 %v6439_v8, %v19432_v6  ;;  %15653 = vmatprep.mubr.msk.bf16.mxu0 %vm17145_vm5, %v21050_v56  ;;  %15701 = vmatprep.mubr.msk.bf16.mxu1 %vm17145_vm5, %v21050_v56 }
 0x43f   : > { %v19626_v55 = vadd.f32 %v19526_v23, %v6451_v62 }
 0x440   : > { %v15291_v2 = vpop.f32.mrb[32].mxu0  ;;  %v15339_v31 = vpop.f32.mrb[52].mxu1  ;;  %v19629_v63 = vadd.f32 %v19480_v43, %v6449_v34  ;;  %v16161_v43 = vld [vmem:[%s20883_s3 + $0x608] sm:$0xff]  }
 0x441   : > { %v6352_v47 = vpop.f32.mrb[33].mxu0  ;;  %v6646_v49 = vpop.f32.mrb[53].mxu1 }
 0x442   : > { %v6442_v25 = vrot.slane %v6352_v47, 2  ;;  %v19632_v6 = vadd.f32 %v6646_v49, %v19531_v54  ;;  %v15292_v0 = vpop.f32.mrb[34].mxu0  ;;  %v15340_v9 = vpop.f32.mrb[54].mxu1 }
 0x443   : > { %v6355_v17 = vpop.f32.mrb[35].mxu0  ;;  %v6649_v27 = vpop.f32.mrb[55].mxu1 }
 0x444   : > { %v6452_v5 = vadd.f32 %v6442_v25, %v19453_v30  ;;  %v6443_v32 = vrot.slane %v6355_v17, 2  ;;  %v19636_v23 = vadd.f32 %v6649_v27, %v19547_v39 }
 0x445   : > { %15654 = vmatmul.mubr.msk.bf16.vlgmr.msra.gmra.mrb[148].mxu0 %vm17138_vm3, %v21050_v56  ;;  %15702 = vmatmul.mubr.msk.bf16.vlgmr.msra.gmra.mrb[160].mxu1 %vm17138_vm3, %v21050_v56 }
 0x446   : > { %v6453_v54 = vadd.f32 %v6443_v32, %v19470_v7  ;;  %15657 = vmatprep.mubr.msk.bf16.mxu0 %vm17195_vm11, %v21050_v56  ;;  %15705 = vmatprep.mubr.msk.bf16.mxu1 %vm17195_vm11, %v21050_v56  ;;  %v19655_v30 = vadd.f32 %v19528_v21, %v6452_v5  ;;  %v16162_v7 = vld [vmem:[%s20883_s3 + $0x610] sm:$0xff]  }
 0x447   : > { %15734 = vmatpush3.bf16.msra.mxu0 %v19524_v28 }
 0x448   : > { %v15295_v39 = vpop.f32.mrb[36].mxu0  ;;  %v15343_v19 = vpop.f32.mrb[56].mxu1  ;;  %15735 = vmatprep.subr.bf16.mxu0 %v16161_v43  ;;  %v19662_v10 = vadd.f32 %v19519_v36, %v6453_v54 }
 0x449   : > { %v6460_v8 = vrot.slane %v15295_v39, 2  ;;  %v19665_v62 = vadd.f32 %v15343_v19, %v19554_v3  ;;  %v6366_v34 = vpop.f32.mrb[37].mxu0  ;;  %v6660_v2 = vpop.f32.mrb[57].mxu1  ;;  %v16163_v3 = vld [vmem:[%s20883_s3 + $0x618] sm:$0xff]  }
 0x44a   : > { %v15296_v21 = vpop.f32.mrb[38].mxu0  ;;  %v15344_v31 = vpop.f32.mrb[58].mxu1  ;;  %v16165_v2 = vld [vmem:[%s20883_s3 + $0x628] sm:$0xff]  }
 0x44b   : > { %v6470_v28 = vadd.f32 %v6460_v8, %v19428_v4  ;;  %v6461_v47 = vrot.slane %v15296_v21, 2  ;;  %v19669_v49 = vadd.f32 %v15344_v31, %v19563_v24  ;;  %v6368_v25 = vpop.f32.mrb[39].mxu0  ;;  %v6662_v0 = vpop.f32.mrb[59].mxu1  ;;  %15736 = vmatpush3.bf16.msra.mxu0 %v16161_v43 }
 0x44c   : > { %v6459_v9 = vrot.slane %v6368_v25, 2  ;;  %v19672_v36 = vadd.f32 %v6662_v0, %v19572_v16  ;;  %15737 = vmatprep.subr.bf16.mxu0 %v16162_v7 }
 0x44d   : > { %v6471_v17 = vadd.f32 %v6461_v47, %v19440_v51  ;;  %15658 = vmatmul.mubr.msk.bf16.gmra.mrb[152].mxu0 %vm17188_vm9, %v21050_v56  ;;  %15706 = vmatmul.mubr.msk.bf16.gmra.mrb[164].mxu1 %vm17188_vm9, %v21050_v56  ;;  %v6704_v4 = vadd.f32 %v19551_v26, %v6470_v28 }
 0x44e   : > { %v6469_v24 = vadd.f32 %v6459_v9, %v19448_v44  ;;  %15661 = vmatprep.mubr.msk.bf16.mxu0 %vm17243_vm1, %v21050_v56  ;;  %15709 = vmatprep.mubr.msk.bf16.mxu1 %vm17243_vm1, %v21050_v56  ;;  %v16164_v44 = vld [vmem:[%s20883_s3 + $0x620] sm:$0xff]  }
 0x44f   : > { %15738 = vmatpush3.bf16.msra.mxu0 %v16162_v7  ;;  %v19693_v51 = vadd.f32 %v19576_v46, %v6471_v17 }
 0x450   : > { %v15299_v16 = vpop.f32.mrb[40].mxu0  ;;  %v15347_v27 = vpop.f32.mrb[60].mxu1  ;;  %v6703_v5 = vadd.f32 %v19549_v37, %v6469_v24  ;;  %15739 = vmatprep.subr.bf16.mxu0 %v16163_v3 }
 0x451   : > { %v6381_v26 = vpop.f32.mrb[41].mxu0  ;;  %v6675_v32 = vpop.f32.mrb[61].mxu1 }
 0x452   : > { %v6462_v43 = vrot.slane %v6381_v26, 2  ;;  %v19700_v54 = vadd.f32 %v6675_v32, %v19581_v58  ;;  %v15300_v39 = vpop.f32.mrb[42].mxu0  ;;  %v15348_v19 = vpop.f32.mrb[62].mxu1 }
 0x453   : > { %v6384_v7 = vpop.f32.mrb[43].mxu0  ;;  %v6678_v46 = vpop.f32.mrb[63].mxu1  ;;  %15740 = vmatpush3.bf16.msra.mxu0 %v16163_v3 }
 0x454   : > { %v6472_v8 = vadd.f32 %v6462_v43, %v19478_v41  ;;  %v6463_v34 = vrot.slane %v6384_v7, 2  ;;  %v19704_v37 = vadd.f32 %v6678_v46, %v19596_v59  ;;  %15741 = vmatprep.subr.bf16.mxu0 %v16164_v44 }
 0x455   : > { %15662 = vmatmul.mubr.msk.bf16.gmra.mrb[156].mxu0 %vm17236_vm15, %v21050_v56  ;;  %15710 = vmatmul.mubr.msk.bf16.gmra.mrb[168].mxu1 %vm17236_vm15, %v21050_v56 }
 0x456   : > { %v6473_v58 = vadd.f32 %v6463_v34, %v19488_v50  ;;  %15665 = vmatprep.mubr.msk.bf16.mxu0 %vm17291_vm10, %v21050_v56  ;;  %15713 = vmatprep.mubr.msk.bf16.mxu1 %vm17291_vm10, %v21050_v56  ;;  %v6706_v41 = vadd.f32 %v19578_v48, %v6472_v8  ;;  %v16166_v50 = vld [vmem:[%s20883_s3 + $0x630] sm:$0xff]  }
 0x457   : > { %15742 = vmatpush3.bf16.msra.mxu0 %v16164_v44 }
 0x458   : > { %v15367_v59 = vpop.f32.mrb[44].mxu0  ;;  %v15415_v21 = vpop.f32.mrb[64].mxu1  ;;  %v6707_v31 = vadd.f32 %v19574_v20, %v6473_v58  ;;  %15743 = vmatprep.subr.bf16.mxu0 %v16165_v2  ;;  %v16167_v20 = vld [vmem:[%s20883_s3 + $0x638] sm:$0xff]  }
 0x459   : > { %v6957_v28 = vrot.slane %v15367_v59, 1  ;;  %v6807_v47 = vpop.f32.mrb[45].mxu0  ;;  %v7071_v25 = vpop.f32.mrb[65].mxu1  ;;  %v7231_v59 = vrot.slane %v15415_v21, 1 }
 0x45a   : > { %v15368_v0 = vpop.f32.mrb[46].mxu0  ;;  %v15416_v9 = vpop.f32.mrb[66].mxu1 }
 0x45b   : > { %v6967_v3 = vadd.f32 %v6957_v28, %v6703_v5  ;;  %v6958_v17 = vrot.slane %v15368_v0, 1  ;;  %v6809_v24 = vpop.f32.mrb[47].mxu0  ;;  %v7073_v16 = vpop.f32.mrb[67].mxu1  ;;  %15744 = vmatpush3.bf16.msra.mxu0 %v16165_v2  ;;  %v7232_v25 = vrot.slane %v15416_v9, 1 }
 0x45c   : > { %15745 = vmatprep.subr.bf16.mxu0 %v16166_v50 }
 0x45d   : > { %v6968_v48 = vadd.f32 %v6958_v17, %v6704_v4  ;;  %15666 = vmatmul.mubr.msk.bf16.gmra.mrb[160].mxu0 %vm17284_vm7, %v21050_v56  ;;  %15714 = vmatmul.mubr.msk.bf16.gmra.mrb[172].mxu1 %vm17284_vm7, %v21050_v56 }
 0x45e   : > { %15669 = vmatprep.mubr.msk.bf16.mxu0 %vm17337_vm4, %v21050_v56  ;;  %15717 = vmatprep.mubr.msk.bf16.mxu1 %vm17337_vm4, %v21050_v56 }
 0x45f   : > { %15746 = vmatpush3.bf16.msra.mxu0 %v16166_v50 }
 0x460   : > { %v15371_v27 = vpop.f32.mrb[48].mxu0  ;;  %v15419_v5 = vpop.f32.mrb[68].mxu1  ;;  %15747 = vmatprep.subr.bf16.mxu0 %v16167_v20 }
 0x461   : > { %v6961_v4 = vrot.slane %v15371_v27, 1  ;;  %v6821_v44 = vpop.f32.mrb[49].mxu0  ;;  %v7085_v26 = vpop.f32.mrb[69].mxu1  ;;  %v7235_v9 = vrot.slane %v15419_v5, 1 }
 0x462   : > { %v6959_v32 = vrot.slane %v6821_v44, 1  ;;  %v15372_v43 = vpop.f32.mrb[50].mxu0  ;;  %v15420_v39 = vpop.f32.mrb[70].mxu1 }
 0x463   : > { %v6971_v19 = vadd.f32 %v6961_v4, %v6707_v31  ;;  %v6824_v7 = vpop.f32.mrb[51].mxu0  ;;  %v7088_v46 = vpop.f32.mrb[71].mxu1  ;;  %15748 = vmatpush3.bf16.msra.mxu0 %v16167_v20  ;;  %v7233_v39 = vrot.slane %v7085_v26, 1 }
 0x464   : > { %v6969_v8 = vadd.f32 %v6959_v32, %v19693_v51  ;;  %v6960_v34 = vrot.slane %v6824_v7, 1 }
 0x465   : > { %15670 = vmatmul.mubr.msk.bf16.gmra.mrb[164].mxu0 %vm21046_vm2, %v21050_v56  ;;  %15718 = vmatmul.mubr.msk.bf16.gmra.mrb[176].mxu1 %vm21046_vm2, %v21050_v56 }
 0x466   : > { %v6970_v2 = vadd.f32 %v6960_v34, %v6706_v41  ;;  %15673 = vmatprep.mubr.msk.bf16.mxu0 %vm21047_vm13, %v21050_v56  ;;  %15721 = vmatprep.mubr.msk.bf16.mxu1 %vm21047_vm13, %v21050_v56 }
 0x468   : > { %v15375_v58 = vpop.f32.mrb[52].mxu0  ;;  %v15423_v51 = vpop.f32.mrb[72].mxu1 }
 0x469   : > { %v6947_v31 = vadd.f32 %v15375_v58, %v19629_v63  ;;  %v7251_v50 = vrot.slane %v15423_v51, 1  ;;  %v6836_v28 = vpop.f32.mrb[53].mxu0  ;;  %v7100_v47 = vpop.f32.mrb[73].mxu1 }
 0x46a   : > { %v15376_v0 = vpop.f32.mrb[54].mxu0  ;;  %v15424_v17 = vpop.f32.mrb[74].mxu1 }
 0x46b   : > { %v19756_v41 = vadd.f32 %v7231_v59, %v6947_v31  ;;  %v19758_v24 = vadd.f32 %v7251_v50, %v6967_v3  ;;  %v6948_v16 = vadd.f32 %v15376_v0, %v19616_v35  ;;  %v7252_v20 = vrot.slane %v15424_v17, 1  ;;  %v6838_v27 = vpop.f32.mrb[55].mxu0  ;;  %v7102_v4 = vpop.f32.mrb[75].mxu1 }
 0x46c   : > { %v7234_v59 = vrot.slane %v7088_v46, 1 }
 0x46d   : > { %v19761_v44 = vadd.f32 %v7232_v25, %v6948_v16  ;;  %v19763_v21 = vadd.f32 %v7252_v20, %v6968_v48  ;;  %15674 = vmatmul.mubr.msk.bf16.gmra.mrb[168].mxu0 %vm21048_vm6, %v21050_v56  ;;  %15722 = vmatmul.mubr.msk.bf16.gmra.mrb[180].mxu1 %vm21048_vm6, %v21050_v56 }
 0x46e   : > { %15677 = vmatprep.mubr.msk.bf16.mxu0 %vm21049_vm8, %v21050_v56  ;;  %15725 = vmatprep.mubr.msk.bf16.mxu1 %vm21049_vm8, %v21050_v56 }
 0x470   : > { %v15379_v35 = vpop.f32.mrb[56].mxu0  ;;  %v15427_v63 = vpop.f32.mrb[76].mxu1 }
 0x471   : > { %v6951_v3 = vadd.f32 %v15379_v35, %v19662_v10  ;;  %v7255_v48 = vrot.slane %v15427_v63, 1  ;;  %v6850_v32 = vpop.f32.mrb[57].mxu0  ;;  %v7114_v43 = vpop.f32.mrb[77].mxu1 }
 0x472   : > { %v6949_v7 = vadd.f32 %v6850_v32, %v19626_v55  ;;  %v7253_v34 = vrot.slane %v7114_v43, 1  ;;  %v15380_v58 = vpop.f32.mrb[58].mxu0  ;;  %v15428_v51 = vpop.f32.mrb[78].mxu1 }
 0x473   : > { %v19779_v31 = vadd.f32 %v7235_v9, %v6951_v3  ;;  %v19781_v50 = vadd.f32 %v7255_v48, %v6971_v19  ;;  %v6853_v28 = vpop.f32.mrb[59].mxu0  ;;  %v7117_v47 = vpop.f32.mrb[79].mxu1 }
 0x474   : > { %v19783_v25 = vadd.f32 %v7233_v39, %v6949_v7  ;;  %v19785_v5 = vadd.f32 %v7253_v34, %v6969_v8  ;;  %v6950_v10 = vadd.f32 %v6853_v28, %v19655_v30  ;;  %v7254_v0 = vrot.slane %v7117_v47, 1 }
 0x475   : > { %15678 = vmatmul.mubr.msk.bf16.gmra.mrb[72].mxu0 %vm17404_vm14, %v21050_v56  ;;  %15726 = vmatmul.mubr.msk.bf16.gmra.mrb[184].mxu1 %vm17404_vm14, %v21050_v56 }
 0x476   : > { %v19794_v55 = vadd.f32 %v7234_v59, %v6950_v10  ;;  %v19796_v26 = vadd.f32 %v7254_v0, %v6970_v2  ;;  %15681 = vmatprep.mubr.msk.bf16.mxu0 %vm17441_vm0, %v21050_v56  ;;  %15729 = vmatprep.mubr.msk.bf16.mxu1 %vm17441_vm0, %v21050_v56 }
 0x478   : > { %v15383_v30 = vpop.f32.mrb[60].mxu0  ;;  %v15431_v19 = vpop.f32.mrb[80].mxu1 }
 0x479   : > { %v6933_v46 = vrot.slane %v15383_v30, 1  ;;  %v6865_v8 = vpop.f32.mrb[61].mxu0  ;;  %v7129_v17 = vpop.f32.mrb[81].mxu1  ;;  %v7192_v47 = vrot.slane %v15431_v19, 1 }
 0x47a   : > { %v15384_v16 = vpop.f32.mrb[62].mxu0  ;;  %v15432_v20 = vpop.f32.mrb[82].mxu1 }
 0x47b   : > { %v6943_v27 = vadd.f32 %v6933_v46, %v19665_v62  ;;  %v6934_v4 = vrot.slane %v15384_v16, 1  ;;  %v6867_v2 = vpop.f32.mrb[63].mxu0  ;;  %v7131_v35 = vpop.f32.mrb[83].mxu1 }
 0x47c   : > { %v6932_v63 = vrot.slane %v6867_v2, 1 }
 0x47d   : > { %v6944_v9 = vadd.f32 %v6934_v4, %v19669_v49  ;;  %15682 = vmatmul.mubr.msk.bf16.gmra.mrb[172].mxu0 %vm17437_vm12, %v21050_v56  ;;  %15730 = vmatmul.mubr.msk.bf16.gmra.mrb[188].mxu1 %vm17437_vm12, %v21050_v56 }
 0x47e   : > { %v6942_v3 = vadd.f32 %v6932_v63, %v19672_v36  ;;  %15749 = vmatprep.mubr.msk.bf16.mxu0 %vm17145_vm5, %v21050_v56  ;;  %v7191_v63 = vrot.slane %v7131_v35, 1 }
 0x480   : > { %v15387_v62 = vpop.f32.mrb[68].mxu0  ;;  %v15435_v48 = vpop.f32.mrb[84].mxu1 }
 0x481   : > { %v6880_v32 = vpop.f32.mrb[69].mxu0  ;;  %v7144_v43 = vpop.f32.mrb[85].mxu1 }
 0x482   : > { %v6935_v39 = vrot.slane %v6880_v32, 1  ;;  %v15388_v49 = vpop.f32.mrb[70].mxu0  ;;  %v15436_v7 = vpop.f32.mrb[86].mxu1 }
 0x483   : > { %v6883_v34 = vpop.f32.mrb[71].mxu0  ;;  %v7147_v58 = vpop.f32.mrb[87].mxu1 }
 0x484   : > { %v6945_v51 = vadd.f32 %v6935_v39, %v19700_v54  ;;  %v6936_v59 = vrot.slane %v6883_v34, 1  ;;  %v7193_v54 = vrot.slane %v15432_v20, 1  ;;  %v7194_v39 = vrot.slane %v7144_v43, 1 }
 0x485   : > { %15750 = vmatmul.mubr.msk.bf16.vlgmr.msra.gmra.mrb[176].mxu0 %vm17138_vm3, %v21050_v56  ;;  %v7195_v11 = vrot.slane %v7147_v58, 1 }
 0x486   : > { %v6946_v36 = vadd.f32 %v6936_v59, %v19704_v37  ;;  %15753 = vmatprep.mubr.msk.bf16.mxu0 %vm17195_vm11, %v21050_v56 }
 0x488   : > { %v15391_v29 = vpop.f32.mrb[76].mxu0  ;;  %v15439_v28 = vpop.f32.mrb[88].mxu1 }
 0x489   : > { %v6923_v10 = vadd.f32 %v15391_v29, %v19599_v42  ;;  %v7212_v0 = vrot.slane %v15439_v28, 1  ;;  %v6894_v30 = vpop.f32.mrb[77].mxu0  ;;  %v7158_v46 = vpop.f32.mrb[89].mxu1 }
 0x48a   : > { %v15392_v8 = vpop.f32.mrb[78].mxu0  ;;  %v15440_v17 = vpop.f32.mrb[90].mxu1 }
 0x48b   : > { %v19825_v16 = vadd.f32 %v7192_v47, %v6923_v10  ;;  %v19827_v52 = vadd.f32 %v7212_v0, %v6943_v27  ;;  %v6924_v37 = vadd.f32 %v15392_v8, %v19603_v12  ;;  %v7213_v4 = vrot.slane %v15440_v17, 1  ;;  %v6896_v22 = vpop.f32.mrb[79].mxu0  ;;  %v7160_v2 = vpop.f32.mrb[91].mxu1 }
 0x48c   : > { %v6922_v19 = vadd.f32 %v6896_v22, %v19606_v14  ;;  %v7211_v62 = vrot.slane %v7160_v2, 1 }
 0x48d   : > { %v19831_v42 = vadd.f32 %v7193_v54, %v6924_v37  ;;  %v19833_v48 = vadd.f32 %v7213_v4, %v6944_v9  ;;  %15754 = vmatmul.mubr.msk.bf16.gmra.mrb[180].mxu0 %vm17188_vm9, %v21050_v56 }
 0x48e   : > { %v19838_v20 = vadd.f32 %v7191_v63, %v6922_v19  ;;  %v19840_v27 = vadd.f32 %v7211_v62, %v6942_v3  ;;  %15757 = vmatprep.mubr.msk.bf16.mxu0 %vm17243_vm1, %v21050_v56 }
 0x490   : > { %v15395_v12 = vpop.f32.mrb[84].mxu0  ;;  %v15443_v35 = vpop.f32.mrb[92].mxu1 }
 0x491   : > { %v6909_v14 = vpop.f32.mrb[85].mxu0  ;;  %v7173_v32 = vpop.f32.mrb[93].mxu1 }
 0x492   : > { %v6925_v9 = vadd.f32 %v6909_v14, %v19632_v6  ;;  %v7214_v49 = vrot.slane %v7173_v32, 1  ;;  %v15396_v7 = vpop.f32.mrb[86].mxu0  ;;  %v15444_v34 = vpop.f32.mrb[94].mxu1 }
 0x493   : > { %v6912_v59 = vpop.f32.mrb[87].mxu0  ;;  %v7176_v29 = vpop.f32.mrb[95].mxu1 }
 0x494   : > { %v19846_v28 = vadd.f32 %v7194_v39, %v6925_v9  ;;  %v19848_v3 = vadd.f32 %v7214_v49, %v6945_v51  ;;  %v6926_v38 = vadd.f32 %v6912_v59, %v19636_v23  ;;  %v7215_v47 = vrot.slane %v7176_v29, 1 }
 0x495   : > { %15758 = vmatmul.mubr.msk.bf16.gmra.mrb[184].mxu0 %vm17236_vm15, %v21050_v56 }
 0x496   : > { %v19854_v43 = vadd.f32 %v7195_v11, %v6926_v38  ;;  %v19856_v6 = vadd.f32 %v7215_v47, %v6946_v36  ;;  %15761 = vmatprep.mubr.msk.bf16.mxu0 %vm17291_vm10, %v21050_v56 }
 0x498   : > { %v15463_v58 = vpop.f32.mrb[88].mxu0  ;;  %v15511_v10 = vpop.f32.mrb[96].mxu1 }
 0x499   : > { %v7545_v0 = vrot.slane %v15463_v58, 2  ;;  %v7365_v51 = vpop.f32.mrb[89].mxu0  ;;  %v7659_v30 = vpop.f32.mrb[97].mxu1  ;;  %v7819_v7 = vrot.slane %v15511_v10, 2 }
 0x49a   : > { %v15464_v46 = vpop.f32.mrb[90].mxu0  ;;  %v15512_v23 = vpop.f32.mrb[98].mxu1 }
 0x49b   : > { %v7555_v54 = vadd.f32 %v7545_v0, %v19758_v24  ;;  %v7546_v8 = vrot.slane %v15464_v46, 2  ;;  %v7367_v15 = vpop.f32.mrb[91].mxu0  ;;  %v7661_v17 = vpop.f32.mrb[99].mxu1  ;;  %v7820_v47 = vrot.slane %v15512_v23, 2 }
 0x49d   : > { %v7556_v37 = vadd.f32 %v7546_v8, %v19763_v21  ;;  %15762 = vmatmul.mubr.msk.bf16.gmra.mrb[188].mxu0 %vm17284_vm7, %v21050_v56 }
 0x49e   : > { %15765 = vmatprep.mubr.msk.bf16.mxu0 %vm17337_vm4, %v21050_v56  ;;  %vm16466_vm4 = vmmov 0  }
 0x4a0   : > { %v15467_v53 = vpop.f32.mrb[92].mxu0  ;;  %v15515_v36 = vpop.f32.mrb[100].mxu1 }
 0x4a1   : > { %v7549_v4 = vrot.slane %v15467_v53, 2  ;;  %v7379_v22 = vpop.f32.mrb[93].mxu0  ;;  %v7673_v2 = vpop.f32.mrb[101].mxu1  ;;  %v7823_v17 = vrot.slane %v15515_v36, 2 }
 0x4a2   : > { %v7547_v63 = vrot.slane %v7379_v22, 2  ;;  %v15468_v24 = vpop.f32.mrb[94].mxu0  ;;  %v15516_v19 = vpop.f32.mrb[102].mxu1  ;;  %v7821_v53 = vrot.slane %v7673_v2, 2 }
 0x4a3   : > { %v7559_v62 = vadd.f32 %v7549_v4, %v19781_v50  ;;  %v7382_v12 = vpop.f32.mrb[95].mxu0  ;;  %v7676_v21 = vpop.f32.mrb[103].mxu1 }
 0x4a4   : > { %v7557_v35 = vadd.f32 %v7547_v63, %v19785_v5  ;;  %v7548_v57 = vrot.slane %v7382_v12, 2  ;;  %v7822_v36 = vrot.slane %v7676_v21, 2 }
 0x4a5   : > { %15766 = vmatmul.mubr.msk.bf16.gmra.mrb[192].mxu0 %vm21046_vm2, %v21050_v56 }
 0x4a6   : > { %v7558_v1 = vadd.f32 %v7548_v57, %v19796_v26  ;;  %15769 = vmatprep.mubr.msk.bf16.mxu0 %vm21047_vm13, %v21050_v56 }
 0x4a8   : > { %v15471_v14 = vpop.f32.mrb[96].mxu0  ;;  %v15519_v32 = vpop.f32.mrb[104].mxu1 }
 0x4a9   : > { %v7525_v39 = vrot.slane %v15471_v14, 1  ;;  %v7839_v9 = vrot.slane %v15519_v32, 2  ;;  %v7394_v50 = vpop.f32.mrb[97].mxu0  ;;  %v7688_v49 = vpop.f32.mrb[105].mxu1 }
 0x4aa   : > { %v15472_v34 = vpop.f32.mrb[98].mxu0  ;;  %v15520_v5 = vpop.f32.mrb[106].mxu1 }
 0x4ab   : > { %v7535_v11 = vadd.f32 %v7525_v39, %v19756_v41  ;;  %v7526_v59 = vrot.slane %v15472_v34, 1  ;;  %v7840_v33 = vrot.slane %v15520_v5, 2  ;;  %v7396_v29 = vpop.f32.mrb[99].mxu0  ;;  %v7690_v38 = vpop.f32.mrb[107].mxu1  ;;  %v19879_v26 = vadd.f32 %v7839_v9, %v7555_v54 }
 0x4ad   : > { %v7536_v13 = vadd.f32 %v7526_v59, %v19761_v44  ;;  %15770 = vmatmul.mubr.msk.bf16.gmra.mrb[196].mxu0 %vm21048_vm6, %v21050_v56  ;;  %v19885_v58 = vadd.f32 %v7819_v7, %v7535_v11  ;;  %v19887_v10 = vadd.f32 %v7840_v33, %v7556_v37 }
 0x4ae   : > { %15773 = vmatprep.mubr.msk.bf16.mxu0 %vm21049_vm8, %v21050_v56 }
 0x4af   : > { %v19892_v41 = vadd.f32 %v7820_v47, %v7536_v13 }
 0x4b0   : > { %v15475_v0 = vpop.f32.mrb[100].mxu0  ;;  %v15523_v51 = vpop.f32.mrb[108].mxu1 }
 0x4b1   : > { %v7529_v30 = vrot.slane %v15475_v0, 1  ;;  %v7843_v46 = vrot.slane %v15523_v51, 2  ;;  %v7408_v23 = vpop.f32.mrb[101].mxu0  ;;  %v7702_v44 = vpop.f32.mrb[109].mxu1 }
 0x4b2   : > { %v7527_v54 = vrot.slane %v7408_v23, 1  ;;  %v7841_v8 = vrot.slane %v7702_v44, 2  ;;  %v15476_v60 = vpop.f32.mrb[102].mxu0  ;;  %v15524_v15 = vpop.f32.mrb[110].mxu1 }
 0x4b3   : > { %v7539_v37 = vadd.f32 %v7529_v30, %v19779_v31  ;;  %v7411_v4 = vpop.f32.mrb[103].mxu0  ;;  %v7705_v22 = vpop.f32.mrb[111].mxu1  ;;  %v19895_v18 = vadd.f32 %v7843_v46, %v7559_v62 }
 0x4b4   : > { %v7537_v63 = vadd.f32 %v7527_v54, %v19783_v25  ;;  %v7528_v24 = vrot.slane %v7411_v4, 1  ;;  %v7842_v19 = vrot.slane %v7705_v22, 2  ;;  %v19898_v12 = vadd.f32 %v7841_v8, %v7557_v35 }
 0x4b5   : > { %15774 = vmatmul.mubr.msk.bf16.gmra.mrb[64].mxu0 %vm17404_vm14, %v21050_v56  ;;  %v19903_v57 = vadd.f32 %v7823_v17, %v7539_v37 }
 0x4b6   : > { %v7538_v2 = vadd.f32 %v7528_v24, %v19794_v55  ;;  %15777 = vmatprep.mubr.msk.bf16.mxu0 %vm17441_vm0, %v21050_v56  ;;  %v19909_v31 = vadd.f32 %v7821_v53, %v7537_v63  ;;  %v19911_v25 = vadd.f32 %v7842_v19, %v7558_v1 }
 0x4b8   : > { %v15479_v62 = vpop.f32.mrb[104].mxu0  ;;  %v15527_v35 = vpop.f32.mrb[112].mxu1  ;;  %v19913_v14 = vadd.f32 %v7822_v36, %v7538_v2 }
 0x4b9   : > { %v7506_v32 = vrot.slane %v15479_v62, 2  ;;  %v7423_v40 = vpop.f32.mrb[105].mxu0  ;;  %v7717_v39 = vpop.f32.mrb[113].mxu1  ;;  %v7780_v54 = vrot.slane %v15527_v35, 2 }
 0x4ba   : > { %v15480_v9 = vpop.f32.mrb[106].mxu0  ;;  %v15528_v50 = vpop.f32.mrb[114].mxu1 }
 0x4bb   : > { %v7516_v21 = vadd.f32 %v7506_v32, %v19827_v52  ;;  %v7507_v55 = vrot.slane %v15480_v9, 2  ;;  %v7425_v49 = vpop.f32.mrb[107].mxu0  ;;  %v7719_v7 = vpop.f32.mrb[115].mxu1 }
 0x4bc   : > { %v7505_v45 = vrot.slane %v7425_v49, 2  ;;  %v7779_v2 = vrot.slane %v7719_v7, 2 }
 0x4bd   : > { %v7517_v34 = vadd.f32 %v7507_v55, %v19833_v48  ;;  %15778 = vmatmul.mubr.msk.bf16.gmra.mrb[200].mxu0 %vm17437_vm12, %v21050_v56 }
 0x4be   : > { %v7515_v1 = vadd.f32 %v7505_v45, %v19840_v27 }
 0x4c0   : > { %v15483_v5 = vpop.f32.mrb[108].mxu0  ;;  %v15531_v11 = vpop.f32.mrb[116].mxu1 }
 0x4c1   : > { %v7438_v59 = vpop.f32.mrb[109].mxu0  ;;  %v7732_v33 = vpop.f32.mrb[117].mxu1 }
 0x4c2   : > { %v7508_v29 = vrot.slane %v7438_v59, 2  ;;  %v15484_v38 = vpop.f32.mrb[110].mxu0  ;;  %v15532_v47 = vpop.f32.mrb[118].mxu1 }
 0x4c3   : > { %v7441_v52 = vpop.f32.mrb[111].mxu0  ;;  %v7735_v13 = vpop.f32.mrb[119].mxu1 }
 0x4c4   : > { %v7518_v0 = vadd.f32 %v7508_v29, %v19848_v3  ;;  %v7509_v51 = vrot.slane %v7441_v52, 2 }
 0x4c6   : > { %v7519_v48 = vadd.f32 %v7509_v51, %v19856_v6  ;;  %v7781_v6 = vrot.slane %v15528_v50, 2  ;;  %v7782_v50 = vrot.slane %v7732_v33, 2 }
 0x4c8   : > { %v15487_v30 = vpop.f32.mrb[112].mxu0  ;;  %v15535_v46 = vpop.f32.mrb[120].mxu1 }
 0x4c9   : > { %v7486_v61 = vrot.slane %v15487_v30, 1  ;;  %v7800_v23 = vrot.slane %v15535_v46, 2  ;;  %v7452_v44 = vpop.f32.mrb[113].mxu0  ;;  %v7746_v27 = vpop.f32.mrb[121].mxu1 }
 0x4ca   : > { %v15488_v8 = vpop.f32.mrb[114].mxu0  ;;  %v15536_v60 = vpop.f32.mrb[122].mxu1 }
 0x4cb   : > { %v7496_v15 = vadd.f32 %v7486_v61, %v19825_v16  ;;  %v7487_v17 = vrot.slane %v15488_v8, 1  ;;  %v7801_v53 = vrot.slane %v15536_v60, 2  ;;  %v7454_v37 = vpop.f32.mrb[115].mxu0  ;;  %v7748_v4 = vpop.f32.mrb[123].mxu1  ;;  %v19924_v22 = vadd.f32 %v7800_v23, %v7516_v21 }
 0x4cc   : > { %v7485_v3 = vrot.slane %v7454_v37, 1  ;;  %v7799_v63 = vrot.slane %v7748_v4, 2 }
 0x4cd   : > { %v7497_v24 = vadd.f32 %v7487_v17, %v19831_v42  ;;  %v7790_v19 = vadd.f32 %v7780_v54, %v7496_v15  ;;  %v19927_v36 = vadd.f32 %v7801_v53, %v7517_v34 }
 0x4ce   : > { %v7495_v62 = vadd.f32 %v7485_v3, %v19838_v20  ;;  %v7809_v35 = vadd.f32 %v7799_v63, %v7515_v1  ;;  %v7783_v20 = vrot.slane %v7735_v13, 2 }
 0x4cf   : > { %v7791_v32 = vadd.f32 %v7781_v6, %v7497_v24  ;;  %v16170_v6 = vld [vmem:[%s20885_s5 + $0x48] sm:$0xff]  }
 0x4d0   : > { %v15491_v16 = vpop.f32.mrb[80].mxu0  ;;  %v15539_v40 = vpop.f32.mrb[124].mxu1  ;;  %v7789_v39 = vadd.f32 %v7779_v2, %v7495_v62  ;;  %v16171_v24 = vld [vmem:[%s20885_s5 + $0x8] sm:$0xff]  }
 0x4d1   : > { %v7467_v9 = vpop.f32.mrb[81].mxu0  ;;  %v7761_v55 = vpop.f32.mrb[125].mxu1 }
 0x4d2   : > { %v7488_v21 = vrot.slane %v7467_v9, 1  ;;  %v7802_v49 = vrot.slane %v7761_v55, 2  ;;  %v15492_v45 = vpop.f32.mrb[82].mxu0  ;;  %v15540_v5 = vpop.f32.mrb[126].mxu1 }
 0x4d3   : > { %v7470_v11 = vpop.f32.mrb[83].mxu0  ;;  %v7764_v42 = vpop.f32.mrb[127].mxu1 }
 0x4d4   : > { %v7498_v34 = vadd.f32 %v7488_v21, %v19846_v28  ;;  %v7489_v59 = vrot.slane %v7470_v11, 1  ;;  %v7803_v7 = vrot.slane %v7764_v42, 2  ;;  %v19931_v29 = vadd.f32 %v7802_v49, %v7518_v0  ;;  %v16168_v0 = vld [vmem:[%s20885_s5 + $0x40] sm:$0xff]  }
 0x4d5   : > { %14116 = vmatprep.subr.bf16.mxu1 %v16168_v0 }
 0x4d6   : > { %v7499_v1 = vadd.f32 %v7489_v59, %v19854_v43  ;;  %v7792_v38 = vadd.f32 %v7782_v50, %v7498_v34  ;;  %v7813_v47 = vadd.f32 %v7803_v7, %v7519_v48  ;;  %v16169_v43 = vld [vmem:[%s20885_s5] sm:$0xff]   ;;  %v16173_v34 = vld [vmem:[%s20885_s5 + $0x10] sm:$0xff]  }
 0x4d7   : > { %14117 = vmatpush3.bf16.msra.mxu1 %v16169_v43 }
 0x4d8   : > { %v15559_v52 = vpop.f32.mrb[116].mxu0  ;;  %v15607_v51 = vpop.f32.mrb[128].mxu1  ;;  %v7793_v30 = vadd.f32 %v7783_v20, %v7499_v1  ;;  %14118 = vmatprep.subr.bf16.mxu1 %v16170_v6 }
 0x4d9   : > { %v8068_v46 = vadd.f32 %v15559_v52, %v7789_v39  ;;  %v7953_v61 = vpop.f32.mrb[117].mxu0  ;;  %v8187_v23 = vpop.f32.mrb[129].mxu1  ;;  %v8312_v62 = vrot.slane %v15607_v51, 1 }
 0x4da   : > { %v15560_v33 = vpop.f32.mrb[118].mxu0  ;;  %v15608_v44 = vpop.f32.mrb[130].mxu1 }
 0x4db   : > { %v8069_v27 = vadd.f32 %v15560_v33, %v7790_v19  ;;  %v7955_v54 = vpop.f32.mrb[119].mxu0  ;;  %v8189_v28 = vpop.f32.mrb[131].mxu1  ;;  %14119 = vmatpush3.bf16.msra.mxu1 %v16171_v24  ;;  %v8313_v21 = vrot.slane %v15608_v44, 1  ;;  %v16180_v24 = vld [vmem:[%s20885_s5 + $0x148] sm:$0xff]  }
 0x4e0   : > { %v15563_v13 = vpop.f32.mrb[120].mxu0  ;;  %v15611_v48 = vpop.f32.mrb[132].mxu1 }
 0x4e1   : > { %v8072_v8 = vadd.f32 %v15563_v13, %v7793_v30  ;;  %v7967_v60 = vpop.f32.mrb[121].mxu0  ;;  %v8201_v15 = vpop.f32.mrb[133].mxu1  ;;  %v8316_v20 = vrot.slane %v15611_v48, 1  ;;  %v16176_v13 = vld [vmem:[%s20885_s5 + $0x140] sm:$0xff]  }
 0x4e2   : > { %v8070_v17 = vadd.f32 %v7967_v60, %v7791_v32  ;;  %v15564_v53 = vpop.f32.mrb[122].mxu0  ;;  %v15612_v37 = vpop.f32.mrb[134].mxu1  ;;  %v8314_v51 = vrot.slane %v8201_v15, 1  ;;  %v16175_v60 = vld [vmem:[%s20885_s5 + $0x18] sm:$0xff]   ;;  %14160 = vmatprep.subr.bf16.mxu0 %v16176_v13 }
 0x4e3   : > { %v7970_v4 = vpop.f32.mrb[123].mxu0  ;;  %v8204_v3 = vpop.f32.mrb[135].mxu1 }
 0x4e4   : > { %v8071_v63 = vadd.f32 %v7970_v4, %v7792_v38  ;;  %v8315_v54 = vrot.slane %v8204_v3, 1 }
 0x4e8   : > { %v15567_v19 = vpop.f32.mrb[124].mxu0  ;;  %v15615_v2 = vpop.f32.mrb[136].mxu1 }
 0x4e9   : > { %v8073_v16 = vadd.f32 %v15567_v19, %v7809_v35  ;;  %v19946_v32 = vadd.f32 %v15615_v2, %v8068_v46  ;;  %v7982_v40 = vpop.f32.mrb[125].mxu0  ;;  %v8216_v39 = vpop.f32.mrb[137].mxu1  ;;  %v16172_v35 = vld [vmem:[%s20885_s5 + $0x50] sm:$0xff]   ;;  %v16181_v19 = vld [vmem:[%s20885_s5 + $0x108] sm:$0xff]   ;;  %v16179_v2 = vld [vmem:[%s20885_s5 + $0x20] sm:$0xff]  }
 0x4ea   : > { %v15568_v9 = vpop.f32.mrb[126].mxu0  ;;  %v15616_v55 = vpop.f32.mrb[138].mxu1  ;;  %14120 = vmatprep.subr.bf16.mxu1 %v16172_v35  ;;  %v16183_v40 = vld [vmem:[%s20885_s5 + $0x110] sm:$0xff]  }
 0x4eb   : > { %v19948_v49 = vadd.f32 %v8312_v62, %v8073_v16  ;;  %v8074_v45 = vadd.f32 %v15568_v9, %v19924_v22  ;;  %v19951_v5 = vadd.f32 %v15616_v55, %v8069_v27  ;;  %v7984_v50 = vpop.f32.mrb[127].mxu0  ;;  %v8218_v11 = vpop.f32.mrb[139].mxu1  ;;  %14121 = vmatpush3.bf16.msra.mxu1 %v16173_v34  ;;  %v16186_v34 = vld [vmem:[%s20885_s5 + $0x158] sm:$0xff]  }
 0x4ed   : > { %v19953_v42 = vadd.f32 %v8313_v21, %v8074_v45 }
 0x4f0   : > { %v15571_v59 = vpop.f32.mrb[128].mxu0  ;;  %v15619_v7 = vpop.f32.mrb[140].mxu1 }
 0x4f1   : > { %v8077_v1 = vadd.f32 %v15571_v59, %v7813_v47  ;;  %v19961_v38 = vadd.f32 %v15619_v7, %v8072_v8  ;;  %v7996_v22 = vpop.f32.mrb[129].mxu0  ;;  %v8230_v52 = vpop.f32.mrb[141].mxu1  ;;  %v16185_v7 = vld [vmem:[%s20885_s5 + $0x28] sm:$0xff]  }
 0x4f2   : > { %v8075_v30 = vadd.f32 %v7996_v22, %v19927_v36  ;;  %v19964_v46 = vadd.f32 %v8230_v52, %v8070_v17  ;;  %v15572_v61 = vpop.f32.mrb[130].mxu0  ;;  %v15620_v23 = vpop.f32.mrb[142].mxu1  ;;  %v16174_v36 = vld [vmem:[%s20885_s5 + $0x58] sm:$0xff]   ;;  %v16189_v22 = vld [vmem:[%s20885_s5 + $0x120] sm:$0xff]  }
 0x4f3   : > { %v19966_v33 = vadd.f32 %v8316_v20, %v8077_v1  ;;  %v7999_v44 = vpop.f32.mrb[131].mxu0  ;;  %v8233_v27 = vpop.f32.mrb[143].mxu1  ;;  %14122 = vmatprep.subr.bf16.mxu1 %v16174_v36  ;;  %v16188_v20 = vld [vmem:[%s20885_s5 + $0x160] sm:$0xff]  }
 0x4f4   : > { %v19968_v28 = vadd.f32 %v8314_v51, %v8075_v30  ;;  %v8076_v47 = vadd.f32 %v7999_v44, %v19931_v29  ;;  %v19971_v0 = vadd.f32 %v8233_v27, %v8071_v63  ;;  %v16177_v29 = vld [vmem:[%s20885_s5 + $0x100] sm:$0xff]   ;;  %14123 = vmatpush3.bf16.msra.mxu1 %v16175_v60 }
 0x4f5   : > { %14161 = vmatpush3.bf16.msra.mxu0 %v16177_v29 }
 0x4f6   : > { %v19973_v43 = vadd.f32 %v8315_v54, %v8076_v47  ;;  %14162 = vmatprep.subr.bf16.mxu0 %v16180_v24 }
 0x4f8   : > { %v15575_v48 = vpop.f32.mrb[132].mxu0  ;;  %v15623_v8 = vpop.f32.mrb[144].mxu1 }
 0x4f9   : > { %v8078_v15 = vadd.f32 %v15575_v48, %v19885_v58  ;;  %v8011_v17 = vpop.f32.mrb[133].mxu0  ;;  %v8245_v53 = vpop.f32.mrb[145].mxu1  ;;  %v16178_v58 = vld [vmem:[%s20885_s5 + $0x60] sm:$0xff]   ;;  %14163 = vmatpush3.bf16.msra.mxu0 %v16181_v19  ;;  %v8337_v52 = vrot.slane %v15623_v8, 1  ;;  %v16193_v8 = vld [vmem:[%s20885_s5 + $0x128] sm:$0xff]   ;;  %v16191_v19 = vld [vmem:[%s20885_s5 + $0x30] sm:$0xff]  }
 0x4fa   : > { %v15576_v37 = vpop.f32.mrb[134].mxu0  ;;  %v15624_v4 = vpop.f32.mrb[146].mxu1  ;;  %14124 = vmatprep.subr.bf16.mxu1 %v16178_v58  ;;  %v16190_v53 = vld [vmem:[%s20885_s5 + $0x70] sm:$0xff]  }
 0x4fb   : > { %v8079_v3 = vadd.f32 %v15576_v37, %v19892_v41  ;;  %v8013_v63 = vpop.f32.mrb[135].mxu0  ;;  %v8247_v6 = vpop.f32.mrb[147].mxu1  ;;  %v16182_v41 = vld [vmem:[%s20885_s5 + $0x150] sm:$0xff]   ;;  %14125 = vmatpush3.bf16.msra.mxu1 %v16179_v2  ;;  %v8338_v54 = vrot.slane %v15624_v4, 1 }
 0x4fc   : > { %14164 = vmatprep.subr.bf16.mxu0 %v16182_v41  ;;  %v16195_v37 = vld [vmem:[%s20885_s5 + $0x130] sm:$0xff]  }
 0x4fd   : > { %14165 = vmatpush3.bf16.msra.mxu0 %v16183_v40 }
 0x4fe   : > { %14166 = vmatprep.subr.bf16.mxu0 %v16186_v34  ;;  %v16197_v34 = vld [vmem:[%s20885_s5 + $0x38] sm:$0xff]  }
 0x500   : > { %v15579_v62 = vpop.f32.mrb[136].mxu0  ;;  %v20004_v16 = vpop.f32.mrb[148].mxu1 }
 0x501   : > { %v8082_v39 = vadd.f32 %v15579_v62, %v19903_v57  ;;  %v8025_v9 = vpop.f32.mrb[137].mxu0  ;;  %v20010_v55 = vpop.f32.mrb[149].mxu1  ;;  %v16184_v57 = vld [vmem:[%s20885_s5 + $0x68] sm:$0xff]   ;;  %v8341_v4 = vrot.slane %v20004_v16, 1 }
 0x502   : > { %v8080_v21 = vadd.f32 %v8025_v9, %v19909_v31  ;;  %v15580_v45 = vpop.f32.mrb[138].mxu0  ;;  %v15628_v50 = vpop.f32.mrb[150].mxu1  ;;  %v16187_v31 = vld [vmem:[%s20885_s5 + $0x118] sm:$0xff]   ;;  %14126 = vmatprep.subr.bf16.mxu1 %v16184_v57  ;;  %v8339_v58 = vrot.slane %v20010_v55, 1 }
 0x503   : > { %v8028_v11 = vpop.f32.mrb[139].mxu0  ;;  %v20013_v35 = vpop.f32.mrb[151].mxu1  ;;  %14167 = vmatpush3.bf16.msra.mxu0 %v16187_v31  ;;  %14127 = vmatpush3.bf16.msra.mxu1 %v16185_v7  ;;  %v16198_v9 = vld [vmem:[%s20885_s5 + $0x178] sm:$0xff]   ;;  %v16201_v31 = vld [vmem:[%s20885_s5 + $0xc0] sm:$0xff]  }
 0x504   : > { %v8081_v59 = vadd.f32 %v8028_v11, %v19913_v14  ;;  %14168 = vmatprep.subr.bf16.mxu0 %v16188_v20  ;;  %14128 = vmatprep.subr.bf16.mxu1 %v16190_v53  ;;  %v8340_v45 = vrot.slane %v20013_v35, 1  ;;  %v16196_v50 = vld [vmem:[%s20885_s5 + $0x78] sm:$0xff]  }
 0x505   : > { %v16199_v11 = vld [vmem:[%s20885_s5 + $0x138] sm:$0xff]  }
 0x507   : > { %14169 = vmatpush3.bf16.msra.mxu0 %v16189_v22  ;;  %14129 = vmatpush3.bf16.msra.mxu1 %v16191_v19 }
 0x508   : > { %v15583_v14 = vpop.f32.mrb[140].mxu0  ;;  %v15631_v1 = vpop.f32.mrb[152].mxu1  ;;  %14130 = vmatprep.subr.bf16.mxu1 %v16196_v50 }
 0x509   : > { %v8083_v51 = vadd.f32 %v15583_v14, %v19879_v26  ;;  %v20035_v30 = vadd.f32 %v15631_v1, %v8078_v15  ;;  %v8040_v61 = vpop.f32.mrb[141].mxu0  ;;  %v8274_v23 = vpop.f32.mrb[153].mxu1  ;;  %v16192_v26 = vld [vmem:[%s20885_s5 + $0x168] sm:$0xff]  }
 0x50a   : > { %v15584_v44 = vpop.f32.mrb[142].mxu0  ;;  %v15632_v27 = vpop.f32.mrb[154].mxu1  ;;  %14170 = vmatprep.subr.bf16.mxu0 %v16192_v26 }
 0x50b   : > { %v20037_v47 = vadd.f32 %v8337_v52, %v8083_v51  ;;  %v8084_v36 = vadd.f32 %v15584_v44, %v19887_v10  ;;  %v20040_v13 = vadd.f32 %v15632_v27, %v8079_v3  ;;  %v8042_v48 = vpop.f32.mrb[143].mxu0  ;;  %v8276_v60 = vpop.f32.mrb[155].mxu1  ;;  %14171 = vmatpush3.bf16.msra.mxu0 %v16193_v8  ;;  %v16194_v10 = vld [vmem:[%s20885_s5 + $0x170] sm:$0xff]   ;;  %14131 = vmatpush3.bf16.msra.mxu1 %v16197_v34 }
 0x50c   : > { %14172 = vmatprep.subr.bf16.mxu0 %v16194_v10  ;;  %14138 = vmatprep.subr.bf16.mxu1 %v16201_v31 }
 0x50d   : > { %v20048_v29 = vadd.f32 %v8338_v54, %v8084_v36 }
 0x50f   : > { %14173 = vmatpush3.bf16.msra.mxu0 %v16195_v37 }
 0x510   : > { %v15587_v15 = vpop.f32.mrb[144].mxu0  ;;  %v15635_v17 = vpop.f32.mrb[156].mxu1  ;;  %14174 = vmatprep.subr.bf16.mxu0 %v16198_v9 }
 0x511   : > { %v8087_v3 = vadd.f32 %v15587_v15, %v19895_v18  ;;  %v20061_v63 = vadd.f32 %v15635_v17, %v8082_v39  ;;  %v8054_v6 = vpop.f32.mrb[145].mxu0  ;;  %v8288_v24 = vpop.f32.mrb[157].mxu1 }
 0x512   : > { %v8085_v2 = vadd.f32 %v8054_v6, %v19898_v12  ;;  %v20068_v41 = vadd.f32 %v8288_v24, %v8080_v21  ;;  %v15588_v62 = vpop.f32.mrb[146].mxu0  ;;  %v15636_v40 = vpop.f32.mrb[158].mxu1 }
 0x513   : > { %v20070_v18 = vadd.f32 %v8341_v4, %v8087_v3  ;;  %v8057_v16 = vpop.f32.mrb[147].mxu0  ;;  %v8291_v39 = vpop.f32.mrb[159].mxu1  ;;  %14175 = vmatpush3.bf16.msra.mxu0 %v16199_v11 }
 0x514   : > { %v20076_v55 = vadd.f32 %v8339_v58, %v8085_v2  ;;  %v8086_v12 = vadd.f32 %v8057_v16, %v19911_v25  ;;  %v20079_v21 = vadd.f32 %v8291_v39, %v8081_v59  ;;  %v16200_v25 = vld [vmem:[%s20885_s5 + $0x240] sm:$0xff]  }
 0x515   : > { %14204 = vmatprep.subr.bf16.mxu0 %v16200_v25 }
 0x516   : > { %v20090_v35 = vadd.f32 %v8340_v45, %v8086_v12 }
 0x518   : > { %v15655_v59 = vpop.f32.mrb[148].mxu0  ;;  %v15703_v57 = vpop.f32.mrb[160].mxu1 }
 0x519   : > { %v8571_v7 = vrot.slane %v15655_v59, 1  ;;  %v8451_v20 = vpop.f32.mrb[149].mxu0  ;;  %v8745_v14 = vpop.f32.mrb[161].mxu1  ;;  %v8885_v2 = vrot.slane %v15703_v57, 2 }
 0x51a   : > { %v15656_v1 = vpop.f32.mrb[150].mxu0  ;;  %v15704_v22 = vpop.f32.mrb[162].mxu1 }
 0x51b   : > { %v8581_v52 = vadd.f32 %v8571_v7, %v19946_v32  ;;  %v8572_v51 = vrot.slane %v15656_v1, 1  ;;  %v8453_v61 = vpop.f32.mrb[151].mxu0  ;;  %v8747_v23 = vpop.f32.mrb[163].mxu1  ;;  %v8886_v12 = vrot.slane %v15704_v22, 2 }
 0x51d   : > { %v8582_v44 = vadd.f32 %v8572_v51, %v19951_v5 }
 0x520   : > { %v15659_v27 = vpop.f32.mrb[152].mxu0  ;;  %v15707_v54 = vpop.f32.mrb[164].mxu1 }
 0x521   : > { %v8575_v36 = vrot.slane %v15659_v27, 1  ;;  %v8465_v48 = vpop.f32.mrb[153].mxu0  ;;  %v8759_v60 = vpop.f32.mrb[165].mxu1  ;;  %v8889_v51 = vrot.slane %v15707_v54, 2 }
 0x522   : > { %v8573_v26 = vrot.slane %v8465_v48, 1  ;;  %v15660_v8 = vpop.f32.mrb[154].mxu0  ;;  %v15708_v10 = vpop.f32.mrb[166].mxu1  ;;  %v8887_v22 = vrot.slane %v8759_v60, 2 }
 0x523   : > { %v8585_v15 = vadd.f32 %v8575_v36, %v19961_v38  ;;  %v8468_v17 = vpop.f32.mrb[155].mxu0  ;;  %v8762_v53 = vpop.f32.mrb[167].mxu1 }
 0x524   : > { %v8583_v37 = vadd.f32 %v8573_v26, %v19964_v46  ;;  %v8574_v32 = vrot.slane %v8468_v17, 1  ;;  %v8888_v10 = vrot.slane %v8762_v53, 2 }
 0x526   : > { %v8584_v4 = vadd.f32 %v8574_v32, %v19971_v0 }
 0x528   : > { %v15663_v3 = vpop.f32.mrb[156].mxu0  ;;  %v15711_v6 = vpop.f32.mrb[168].mxu1 }
 0x529   : > { %v8591_v5 = vrot.slane %v15663_v3, 1  ;;  %v8865_v24 = vrot.slane %v15711_v6, 1  ;;  %v8480_v19 = vpop.f32.mrb[157].mxu0  ;;  %v8774_v58 = vpop.f32.mrb[169].mxu1 }
 0x52a   : > { %v15664_v62 = vpop.f32.mrb[158].mxu0  ;;  %v15712_v40 = vpop.f32.mrb[170].mxu1 }
 0x52b   : > { %v8601_v16 = vadd.f32 %v8591_v5, %v19948_v49  ;;  %v20104_v39 = vadd.f32 %v8865_v24, %v8581_v52  ;;  %v8592_v38 = vrot.slane %v15664_v62, 1  ;;  %v8866_v9 = vrot.slane %v15712_v40, 1  ;;  %v8482_v45 = vpop.f32.mrb[159].mxu0  ;;  %v8776_v46 = vpop.f32.mrb[171].mxu1 }
 0x52d   : > { %v8602_v0 = vadd.f32 %v8592_v38, %v19953_v42  ;;  %v20107_v50 = vadd.f32 %v8866_v9, %v8582_v44  ;;  %v20109_v11 = vadd.f32 %v8885_v2, %v8601_v16 }
 0x52f   : > { %v20111_v34 = vadd.f32 %v8886_v12, %v8602_v0 }
 0x530   : > { %v15667_v25 = vpop.f32.mrb[160].mxu0  ;;  %v15715_v59 = vpop.f32.mrb[172].mxu1 }
 0x531   : > { %v8595_v57 = vrot.slane %v15667_v25, 1  ;;  %v8869_v31 = vrot.slane %v15715_v59, 1  ;;  %v8494_v49 = vpop.f32.mrb[161].mxu0  ;;  %v8788_v7 = vpop.f32.mrb[173].mxu1 }
 0x532   : > { %v8593_v20 = vrot.slane %v8494_v49, 1  ;;  %v8867_v14 = vrot.slane %v8788_v7, 1  ;;  %v15668_v1 = vpop.f32.mrb[162].mxu0  ;;  %v15716_v52 = vpop.f32.mrb[174].mxu1 }
 0x533   : > { %v8605_v42 = vadd.f32 %v8595_v57, %v19966_v33  ;;  %v20114_v61 = vadd.f32 %v8869_v31, %v8585_v15  ;;  %v8497_v23 = vpop.f32.mrb[163].mxu0  ;;  %v8791_v44 = vpop.f32.mrb[175].mxu1 }
 0x534   : > { %v8603_v27 = vadd.f32 %v8593_v20, %v19968_v28  ;;  %v20117_v36 = vadd.f32 %v8867_v14, %v8583_v37  ;;  %v8594_v48 = vrot.slane %v8497_v23, 1  ;;  %v8868_v26 = vrot.slane %v8791_v44, 1 }
 0x535   : > { %v20119_v8 = vadd.f32 %v8889_v51, %v8605_v42 }
 0x536   : > { %v8604_v17 = vadd.f32 %v8594_v48, %v19973_v43  ;;  %v20122_v32 = vadd.f32 %v8868_v26, %v8584_v4  ;;  %v20124_v54 = vadd.f32 %v8887_v22, %v8603_v27 }
 0x538   : > { %v15671_v33 = vpop.f32.mrb[164].mxu0  ;;  %v15719_v60 = vpop.f32.mrb[176].mxu1  ;;  %v20126_v15 = vadd.f32 %v8888_v10, %v8604_v17 }
 0x539   : > { %v8611_v3 = vrot.slane %v15671_v33, 1  ;;  %v8509_v6 = vpop.f32.mrb[165].mxu0  ;;  %v8803_v28 = vpop.f32.mrb[177].mxu1  ;;  %v8925_v14 = vrot.slane %v15719_v60, 2 }
 0x53a   : > { %v15672_v37 = vpop.f32.mrb[166].mxu0  ;;  %v15720_v5 = vpop.f32.mrb[178].mxu1 }
 0x53b   : > { %v8621_v24 = vadd.f32 %v8611_v3, %v20035_v30  ;;  %v8612_v19 = vrot.slane %v15672_v37, 1  ;;  %v8511_v58 = vpop.f32.mrb[167].mxu0  ;;  %v8805_v53 = vpop.f32.mrb[179].mxu1  ;;  %v8926_v44 = vrot.slane %v15720_v5, 2 }
 0x53d   : > { %v8622_v43 = vadd.f32 %v8612_v19, %v20040_v13 }
 0x540   : > { %v15675_v4 = vpop.f32.mrb[168].mxu0  ;;  %v15723_v2 = vpop.f32.mrb[180].mxu1 }
 0x541   : > { %v8615_v62 = vrot.slane %v15675_v4, 1  ;;  %v8523_v40 = vpop.f32.mrb[169].mxu0  ;;  %v8817_v16 = vpop.f32.mrb[181].mxu1  ;;  %v8929_v19 = vrot.slane %v15723_v2, 2 }
 0x542   : > { %v8613_v38 = vrot.slane %v8523_v40, 1  ;;  %v15676_v9 = vpop.f32.mrb[170].mxu0  ;;  %v15724_v45 = vpop.f32.mrb[182].mxu1  ;;  %v8927_v5 = vrot.slane %v8817_v16, 2 }
 0x543   : > { %v8625_v46 = vadd.f32 %v8615_v62, %v20061_v63  ;;  %v8526_v12 = vpop.f32.mrb[171].mxu0  ;;  %v8820_v0 = vpop.f32.mrb[183].mxu1 }
 0x544   : > { %v8623_v25 = vadd.f32 %v8613_v38, %v20068_v41  ;;  %v8614_v30 = vrot.slane %v8526_v12, 1  ;;  %v8928_v45 = vrot.slane %v8820_v0, 2 }
 0x546   : > { %v8624_v59 = vadd.f32 %v8614_v30, %v20079_v21 }
 0x548   : > { %v15679_v57 = vpop.f32.mrb[72].mxu0  ;;  %v15727_v31 = vpop.f32.mrb[184].mxu1 }
 0x549   : > { %v8631_v13 = vrot.slane %v15679_v57, 1  ;;  %v8905_v49 = vrot.slane %v15727_v31, 1  ;;  %v8538_v7 = vpop.f32.mrb[73].mxu0  ;;  %v8832_v20 = vpop.f32.mrb[185].mxu1 }
 0x54a   : > { %v15680_v1 = vpop.f32.mrb[74].mxu0  ;;  %v15728_v52 = vpop.f32.mrb[186].mxu1 }
 0x54b   : > { %v8641_v51 = vadd.f32 %v8631_v13, %v20037_v47  ;;  %v20134_v22 = vadd.f32 %v8905_v49, %v8621_v24  ;;  %v8632_v63 = vrot.slane %v15680_v1, 1  ;;  %v8906_v42 = vrot.slane %v15728_v52, 1  ;;  %v8540_v23 = vpop.f32.mrb[75].mxu0  ;;  %v8834_v41 = vpop.f32.mrb[187].mxu1 }
 0x54d   : > { %v8642_v21 = vadd.f32 %v8632_v63, %v20048_v29  ;;  %v20137_v27 = vadd.f32 %v8906_v42, %v8622_v43  ;;  %v20139_v48 = vadd.f32 %v8925_v14, %v8641_v51 }
 0x54f   : > { %v20141_v26 = vadd.f32 %v8926_v44, %v8642_v21 }
 0x550   : > { %v15683_v10 = vpop.f32.mrb[172].mxu0  ;;  %v15731_v17 = vpop.f32.mrb[188].mxu1 }
 0x551   : > { %v8635_v33 = vrot.slane %v15683_v10, 1  ;;  %v8909_v60 = vrot.slane %v15731_v17, 1  ;;  %v8552_v47 = vpop.f32.mrb[173].mxu0  ;;  %v8846_v3 = vpop.f32.mrb[189].mxu1 }
 0x552   : > { %v8633_v6 = vrot.slane %v8552_v47, 1  ;;  %v8907_v28 = vrot.slane %v8846_v3, 1  ;;  %v15684_v37 = vpop.f32.mrb[174].mxu0  ;;  %v15732_v24 = vpop.f32.mrb[190].mxu1 }
 0x553   : > { %v8645_v29 = vadd.f32 %v8635_v33, %v20070_v18  ;;  %v20144_v58 = vadd.f32 %v8909_v60, %v8625_v46  ;;  %v8555_v53 = vpop.f32.mrb[175].mxu0  ;;  %v8849_v43 = vpop.f32.mrb[191].mxu1 }
 0x554   : > { %v8643_v4 = vadd.f32 %v8633_v6, %v20076_v55  ;;  %v20147_v62 = vadd.f32 %v8907_v28, %v8623_v25  ;;  %v8634_v40 = vrot.slane %v8555_v53, 1  ;;  %v8908_v38 = vrot.slane %v8849_v43, 1 }
 0x555   : > { %v20149_v9 = vadd.f32 %v8929_v19, %v8645_v29 }
 0x556   : > { %v8644_v12 = vadd.f32 %v8634_v40, %v20090_v35  ;;  %v8918_v30 = vadd.f32 %v8908_v38, %v8624_v59  ;;  %v20152_v2 = vadd.f32 %v8927_v5, %v8643_v4 }
 0x558   : > { %v15751_v16 = vpop.f32.mrb[176].mxu0  ;;  %v20154_v18 = vadd.f32 %v8928_v45, %v8644_v12 }
 0x559   : > { %v9159_v46 = vrot.slane %v15751_v16, 2  ;;  %v9039_v57 = vpop.f32.mrb[177].mxu0 }
 0x55a   : > { %v15752_v31 = vpop.f32.mrb[178].mxu0 }
 0x55b   : > { %v20157_v55 = vadd.f32 %v9159_v46, %v20104_v39  ;;  %v9160_v25 = vrot.slane %v15752_v31, 2  ;;  %v9041_v13 = vpop.f32.mrb[179].mxu0 }
 0x55d   : > { %v20160_v49 = vadd.f32 %v9160_v25, %v20107_v50 }
 0x560   : > { %v15755_v0 = vpop.f32.mrb[180].mxu0 }
 0x561   : > { %v9163_v7 = vrot.slane %v15755_v0, 2  ;;  %v9053_v35 = vpop.f32.mrb[181].mxu0 }
 0x562   : > { %v9161_v59 = vrot.slane %v9053_v35, 2  ;;  %v15756_v20 = vpop.f32.mrb[182].mxu0 }
 0x563   : > { %v20163_v14 = vadd.f32 %v9163_v7, %v20114_v61  ;;  %v9056_v1 = vpop.f32.mrb[183].mxu0 }
 0x564   : > { %v20166_v52 = vadd.f32 %v9161_v59, %v20117_v36  ;;  %v9162_v51 = vrot.slane %v9056_v1, 2 }
 0x566   : > { %v20169_v39 = vadd.f32 %v9162_v51, %v20122_v32 }
 0x568   : > { %v15759_v63 = vpop.f32.mrb[184].mxu0 }
 0x569   : > { %v9179_v42 = vrot.slane %v15759_v63, 2  ;;  %v9068_v50 = vpop.f32.mrb[185].mxu0 }
 0x56a   : > { %v15760_v23 = vpop.f32.mrb[186].mxu0 }
 0x56b   : > { %v9189_v41 = vadd.f32 %v9179_v42, %v20109_v11  ;;  %v9180_v44 = vrot.slane %v15760_v23, 2  ;;  %v9070_v21 = vpop.f32.mrb[187].mxu0 }
 0x56c   : > { %v16465_v21 = vmov 0.0  }
 0x56d   : > { %v9234_v10 = vmax.f32 %v20157_v55, %v9189_v41  ;;  %v9190_v61 = vadd.f32 %v9180_v44, %v20111_v34 }
 0x56f   : > { %v9235_v17 = vmax.f32 %v20160_v49, %v9190_v61 }
 0x570   : > { %v15763_v36 = vpop.f32.mrb[188].mxu0 }
 0x571   : > { %v9183_v33 = vrot.slane %v15763_v36, 2  ;;  %v9082_v60 = vpop.f32.mrb[189].mxu0 }
 0x572   : > { %v9181_v47 = vrot.slane %v9082_v60, 2  ;;  %v15764_v32 = vpop.f32.mrb[190].mxu0 }
 0x573   : > { %v9193_v3 = vadd.f32 %v9183_v33, %v20119_v8  ;;  %v9085_v6 = vpop.f32.mrb[191].mxu0  ;;  %v16202_v32 = vld [vmem:[%s20885_s5 + $0x200] sm:$0xff]  }
 0x574   : > { %v20177_v28 = vadd.f32 %v9181_v47, %v20124_v54  ;;  %v9182_v11 = vrot.slane %v9085_v6, 2 }
 0x575   : > { %v9238_v37 = vmax.f32 %v20163_v14, %v9193_v3  ;;  %v16203_v3 = vld [vmem:[%s20885_s5 + $0x80] sm:$0xff]  }
 0x576   : > { %v9236_v24 = vmax.f32 %v20166_v52, %v20177_v28  ;;  %v20183_v34 = vadd.f32 %v9182_v11, %v20126_v15 }
 0x578   : > { %v9237_v19 = vmax.f32 %v20169_v39, %v20183_v34  ;;  %v15767_v5 = vpop.f32.mrb[192].mxu0  ;;  %v16208_v39 = vld [vmem:[%s20885_s5 + $0x250] sm:$0xff]  }
 0x579   : > { %v9199_v29 = vrot.slane %v15767_v5, 2  ;;  %v9097_v53 = vpop.f32.mrb[193].mxu0  ;;  %v16209_v34 = vld [vmem:[%s20885_s5 + $0xd0] sm:$0xff]  }
 0x57a   : > { %v15768_v8 = vpop.f32.mrb[194].mxu0 }
 0x57b   : > { %v9209_v43 = vadd.f32 %v9199_v29, %v20134_v22  ;;  %v9200_v54 = vrot.slane %v15768_v8, 2  ;;  %v9099_v4 = vpop.f32.mrb[195].mxu0  ;;  %v16204_v29 = vld [vmem:[%s20885_s5 + $0x248] sm:$0xff]  }
 0x57c   : > { %v16206_v8 = vld [vmem:[%s20885_s5 + $0x208] sm:$0xff]   ;;  %v16212_v4 = vld [vmem:[%s20885_s5 + $0x258] sm:$0xff]  }
 0x57d   : > { %v9210_v40 = vadd.f32 %v9200_v54, %v20137_v27  ;;  %v16211_v54 = vld [vmem:[%s20885_s5 + $0x90] sm:$0xff]  }
 0x580   : > { %v15771_v38 = vpop.f32.mrb[196].mxu0 }
 0x581   : > { %v9203_v45 = vrot.slane %v15771_v38, 2  ;;  %v9111_v12 = vpop.f32.mrb[197].mxu0  ;;  %v16214_v38 = vld [vmem:[%s20885_s5 + $0x218] sm:$0xff]  }
 0x582   : > { %v9201_v16 = vrot.slane %v9111_v12, 2  ;;  %v15772_v46 = vpop.f32.mrb[198].mxu0  ;;  %v16216_v12 = vld [vmem:[%s20885_s5 + $0x260] sm:$0xff]  }
 0x583   : > { %v9213_v15 = vadd.f32 %v9203_v45, %v20144_v58  ;;  %v9114_v57 = vpop.f32.mrb[199].mxu0  ;;  %v20196_v58 = vld [vmem:[%s20884_s4] ss:$0 sm:$0xff]  ;;  %v16215_v45 = vld [vmem:[%s20885_s5 + $0x98] sm:$0xff]  }
 0x584   : > { %v9211_v31 = vadd.f32 %v9201_v16, %v20147_v62  ;;  %v9202_v55 = vrot.slane %v9114_v57, 2  ;;  %v16217_v16 = vld [vmem:[%s20885_s5 + $0xe0] sm:$0xff]  }
 0x585   : > { %v16219_v57 = vld [vmem:[%s20885_s5 + $0xa0] sm:$0xff]  }
 0x586   : > { %v9212_v25 = vadd.f32 %v9202_v55, %v8918_v30  ;;  %v16221_v55 = vld [vmem:[%s20885_s5 + $0xe8] sm:$0xff]  }
 0x588   : > { %v15775_v13 = vpop.f32.mrb[64].mxu0 }
 0x589   : > { %v9219_v49 = vrot.slane %v15775_v13, 2  ;;  %v9126_v0 = vpop.f32.mrb[65].mxu0  ;;  %v16223_v13 = vld [vmem:[%s20885_s5 + $0xa8] sm:$0xff]  }
 0x58a   : > { %v15776_v22 = vpop.f32.mrb[66].mxu0  ;;  %v16225_v0 = vld [vmem:[%s20885_s5 + $0xf0] sm:$0xff]  }
 0x58b   : > { %v9229_v7 = vadd.f32 %v9219_v49, %v20139_v48  ;;  %v9220_v35 = vrot.slane %v15776_v22, 2  ;;  %v9128_v27 = vpop.f32.mrb[67].mxu0  ;;  %v16224_v49 = vld [vmem:[%s20885_s5 + $0x270] sm:$0xff]  }
 0x58c   : > { %v16228_v27 = vld [vmem:[%s20885_s5 + $0x278] sm:$0xff]  }
 0x58d   : > { %v9239_v59 = vmax.f32 %v9209_v43, %v9229_v7  ;;  %v9230_v20 = vadd.f32 %v9220_v35, %v20141_v26  ;;  %v16207_v43 = vld [vmem:[%s20885_s5 + $0x88] sm:$0xff]   ;;  %v16226_v7 = vld [vmem:[%s20885_s5 + $0x230] sm:$0xff]  }
 0x58e   : > { %v16227_v35 = vld [vmem:[%s20885_s5 + $0xb0] sm:$0xff]  }
 0x58f   : > { %v9244_v14 = vmax.f32 %v9234_v10, %v9239_v59  ;;  %v9240_v62 = vmax.f32 %v9210_v40, %v9230_v20  ;;  %v16213_v40 = vld [vmem:[%s20885_s5 + $0xd8] sm:$0xff]  }
 0x590   : > { %v15779_v1 = vpop.f32.mrb[200].mxu0  ;;  %v16229_v59 = vld [vmem:[%s20885_s5 + $0xf8] sm:$0xff]  }
 0x591   : > { %v9256_v30 = vadd.f32 %v20196_v58, %v9244_v14  ;;  %v9245_v52 = vmax.f32 %v9235_v17, %v9240_v62  ;;  %v9223_v51 = vrot.slane %v15779_v1, 2  ;;  %v9140_v63 = vpop.f32.mrb[201].mxu0  ;;  %v16230_v14 = vld [vmem:[%s20885_s5 + $0x238] sm:$0xff]  }
 0x592   : > { %v9221_v42 = vrot.slane %v9140_v63, 2  ;;  %v15780_v48 = vpop.f32.mrb[202].mxu0  ;;  %v16231_v62 = vld [vmem:[%s20885_s5 + $0xb8] sm:$0xff]   ;;  %v16234_v63 = vld [vmem:[%s20885_s5 + $0x300] sm:$0xff]  }
 0x593   : > { %vm9261_vm3 = vcmp.gt.f32.partialorder %v9256_v30, 1.0  ;;  %v9233_v50 = vadd.f32 %v9223_v51, %v20149_v9  ;;  %v9143_v23 = vpop.f32.mrb[203].mxu0  ;;  %v9257_v26 = vadd.f32 %v20196_v58, %v9245_v52  ;;  %v16232_v30 = vld [vmem:[%s20885_s5 + $0x340] sm:$0xff]  }
 0x594   : > { %v9231_v41 = vadd.f32 %v9221_v42, %v20152_v2  ;;  %v9222_v44 = vrot.slane %v9143_v23, 2  ;;  %v13201_v10 = vsel %vm9261_vm3, 1.0, %v16465_v21  ;;  %vm13406_vm11 = vmpackc.low %vm9261_vm3, %vm9261_vm3  ;;  %v16233_v52 = vld [vmem:[%s20885_s5 + $0x1c0] sm:$0xff]  }
 0x595   : > { %v9243_v61 = vmax.f32 %v9213_v15, %v9233_v50  ;;  %vm9262_vm5 = vcmp.gt.f32.partialorder %v9257_v26, 1.0  ;;  %v20204_v17 = vpack.c.bf16 %v13201_v10, %v13201_v10  ;;  %v16218_v15 = vld [vmem:[%s20885_s5 + $0x220] sm:$0xff]   ;;  %v16236_v26 = vld [vmem:[%s20885_s5 + $0x348] sm:$0xff]  }
 0x596   : > { %v9241_v36 = vmax.f32 %v9211_v31, %v9231_v41  ;;  %v9232_v33 = vadd.f32 %v9222_v44, %v20154_v18  ;;  %v13202_v60 = vsel %vm9262_vm5, 1.0, %v16465_v21  ;;  %vm13408_vm9 = vmpackc.low %vm9262_vm5, %vm9262_vm5  ;;  %v16220_v31 = vld [vmem:[%s20885_s5 + $0x268] sm:$0xff]   ;;  %v16235_v50 = vld [vmem:[%s20885_s5 + $0x180] sm:$0xff]  }
 0x597   : > { %v9248_v9 = vmax.f32 %v9238_v37, %v9243_v61  ;;  %v20208_v47 = vpack.c.bf16 %v13202_v60, %v13202_v60  ;;  %13409 = vmatprep.mubr.msk.bf16.mxu0 %vm13408_vm9, %v21050_v56  ;;  %v9282_v2 = vshrl.u32 %v20204_v17, 16  ;;  %v9290_v28 = vrot.slane %v20204_v17, 2  ;;  %v16237_v41 = vld [vmem:[%s20885_s5 + $0x1c8] sm:$0xff]   ;;  %v16243_v60 = vld [vmem:[%s20885_s5 + $0x190] sm:$0xff]  }
 0x598   : > { %v9246_v6 = vmax.f32 %v9236_v24, %v9241_v36  ;;  %v9242_v18 = vmax.f32 %v9212_v25, %v9232_v33  ;;  %v16205_v24 = vld [vmem:[%s20885_s5 + $0xc8] sm:$0xff]   ;;  %v9286_v48 = vrot.slane %v20204_v17, 1  ;;  %v16240_v17 = vld [vmem:[%s20885_s5 + $0x350] sm:$0xff]  }
 0x599   : > { %v20222_v11 = vadd.f32 %v20196_v58, %v9248_v9  ;;  %10995 = vmatprep.mubr.bf16.mxu1 %v9282_v2  ;;  %v9288_v37 = vrot.slane %v9282_v2, 1  ;;  %v9301_v5 = vrot.slane %v20208_v47, 2  ;;  %11076 = vmatmul.mubr.bf16.vlgmr.msra.gmra.mrb[204].mxu0 %v9290_v28  ;;  %v16222_v25 = vld [vmem:[%s20885_s5 + $0x228] sm:$0xff]   ;;  %v9293_v1 = vshrl.u32 %v20208_v47, 16  ;;  %v16241_v36 = vld [vmem:[%s20885_s5 + $0x1d0] sm:$0xff]   ;;  %v16244_v9 = vld [vmem:[%s20885_s5 + $0x358] sm:$0xff]  }
 0x59a   : > { %v20234_v53 = vmax.f32 %v9237_v19, %v9242_v18  ;;  %13407 = vmatmul.mubr.msk.bf16.vlgmr.msra.gmra.mrb[192].mxu1 %vm13406_vm11, %v21050_v56  ;;  %14205 = vmatpush3.bf16.msra.mxu0 %v16202_v32  ;;  %v16210_v19 = vld [vmem:[%s20885_s5 + $0x210] sm:$0xff]   ;;  %v20274_v46 = vadd.f32 %v20196_v58, %v9246_v6  ;;  %v9297_v44 = vrot.slane %v20208_v47, 1  ;;  %v16238_v10 = vld [vmem:[%s20885_s5 + $0x308] sm:$0xff]   ;;  %v16245_v2 = vld [vmem:[%s20885_s5 + $0x1d8] sm:$0xff]  }
 0x59b   : > { %14139 = vmatpush3.bf16.msra.mxu1 %v16203_v3  ;;  %11035 = vmatprep.mubr.bf16.mxu1 %v9288_v37  ;;  %v9299_v42 = vrot.slane %v9293_v1, 1  ;;  %v16239_v61 = vld [vmem:[%s20885_s5 + $0x188] sm:$0xff]   ;;  %v16242_v33 = vld [vmem:[%s20885_s5 + $0x310] sm:$0xff]   ;;  %v16246_v32 = vld [vmem:[%s20885_s5 + $0x318] sm:$0xff]   ;;  %vm9265_vm7 = vcmp.gt.f32.partialorder %v20222_v11, 1.0 }
 0x59c   : > { %11155 = vmatprep.mubr.bf16.mxu0 %v9301_v5  ;;  %14206 = vmatprep.subr.bf16.mxu0 %v16204_v29  ;;  %vm9263_vm15 = vcmp.gt.f32.partialorder %v20274_v46, 1.0  ;;  %v20379_v3 = vadd.f32 %v20196_v58, %v20234_v53  ;;  %v16247_v6 = vld [vmem:[%s20885_s5 + $0x198] sm:$0xff]   ;;  %v16248_v18 = vld [vmem:[%s20885_s5 + $0x360] sm:$0xff]   ;;  %v16252_v5 = vld [vmem:[%s20885_s5 + $0x368] sm:$0xff]  }
 0x59d   : > { %14140 = vmatprep.subr.bf16.mxu1 %v16205_v24  ;;  %v13203_v22 = vsel %vm9263_vm15, 1.0, %v16465_v21  ;;  %v16249_v28 = vld [vmem:[%s20885_s5 + $0x1e0] sm:$0xff]   ;;  %v16253_v29 = vld [vmem:[%s20885_s5 + $0x1e8] sm:$0xff]   ;;  %v16273_v47 = vld [vmem:[%s20885_s5 + $0x2d0] sm:$0xff]  }
 0x59e   : > { %14207 = vmatpush3.bf16.msra.mxu0 %v16206_v8  ;;  %v20316_v20 = vpack.c.bf16 %v13203_v22, %v13203_v22  ;;  %v16250_v58 = vld [vmem:[%s20885_s5 + $0x320] sm:$0xff]   ;;  %vm9264_vm1 = vcmp.gt.f32.partialorder %v20379_v3, 1.0  ;;  %v16254_v53 = vld [vmem:[%s20885_s5 + $0x328] sm:$0xff]   ;;  %v16294_v11 = vld [vmem:[%s20885_s5 + $0x438] sm:$0xff]  }
 0x59f   : > { %14141 = vmatpush3.bf16.msra.mxu1 %v16207_v43  ;;  %14208 = vmatprep.subr.bf16.mxu0 %v16208_v39  ;;  %v16251_v37 = vld [vmem:[%s20885_s5 + $0x1a0] sm:$0xff]   ;;  %v13204_v24 = vsel %vm9264_vm1, 1.0, %v16465_v21  ;;  %v16255_v8 = vld [vmem:[%s20885_s5 + $0x1a8] sm:$0xff]   ;;  %v16256_v43 = vld [vmem:[%s20885_s5 + $0x370] sm:$0xff]  }
 0x5a0   : > { %14142 = vmatprep.subr.bf16.mxu1 %v16209_v34  ;;  %v9304_v51 = vshrl.u32 %v20316_v20, 16  ;;  %v16257_v39 = vld [vmem:[%s20885_s5 + $0x1f0] sm:$0xff]   ;;  %v20418_v34 = vpack.c.bf16 %v13204_v24, %v13204_v24  ;;  %v16270_v22 = vld [vmem:[%s20885_s5 + $0x408] sm:$0xff]   ;;  %vm13410_vm10 = vmpackc.low %vm9263_vm15, %vm9263_vm15 }
 0x5a1   : > { %vm13412_vm0 = vmpackc.low %vm9264_vm1, %vm9264_vm1  ;;  %v16303_v46 = vld [vmem:[%s20885_s5 + $0x388] sm:$0xff]   ;;  %v16304_v24 = vld [vmem:[%s20885_s5 + $0x550] sm:$0xff]  }
 0x5a2   : > { %14209 = vmatpush3.bf16.msra.mxu0 %v16210_v19  ;;  %v9310_v23 = vrot.slane %v9304_v51, 1  ;;  %v16258_v19 = vld [vmem:[%s20885_s5 + $0x330] sm:$0xff]  }
 0x5a3   : > { %14143 = vmatpush3.bf16.msra.mxu1 %v16211_v54  ;;  %14210 = vmatprep.subr.bf16.mxu0 %v16212_v4  ;;  %v16259_v54 = vld [vmem:[%s20885_s5 + $0x1b0] sm:$0xff]   ;;  %v16260_v4 = vld [vmem:[%s20885_s5 + $0x378] sm:$0xff]  }
 0x5a4   : > { %14144 = vmatprep.subr.bf16.mxu1 %v16213_v40  ;;  %v16261_v40 = vld [vmem:[%s20885_s5 + $0x1f8] sm:$0xff]   ;;  %v16306_v3 = vld [vmem:[%s20885_s5 + $0x510] sm:$0xff]  }
 0x5a6   : > { %14211 = vmatpush3.bf16.msra.mxu0 %v16214_v38  ;;  %v9315_v38 = vshll.u32 %v20418_v34, 16 }
 0x5a7   : > { %14145 = vmatpush3.bf16.msra.mxu1 %v16215_v45  ;;  %14212 = vmatprep.subr.bf16.mxu0 %v16216_v12  ;;  %v16262_v45 = vld [vmem:[%s20885_s5 + $0x338] sm:$0xff]  }
 0x5a8   : > { %14146 = vmatprep.subr.bf16.mxu1 %v16217_v16  ;;  %v16263_v12 = vld [vmem:[%s20885_s5 + $0x1b8] sm:$0xff]   ;;  %v16264_v16 = vld [vmem:[%s20885_s5 + $0x440] sm:$0xff]  }
 0x5aa   : > { %14213 = vmatpush3.bf16.msra.mxu0 %v16218_v15  ;;  %v16265_v15 = vld [vmem:[%s20885_s5 + $0x2c0] sm:$0xff]  }
 0x5ab   : > { %14147 = vmatpush3.bf16.msra.mxu1 %v16219_v57  ;;  %14214 = vmatprep.subr.bf16.mxu0 %v16220_v31  ;;  %v9317_v57 = vrot.slane %v9315_v38, 1  ;;  %v16266_v31 = vld [vmem:[%s20885_s5 + $0x400] sm:$0xff]  }
 0x5ac   : > { %14148 = vmatprep.subr.bf16.mxu1 %v16221_v55  ;;  %v9308_v55 = vrot.slane %v20316_v20, 1 }
 0x5ae   : > { %14215 = vmatpush3.bf16.msra.mxu0 %v16222_v25  ;;  %v16267_v25 = vld [vmem:[%s20885_s5 + $0x280] sm:$0xff]  }
 0x5af   : > { %14149 = vmatpush3.bf16.msra.mxu1 %v16223_v13  ;;  %14216 = vmatprep.subr.bf16.mxu0 %v16224_v49  ;;  %v16268_v13 = vld [vmem:[%s20885_s5 + $0x448] sm:$0xff]   ;;  %v9331_v49 = vshrl.u32 %v9317_v57, 16 }
 0x5b0   : > { %14150 = vmatprep.subr.bf16.mxu1 %v16225_v0  ;;  %v16269_v0 = vld [vmem:[%s20885_s5 + $0x2c8] sm:$0xff]  }
 0x5b1   : > { %v16319_v57 = vld [vmem:[%s20885_s5 + $0x3a8] sm:$0xff]  }
 0x5b2   : > { %14217 = vmatpush3.bf16.msra.mxu0 %v16226_v7  ;;  %v16271_v7 = vld [vmem:[%s20885_s5 + $0x288] sm:$0xff]  }
 0x5b3   : > { %14151 = vmatpush3.bf16.msra.mxu1 %v16227_v35  ;;  %14218 = vmatprep.subr.bf16.mxu0 %v16228_v27  ;;  %v16272_v35 = vld [vmem:[%s20885_s5 + $0x450] sm:$0xff]  }
 0x5b4   : > { %14152 = vmatprep.subr.bf16.mxu1 %v16229_v59  ;;  %v16274_v27 = vld [vmem:[%s20885_s5 + $0x410] sm:$0xff]  }
 0x5b5   : > { %v16275_v59 = vld [vmem:[%s20885_s5 + $0x290] sm:$0xff]  }
 0x5b6   : > { %14219 = vmatpush3.bf16.msra.mxu0 %v16230_v14  ;;  %v16276_v14 = vld [vmem:[%s20885_s5 + $0x458] sm:$0xff]  }
 0x5b7   : > { %14153 = vmatpush3.bf16.msra.mxu1 %v16231_v62  ;;  %14248 = vmatprep.subr.bf16.mxu0 %v16232_v30  ;;  %v16277_v62 = vld [vmem:[%s20885_s5 + $0x2d8] sm:$0xff]  }
 0x5b8   : > { %14182 = vmatprep.subr.bf16.mxu1 %v16233_v52  ;;  %v16279_v30 = vld [vmem:[%s20885_s5 + $0x298] sm:$0xff]   ;;  %v16280_v52 = vld [vmem:[%s20885_s5 + $0x460] sm:$0xff]  }
 0x5b9   : > { %11156 = vmatmul.mubr.bf16.vlgmr.msra.gmra.mrb[208].mxu0 %v9299_v42  ;;  %v16283_v42 = vld [vmem:[%s20885_s5 + $0x2a0] sm:$0xff]  }
 0x5ba   : > { %11036 = vmatmul.mubr.bf16.vlgmr.msra.gmra.mrb[196].mxu1 %v9286_v48  ;;  %14249 = vmatpush3.bf16.msra.mxu0 %v16234_v63  ;;  %v16282_v63 = vld [vmem:[%s20885_s5 + $0x420] sm:$0xff]   ;;  %v16284_v48 = vld [vmem:[%s20885_s5 + $0x468] sm:$0xff]  }
 0x5bb   : > { %11235 = vmatprep.mubr.bf16.mxu0 %v9310_v23  ;;  %14183 = vmatpush3.bf16.msra.mxu1 %v16235_v50  ;;  %v16285_v50 = vld [vmem:[%s20885_s5 + $0x2e8] sm:$0xff]  }
 0x5bc   : > { %11115 = vmatprep.mubr.bf16.mxu1 %v9297_v44  ;;  %14250 = vmatprep.subr.bf16.mxu0 %v16236_v26  ;;  %v16286_v23 = vld [vmem:[%s20885_s5 + $0x428] sm:$0xff]   ;;  %v16289_v44 = vld [vmem:[%s20885_s5 + $0x2f0] sm:$0xff]  }
 0x5bd   : > { %14184 = vmatprep.subr.bf16.mxu1 %v16237_v41  ;;  %v16287_v26 = vld [vmem:[%s20885_s5 + $0x2a8] sm:$0xff]   ;;  %v16288_v41 = vld [vmem:[%s20885_s5 + $0x470] sm:$0xff]  }
 0x5be   : > { %14251 = vmatpush3.bf16.msra.mxu0 %v16238_v10  ;;  %v16290_v10 = vld [vmem:[%s20885_s5 + $0x430] sm:$0xff]  }
 0x5bf   : > { %14185 = vmatpush3.bf16.msra.mxu1 %v16239_v61  ;;  %14252 = vmatprep.subr.bf16.mxu0 %v16240_v17  ;;  %v16291_v61 = vld [vmem:[%s20885_s5 + $0x2b0] sm:$0xff]   ;;  %v16292_v17 = vld [vmem:[%s20885_s5 + $0x478] sm:$0xff]  }
 0x5c0   : > { %14186 = vmatprep.subr.bf16.mxu1 %v16241_v36  ;;  %v16293_v36 = vld [vmem:[%s20885_s5 + $0x2f8] sm:$0xff]  }
 0x5c2   : > { %14253 = vmatpush3.bf16.msra.mxu0 %v16242_v33  ;;  %v13205_v33 = vsel %vm9265_vm7, 1.0, %v16465_v21 }
 0x5c3   : > { %14187 = vmatpush3.bf16.msra.mxu1 %v16243_v60  ;;  %14254 = vmatprep.subr.bf16.mxu0 %v16244_v9  ;;  %v16295_v60 = vld [vmem:[%s20885_s5 + $0x2b8] sm:$0xff]   ;;  %v16296_v9 = vld [vmem:[%s20885_s5 + $0x540] sm:$0xff]  }
 0x5c4   : > { %14188 = vmatprep.subr.bf16.mxu1 %v16245_v2  ;;  %v16297_v2 = vld [vmem:[%s20885_s5 + $0x3c0] sm:$0xff]  }
 0x5c6   : > { %14255 = vmatpush3.bf16.msra.mxu0 %v16246_v32  ;;  %v20550_v32 = vpack.c.bf16 %v13205_v33, %v13205_v33  ;;  %v16348_v33 = vld [vmem:[%s20885_s5 + $0x4b0] sm:$0xff]  }
 0x5c7   : > { %14189 = vmatpush3.bf16.msra.mxu1 %v16247_v6  ;;  %14256 = vmatprep.subr.bf16.mxu0 %v16248_v18  ;;  %v16298_v6 = vld [vmem:[%s20885_s5 + $0x500] sm:$0xff]   ;;  %v9328_v18 = vshrl.u32 %v20418_v34, 16 }
 0x5c8   : > { %14190 = vmatprep.subr.bf16.mxu1 %v16249_v28  ;;  %v16299_v28 = vld [vmem:[%s20885_s5 + $0x380] sm:$0xff]  }
 0x5ca   : > { %14257 = vmatpush3.bf16.msra.mxu0 %v16250_v58  ;;  %v16300_v58 = vld [vmem:[%s20885_s5 + $0x548] sm:$0xff]  }
 0x5cb   : > { %14191 = vmatpush3.bf16.msra.mxu1 %v16251_v37  ;;  %14258 = vmatprep.subr.bf16.mxu0 %v16252_v5  ;;  %v9342_v37 = vshrl.u32 %v20550_v32, 16  ;;  %v16301_v5 = vld [vmem:[%s20885_s5 + $0x3c8] sm:$0xff]  }
 0x5cc   : > { %14192 = vmatprep.subr.bf16.mxu1 %v16253_v29  ;;  %v16302_v29 = vld [vmem:[%s20885_s5 + $0x508] sm:$0xff]  }
 0x5ce   : > { %14259 = vmatpush3.bf16.msra.mxu0 %v16254_v53  ;;  %v16305_v53 = vld [vmem:[%s20885_s5 + $0x3d0] sm:$0xff]  }
 0x5cf   : > { %14193 = vmatpush3.bf16.msra.mxu1 %v16255_v8  ;;  %14260 = vmatprep.subr.bf16.mxu0 %v16256_v43  ;;  %v16307_v8 = vld [vmem:[%s20885_s5 + $0x390] sm:$0xff]   ;;  %v16309_v43 = vld [vmem:[%s20885_s5 + $0x3d8] sm:$0xff]  }
 0x5d0   : > { %14194 = vmatprep.subr.bf16.mxu1 %v16257_v39  ;;  %v16310_v39 = vld [vmem:[%s20885_s5 + $0x518] sm:$0xff]  }
 0x5d2   : > { %14261 = vmatpush3.bf16.msra.mxu0 %v16258_v19  ;;  %v16311_v19 = vld [vmem:[%s20885_s5 + $0x398] sm:$0xff]  }
 0x5d3   : > { %14195 = vmatpush3.bf16.msra.mxu1 %v16259_v54  ;;  %14262 = vmatprep.subr.bf16.mxu0 %v16260_v4  ;;  %v16312_v54 = vld [vmem:[%s20885_s5 + $0x560] sm:$0xff]  }
 0x5d4   : > { %14196 = vmatprep.subr.bf16.mxu1 %v16261_v40  ;;  %v16313_v4 = vld [vmem:[%s20885_s5 + $0x3e0] sm:$0xff]  }
 0x5d5   : > { %v16314_v40 = vld [vmem:[%s20885_s5 + $0x520] sm:$0xff]  }
 0x5d6   : > { %14263 = vmatpush3.bf16.msra.mxu0 %v16262_v45  ;;  %v16315_v45 = vld [vmem:[%s20885_s5 + $0x3a0] sm:$0xff]  }
 0x5d7   : > { %14197 = vmatpush3.bf16.msra.mxu1 %v16263_v12  ;;  %14292 = vmatprep.subr.bf16.mxu0 %v16264_v16  ;;  %v16316_v12 = vld [vmem:[%s20885_s5 + $0x568] sm:$0xff]  }
 0x5d8   : > { %14226 = vmatprep.subr.bf16.mxu1 %v16265_v15  ;;  %v16317_v16 = vld [vmem:[%s20885_s5 + $0x3e8] sm:$0xff]  }
 0x5d9   : > { %11236 = vmatmul.mubr.bf16.vlgmr.msra.gmra.mrb[212].mxu0 %v9308_v55  ;;  %v16318_v15 = vld [vmem:[%s20885_s5 + $0x528] sm:$0xff]   ;;  %v16321_v55 = vld [vmem:[%s20885_s5 + $0x3f0] sm:$0xff]  }
 0x5da   : > { %11116 = vmatmul.mubr.bf16.vlgmr.msra.gmra.mrb[200].mxu1 %v9293_v1  ;;  %14293 = vmatpush3.bf16.msra.mxu0 %v16266_v31  ;;  %v16278_v1 = vld [vmem:[%s20885_s5 + $0x418] sm:$0xff]   ;;  %v16320_v31 = vld [vmem:[%s20885_s5 + $0x570] sm:$0xff]  }
 0x5db   : > { %11315 = vmatprep.mubr.bf16.mxu0 %v9331_v49  ;;  %14227 = vmatpush3.bf16.msra.mxu1 %v16267_v25  ;;  %v16322_v25 = vld [vmem:[%s20885_s5 + $0x530] sm:$0xff]   ;;  %v16324_v49 = vld [vmem:[%s20885_s5 + $0x578] sm:$0xff]  }
 0x5dc   : > { %11195 = vmatprep.mubr.bf16.mxu1 %v9304_v51  ;;  %14294 = vmatprep.subr.bf16.mxu0 %v16268_v13  ;;  %v16281_v51 = vld [vmem:[%s20885_s5 + $0x2e0] sm:$0xff]   ;;  %v16323_v13 = vld [vmem:[%s20885_s5 + $0x3b0] sm:$0xff]  }
 0x5dd   : > { %14228 = vmatprep.subr.bf16.mxu1 %v16269_v0  ;;  %v16325_v0 = vld [vmem:[%s20885_s5 + $0x3f8] sm:$0xff]  }
 0x5de   : > { %14295 = vmatpush3.bf16.msra.mxu0 %v16270_v22  ;;  %v16326_v22 = vld [vmem:[%s20885_s5 + $0x538] sm:$0xff]  }
 0x5df   : > { %14229 = vmatpush3.bf16.msra.mxu1 %v16271_v7  ;;  %14296 = vmatprep.subr.bf16.mxu0 %v16272_v35  ;;  %v20650_v7 = vshll.u32 %v20550_v32, 16  ;;  %v16327_v35 = vld [vmem:[%s20885_s5 + $0x3b8] sm:$0xff]  }
 0x5e0   : > { %14230 = vmatprep.subr.bf16.mxu1 %v16273_v47  ;;  %v16328_v47 = vld [vmem:[%s20885_s5 + $0x4c0] sm:$0xff]  }
 0x5e2   : > { %14297 = vmatpush3.bf16.msra.mxu0 %v16274_v27  ;;  %v9320_v27 = vrot.slane %v9315_v38, 2  ;;  %v16331_v38 = vld [vmem:[%s20885_s5 + $0x4c8] sm:$0xff]  }
 0x5e3   : > { %14231 = vmatpush3.bf16.msra.mxu1 %v16275_v59  ;;  %14298 = vmatprep.subr.bf16.mxu0 %v16276_v14  ;;  %v16329_v59 = vld [vmem:[%s20885_s5 + $0x600] sm:$0xff]   ;;  %v9340_v14 = vshrl.u32 %v20650_v7, 16 }
 0x5e4   : > { %14232 = vmatprep.subr.bf16.mxu1 %v16277_v62  ;;  %v16330_v62 = vld [vmem:[%s20885_s5 + $0x480] sm:$0xff]  }
 0x5e6   : > { %14299 = vmatpush3.bf16.msra.mxu0 %v16278_v1  ;;  %v9312_v1 = vrot.slane %v20316_v20, 2  ;;  %v16334_v20 = vld [vmem:[%s20885_s5 + $0x4d0] sm:$0xff]  }
 0x5e7   : > { %14233 = vmatpush3.bf16.msra.mxu1 %v16279_v30  ;;  %14300 = vmatprep.subr.bf16.mxu0 %v16280_v52  ;;  %v9337_v30 = vshrl.u32 %v9320_v27, 16  ;;  %v16332_v52 = vld [vmem:[%s20885_s5 + $0x608] sm:$0xff]  }
 0x5e8   : > { %14234 = vmatprep.subr.bf16.mxu1 %v16281_v51  ;;  %v16333_v51 = vld [vmem:[%s20885_s5 + $0x488] sm:$0xff]  }
 0x5ea   : > { %14301 = vmatpush3.bf16.msra.mxu0 %v16282_v63  ;;  %v16335_v63 = vld [vmem:[%s20885_s5 + $0x610] sm:$0xff]  }
 0x5eb   : > { %14235 = vmatpush3.bf16.msra.mxu1 %v16283_v42  ;;  %14302 = vmatprep.subr.bf16.mxu0 %v16284_v48  ;;  %v16336_v42 = vld [vmem:[%s20885_s5 + $0x490] sm:$0xff]   ;;  %v16337_v48 = vld [vmem:[%s20885_s5 + $0x4d8] sm:$0xff]  }
 0x5ec   : > { %14236 = vmatprep.subr.bf16.mxu1 %v16285_v50  ;;  %v16338_v50 = vld [vmem:[%s20885_s5 + $0x618] sm:$0xff]  }
 0x5ee   : > { %14303 = vmatpush3.bf16.msra.mxu0 %v16286_v23  ;;  %v16339_v23 = vld [vmem:[%s20885_s5 + $0x498] sm:$0xff]  }
 0x5ef   : > { %14237 = vmatpush3.bf16.msra.mxu1 %v16287_v26  ;;  %14304 = vmatprep.subr.bf16.mxu0 %v16288_v41  ;;  %v16340_v26 = vld [vmem:[%s20885_s5 + $0x4e0] sm:$0xff]  }
 0x5f0   : > { %14238 = vmatprep.subr.bf16.mxu1 %v16289_v44  ;;  %v16341_v41 = vld [vmem:[%s20885_s5 + $0x620] sm:$0xff]  }
 0x5f1   : > { %v16342_v44 = vld [vmem:[%s20885_s5 + $0x4a0] sm:$0xff]  }
 0x5f2   : > { %14305 = vmatpush3.bf16.msra.mxu0 %v16290_v10  ;;  %v16343_v10 = vld [vmem:[%s20885_s5 + $0x4e8] sm:$0xff]  }
 0x5f3   : > { %14239 = vmatpush3.bf16.msra.mxu1 %v16291_v61  ;;  %14306 = vmatprep.subr.bf16.mxu0 %v16292_v17  ;;  %v16344_v61 = vld [vmem:[%s20885_s5 + $0x628] sm:$0xff]  }
 0x5f4   : > { %14240 = vmatprep.subr.bf16.mxu1 %v16293_v36  ;;  %v16345_v17 = vld [vmem:[%s20885_s5 + $0x4a8] sm:$0xff]   ;;  %v16346_v36 = vld [vmem:[%s20885_s5 + $0x4f0] sm:$0xff]  }
 0x5f6   : > { %14307 = vmatpush3.bf16.msra.mxu0 %v16294_v11  ;;  %v16347_v11 = vld [vmem:[%s20885_s5 + $0x630] sm:$0xff]  }
 0x5f7   : > { %14241 = vmatpush3.bf16.msra.mxu1 %v16295_v60  ;;  %14336 = vmatprep.subr.bf16.mxu0 %v16296_v9  ;;  %v16349_v60 = vld [vmem:[%s20885_s5 + $0x4f8] sm:$0xff]  }
 0x5f8   : > { %14270 = vmatprep.subr.bf16.mxu1 %v16297_v2  ;;  %v16350_v9 = vld [vmem:[%s20885_s5 + $0x638] sm:$0xff]   ;;  %v9327_v2 = vrot.slane %v20650_v7, 2 }
 0x5f9   : > { %11316 = vmatmul.mubr.bf16.vlgmr.msra.gmra.mrb[216].mxu0 %v9328_v18  ;;  %v9319_v18 = vrot.slane %v20418_v34, 1  ;;  %v16354_v34 = vld [vmem:[%s20885_s5 + $0x5c8] sm:$0xff]  }
 0x5fa   : > { %13411 = vmatmul.mubr.msk.bf16.vlgmr.msra.gmra.mrb[204].mxu1 %vm13410_vm10, %v21050_v56  ;;  %14337 = vmatpush3.bf16.msra.mxu0 %v16298_v6  ;;  %v16351_v6 = vld [vmem:[%s20885_s5 + $0x4b8] sm:$0xff]  }
 0x5fb   : > { %11395 = vmatprep.mubr.bf16.mxu0 %v9342_v37  ;;  %14271 = vmatpush3.bf16.msra.mxu1 %v16299_v28  ;;  %v16352_v28 = vld [vmem:[%s20885_s5 + $0x5c0] sm:$0xff]   ;;  %v9351_v37 = vshrl.u32 %v9327_v2, 16 }
 0x5fc   : > { %13413 = vmatprep.mubr.msk.bf16.mxu1 %vm13412_vm0, %v21050_v56  ;;  %14338 = vmatprep.subr.bf16.mxu0 %v16300_v58  ;;  %v16308_v56 = vld [vmem:[%s20885_s5 + $0x558] sm:$0xff]   ;;  %v9326_v58 = vrot.slane %v20550_v32, 1  ;;  %v16355_v32 = vld [vmem:[%s20885_s5 + $0x588] sm:$0xff]  }
 0x5fd   : > { %14272 = vmatprep.subr.bf16.mxu1 %v16301_v5  ;;  %v16353_v5 = vld [vmem:[%s20885_s5 + $0x580] sm:$0xff]  }
 0x5fe   : > { %14339 = vmatpush3.bf16.msra.mxu0 %v16302_v29  ;;  %v9334_v29 = vshrl.u32 %v9319_v18, 16 }
 0x5ff   : > { %14273 = vmatpush3.bf16.msra.mxu1 %v16303_v46  ;;  %14340 = vmatprep.subr.bf16.mxu0 %v16304_v24  ;;  %v9348_v46 = vshrl.u32 %v9326_v58, 16  ;;  %v16356_v24 = vld [vmem:[%s20885_s5 + $0x5d0] sm:$0xff]  }
 0x600   : > { %14274 = vmatprep.subr.bf16.mxu1 %v16305_v53  ;;  %v16357_v53 = vld [vmem:[%s20885_s5 + $0x590] sm:$0xff]  }
 0x602   : > { %14341 = vmatpush3.bf16.msra.mxu0 %v16306_v3  ;;  %v16358_v3 = vld [vmem:[%s20885_s5 + $0x5d8] sm:$0xff]  }
 0x603   : > { %14275 = vmatpush3.bf16.msra.mxu1 %v16307_v8  ;;  %14342 = vmatprep.subr.bf16.mxu0 %v16308_v56  ;;  %v16359_v8 = vld [vmem:[%s20885_s5 + $0x598] sm:$0xff]   ;;  %v16360_v56 = vld [vmem:[%s20885_s5 + $0x5e0] sm:$0xff]  }
 0x604   : > { %14276 = vmatprep.subr.bf16.mxu1 %v16309_v43  ;;  %v16361_v43 = vld [vmem:[%s20885_s5 + $0x5a0] sm:$0xff]  }
 0x606   : > { %14343 = vmatpush3.bf16.msra.mxu0 %v16310_v39  ;;  %v16362_v39 = vld [vmem:[%s20885_s5 + $0x5e8] sm:$0xff]  }
 0x607   : > { %14277 = vmatpush3.bf16.msra.mxu1 %v16311_v19  ;;  %14344 = vmatprep.subr.bf16.mxu0 %v16312_v54  ;;  %v16363_v19 = vld [vmem:[%s20885_s5 + $0x5a8] sm:$0xff]   ;;  %v16364_v54 = vld [vmem:[%s20885_s5 + $0x5f0] sm:$0xff]  }
 0x608   : > { %14278 = vmatprep.subr.bf16.mxu1 %v16313_v4  ;;  %v16365_v4 = vld [vmem:[%s20885_s5 + $0x5b0] sm:$0xff]  }
 0x60a   : > { %14345 = vmatpush3.bf16.msra.mxu0 %v16314_v40  ;;  %v16366_v40 = vld [vmem:[%s20885_s5 + $0x5f8] sm:$0xff]  }
 0x60b   : > { %14279 = vmatpush3.bf16.msra.mxu1 %v16315_v45  ;;  %14346 = vmatprep.subr.bf16.mxu0 %v16316_v12  ;;  %v16367_v45 = vld [vmem:[%s20885_s5 + $0x5b8] sm:$0xff]   ;;  %v9324_v12 = vrot.slane %v20650_v7, 1 }
 0x60c   : > { %14280 = vmatprep.subr.bf16.mxu1 %v16317_v16 }
 0x60d   : > { %v9345_v16 = vshrl.u32 %v9324_v12, 16 }
 0x60e   : > { %14347 = vmatpush3.bf16.msra.mxu0 %v16318_v15 }
 0x60f   : > { %14281 = vmatpush3.bf16.msra.mxu1 %v16319_v57  ;;  %14348 = vmatprep.subr.bf16.mxu0 %v16320_v31 }
 0x610   : > { %14282 = vmatprep.subr.bf16.mxu1 %v16321_v55 }
 0x612   : > { %14349 = vmatpush3.bf16.msra.mxu0 %v16322_v25 }
 0x613   : > { %14283 = vmatpush3.bf16.msra.mxu1 %v16323_v13  ;;  %14350 = vmatprep.subr.bf16.mxu0 %v16324_v49 }
 0x614   : > { %14284 = vmatprep.subr.bf16.mxu1 %v16325_v0 }
 0x616   : > { %14351 = vmatpush3.bf16.msra.mxu0 %v16326_v22 }
 0x617   : > { %14285 = vmatpush3.bf16.msra.mxu1 %v16327_v35  ;;  %15781 = vmatprep.subr.bf16.mxu0 %v16465_v21 }
 0x618   : > { %14314 = vmatprep.subr.bf16.mxu1 %v16328_v47  ;;  %v9762_v47 = vld [vmem:[%s20886_s6] sm:$0x1] }
 0x619   : > { %11396 = vmatmul.mubr.bf16.vlgmr.msra.gmra.mrb[220].mxu0 %v9340_v14 }
 0x61a   : > { %11276 = vmatmul.mubr.bf16.vlgmr.msra.gmra.mrb[208].mxu1 %v9312_v1  ;;  %15782 = vmatpush3.bf16.msra.mxu0 %v16329_v59 }
 0x61b   : > { %14315 = vmatpush3.bf16.msra.mxu1 %v16330_v62  ;;  %11355 = vmatprep.mubr.bf16.mxu1 %v9337_v30 }
 0x61c   : > { %15783 = vmatprep.subr.bf16.mxu0 %v16465_v21  ;;  %14316 = vmatprep.subr.bf16.mxu1 %v16331_v38 }
 0x61d   : > { %15797 = vmatprep.mubr.msk.bf16.mxu0 %vm16466_vm4, %v16465_v21 }
 0x61e   : > { %15784 = vmatpush3.bf16.msra.mxu0 %v16332_v52 }
 0x61f   : > { %14317 = vmatpush3.bf16.msra.mxu1 %v16333_v51  ;;  %15785 = vmatprep.subr.bf16.mxu0 %v16465_v21 }
 0x620   : > { %14318 = vmatprep.subr.bf16.mxu1 %v16334_v20 }
 0x622   : > { %15786 = vmatpush3.bf16.msra.mxu0 %v16335_v63 }
 0x623   : > { %14319 = vmatpush3.bf16.msra.mxu1 %v16336_v42  ;;  %15787 = vmatprep.subr.bf16.mxu0 %v16465_v21 }
 0x624   : > { %14320 = vmatprep.subr.bf16.mxu1 %v16337_v48 }
 0x626   : > { %15788 = vmatpush3.bf16.msra.mxu0 %v16338_v50 }
 0x627   : > { %14321 = vmatpush3.bf16.msra.mxu1 %v16339_v23  ;;  %15789 = vmatprep.subr.bf16.mxu0 %v16465_v21 }
 0x628   : > { %14322 = vmatprep.subr.bf16.mxu1 %v16340_v26 }
 0x62a   : > { %15790 = vmatpush3.bf16.msra.mxu0 %v16341_v41 }
 0x62b   : > { %14323 = vmatpush3.bf16.msra.mxu1 %v16342_v44  ;;  %15791 = vmatprep.subr.bf16.mxu0 %v16465_v21 }
 0x62c   : > { %14324 = vmatprep.subr.bf16.mxu1 %v16343_v10 }
 0x62e   : > { %15792 = vmatpush3.bf16.msra.mxu0 %v16344_v61 }
 0x62f   : > { %14325 = vmatpush3.bf16.msra.mxu1 %v16345_v17  ;;  %15793 = vmatprep.subr.bf16.mxu0 %v16465_v21 }
 0x630   : > { %14326 = vmatprep.subr.bf16.mxu1 %v16346_v36 }
 0x632   : > { %15794 = vmatpush3.bf16.msra.mxu0 %v16347_v11 }
 0x633   : > { %14327 = vmatpush3.bf16.msra.mxu1 %v16348_v33  ;;  %15795 = vmatprep.subr.bf16.mxu0 %v16465_v21 }
 0x634   : > { %14328 = vmatprep.subr.bf16.mxu1 %v16349_v60 }
 0x636   : > { %15796 = vmatpush3.bf16.msra.mxu0 %v16350_v9 }
 0x637   : > { %14329 = vmatpush3.bf16.msra.mxu1 %v16351_v6 }
 0x638   : > { %14358 = vmatprep.subr.bf16.mxu1 %v16352_v28 }
 0x639   : > { %15798 = vmatmul.mubr.bf16.vlgmr.msra.gmra.mrb[224].mxu0 %v9351_v37 }
 0x63a   : > { %11356 = vmatmul.mubr.bf16.vlgmr.msra.gmra.mrb[212].mxu1 %v9334_v29 }
 0x63b   : > { %14359 = vmatpush3.bf16.msra.mxu1 %v16353_v5  ;;  %11435 = vmatprep.mubr.bf16.mxu1 %v9348_v46 }
 0x63c   : > { %14360 = vmatprep.subr.bf16.mxu1 %v16354_v34 }
 0x63f   : > { %14361 = vmatpush3.bf16.msra.mxu1 %v16355_v32 }
 0x640   : > { %14362 = vmatprep.subr.bf16.mxu1 %v16356_v24 }
 0x643   : > { %14363 = vmatpush3.bf16.msra.mxu1 %v16357_v53 }
 0x644   : > { %14364 = vmatprep.subr.bf16.mxu1 %v16358_v3 }
 0x647   : > { %14365 = vmatpush3.bf16.msra.mxu1 %v16359_v8 }
 0x648   : > { %14366 = vmatprep.subr.bf16.mxu1 %v16360_v56 }
 0x64b   : > { %14367 = vmatpush3.bf16.msra.mxu1 %v16361_v43 }
 0x64c   : > { %14368 = vmatprep.subr.bf16.mxu1 %v16362_v39 }
 0x64f   : > { %14369 = vmatpush3.bf16.msra.mxu1 %v16363_v19 }
 0x650   : > { %14370 = vmatprep.subr.bf16.mxu1 %v16364_v54 }
 0x653   : > { %14371 = vmatpush3.bf16.msra.mxu1 %v16365_v4 }
 0x654   : > { %14372 = vmatprep.subr.bf16.mxu1 %v16366_v40 }
 0x657   : > { %14373 = vmatpush3.bf16.msra.mxu1 %v16367_v45 }
 0x65a   : > { %11436 = vmatmul.mubr.bf16.vlgmr.msra.gmra.mrb[216].mxu1 %v9345_v16 }
 0x66c   : > { %v14176_v15 = vpop.f32.mrb[204].mxu0 }
 0x66d   : > { %v14132_v57 = vpop.f32.mrb[192].mxu1  ;;  %v14177_v31 = vpop.f32.mrb[205].mxu0 }
 0x66e   : > { %v14133_v55 = vpop.f32.mrb[193].mxu1  ;;  %v14178_v25 = vadd.f32 %v14177_v31, %v14176_v15  ;;  %v14179_v49 = vpop.f32.mrb[206].mxu0 }
 0x66f   : > { %v14134_v13 = vadd.f32 %v14133_v55, %v14132_v57  ;;  %v14135_v0 = vpop.f32.mrb[194].mxu1  ;;  %v14180_v22 = vpop.f32.mrb[207].mxu0 }
 0x670   : > { %v14136_v35 = vpop.f32.mrb[195].mxu1 }
 0x671   : > { %v10998_v62 = vadd.f32 %v14134_v13, %v9762_v47 }
 0x68c   : > { %v14220_v27 = vpop.f32.mrb[208].mxu0 }
 0x68d   : > { %v14154_v7 = vpop.f32.mrb[196].mxu1  ;;  %v14221_v59 = vpop.f32.mrb[209].mxu0 }
 0x68e   : > { %v14155_v14 = vpop.f32.mrb[197].mxu1  ;;  %v14222_v1 = vadd.f32 %v14221_v59, %v14220_v27  ;;  %v14223_v30 = vpop.f32.mrb[210].mxu0 }
 0x68f   : > { %v14156_v38 = vadd.f32 %v14155_v14, %v14154_v7  ;;  %v14157_v52 = vpop.f32.mrb[198].mxu1  ;;  %v14224_v51 = vpop.f32.mrb[211].mxu0 }
 0x690   : > { %v14158_v20 = vpop.f32.mrb[199].mxu1 }
 0x691   : > { %v11038_v63 = vadd.f32 %v14156_v38, %v10998_v62 }
 0x693   : > { %v11078_v42 = vadd.f32 %v14178_v25, %v11038_v63 }
 0x6ac   : > { %v14264_v48 = vpop.f32.mrb[212].mxu0 }
 0x6ad   : > { %v14198_v50 = vpop.f32.mrb[200].mxu1  ;;  %v14265_v23 = vpop.f32.mrb[213].mxu0 }
 0x6ae   : > { %v14266_v26 = vadd.f32 %v14265_v23, %v14264_v48  ;;  %v14199_v41 = vpop.f32.mrb[201].mxu1  ;;  %v14267_v44 = vpop.f32.mrb[214].mxu0 }
 0x6af   : > { %v14200_v10 = vadd.f32 %v14199_v41, %v14198_v50  ;;  %v14201_v61 = vpop.f32.mrb[202].mxu1  ;;  %v14268_v17 = vpop.f32.mrb[215].mxu0 }
 0x6b0   : > { %v14202_v36 = vpop.f32.mrb[203].mxu1 }
 0x6b1   : > { %v11118_v11 = vadd.f32 %v14200_v10, %v11078_v42 }
 0x6b3   : > { %v11158_v33 = vadd.f32 %v14222_v1, %v11118_v11 }
 0x6cc   : > { %v14308_v60 = vpop.f32.mrb[216].mxu0 }
 0x6cd   : > { %v14242_v9 = vpop.f32.mrb[204].mxu1  ;;  %v14309_v2 = vpop.f32.mrb[217].mxu0 }
 0x6ce   : > { %v14310_v6 = vadd.f32 %v14309_v2, %v14308_v60  ;;  %v14243_v18 = vpop.f32.mrb[205].mxu1  ;;  %v14311_v28 = vpop.f32.mrb[218].mxu0 }
 0x6cf   : > { %v14244_v58 = vadd.f32 %v14243_v18, %v14242_v9  ;;  %v14245_v37 = vpop.f32.mrb[206].mxu1  ;;  %v14312_v5 = vpop.f32.mrb[219].mxu0 }
 0x6d0   : > { %v14246_v29 = vpop.f32.mrb[207].mxu1 }
 0x6d1   : > { %v11198_v34 = vadd.f32 %v14244_v58, %v11158_v33 }
 0x6d3   : > { %v11238_v46 = vadd.f32 %v14266_v26, %v11198_v34 }
 0x6ec   : > { %v14352_v32 = vpop.f32.mrb[220].mxu0 }
 0x6ed   : > { %v14286_v24 = vpop.f32.mrb[208].mxu1  ;;  %v14353_v53 = vpop.f32.mrb[221].mxu0 }
 0x6ee   : > { %v14354_v3 = vadd.f32 %v14353_v53, %v14352_v32  ;;  %v14287_v8 = vpop.f32.mrb[209].mxu1  ;;  %v14355_v56 = vpop.f32.mrb[222].mxu0 }
 0x6ef   : > { %v14288_v43 = vadd.f32 %v14287_v8, %v14286_v24  ;;  %v14289_v39 = vpop.f32.mrb[210].mxu1  ;;  %v14356_v19 = vpop.f32.mrb[223].mxu0 }
 0x6f0   : > { %v14290_v54 = vpop.f32.mrb[211].mxu1 }
 0x6f1   : > { %v11278_v4 = vadd.f32 %v14288_v43, %v11238_v46 }
 0x6f3   : > { %v11318_v40 = vadd.f32 %v14310_v6, %v11278_v4 }
 0x70c   : > { %v11477_v45 = vpop.f32.mrb[224].mxu0 }
 0x70d   : > { %v14330_v12 = vpop.f32.mrb[212].mxu1  ;;  %v15799_v16 = vpop.f32.mrb[225].mxu0 }
 0x70e   : > { %v14331_v15 = vpop.f32.mrb[213].mxu1  ;;  %v11480_v57 = vpop.f32.mrb[226].mxu0 }
 0x70f   : > { %v14332_v31 = vadd.f32 %v14331_v15, %v14330_v12  ;;  %v14333_v55 = vpop.f32.mrb[214].mxu1  ;;  %v15800_v25 = vpop.f32.mrb[227].mxu0 }
 0x710   : > { %v14334_v13 = vpop.f32.mrb[215].mxu1 }
 0x711   : > { %v11358_v49 = vadd.f32 %v14332_v31, %v11318_v40 }
 0x713   : > { %v11398_v0 = vadd.f32 %v14354_v3, %v11358_v49 }
 0x72d   : > { %v14374_v22 = vpop.f32.mrb[216].mxu1 }
 0x72e   : > { %v14375_v35 = vpop.f32.mrb[217].mxu1 }
 0x72f   : > { %v14376_v47 = vadd.f32 %v14375_v35, %v14374_v22  ;;  %v14377_v27 = vpop.f32.mrb[218].mxu1 }
 0x730   : > { %v14378_v7 = vpop.f32.mrb[219].mxu1 }
 0x731   : > { %v11438_v59 = vadd.f32 %v14376_v47, %v11398_v0 }
 0x733   : > { %v11478_v14 = vadd.f32 %v11477_v45, %v11438_v59 }
 0x735   : > { %vm11484_vm14 = vcmp.gt.f32.partialorder %v11478_v14, 1.0  ;;  %11483 = vst [vmem:[%s862_s22] sm:$0x1] %v11478_v14 }
 0x736   : > { %v13414_v62 = vsel %vm11484_vm14, 1.0, %v16465_v21 }
 0x737   : > { %16381 = shalt.err (!%p16378_p5)
}
 0x738   : > { %s16382_s20 = scalar_lea.hbm %s20804_s13, 16  ;;  %s16386_s17 = scalar_lea.hbm %s20888_s8, 32 }
 0x739   : > { %p16383_p7 = scmp.ne.s32.totalorder %s20804_s13, %s16382_s20  ;;  %p16387_p12 = scmp.lt.u32.totalorder %s20804_s13, %s20888_s8 }
 0x73a   : > { %p16388_p13 = scmp.lt.u32.totalorder %s16386_s17, %s16382_s20  ;;  %p16390_p1 = scmp.lt.u32.totalorder %s16382_s20, %s20804_s13 }
 0x73b   : > { %p16384_p10 = pnand %p16383_p7, %p16552_p6 }
 0x73c   : > { %p16389_p0 = por %p16388_p13, %p16387_p12 }
 0x73d   : > { %p16385_p11 = pneg %p16384_p10 }
 0x73e   : > { %p16391_p2 = por %p16390_p1, %p16389_p0 }
 0x740   : > { %p16392_p3 = pnand %p16391_p2, %p16385_p11 }
 0x742   : > { %16395 = shalt.err (!%p16392_p3)
}
 0x743   : > { %15850 = dma.vmem_to_hbm [thread:$0]  (%p16552_p6), %s20806_s23, 16, %s20804_s13, %s11493_s21  }
 0x744   : > { %s21110_s24 = scalar_lea.vmem [#allocation3], %s16706_s26  ;;  %s11489_s19 = scalar_lea.sflag [#allocation4], %s16706_s26 }
 0x745   : > { %11487 = vst [vmem:[%s21110_s24] sm:$0x1] %v13414_v62  ;;  %s16396_s22 = scalar_lea.vmem %s20813_s25, 16  ;;  %s16468_s20 = smov [#allocation3]  }
 0x746   : > { %p16397_p4 = scmp.ne.s32.totalorder %s20813_s25, %s16396_s22  ;;  %s16400_s9 = sshll.u32 %s16468_s20, 4  ;;  %s16401_s9 = int_to_ptr.vmem [resolvable:$false] %s16400_s9 }
 0x747   : > { %s16402_s17 = scalar_lea.vmem %s16401_s9, 32  ;;  %p16403_p10 = scmp.lt.s32.totalorder %s20813_s25, %s16401_s9 }
 0x748   : > { %p16398_p5 = pnand %p16397_p4, %p16552_p6  ;;  %p16404_p11 = scmp.lt.s32.totalorder %s16402_s17, %s16396_s22 }
 0x74a   : > { %p16399_p7 = pneg %p16398_p5  ;;  %p16405_p12 = por %p16404_p11, %p16403_p10 }
 0x74c   : > { %p16406_p13 = pnand %p16405_p12, %p16399_p7 }
 0x74e   : > { %16409 = shalt.err (!%p16406_p13)
}
 0x74f   : > { %s16410_s26 = scalar_lea.hbm %s20811_s18, 16  ;;  %s16414_s21 = scalar_lea.hbm %s20887_s7, 32 }
 0x750   : > { %p16411_p0 = scmp.ne.s32.totalorder %s20811_s18, %s16410_s26  ;;  %p16415_p3 = scmp.lt.u32.totalorder %s20811_s18, %s20887_s7 }
 0x751   : > { %p16416_p4 = scmp.lt.u32.totalorder %s16414_s21, %s16410_s26  ;;  %p16418_p7 = scmp.lt.u32.totalorder %s16410_s26, %s20811_s18 }
 0x752   : > { %p16412_p1 = pnand %p16411_p0, %p16552_p6 }
 0x753   : > { %p16417_p5 = por %p16416_p4, %p16415_p3 }
 0x754   : > { %p16413_p2 = pneg %p16412_p1 }
 0x755   : > { %p16419_p10 = por %p16418_p7, %p16417_p5 }
 0x757   : > { %p16420_p11 = pnand %p16419_p10, %p16413_p2 }
 0x759   : > { %16423 = shalt.err (!%p16420_p11)
}
 0x75a   : > { %15849 = dma.vmem_to_hbm [thread:$0]  (%p16552_p6), %s20813_s25, 16, %s20811_s18, %s11489_s19  }
 0x75b PF: > { %s11530_s24 = sand.u32 1, %s16450_s27   ;;  %p15854_p12 = pnand %p11609_p9, %p16556_p8 }
 0x75c   : > { %s11531_s22 = scalar_lea.sflag [#allocation4], %s11530_s24 }
 0x75d   : > { %16441 = dma.done.wait (!%p15854_p12), %s11531_s22, 16  }
 0x75e   : > { %16443 = vsyncadd (!%p15854_p12), %s11531_s22, 4294967280  ;;  %s11539_s20 = scalar_lea.sflag [#allocation6], %s11530_s24 }
 0x75f   : > { %16445 = dma.done.wait (!%p15854_p12), %s11539_s20, 16  }
 0x760   : > { %16447 = vsyncadd (!%p15854_p12), %s11539_s20, 4294967280  ;;  %p22_p6 = scmp.ge.s32.totalorder %s16537_s11, 4   ;;  %s21111_s27 = smov %s16454_s28 }
 0x761   : > { %s21112_s28 = smov %s16458_s29  ;;  %s21113_s29 = smov %s16550_s14 }
 0x762   : > { %s21114_s30 = smov %s16537_s11  ;;  %24 = sbr.rel (!%p22_p6) target bundleno = 5 (0x5), region = 173 }
 0x769   :  { %11543 = vsyncpa [#allocation4], 1 }
 0x76a   :  { %11545 = vsyncpa [#allocation4 + $0x1], 1 }
 0x76b   :  { %11546 = vsyncpa [#allocation6], 1 }
 0x76c   :  { %11548 = vsyncpa [#allocation6 + $0x1], 1 }

</bundles_post_ra>
